<compile_context>
chip_gen: v7x
topology: tpu7x:2x2x1
jax: 0.10.0
libtpu: 0.0.40
codegen_flags: <defaults>
</compile_context>

<pallas_src>
import functools
import jax
import jax.numpy as jnp
from jax.experimental import pallas as pl
from jax.experimental.pallas import tpu as pltpu

# ----------------------------- configuration -------------------------------
DIM = 32            # input channel dim of EncoderUpLayer
PATCH = 2           # patch_size
WINDOW = (4, 4)     # window_size
SHIFT = (2, 2)      # shift_size (second block)
NUM_CONTRASTS = 2
NUM_HEADS = 2
DTYPE = jnp.float32

VMEM_LIMIT = 32 * 1024 * 1024   # explicit scoped-VMEM budget (safe on v5e/v6e/v7x)


# ----------------------------- small helpers -------------------------------
def _bf16(x):
    return x.astype(jnp.bfloat16)


def _layernorm_rows(x, g, b, eps=1e-5):
    """LayerNorm over last dim; x:(N,D) f32, g/b:(1,D)."""
    mu = jnp.mean(x, axis=-1, keepdims=True)
    var = jnp.mean(jnp.square(x - mu), axis=-1, keepdims=True)
    return (x - mu) * jax.lax.rsqrt(var + eps) * g + b


# ----------------------------- Pallas kernels ------------------------------
def _expand_kernel(x_ref, w_ref, o_ref):
    # PatchExpansion linear (bias=False): (N, D) @ (D, p*D)
    o_ref[...] = jnp.dot(_bf16(x_ref[...]), _bf16(w_ref[...]),
                         preferred_element_type=jnp.float32).astype(o_ref.dtype)


def patch_expand_linear(x2d, w):
    N, Din = x2d.shape
    Dout = w.shape[1]
    return pl.pallas_call(
        _expand_kernel,
        out_shape=jax.ShapeDtypeStruct((N, Dout), x2d.dtype),
        grid=(1,),
        in_specs=[pl.BlockSpec((N, Din), lambda i: (0, 0)),
                  pl.BlockSpec((Din, Dout), lambda i: (0, 0))],
        out_specs=pl.BlockSpec((N, Dout), lambda i: (0, 0)),
        compiler_params=pltpu.CompilerParams(vmem_limit_bytes=VMEM_LIMIT),
    )(x2d, w)


def _ln_compress_kernel(xe_ref, sk_ref, g_ref, b_ref, wa_ref, wb_ref, cb_ref, o_ref):
    # LN(expanded) then compress(concat([LN(xe), skip])) = LN(xe)@Wa + skip@Wb + b
    xn = _layernorm_rows(xe_ref[...].astype(jnp.float32), g_ref[...], b_ref[...])
    out = (jnp.dot(_bf16(xn), _bf16(wa_ref[...]),
                   preferred_element_type=jnp.float32)
           + jnp.dot(_bf16(sk_ref[...].astype(jnp.float32)), _bf16(wb_ref[...]),
                     preferred_element_type=jnp.float32)
           + cb_ref[...])
    o_ref[...] = out.astype(o_ref.dtype)


def expand_norm_compress(xe2d, skip2d, g, b, w_compress, b_compress, *, row_split=2):
    N, D = xe2d.shape
    wa = w_compress[:D]     # multiplies the expanded (LN'd) half of the concat
    wb = w_compress[D:]     # multiplies the skip half of the concat
    tile = N // row_split
    return pl.pallas_call(
        _ln_compress_kernel,
        out_shape=jax.ShapeDtypeStruct((N, D), xe2d.dtype),
        grid=(row_split,),
        in_specs=[
            pl.BlockSpec((tile, D), lambda i: (i, 0)),
            pl.BlockSpec((tile, D), lambda i: (i, 0)),
            pl.BlockSpec((1, D), lambda i: (0, 0)),
            pl.BlockSpec((1, D), lambda i: (0, 0)),
            pl.BlockSpec((D, D), lambda i: (0, 0)),
            pl.BlockSpec((D, D), lambda i: (0, 0)),
            pl.BlockSpec((1, D), lambda i: (0, 0)),
        ],
        out_specs=pl.BlockSpec((tile, D), lambda i: (i, 0)),
        compiler_params=pltpu.CompilerParams(
            dimension_semantics=("parallel",), vmem_limit_bytes=VMEM_LIMIT),
    )(xe2d, skip2d, g.reshape(1, D), b.reshape(1, D), wa, wb,
      b_compress.reshape(1, D))


def _encoder_block_kernel(xw_ref, bias_ref,
                          n1g_ref, n1b_ref, qkv_w_ref, qkv_b_ref,
                          proj_w_ref, proj_b_ref,
                          n2g_ref, n2b_ref,
                          w1_ref, b1_ref, w2_ref, b2_ref,
                          o_ref, *, num_heads):
    """One fully-fused MultiContrastEncoderBlock on a batch of windows.

    xw_ref: (nw, T, D) window-partitioned tokens (T = C*wh*ww).
    bias_ref: (nH, T, T) precomputed contrast-pair attention bias.
    """
    nw, T, D = xw_ref.shape
    Dh = D // num_heads
    scale = 1.0 / (Dh ** 0.5)

    xt = xw_ref[...].astype(jnp.float32).reshape(nw * T, D)   # (N, D)

    # ---------------- W-MSA branch (pre-norm) ----------------
    xn = _layernorm_rows(xt, n1g_ref[...], n1b_ref[...])
    qkv = jnp.dot(_bf16(xn), _bf16(qkv_w_ref[...]),
                  preferred_element_type=jnp.float32) + qkv_b_ref[...]   # (N, 3D)
    q = qkv[:, 0 * D:1 * D].reshape(nw, T, D)
    k = qkv[:, 1 * D:2 * D].reshape(nw, T, D)
    v = qkv[:, 2 * D:3 * D].reshape(nw, T, D)

    bias = bias_ref[...].astype(jnp.float32)     # (nH, T, T)
    proj_w = proj_w_ref[...]                     # (D, D)

    # Per-head attention over ALL windows at once; head-concat + output
    # projection fused as a sum of per-head matmuls (no in-kernel concat).
    attn = jnp.zeros((nw * T, D), jnp.float32)
    for h in range(num_heads):                   # static, unrolled (num_heads=2)
        sl = slice(h * Dh, (h + 1) * Dh)
        qh = _bf16(q[:, :, sl] * scale)          # (nw, T, Dh)
        kh = _bf16(k[:, :, sl])
        vh = _bf16(v[:, :, sl])
        s = jnp.einsum('wtd,wsd->wts', qh, kh,
                       preferred_element_type=jnp.float32)      # (nw, T, T)
        s = s + bias[h][None, :, :]
        s = s - jnp.max(s, axis=-1, keepdims=True)
        p = jnp.exp(s)
        p = p * pl.reciprocal(jnp.sum(p, axis=-1, keepdims=True), approx=True)
        oh = jnp.einsum('wts,wsd->wtd', _bf16(p), vh,
                        preferred_element_type=jnp.float32)     # (nw, T, Dh)
        attn = attn + jnp.dot(_bf16(oh.reshape(nw * T, Dh)),
                              _bf16(proj_w[sl, :]),
                              preferred_element_type=jnp.float32)
    x1 = xt + attn + proj_b_ref[...]

    # ---------------- MLP branch (pre-norm) ----------------
    x1n = _layernorm_rows(x1, n2g_ref[...], n2b_ref[...])
    h1 = jnp.dot(_bf16(x1n), _bf16(w1_ref[...]),
                 preferred_element_type=jnp.float32) + b1_ref[...]
    # TODO(synk): torch nn.GELU default is exact erf; tanh approximation used here.
    h1 = jax.nn.gelu(h1, approximate=True)
    h2 = jnp.dot(_bf16(h1), _bf16(w2_ref[...]),
                 preferred_element_type=jnp.float32) + b2_ref[...]
    y = x1 + h2

    o_ref[...] = y.reshape(nw, T, D).astype(o_ref.dtype)


def encoder_block_fused(bp, xw, bias, *, num_heads=NUM_HEADS, win_split=2):
    """xw: (nWin, T, D) window-partitioned tokens -> same shape."""
    nWin, T, D = xw.shape
    assert nWin % win_split == 0
    nw_blk = nWin // win_split
    kernel = functools.partial(_encoder_block_kernel, num_heads=num_heads)
    return pl.pallas_call(
        kernel,
        out_shape=jax.ShapeDtypeStruct((nWin, T, D), xw.dtype),
        grid=(win_split,),
        in_specs=[
            pl.BlockSpec((nw_blk, T, D), lambda i: (i, 0, 0)),       # xw
            pl.BlockSpec((num_heads, T, T), lambda i: (0, 0, 0)),    # bias
            pl.BlockSpec((1, D), lambda i: (0, 0)),                  # norm1_g
            pl.BlockSpec((1, D), lambda i: (0, 0)),                  # norm1_b
            pl.BlockSpec((D, 3 * D), lambda i: (0, 0)),              # qkv_w
            pl.BlockSpec((1, 3 * D), lambda i: (0, 0)),              # qkv_b
            pl.BlockSpec((D, D), lambda i: (0, 0)),                  # proj_w
            pl.BlockSpec((1, D), lambda i: (0, 0)),                  # proj_b
            pl.BlockSpec((1, D), lambda i: (0, 0)),                  # norm2_g
            pl.BlockSpec((1, D), lambda i: (0, 0)),                  # norm2_b
            pl.BlockSpec((D, 4 * D), lambda i: (0, 0)),              # mlp_w1
            pl.BlockSpec((1, 4 * D), lambda i: (0, 0)),              # mlp_b1
            pl.BlockSpec((4 * D, D), lambda i: (0, 0)),              # mlp_w2
            pl.BlockSpec((1, D), lambda i: (0, 0)),                  # mlp_b2
        ],
        out_specs=pl.BlockSpec((nw_blk, T, D), lambda i: (i, 0, 0)),
        compiler_params=pltpu.CompilerParams(
            dimension_semantics=("parallel",),     # window halves -> 2 TCs on v7x
            vmem_limit_bytes=VMEM_LIMIT),
    )(xw, bias,
      bp['norm1_g'].reshape(1, D), bp['norm1_b'].reshape(1, D),
      bp['qkv_w'], bp['qkv_b'].reshape(1, 3 * D),
      bp['proj_w'], bp['proj_b'].reshape(1, D),
      bp['norm2_g'].reshape(1, D), bp['norm2_b'].reshape(1, D),
      bp['mlp_w1'], bp['mlp_b1'].reshape(1, 4 * D),
      bp['mlp_w2'], bp['mlp_b2'].reshape(1, D))


# ------------------------------ JAX glue ------------------------------------
def window_partition(x, wh, ww):
    # x: (B, C, H, W, D) -> (B*nWh*nWw, C*wh*ww, D)   (contrast-major tokens)
    B, C, H, W, D = x.shape
    x = x.reshape(B, C, H // wh, wh, W // ww, ww, D)
    x = x.transpose(0, 2, 4, 1, 3, 5, 6)
    return x.reshape(B * (H // wh) * (W // ww), C * wh * ww, D)


def window_reverse(xw, B, C, H, W, wh, ww):
    D = xw.shape[-1]
    x = xw.reshape(B, H // wh, W // ww, C, wh, ww, D)
    x = x.transpose(0, 3, 1, 4, 2, 5, 6)
    return x.reshape(B, C, H, W, D)


def make_contrast_bias(contrast_bias, selected_contrasts, win_tokens):
    # TODO(synk): exact use of selected_contrasts inside MultiContrastEncoderBlock
    # is unknown; a learned contrast-pair bias gathered by the selection is used.
    cb = contrast_bias[selected_contrasts][:, selected_contrasts]        # (C, C, nH)
    cb = jnp.repeat(jnp.repeat(cb, win_tokens, axis=0), win_tokens, axis=1)  # (T, T, nH)
    return cb.transpose(2, 0, 1)                                         # (nH, T, T)


def encoder_up_layer(params, x, skiped_features, selected_contrasts):
    """x: (B, C, H, W, DIM); skiped_features: (B, C, 2H, 2W, DIM//PATCH)."""
    B, C, H, W, D = x.shape
    p = PATCH
    Dp = D // p
    wh, ww = WINDOW
    Ho, Wo = H * p, W * p

    # --- PatchExpansion: linear expand (bias=False) + pixel shuffle + LN,
    #     then concat with skip + compress (LN/concat/compress fused). ---
    xe = patch_expand_linear(x.reshape(-1, D), params['expand_w'])       # (BCHW, p*D)
    xe = xe.reshape(B, C, H, W, p, p, Dp).transpose(0, 1, 2, 4, 3, 5, 6)
    xe = xe.reshape(B * C * Ho * Wo, Dp)
    xc = expand_norm_compress(xe, skiped_features.reshape(-1, Dp),
                              params['expand_norm_g'], params['expand_norm_b'],
                              params['compress_w'], params['compress_b'])
    xc = xc.reshape(B, C, Ho, Wo, Dp)

    # --- precomputed per-block attention biases (hoisted out of the kernels) ---
    bias0 = make_contrast_bias(params['block0']['contrast_bias'],
                               selected_contrasts, wh * ww)
    bias1 = make_contrast_bias(params['block1']['contrast_bias'],
                               selected_contrasts, wh * ww)

    # --- block 0: W-MSA (no shift) + MLP, fully fused ---
    xw = window_partition(xc, wh, ww)                       # (nWin, T, Dp)
    xw = encoder_block_fused(params['block0'], xw, bias0)
    x1 = window_reverse(xw, B, C, Ho, Wo, wh, ww)

    # --- block 1: shifted windows (cyclic shift kept as a tiny XLA roll) ---
    # TODO(synk): Swin-style cross-boundary attention mask for shifted windows
    # is not reproduced (unknown internals); plain cyclic shift is used.
    xs = jnp.roll(x1, shift=(-SHIFT[0], -SHIFT[1]), axis=(2, 3))
    xw = window_partition(xs, wh, ww)
    xw = encoder_block_fused(params['block1'], xw, bias1)
    x2 = window_reverse(xw, B, C, Ho, Wo, wh, ww)
    x2 = jnp.roll(x2, shift=SHIFT, axis=(2, 3))
    return x2


# --------------------------- parameter init ---------------------------------
def init_params(key):
    d = DIM // PATCH
    keys = iter(jax.random.split(key, 64))

    def w(shape, scale=0.02):
        return (jax.random.normal(next(keys), shape, DTYPE) * scale).astype(DTYPE)

    def block():
        return dict(
            norm1_g=jnp.ones((d,), DTYPE), norm1_b=jnp.zeros((d,), DTYPE),
            qkv_w=w((d, 3 * d)), qkv_b=jnp.zeros((3 * d,), DTYPE),
            proj_w=w((d, d)), proj_b=jnp.zeros((d,), DTYPE),
            contrast_bias=w((NUM_CONTRASTS, NUM_CONTRASTS, NUM_HEADS)),
            norm2_g=jnp.ones((d,), DTYPE), norm2_b=jnp.zeros((d,), DTYPE),
            mlp_w1=w((d, 4 * d)), mlp_b1=jnp.zeros((4 * d,), DTYPE),
            mlp_w2=w((4 * d, d)), mlp_b2=jnp.zeros((d,), DTYPE),
        )

    return dict(
        expand_w=w((DIM, PATCH * DIM)),
        expand_norm_g=jnp.ones((d,), DTYPE),
        expand_norm_b=jnp.zeros((d,), DTYPE),
        compress_w=w((2 * d, d)),
        compress_b=jnp.zeros((d,), DTYPE),
        block0=block(),
        block1=block(),
    )


# -------------------------------- main ---------------------------------------
if __name__ == "__main__":
    key = jax.random.PRNGKey(0)
    kp, kx, ks = jax.random.split(key, 3)

    params = init_params(kp)

    B, C, H, W = 1, NUM_CONTRASTS, 8, 8
    x = jax.random.normal(kx, (B, C, H, W, DIM), DTYPE)
    skiped = jax.random.normal(ks, (B, C, 2 * H, 2 * W, DIM // PATCH), DTYPE)
    selected_contrasts = jnp.array([0, 1], dtype=jnp.int32)

    fwd = jax.jit(encoder_up_layer)
    out = jax.block_until_ready(fwd(params, x, skiped, selected_contrasts))

    assert out.shape == (B, C, 2 * H, 2 * W, DIM // PATCH), out.shape
    assert bool(jnp.all(jnp.isfinite(out)))
    print("KERNEL_OK")
</pallas_src>

<mosaic_0001>
module attributes {stable_mosaic.version = 11 : i64} {
  func.func @_expand_kernel(%arg0: i32, %arg1: memref<128x32xf32, #tpu.memory_space<vmem>>, %arg2: memref<32x64xf32, #tpu.memory_space<vmem>>, %arg3: memref<128x64xf32, #tpu.memory_space<vmem>>) attributes {dimension_semantics = [#tpu.dimension_semantics<arbitrary>], iteration_bounds = array<i64: 1>, scalar_prefetch = 0 : i64, scratch_operands = 0 : i64, tpu.core_type = #tpu.core_type<tc>, window_params = [{pipeline_mode = #tpu.pipeline_mode<synchronous>, transform_indices = @transform_0, window_bounds = array<i64: 128, 32>}, {pipeline_mode = #tpu.pipeline_mode<synchronous>, transform_indices = @transform_1, window_bounds = array<i64: 32, 64>}, {pipeline_mode = #tpu.pipeline_mode<synchronous>, transform_indices = @transform_2, window_bounds = array<i64: 128, 64>}]} {
    %c0 = arith.constant 0 : index
    %c0_0 = arith.constant 0 : index
    %0 = vector.load %arg1[%c0, %c0_0] : memref<128x32xf32, #tpu.memory_space<vmem>>, vector<128x32xf32>
    %1 = arith.truncf %0 : vector<128x32xf32> to vector<128x32xbf16>
    %c0_1 = arith.constant 0 : index
    %c0_2 = arith.constant 0 : index
    %2 = vector.load %arg2[%c0_1, %c0_2] : memref<32x64xf32, #tpu.memory_space<vmem>>, vector<32x64xf32>
    %3 = arith.truncf %2 : vector<32x64xf32> to vector<32x64xbf16>
    %cst = arith.constant dense<0.000000e+00> : vector<128x64xf32>
    %4 = tpu.matmul %1, %3, %cst {dimension_numbers = #tpu.dot_dimension_numbers<[1], [0], [0], [1], [0, 0, 1, 1], [], []>} : vector<128x32xbf16>, vector<32x64xbf16>, vector<128x64xf32> -> vector<128x64xf32>
    %c0_3 = arith.constant 0 : index
    %c0_4 = arith.constant 0 : index
    %5 = vector.load %arg3[%c0_3, %c0_4] : memref<128x64xf32, #tpu.memory_space<vmem>>, vector<128x64xf32>
    tpu.vector_store %arg3[%c0_3, %c0_4], %4 {strides = array<i32>} : memref<128x64xf32, #tpu.memory_space<vmem>>, vector<128x64xf32>,
    return
  }
  func.func @transform_0(%arg0: i32) -> (i32, i32) {
    %c0_i32 = arith.constant 0 : i32
    %c0_i32_0 = arith.constant 0 : i32
    %c0_i32_1 = arith.constant 0 : i32
    return %c0_i32, %c0_i32_0 : i32, i32
  }
  func.func @transform_1(%arg0: i32) -> (i32, i32) {
    %c0_i32 = arith.constant 0 : i32
    %c0_i32_0 = arith.constant 0 : i32
    %c0_i32_1 = arith.constant 0 : i32
    return %c0_i32, %c0_i32_0 : i32, i32
  }
  func.func @transform_2(%arg0: i32) -> (i32, i32) {
    %c0_i32 = arith.constant 0 : i32
    %c0_i32_0 = arith.constant 0 : i32
    %c0_i32_1 = arith.constant 0 : i32
    return %c0_i32, %c0_i32_0 : i32, i32
  }
}

module attributes {stable_mosaic.version = 11 : i64} {
  func.func @_ln_compress_kernel(%arg0: i32, %arg1: memref<256x16xf32, #tpu.memory_space<vmem>>, %arg2: memref<256x16xf32, #tpu.memory_space<vmem>>, %arg3: memref<1x16xf32, #tpu.memory_space<vmem>>, %arg4: memref<1x16xf32, #tpu.memory_space<vmem>>, %arg5: memref<16x16xf32, #tpu.memory_space<vmem>>, %arg6: memref<16x16xf32, #tpu.memory_space<vmem>>, %arg7: memref<1x16xf32, #tpu.memory_space<vmem>>, %arg8: memref<256x16xf32, #tpu.memory_space<vmem>>) attributes {dimension_semantics = [#tpu.dimension_semantics<parallel>], iteration_bounds = array<i64: 2>, scalar_prefetch = 0 : i64, scratch_operands = 0 : i64, tpu.core_type = #tpu.core_type<tc>, window_params = [{transform_indices = @transform_0, window_bounds = array<i64: 256, 16>}, {transform_indices = @transform_1, window_bounds = array<i64: 256, 16>}, {pipeline_mode = #tpu.pipeline_mode<synchronous>, transform_indices = @transform_2, window_bounds = array<i64: 1, 16>}, {pipeline_mode = #tpu.pipeline_mode<synchronous>, transform_indices = @transform_3, window_bounds = array<i64: 1, 16>}, {pipeline_mode = #tpu.pipeline_mode<synchronous>, transform_indices = @transform_4, window_bounds = array<i64: 16, 16>}, {pipeline_mode = #tpu.pipeline_mode<synchronous>, transform_indices = @transform_5, window_bounds = array<i64: 16, 16>}, {pipeline_mode = #tpu.pipeline_mode<synchronous>, transform_indices = @transform_6, window_bounds = array<i64: 1, 16>}, {transform_indices = @transform_7, window_bounds = array<i64: 256, 16>}]} {
    %c0 = arith.constant 0 : index
    %c0_0 = arith.constant 0 : index
    %0 = vector.load %arg1[%c0, %c0_0] : memref<256x16xf32, #tpu.memory_space<vmem>>, vector<256x16xf32>
    %c0_1 = arith.constant 0 : index
    %c0_2 = arith.constant 0 : index
    %1 = vector.load %arg3[%c0_1, %c0_2] : memref<1x16xf32, #tpu.memory_space<vmem>>, vector<1x16xf32>
    %c0_3 = arith.constant 0 : index
    %c0_4 = arith.constant 0 : index
    %2 = vector.load %arg4[%c0_3, %c0_4] : memref<1x16xf32, #tpu.memory_space<vmem>>, vector<1x16xf32>
    %cst = arith.constant dense<0.000000e+00> : vector<256xf32>
    %3 = vector.multi_reduction <add>, %0, %cst [1] : vector<256x16xf32> to vector<256xf32>
    %4 = vector.shape_cast %3 : vector<256xf32> to vector<256x1xf32>
    %cst_5 = arith.constant 1.600000e+01 : f32
    %5 = vector.broadcast %cst_5 : f32 to vector<256x1xf32>
    %6 = arith.divf %4, %5 : vector<256x1xf32>
    %7 = vector.broadcast %6 : vector<256x1xf32> to vector<256x16xf32>
    %8 = arith.subf %0, %7 : vector<256x16xf32>
    %9 = arith.mulf %8, %8 : vector<256x16xf32>
    %cst_6 = arith.constant dense<0.000000e+00> : vector<256xf32>
    %10 = vector.multi_reduction <add>, %9, %cst_6 [1] : vector<256x16xf32> to vector<256xf32>
    %11 = vector.shape_cast %10 : vector<256xf32> to vector<256x1xf32>
    %cst_7 = arith.constant 1.600000e+01 : f32
    %12 = vector.broadcast %cst_7 : f32 to vector<256x1xf32>
    %13 = arith.divf %11, %12 : vector<256x1xf32>
    %14 = vector.broadcast %6 : vector<256x1xf32> to vector<256x16xf32>
    %15 = arith.subf %0, %14 : vector<256x16xf32>
    %cst_8 = arith.constant 9.99999974E-6 : f32
    %16 = vector.broadcast %cst_8 : f32 to vector<256x1xf32>
    %17 = arith.addf %13, %16 : vector<256x1xf32>
    %18 = math.rsqrt %17 : vector<256x1xf32>
    %19 = vector.broadcast %18 : vector<256x1xf32> to vector<256x16xf32>
    %20 = arith.mulf %15, %19 : vector<256x16xf32>
    %21 = vector.broadcast %1 : vector<1x16xf32> to vector<256x16xf32>
    %22 = arith.mulf %20, %21 : vector<256x16xf32>
    %23 = vector.broadcast %2 : vector<1x16xf32> to vector<256x16xf32>
    %24 = arith.addf %22, %23 : vector<256x16xf32>
    %25 = arith.truncf %24 : vector<256x16xf32> to vector<256x16xbf16>
    %c0_9 = arith.constant 0 : index
    %c0_10 = arith.constant 0 : index
    %26 = vector.load %arg5[%c0_9, %c0_10] : memref<16x16xf32, #tpu.memory_space<vmem>>, vector<16x16xf32>
    %27 = arith.truncf %26 : vector<16x16xf32> to vector<16x16xbf16>
    %cst_11 = arith.constant dense<0.000000e+00> : vector<256x16xf32>
    %28 = tpu.matmul %25, %27, %cst_11 {dimension_numbers = #tpu.dot_dimension_numbers<[1], [0], [0], [1], [0, 0, 1, 1], [], []>} : vector<256x16xbf16>, vector<16x16xbf16>, vector<256x16xf32> -> vector<256x16xf32>
    %c0_12 = arith.constant 0 : index
    %c0_13 = arith.constant 0 : index
    %29 = vector.load %arg2[%c0_12, %c0_13] : memref<256x16xf32, #tpu.memory_space<vmem>>, vector<256x16xf32>
    %30 = arith.truncf %29 : vector<256x16xf32> to vector<256x16xbf16>
    %c0_14 = arith.constant 0 : index
    %c0_15 = arith.constant 0 : index
    %31 = vector.load %arg6[%c0_14, %c0_15] : memref<16x16xf32, #tpu.memory_space<vmem>>, vector<16x16xf32>
    %32 = arith.truncf %31 : vector<16x16xf32> to vector<16x16xbf16>
    %cst_16 = arith.constant dense<0.000000e+00> : vector<256x16xf32>
    %33 = tpu.matmul %30, %32, %cst_16 {dimension_numbers = #tpu.dot_dimension_numbers<[1], [0], [0], [1], [0, 0, 1, 1], [], []>} : vector<256x16xbf16>, vector<16x16xbf16>, vector<256x16xf32> -> vector<256x16xf32>
    %34 = arith.addf %28, %33 : vector<256x16xf32>
    %c0_17 = arith.constant 0 : index
    %c0_18 = arith.constant 0 : index
    %35 = vector.load %arg7[%c0_17, %c0_18] : memref<1x16xf32, #tpu.memory_space<vmem>>, vector<1x16xf32>
    %36 = vector.broadcast %35 : vector<1x16xf32> to vector<256x16xf32>
    %37 = arith.addf %34, %36 : vector<256x16xf32>
    %c0_19 = arith.constant 0 : index
    %c0_20 = arith.constant 0 : index
    %38 = vector.load %arg8[%c0_19, %c0_20] : memref<256x16xf32, #tpu.memory_space<vmem>>, vector<256x16xf32>
    tpu.vector_store %arg8[%c0_19, %c0_20], %37 {strides = array<i32>} : memref<256x16xf32, #tpu.memory_space<vmem>>, vector<256x16xf32>,
    return
  }
  func.func @transform_0(%arg0: i32) -> (i32, i32) {
    %c0_i32 = arith.constant 0 : i32
    %c0_i32_0 = arith.constant 0 : i32
    return %arg0, %c0_i32 : i32, i32
  }
  func.func @transform_1(%arg0: i32) -> (i32, i32) {
    %c0_i32 = arith.constant 0 : i32
    %c0_i32_0 = arith.constant 0 : i32
    return %arg0, %c0_i32 : i32, i32
  }
  func.func @transform_2(%arg0: i32) -> (i32, i32) {
    %c0_i32 = arith.constant 0 : i32
    %c0_i32_0 = arith.constant 0 : i32
    %c0_i32_1 = arith.constant 0 : i32
    return %c0_i32, %c0_i32_0 : i32, i32
  }
  func.func @transform_3(%arg0: i32) -> (i32, i32) {
    %c0_i32 = arith.constant 0 : i32
    %c0_i32_0 = arith.constant 0 : i32
    %c0_i32_1 = arith.constant 0 : i32
    return %c0_i32, %c0_i32_0 : i32, i32
  }
  func.func @transform_4(%arg0: i32) -> (i32, i32) {
    %c0_i32 = arith.constant 0 : i32
    %c0_i32_0 = arith.constant 0 : i32
    %c0_i32_1 = arith.constant 0 : i32
    return %c0_i32, %c0_i32_0 : i32, i32
  }
  func.func @transform_5(%arg0: i32) -> (i32, i32) {
    %c0_i32 = arith.constant 0 : i32
    %c0_i32_0 = arith.constant 0 : i32
    %c0_i32_1 = arith.constant 0 : i32
    return %c0_i32, %c0_i32_0 : i32, i32
  }
  func.func @transform_6(%arg0: i32) -> (i32, i32) {
    %c0_i32 = arith.constant 0 : i32
    %c0_i32_0 = arith.constant 0 : i32
    %c0_i32_1 = arith.constant 0 : i32
    return %c0_i32, %c0_i32_0 : i32, i32
  }
  func.func @transform_7(%arg0: i32) -> (i32, i32) {
    %c0_i32 = arith.constant 0 : i32
    %c0_i32_0 = arith.constant 0 : i32
    return %arg0, %c0_i32 : i32, i32
  }
}

module attributes {stable_mosaic.version = 11 : i64} {
  func.func @_encoder_block_kernel(%arg0: i32, %arg1: memref<8x32x16xf32, #tpu.memory_space<vmem>>, %arg2: memref<2x32x32xf32, #tpu.memory_space<vmem>>, %arg3: memref<1x16xf32, #tpu.memory_space<vmem>>, %arg4: memref<1x16xf32, #tpu.memory_space<vmem>>, %arg5: memref<16x48xf32, #tpu.memory_space<vmem>>, %arg6: memref<1x48xf32, #tpu.memory_space<vmem>>, %arg7: memref<16x16xf32, #tpu.memory_space<vmem>>, %arg8: memref<1x16xf32, #tpu.memory_space<vmem>>, %arg9: memref<1x16xf32, #tpu.memory_space<vmem>>, %arg10: memref<1x16xf32, #tpu.memory_space<vmem>>, %arg11: memref<16x64xf32, #tpu.memory_space<vmem>>, %arg12: memref<1x64xf32, #tpu.memory_space<vmem>>, %arg13: memref<64x16xf32, #tpu.memory_space<vmem>>, %arg14: memref<1x16xf32, #tpu.memory_space<vmem>>, %arg15: memref<8x32x16xf32, #tpu.memory_space<vmem>>) attributes {dimension_semantics = [#tpu.dimension_semantics<parallel>], iteration_bounds = array<i64: 2>, scalar_prefetch = 0 : i64, scratch_operands = 0 : i64, tpu.core_type = #tpu.core_type<tc>, window_params = [{transform_indices = @transform_0, window_bounds = array<i64: 8, 32, 16>}, {pipeline_mode = #tpu.pipeline_mode<synchronous>, transform_indices = @transform_1, window_bounds = array<i64: 2, 32, 32>}, {pipeline_mode = #tpu.pipeline_mode<synchronous>, transform_indices = @transform_2, window_bounds = array<i64: 1, 16>}, {pipeline_mode = #tpu.pipeline_mode<synchronous>, transform_indices = @transform_3, window_bounds = array<i64: 1, 16>}, {pipeline_mode = #tpu.pipeline_mode<synchronous>, transform_indices = @transform_4, window_bounds = array<i64: 16, 48>}, {pipeline_mode = #tpu.pipeline_mode<synchronous>, transform_indices = @transform_5, window_bounds = array<i64: 1, 48>}, {pipeline_mode = #tpu.pipeline_mode<synchronous>, transform_indices = @transform_6, window_bounds = array<i64: 16, 16>}, {pipeline_mode = #tpu.pipeline_mode<synchronous>, transform_indices = @transform_7, window_bounds = array<i64: 1, 16>}, {pipeline_mode = #tpu.pipeline_mode<synchronous>, transform_indices = @transform_8, window_bounds = array<i64: 1, 16>}, {pipeline_mode = #tpu.pipeline_mode<synchronous>, transform_indices = @transform_9, window_bounds = array<i64: 1, 16>}, {pipeline_mode = #tpu.pipeline_mode<synchronous>, transform_indices = @transform_10, window_bounds = array<i64: 16, 64>}, {pipeline_mode = #tpu.pipeline_mode<synchronous>, transform_indices = @transform_11, window_bounds = array<i64: 1, 64>}, {pipeline_mode = #tpu.pipeline_mode<synchronous>, transform_indices = @transform_12, window_bounds = array<i64: 64, 16>}, {pipeline_mode = #tpu.pipeline_mode<synchronous>, transform_indices = @transform_13, window_bounds = array<i64: 1, 16>}, {transform_indices = @transform_14, window_bounds = array<i64: 8, 32, 16>}]} {
    %c0 = arith.constant 0 : index
    %c0_0 = arith.constant 0 : index
    %c0_1 = arith.constant 0 : index
    %0 = vector.load %arg1[%c0, %c0_0, %c0_1] : memref<8x32x16xf32, #tpu.memory_space<vmem>>, vector<8x32x16xf32>
    %1 = vector.shape_cast %0 : vector<8x32x16xf32> to vector<256x16xf32>
    %c0_2 = arith.constant 0 : index
    %c0_3 = arith.constant 0 : index
    %2 = vector.load %arg3[%c0_2, %c0_3] : memref<1x16xf32, #tpu.memory_space<vmem>>, vector<1x16xf32>
    %c0_4 = arith.constant 0 : index
    %c0_5 = arith.constant 0 : index
    %3 = vector.load %arg4[%c0_4, %c0_5] : memref<1x16xf32, #tpu.memory_space<vmem>>, vector<1x16xf32>
    %cst = arith.constant dense<0.000000e+00> : vector<256xf32>
    %4 = vector.multi_reduction <add>, %1, %cst [1] : vector<256x16xf32> to vector<256xf32>
    %5 = vector.shape_cast %4 : vector<256xf32> to vector<256x1xf32>
    %cst_6 = arith.constant 1.600000e+01 : f32
    %6 = vector.broadcast %cst_6 : f32 to vector<256x1xf32>
    %7 = arith.divf %5, %6 : vector<256x1xf32>
    %8 = vector.broadcast %7 : vector<256x1xf32> to vector<256x16xf32>
    %9 = arith.subf %1, %8 : vector<256x16xf32>
    %10 = arith.mulf %9, %9 : vector<256x16xf32>
    %cst_7 = arith.constant dense<0.000000e+00> : vector<256xf32>
    %11 = vector.multi_reduction <add>, %10, %cst_7 [1] : vector<256x16xf32> to vector<256xf32>
    %12 = vector.shape_cast %11 : vector<256xf32> to vector<256x1xf32>
    %cst_8 = arith.constant 1.600000e+01 : f32
    %13 = vector.broadcast %cst_8 : f32 to vector<256x1xf32>
    %14 = arith.divf %12, %13 : vector<256x1xf32>
    %15 = vector.broadcast %7 : vector<256x1xf32> to vector<256x16xf32>
    %16 = arith.subf %1, %15 : vector<256x16xf32>
    %cst_9 = arith.constant 9.99999974E-6 : f32
    %17 = vector.broadcast %cst_9 : f32 to vector<256x1xf32>
    %18 = arith.addf %14, %17 : vector<256x1xf32>
    %19 = math.rsqrt %18 : vector<256x1xf32>
    %20 = vector.broadcast %19 : vector<256x1xf32> to vector<256x16xf32>
    %21 = arith.mulf %16, %20 : vector<256x16xf32>
    %22 = vector.broadcast %2 : vector<1x16xf32> to vector<256x16xf32>
    %23 = arith.mulf %21, %22 : vector<256x16xf32>
    %24 = vector.broadcast %3 : vector<1x16xf32> to vector<256x16xf32>
    %25 = arith.addf %23, %24 : vector<256x16xf32>
    %26 = arith.truncf %25 : vector<256x16xf32> to vector<256x16xbf16>
    %c0_10 = arith.constant 0 : index
    %c0_11 = arith.constant 0 : index
    %27 = vector.load %arg5[%c0_10, %c0_11] : memref<16x48xf32, #tpu.memory_space<vmem>>, vector<16x48xf32>
    %28 = arith.truncf %27 : vector<16x48xf32> to vector<16x48xbf16>
    %cst_12 = arith.constant dense<0.000000e+00> : vector<256x48xf32>
    %29 = tpu.matmul %26, %28, %cst_12 {dimension_numbers = #tpu.dot_dimension_numbers<[1], [0], [0], [1], [0, 0, 1, 1], [], []>} : vector<256x16xbf16>, vector<16x48xbf16>, vector<256x48xf32> -> vector<256x48xf32>
    %c0_13 = arith.constant 0 : index
    %c0_14 = arith.constant 0 : index
    %30 = vector.load %arg6[%c0_13, %c0_14] : memref<1x48xf32, #tpu.memory_space<vmem>>, vector<1x48xf32>
    %31 = vector.broadcast %30 : vector<1x48xf32> to vector<256x48xf32>
    %32 = arith.addf %29, %31 : vector<256x48xf32>
    %33 = vector.extract_strided_slice %32 {offsets = [0, 0], sizes = [256, 16], strides = [1, 1]} : vector<256x48xf32> to vector<256x16xf32>
    %34 = vector.shape_cast %33 : vector<256x16xf32> to vector<8x32x16xf32>
    %35 = vector.extract_strided_slice %32 {offsets = [0, 16], sizes = [256, 16], strides = [1, 1]} : vector<256x48xf32> to vector<256x16xf32>
    %36 = vector.shape_cast %35 : vector<256x16xf32> to vector<8x32x16xf32>
    %37 = vector.extract_strided_slice %32 {offsets = [0, 32], sizes = [256, 16], strides = [1, 1]} : vector<256x48xf32> to vector<256x16xf32>
    %38 = vector.shape_cast %37 : vector<256x16xf32> to vector<8x32x16xf32>
    %c0_15 = arith.constant 0 : index
    %c0_16 = arith.constant 0 : index
    %c0_17 = arith.constant 0 : index
    %39 = vector.load %arg2[%c0_15, %c0_16, %c0_17] : memref<2x32x32xf32, #tpu.memory_space<vmem>>, vector<2x32x32xf32>
    %c0_18 = arith.constant 0 : index
    %c0_19 = arith.constant 0 : index
    %40 = vector.load %arg7[%c0_18, %c0_19] : memref<16x16xf32, #tpu.memory_space<vmem>>, vector<16x16xf32>
    %cst_20 = arith.constant 0.000000e+00 : f32
    %41 = vector.broadcast %cst_20 : f32 to vector<256x16xf32>
    %42 = vector.extract_strided_slice %34 {offsets = [0, 0, 0], sizes = [8, 32, 8], strides = [1, 1, 1]} : vector<8x32x16xf32> to vector<8x32x8xf32>
    %cst_21 = arith.constant 0.353553385 : f32
    %43 = vector.broadcast %cst_21 : f32 to vector<8x32x8xf32>
    %44 = arith.mulf %42, %43 : vector<8x32x8xf32>
    %45 = arith.truncf %44 : vector<8x32x8xf32> to vector<8x32x8xbf16>
    %46 = vector.extract_strided_slice %36 {offsets = [0, 0, 0], sizes = [8, 32, 8], strides = [1, 1, 1]} : vector<8x32x16xf32> to vector<8x32x8xf32>
    %47 = arith.truncf %46 : vector<8x32x8xf32> to vector<8x32x8xbf16>
    %48 = vector.extract_strided_slice %38 {offsets = [0, 0, 0], sizes = [8, 32, 8], strides = [1, 1, 1]} : vector<8x32x16xf32> to vector<8x32x8xf32>
    %49 = arith.truncf %48 : vector<8x32x8xf32> to vector<8x32x8xbf16>
    "tpu.trace_start"() <{level = 10 : i32, message = "wtd,wsd->wts"}> : () -> ()
    %cst_22 = arith.constant dense<0.000000e+00> : vector<8x32x32xf32>
    %50 = tpu.matmul %45, %47, %cst_22 {dimension_numbers = #tpu.dot_dimension_numbers<[2], [2], [1], [1], [0, 0, 0, 1, 1, 1], [0], [0]>} : vector<8x32x8xbf16>, vector<8x32x8xbf16>, vector<8x32x32xf32> -> vector<8x32x32xf32>
    "tpu.trace_stop"() : () -> ()
    %51 = vector.extract_strided_slice %39 {offsets = [0, 0, 0], sizes = [1, 32, 32], strides = [1, 1, 1]} : vector<2x32x32xf32> to vector<1x32x32xf32>
    %52 = vector.shape_cast %51 : vector<1x32x32xf32> to vector<32x32xf32>
    %53 = vector.shape_cast %52 : vector<32x32xf32> to vector<1x32x32xf32>
    %54 = vector.broadcast %53 : vector<1x32x32xf32> to vector<8x32x32xf32>
    %55 = arith.addf %50, %54 : vector<8x32x32xf32>
    %cst_23 = arith.constant dense<0xFF800000> : vector<8x32xf32>
    %56 = vector.multi_reduction <maximumf>, %55, %cst_23 [2] : vector<8x32x32xf32> to vector<8x32xf32>
    %57 = vector.shape_cast %56 : vector<8x32xf32> to vector<8x32x1xf32>
    %58 = vector.broadcast %57 : vector<8x32x1xf32> to vector<8x32x32xf32>
    %59 = arith.subf %55, %58 : vector<8x32x32xf32>
    %60 = math.exp %59 : vector<8x32x32xf32>
    %cst_24 = arith.constant dense<0.000000e+00> : vector<8x32xf32>
    %61 = vector.multi_reduction <add>, %60, %cst_24 [2] : vector<8x32x32xf32> to vector<8x32xf32>
    %62 = vector.shape_cast %61 : vector<8x32xf32> to vector<8x32x1xf32>
    %63 = tpu.reciprocal %62 {approx = true} : vector<8x32x1xf32> -> vector<8x32x1xf32>
    %64 = vector.broadcast %63 : vector<8x32x1xf32> to vector<8x32x32xf32>
    %65 = arith.mulf %60, %64 : vector<8x32x32xf32>
    %66 = arith.truncf %65 : vector<8x32x32xf32> to vector<8x32x32xbf16>
    "tpu.trace_start"() <{level = 10 : i32, message = "wts,wsd->wtd"}> : () -> ()
    %cst_25 = arith.constant dense<0.000000e+00> : vector<8x32x8xf32>
    %67 = tpu.matmul %66, %49, %cst_25 {dimension_numbers = #tpu.dot_dimension_numbers<[2], [1], [1], [2], [0, 0, 0, 1, 1, 2], [0], [0]>} : vector<8x32x32xbf16>, vector<8x32x8xbf16>, vector<8x32x8xf32> -> vector<8x32x8xf32>
    "tpu.trace_stop"() : () -> ()
    %68 = vector.shape_cast %67 : vector<8x32x8xf32> to vector<256x8xf32>
    %69 = arith.truncf %68 : vector<256x8xf32> to vector<256x8xbf16>
    %70 = vector.extract_strided_slice %40 {offsets = [0, 0], sizes = [8, 16], strides = [1, 1]} : vector<16x16xf32> to vector<8x16xf32>
    %71 = arith.truncf %70 : vector<8x16xf32> to vector<8x16xbf16>
    %cst_26 = arith.constant dense<0.000000e+00> : vector<256x16xf32>
    %72 = tpu.matmul %69, %71, %cst_26 {dimension_numbers = #tpu.dot_dimension_numbers<[1], [0], [0], [1], [0, 0, 1, 1], [], []>} : vector<256x8xbf16>, vector<8x16xbf16>, vector<256x16xf32> -> vector<256x16xf32>
    %73 = arith.addf %41, %72 : vector<256x16xf32>
    %74 = vector.extract_strided_slice %34 {offsets = [0, 0, 8], sizes = [8, 32, 8], strides = [1, 1, 1]} : vector<8x32x16xf32> to vector<8x32x8xf32>
    %cst_27 = arith.constant 0.353553385 : f32
    %75 = vector.broadcast %cst_27 : f32 to vector<8x32x8xf32>
    %76 = arith.mulf %74, %75 : vector<8x32x8xf32>
    %77 = arith.truncf %76 : vector<8x32x8xf32> to vector<8x32x8xbf16>
    %78 = vector.extract_strided_slice %36 {offsets = [0, 0, 8], sizes = [8, 32, 8], strides = [1, 1, 1]} : vector<8x32x16xf32> to vector<8x32x8xf32>
    %79 = arith.truncf %78 : vector<8x32x8xf32> to vector<8x32x8xbf16>
    %80 = vector.extract_strided_slice %38 {offsets = [0, 0, 8], sizes = [8, 32, 8], strides = [1, 1, 1]} : vector<8x32x16xf32> to vector<8x32x8xf32>
    %81 = arith.truncf %80 : vector<8x32x8xf32> to vector<8x32x8xbf16>
    "tpu.trace_start"() <{level = 10 : i32, message = "wtd,wsd->wts"}> : () -> ()
    %cst_28 = arith.constant dense<0.000000e+00> : vector<8x32x32xf32>
    %82 = tpu.matmul %77, %79, %cst_28 {dimension_numbers = #tpu.dot_dimension_numbers<[2], [2], [1], [1], [0, 0, 0, 1, 1, 1], [0], [0]>} : vector<8x32x8xbf16>, vector<8x32x8xbf16>, vector<8x32x32xf32> -> vector<8x32x32xf32>
    "tpu.trace_stop"() : () -> ()
    %83 = vector.extract_strided_slice %39 {offsets = [1, 0, 0], sizes = [1, 32, 32], strides = [1, 1, 1]} : vector<2x32x32xf32> to vector<1x32x32xf32>
    %84 = vector.shape_cast %83 : vector<1x32x32xf32> to vector<32x32xf32>
    %85 = vector.shape_cast %84 : vector<32x32xf32> to vector<1x32x32xf32>
    %86 = vector.broadcast %85 : vector<1x32x32xf32> to vector<8x32x32xf32>
    %87 = arith.addf %82, %86 : vector<8x32x32xf32>
    %cst_29 = arith.constant dense<0xFF800000> : vector<8x32xf32>
    %88 = vector.multi_reduction <maximumf>, %87, %cst_29 [2] : vector<8x32x32xf32> to vector<8x32xf32>
    %89 = vector.shape_cast %88 : vector<8x32xf32> to vector<8x32x1xf32>
    %90 = vector.broadcast %89 : vector<8x32x1xf32> to vector<8x32x32xf32>
    %91 = arith.subf %87, %90 : vector<8x32x32xf32>
    %92 = math.exp %91 : vector<8x32x32xf32>
    %cst_30 = arith.constant dense<0.000000e+00> : vector<8x32xf32>
    %93 = vector.multi_reduction <add>, %92, %cst_30 [2] : vector<8x32x32xf32> to vector<8x32xf32>
    %94 = vector.shape_cast %93 : vector<8x32xf32> to vector<8x32x1xf32>
    %95 = tpu.reciprocal %94 {approx = true} : vector<8x32x1xf32> -> vector<8x32x1xf32>
    %96 = vector.broadcast %95 : vector<8x32x1xf32> to vector<8x32x32xf32>
    %97 = arith.mulf %92, %96 : vector<8x32x32xf32>
    %98 = arith.truncf %97 : vector<8x32x32xf32> to vector<8x32x32xbf16>
    "tpu.trace_start"() <{level = 10 : i32, message = "wts,wsd->wtd"}> : () -> ()
    %cst_31 = arith.constant dense<0.000000e+00> : vector<8x32x8xf32>
    %99 = tpu.matmul %98, %81, %cst_31 {dimension_numbers = #tpu.dot_dimension_numbers<[2], [1], [1], [2], [0, 0, 0, 1, 1, 2], [0], [0]>} : vector<8x32x32xbf16>, vector<8x32x8xbf16>, vector<8x32x8xf32> -> vector<8x32x8xf32>
    "tpu.trace_stop"() : () -> ()
    %100 = vector.shape_cast %99 : vector<8x32x8xf32> to vector<256x8xf32>
    %101 = arith.truncf %100 : vector<256x8xf32> to vector<256x8xbf16>
    %102 = vector.extract_strided_slice %40 {offsets = [8, 0], sizes = [8, 16], strides = [1, 1]} : vector<16x16xf32> to vector<8x16xf32>
    %103 = arith.truncf %102 : vector<8x16xf32> to vector<8x16xbf16>
    %cst_32 = arith.constant dense<0.000000e+00> : vector<256x16xf32>
    %104 = tpu.matmul %101, %103, %cst_32 {dimension_numbers = #tpu.dot_dimension_numbers<[1], [0], [0], [1], [0, 0, 1, 1], [], []>} : vector<256x8xbf16>, vector<8x16xbf16>, vector<256x16xf32> -> vector<256x16xf32>
    %105 = arith.addf %73, %104 : vector<256x16xf32>
    %106 = arith.addf %1, %105 : vector<256x16xf32>
    %c0_33 = arith.constant 0 : index
    %c0_34 = arith.constant 0 : index
    %107 = vector.load %arg8[%c0_33, %c0_34] : memref<1x16xf32, #tpu.memory_space<vmem>>, vector<1x16xf32>
    %108 = vector.broadcast %107 : vector<1x16xf32> to vector<256x16xf32>
    %109 = arith.addf %106, %108 : vector<256x16xf32>
    %c0_35 = arith.constant 0 : index
    %c0_36 = arith.constant 0 : index
    %110 = vector.load %arg9[%c0_35, %c0_36] : memref<1x16xf32, #tpu.memory_space<vmem>>, vector<1x16xf32>
    %c0_37 = arith.constant 0 : index
    %c0_38 = arith.constant 0 : index
    %111 = vector.load %arg10[%c0_37, %c0_38] : memref<1x16xf32, #tpu.memory_space<vmem>>, vector<1x16xf32>
    %cst_39 = arith.constant dense<0.000000e+00> : vector<256xf32>
    %112 = vector.multi_reduction <add>, %109, %cst_39 [1] : vector<256x16xf32> to vector<256xf32>
    %113 = vector.shape_cast %112 : vector<256xf32> to vector<256x1xf32>
    %cst_40 = arith.constant 1.600000e+01 : f32
    %114 = vector.broadcast %cst_40 : f32 to vector<256x1xf32>
    %115 = arith.divf %113, %114 : vector<256x1xf32>
    %116 = vector.broadcast %115 : vector<256x1xf32> to vector<256x16xf32>
    %117 = arith.subf %109, %116 : vector<256x16xf32>
    %118 = arith.mulf %117, %117 : vector<256x16xf32>
    %cst_41 = arith.constant dense<0.000000e+00> : vector<256xf32>
    %119 = vector.multi_reduction <add>, %118, %cst_41 [1] : vector<256x16xf32> to vector<256xf32>
    %120 = vector.shape_cast %119 : vector<256xf32> to vector<256x1xf32>
    %cst_42 = arith.constant 1.600000e+01 : f32
    %121 = vector.broadcast %cst_42 : f32 to vector<256x1xf32>
    %122 = arith.divf %120, %121 : vector<256x1xf32>
    %123 = vector.broadcast %115 : vector<256x1xf32> to vector<256x16xf32>
    %124 = arith.subf %109, %123 : vector<256x16xf32>
    %cst_43 = arith.constant 9.99999974E-6 : f32
    %125 = vector.broadcast %cst_43 : f32 to vector<256x1xf32>
    %126 = arith.addf %122, %125 : vector<256x1xf32>
    %127 = math.rsqrt %126 : vector<256x1xf32>
    %128 = vector.broadcast %127 : vector<256x1xf32> to vector<256x16xf32>
    %129 = arith.mulf %124, %128 : vector<256x16xf32>
    %130 = vector.broadcast %110 : vector<1x16xf32> to vector<256x16xf32>
    %131 = arith.mulf %129, %130 : vector<256x16xf32>
    %132 = vector.broadcast %111 : vector<1x16xf32> to vector<256x16xf32>
    %133 = arith.addf %131, %132 : vector<256x16xf32>
    %134 = arith.truncf %133 : vector<256x16xf32> to vector<256x16xbf16>
    %c0_44 = arith.constant 0 : index
    %c0_45 = arith.constant 0 : index
    %135 = vector.load %arg11[%c0_44, %c0_45] : memref<16x64xf32, #tpu.memory_space<vmem>>, vector<16x64xf32>
    %136 = arith.truncf %135 : vector<16x64xf32> to vector<16x64xbf16>
    %cst_46 = arith.constant dense<0.000000e+00> : vector<256x64xf32>
    %137 = tpu.matmul %134, %136, %cst_46 {dimension_numbers = #tpu.dot_dimension_numbers<[1], [0], [0], [1], [0, 0, 1, 1], [], []>} : vector<256x16xbf16>, vector<16x64xbf16>, vector<256x64xf32> -> vector<256x64xf32>
    %c0_47 = arith.constant 0 : index
    %c0_48 = arith.constant 0 : index
    %138 = vector.load %arg12[%c0_47, %c0_48] : memref<1x64xf32, #tpu.memory_space<vmem>>, vector<1x64xf32>
    %139 = vector.broadcast %138 : vector<1x64xf32> to vector<256x64xf32>
    %140 = arith.addf %137, %139 : vector<256x64xf32>
    %141 = arith.mulf %140, %140 : vector<256x64xf32>
    %142 = arith.mulf %140, %141 : vector<256x64xf32>
    %cst_49 = arith.constant 4.471500e-02 : f32
    %143 = vector.broadcast %cst_49 : f32 to vector<256x64xf32>
    %144 = arith.mulf %143, %142 : vector<256x64xf32>
    %145 = arith.addf %140, %144 : vector<256x64xf32>
    %cst_50 = arith.constant 0.797884583 : f32
    %146 = vector.broadcast %cst_50 : f32 to vector<256x64xf32>
    %147 = arith.mulf %146, %145 : vector<256x64xf32>
    %148 = math.tanh %147 : vector<256x64xf32>
    %cst_51 = arith.constant 1.000000e+00 : f32
    %149 = vector.broadcast %cst_51 : f32 to vector<256x64xf32>
    %150 = arith.addf %149, %148 : vector<256x64xf32>
    %cst_52 = arith.constant 5.000000e-01 : f32
    %151 = vector.broadcast %cst_52 : f32 to vector<256x64xf32>
    %152 = arith.mulf %151, %150 : vector<256x64xf32>
    %153 = arith.mulf %140, %152 : vector<256x64xf32>
    %154 = arith.truncf %153 : vector<256x64xf32> to vector<256x64xbf16>
    %c0_53 = arith.constant 0 : index
    %c0_54 = arith.constant 0 : index
    %155 = vector.load %arg13[%c0_53, %c0_54] : memref<64x16xf32, #tpu.memory_space<vmem>>, vector<64x16xf32>
    %156 = arith.truncf %155 : vector<64x16xf32> to vector<64x16xbf16>
    %cst_55 = arith.constant dense<0.000000e+00> : vector<256x16xf32>
    %157 = tpu.matmul %154, %156, %cst_55 {dimension_numbers = #tpu.dot_dimension_numbers<[1], [0], [0], [1], [0, 0, 1, 1], [], []>} : vector<256x64xbf16>, vector<64x16xbf16>, vector<256x16xf32> -> vector<256x16xf32>
    %c0_56 = arith.constant 0 : index
    %c0_57 = arith.constant 0 : index
    %158 = vector.load %arg14[%c0_56, %c0_57] : memref<1x16xf32, #tpu.memory_space<vmem>>, vector<1x16xf32>
    %159 = vector.broadcast %158 : vector<1x16xf32> to vector<256x16xf32>
    %160 = arith.addf %157, %159 : vector<256x16xf32>
    %161 = arith.addf %109, %160 : vector<256x16xf32>
    %162 = vector.shape_cast %161 : vector<256x16xf32> to vector<8x32x16xf32>
    %c0_58 = arith.constant 0 : index
    %c0_59 = arith.constant 0 : index
    %c0_60 = arith.constant 0 : index
    %163 = vector.load %arg15[%c0_58, %c0_59, %c0_60] : memref<8x32x16xf32, #tpu.memory_space<vmem>>, vector<8x32x16xf32>
    tpu.vector_store %arg15[%c0_58, %c0_59, %c0_60], %162 {strides = array<i32>} : memref<8x32x16xf32, #tpu.memory_space<vmem>>, vector<8x32x16xf32>,
    return
  }
  func.func @transform_0(%arg0: i32) -> (i32, i32, i32) {
    %c0_i32 = arith.constant 0 : i32
    %c0_i32_0 = arith.constant 0 : i32
    %c0_i32_1 = arith.constant 0 : i32
    return %arg0, %c0_i32, %c0_i32_0 : i32, i32, i32
  }
  func.func @transform_1(%arg0: i32) -> (i32, i32, i32) {
    %c0_i32 = arith.constant 0 : i32
    %c0_i32_0 = arith.constant 0 : i32
    %c0_i32_1 = arith.constant 0 : i32
    %c0_i32_2 = arith.constant 0 : i32
    return %c0_i32, %c0_i32_0, %c0_i32_1 : i32, i32, i32
  }
  func.func @transform_2(%arg0: i32) -> (i32, i32) {
    %c0_i32 = arith.constant 0 : i32
    %c0_i32_0 = arith.constant 0 : i32
    %c0_i32_1 = arith.constant 0 : i32
    return %c0_i32, %c0_i32_0 : i32, i32
  }
  func.func @transform_3(%arg0: i32) -> (i32, i32) {
    %c0_i32 = arith.constant 0 : i32
    %c0_i32_0 = arith.constant 0 : i32
    %c0_i32_1 = arith.constant 0 : i32
    return %c0_i32, %c0_i32_0 : i32, i32
  }
  func.func @transform_4(%arg0: i32) -> (i32, i32) {
    %c0_i32 = arith.constant 0 : i32
    %c0_i32_0 = arith.constant 0 : i32
    %c0_i32_1 = arith.constant 0 : i32
    return %c0_i32, %c0_i32_0 : i32, i32
  }
  func.func @transform_5(%arg0: i32) -> (i32, i32) {
    %c0_i32 = arith.constant 0 : i32
    %c0_i32_0 = arith.constant 0 : i32
    %c0_i32_1 = arith.constant 0 : i32
    return %c0_i32, %c0_i32_0 : i32, i32
  }
  func.func @transform_6(%arg0: i32) -> (i32, i32) {
    %c0_i32 = arith.constant 0 : i32
    %c0_i32_0 = arith.constant 0 : i32
    %c0_i32_1 = arith.constant 0 : i32
    return %c0_i32, %c0_i32_0 : i32, i32
  }
  func.func @transform_7(%arg0: i32) -> (i32, i32) {
    %c0_i32 = arith.constant 0 : i32
    %c0_i32_0 = arith.constant 0 : i32
    %c0_i32_1 = arith.constant 0 : i32
    return %c0_i32, %c0_i32_0 : i32, i32
  }
  func.func @transform_8(%arg0: i32) -> (i32, i32) {
    %c0_i32 = arith.constant 0 : i32
    %c0_i32_0 = arith.constant 0 : i32
    %c0_i32_1 = arith.constant 0 : i32
    return %c0_i32, %c0_i32_0 : i32, i32
  }
  func.func @transform_9(%arg0: i32) -> (i32, i32) {
    %c0_i32 = arith.constant 0 : i32
    %c0_i32_0 = arith.constant 0 : i32
    %c0_i32_1 = arith.constant 0 : i32
    return %c0_i32, %c0_i32_0 : i32, i32
  }
  func.func @transform_10(%arg0: i32) -> (i32, i32) {
    %c0_i32 = arith.constant 0 : i32
    %c0_i32_0 = arith.constant 0 : i32
    %c0_i32_1 = arith.constant 0 : i32
    return %c0_i32, %c0_i32_0 : i32, i32
  }
  func.func @transform_11(%arg0: i32) -> (i32, i32) {
    %c0_i32 = arith.constant 0 : i32
    %c0_i32_0 = arith.constant 0 : i32
    %c0_i32_1 = arith.constant 0 : i32
    return %c0_i32, %c0_i32_0 : i32, i32
  }
  func.func @transform_12(%arg0: i32) -> (i32, i32) {
    %c0_i32 = arith.constant 0 : i32
    %c0_i32_0 = arith.constant 0 : i32
    %c0_i32_1 = arith.constant 0 : i32
    return %c0_i32, %c0_i32_0 : i32, i32
  }
  func.func @transform_13(%arg0: i32) -> (i32, i32) {
    %c0_i32 = arith.constant 0 : i32
    %c0_i32_0 = arith.constant 0 : i32
    %c0_i32_1 = arith.constant 0 : i32
    return %c0_i32, %c0_i32_0 : i32, i32
  }
  func.func @transform_14(%arg0: i32) -> (i32, i32, i32) {
    %c0_i32 = arith.constant 0 : i32
    %c0_i32_0 = arith.constant 0 : i32
    %c0_i32_1 = arith.constant 0 : i32
    return %arg0, %c0_i32, %c0_i32_0 : i32, i32, i32
  }
}

</mosaic_0001>

<bundles_post_ra>
// kernel: encoder_up_layer.4
= control target key start
LH: loop header
LB: loop body
LE: loop exit
PB: predicated region body
PF: predicated region fallthrough
CT: control target
= control target key end

     0   :  { %vm42_vm0 = vcmask 261120   ;;  %vm164_vm1 = vcmask 523264   ;;  %s374_s1 = inlined_call_operand.vmem [shape: f32[32,64], index: 1, kind: input, shape index: {}]   ;;  %s375_s0 = inlined_call_operand.vmem [shape: f32[128,32], index: 0, kind: input, shape index: {}]   ;;  %s376_s2 = inlined_call_operand.vmem [shape: f32[128,64], index: 2, kind: output, shape index: {}]  }
   0x1   :  { %v36_v0 = vld [vmem:[%s374_s1] sm:$0xff]  ;;  %v37_v1 = vld [vmem:[%s374_s1 + $0x8] sm:$0xff]  ;;  %v38_v2 = vld [vmem:[%s374_s1 + $0x10] sm:$0xff] }
   0x2   :  { %v40_v3 = vpack.c.bf16 %v37_v1, %v36_v0  ;;  %v39_v4 = vld [vmem:[%s374_s1 + $0x18] sm:$0xff]  ;;  %v12_v5 = vld [vmem:[%s375_s0] sm:$0xff]  ;;  %v13_v6 = vld [vmem:[%s375_s0 + $0x8] sm:$0xff] }
   0x3   :  { %v41_v7 = vpack.c.bf16 %v39_v4, %v38_v2  ;;  %v28_v8 = vpack.c.bf16 %v13_v6, %v12_v5  ;;  %v20_v9 = vld [vmem:[%s375_s0 + $0x40] sm:$0xff]  ;;  %v21_v10 = vld [vmem:[%s375_s0 + $0x48] sm:$0xff]  ;;  %v14_v12 = vld [vmem:[%s375_s0 + $0x10] sm:$0xff] }
   0x4   :  { %203 = vmatprep.subr.bf16.mxu0 %v40_v3  ;;  %223 = vmatprep.subr.bf16.mxu1 %v40_v3  ;;  %v32_v11 = vpack.c.bf16 %v21_v10, %v20_v9  ;;  %v15_v13 = vld [vmem:[%s375_s0 + $0x18] sm:$0xff]  ;;  %v22_v14 = vld [vmem:[%s375_s0 + $0x50] sm:$0xff]  ;;  %v16_v16 = vld [vmem:[%s375_s0 + $0x20] sm:$0xff] }
   0x5   :  { %204 = vmatpush3.bf16.msra.mxu0 %v40_v3  ;;  %225 = vmatpush3.bf16.msra.mxu1 %v40_v3  ;;  %v23_v15 = vld [vmem:[%s375_s0 + $0x58] sm:$0xff]  ;;  %v17_v17 = vld [vmem:[%s375_s0 + $0x28] sm:$0xff]  ;;  %v24_v18 = vld [vmem:[%s375_s0 + $0x60] sm:$0xff]  ;;  %v29_v20 = vpack.c.bf16 %v15_v13, %v14_v12 }
   0x6   :  { %205 = vmatprep.subr.bf16.mxu0 %v41_v7  ;;  %224 = vmatprep.subr.bf16.mxu1 %v41_v7  ;;  %v25_v19 = vld [vmem:[%s375_s0 + $0x68] sm:$0xff]  ;;  %v33_v21 = vpack.c.bf16 %v23_v15, %v22_v14  ;;  %v30_v22 = vpack.c.bf16 %v17_v17, %v16_v16  ;;  %v18_v24 = vld [vmem:[%s375_s0 + $0x30] sm:$0xff]  ;;  %v19_v25 = vld [vmem:[%s375_s0 + $0x38] sm:$0xff] }
   0x7   :  { %207 = vmatprep.mubr.msk.bf16.mxu0 %vm42_vm0, %v28_v8  ;;  %215 = vmatprep.mubr.msk.bf16.mxu1 %vm42_vm0, %v32_v11  ;;  %v34_v23 = vpack.c.bf16 %v25_v19, %v24_v18  ;;  %v26_v26 = vld [vmem:[%s375_s0 + $0x70] sm:$0xff]  ;;  %v27_v27 = vld [vmem:[%s375_s0 + $0x78] sm:$0xff]  ;;  %v31_v28 = vpack.c.bf16 %v19_v25, %v18_v24 }
   0x8   :  { %v35_v29 = vpack.c.bf16 %v27_v27, %v26_v26 }
   0x9   :  { %206 = vmatpush3.bf16.msra.mxu0 %v41_v7  ;;  %226 = vmatpush3.bf16.msra.mxu1 %v41_v7 }
   0xc   :  { %208 = vmatmul.mubr.msk.bf16.vlgmr.msra.gmra.mrb[0].mxu0 %vm42_vm0, %v29_v20  ;;  %216 = vmatmul.mubr.msk.bf16.vlgmr.msra.gmra.mrb[0].mxu1 %vm42_vm0, %v33_v21 }
   0xd   :  { %211 = vmatprep.mubr.msk.bf16.mxu0 %vm42_vm0, %v30_v22  ;;  %219 = vmatprep.mubr.msk.bf16.mxu1 %vm42_vm0, %v34_v23 }
  0x14   :  { %212 = vmatmul.mubr.msk.bf16.gmra.mrb[4].mxu0 %vm42_vm0, %v31_v28  ;;  %220 = vmatmul.mubr.msk.bf16.gmra.mrb[4].mxu1 %vm42_vm0, %v35_v29 }
  0xdf   :  { %v209_v30 = vpop.f32.mrb[0].mxu0  ;;  %v217_v31 = vpop.f32.mrb[0].mxu1 }
  0xe0   :  { %167 = vst.msk [vmem:[%s376_s2 + $0x10] sm:$0xff] %vm164_vm1, %v209_v30  ;;  %175 = vst.msk [vmem:[%s376_s2 + $0x50] sm:$0xff] %vm164_vm1, %v217_v31  ;;  %v101_v32 = vpop.f32.mrb[1].mxu0  ;;  %v133_v33 = vpop.f32.mrb[1].mxu1 }
  0xe1   :  { %165 = vst.msk [vmem:[%s376_s2] sm:$0xff] %vm164_vm1, %v101_v32  ;;  %173 = vst.msk [vmem:[%s376_s2 + $0x40] sm:$0xff] %vm164_vm1, %v133_v33  ;;  %v210_v34 = vpop.f32.mrb[2].mxu0  ;;  %v218_v35 = vpop.f32.mrb[2].mxu1 }
  0xe2   :  { %168 = vst.msk [vmem:[%s376_s2 + $0x18] sm:$0xff] %vm164_vm1, %v210_v34  ;;  %176 = vst.msk [vmem:[%s376_s2 + $0x58] sm:$0xff] %vm164_vm1, %v218_v35  ;;  %v104_v36 = vpop.f32.mrb[3].mxu0  ;;  %v136_v37 = vpop.f32.mrb[3].mxu1 }
  0xe3   :  { %166 = vst.msk [vmem:[%s376_s2 + $0x8] sm:$0xff] %vm164_vm1, %v104_v36  ;;  %174 = vst.msk [vmem:[%s376_s2 + $0x48] sm:$0xff] %vm164_vm1, %v136_v37 }
  0xe7   :  { %v213_v38 = vpop.f32.mrb[4].mxu0  ;;  %v221_v39 = vpop.f32.mrb[4].mxu1 }
  0xe8   :  { %171 = vst.msk [vmem:[%s376_s2 + $0x30] sm:$0xff] %vm164_vm1, %v213_v38  ;;  %179 = vst.msk [vmem:[%s376_s2 + $0x70] sm:$0xff] %vm164_vm1, %v221_v39  ;;  %v117_v40 = vpop.f32.mrb[5].mxu0  ;;  %v149_v41 = vpop.f32.mrb[5].mxu1 }
  0xe9   :  { %169 = vst.msk [vmem:[%s376_s2 + $0x20] sm:$0xff] %vm164_vm1, %v117_v40  ;;  %177 = vst.msk [vmem:[%s376_s2 + $0x60] sm:$0xff] %vm164_vm1, %v149_v41  ;;  %v214_v42 = vpop.f32.mrb[6].mxu0  ;;  %v222_v43 = vpop.f32.mrb[6].mxu1 }
  0xea   :  { %172 = vst.msk [vmem:[%s376_s2 + $0x38] sm:$0xff] %vm164_vm1, %v214_v42  ;;  %180 = vst.msk [vmem:[%s376_s2 + $0x78] sm:$0xff] %vm164_vm1, %v222_v43  ;;  %v120_v44 = vpop.f32.mrb[7].mxu0  ;;  %v152_v45 = vpop.f32.mrb[7].mxu1 }
  0xeb   :  { %170 = vst.msk [vmem:[%s376_s2 + $0x28] sm:$0xff] %vm164_vm1, %v120_v44  ;;  %178 = vst.msk [vmem:[%s376_s2 + $0x68] sm:$0xff] %vm164_vm1, %v152_v45 }

// kernel: encoder_up_layer.5
= control target key start
LH: loop header
LB: loop body
LE: loop exit
PB: predicated region body
PF: predicated region fallthrough
CT: control target
= control target key end

     0   :  { %s1762_s24 = smov 0   ;;  %s2491_s0 = inlined_call_operand.vmem [shape: f32[512,16], index: 0, kind: input, shape index: {}]   ;;  %s2492_s1 = inlined_call_operand.vmem [shape: f32[512,16], index: 1, kind: input, shape index: {}]   ;;  %s2493_s2 = inlined_call_operand.vmem [shape: f32[1,16], index: 2, kind: input, shape index: {}]   ;;  %s2494_s3 = inlined_call_operand.vmem [shape: f32[1,16], index: 3, kind: input, shape index: {}]   ;;  %s2495_s4 = inlined_call_operand.vmem [shape: f32[16,16], index: 4, kind: input, shape index: {}]   ;;  %s2496_s5 = inlined_call_operand.vmem [shape: f32[16,16], index: 5, kind: input, shape index: {}]   ;;  %s2497_s6 = inlined_call_operand.vmem [shape: f32[1,16], index: 6, kind: input, shape index: {}]   ;;  %s2498_s7 = inlined_call_operand.vmem [shape: f32[512,16], index: 7, kind: output, shape index: {}]  }
   0x1 LB: > { %s1460_s25 = sadd.s32 4294967295, %s1720_s24   ;;  %p1464_p0 = scmp.ge.s32.totalorder %s1720_s24, 1  ;;  %s1720_s24 = sphi %s1762_s24, %s17_s24  }
   0x2   : > { %p249_p1 = scmp.lt.s32.totalorder %s1720_s24, 3 }
   0x4   : > { %p250_p2 = pnand %p1464_p0, %p249_p1 }
   0x5   : > { %s1465_s26 = sshll.u32 (!%p250_p2), %s1460_s25, 5  ;;  %vm339_vm0 = vcmask (!%p250_p2), 130048  }
   0x6   : > { %253 = sbr.rel (%p250_p2) target bundleno = 616 (0x268), region = 48  ;;  %p287_p3 = scmp.lt.s32.totalorder (!%p250_p2), %s1465_s26, 63 }
   0xd   : > { %s2500_s26 = smov (!%p287_p3, %s1465_s26), 63 }
   0xe   : > { %s1770_s27 = sshll.u32 %s2500_s26, 3 }
   0xf   : > { %s1776_s30 = scalar_lea.vmem %s2491_s0, %s1770_s27  ;;  %s2078_s14 = scalar_lea.vmem %s2492_s1, %s1770_s27 }
  0x10   : > { %v1779_v0 = vld [vmem:[%s1776_s30] sm:$0xff]  ;;  %v1782_v1 = vld [vmem:[%s1776_s30 + $0x10] sm:$0xff]  ;;  %v1785_v2 = vld [vmem:[%s1776_s30 + $0x8] sm:$0xff]  ;;  %s2369_s29 = scalar_lea.vmem %s2498_s7, %s1770_s27 }
  0x11   : > { %v340_v3 = vsel %vm339_vm0, %v1779_v0, 0.0  ;;  %v346_v4 = vsel %vm339_vm0, %v1782_v1, 0.0  ;;  %v1792_v5 = vld [vmem:[%s1776_s30 + $0x18] sm:$0xff]  ;;  %v343_v6 = vsel %vm339_vm0, %v1785_v2, 0.0  ;;  %v1799_v8 = vld [vmem:[%s1776_s30 + $0x20] sm:$0xff]  ;;  %v1802_v9 = vld [vmem:[%s1776_s30 + $0x28] sm:$0xff] }
  0x12   : > { %341 = vadd.xlane.f32.xlu0 %v340_v3  ;;  %347 = vadd.xlane.f32.xlu1 %v346_v4  ;;  %v349_v7 = vsel %vm339_vm0, %v1792_v5, 0.0  ;;  %v352_v10 = vsel %vm339_vm0, %v1799_v8, 0.0  ;;  %v355_v11 = vsel %vm339_vm0, %v1802_v9, 0.0  ;;  %v1809_v12 = vld [vmem:[%s1776_s30 + $0x30] sm:$0xff]  ;;  %v1812_v13 = vld [vmem:[%s1776_s30 + $0x38] sm:$0xff]  ;;  %v1819_v16 = vld [vmem:[%s1776_s30 + $0x40] sm:$0xff] }
  0x13   : > { %v358_v14 = vsel %vm339_vm0, %v1809_v12, 0.0  ;;  %v361_v15 = vsel %vm339_vm0, %v1812_v13, 0.0  ;;  %v1822_v17 = vld [vmem:[%s1776_s30 + $0x48] sm:$0xff]  ;;  %v364_v18 = vsel %vm339_vm0, %v1819_v16, 0.0  ;;  %v1829_v20 = vld [vmem:[%s1776_s30 + $0x50] sm:$0xff]  ;;  %v1832_v21 = vld [vmem:[%s1776_s30 + $0x58] sm:$0xff] }
  0x14   : > { %v367_v19 = vsel %vm339_vm0, %v1822_v17, 0.0  ;;  %v370_v22 = vsel %vm339_vm0, %v1829_v20, 0.0  ;;  %v373_v23 = vsel %vm339_vm0, %v1832_v21, 0.0  ;;  %v1839_v24 = vld [vmem:[%s1776_s30 + $0x60] sm:$0xff]  ;;  %v1842_v25 = vld [vmem:[%s1776_s30 + $0x68] sm:$0xff]  ;;  %v1849_v28 = vld [vmem:[%s1776_s30 + $0x70] sm:$0xff] }
  0x15   : > { %v376_v26 = vsel %vm339_vm0, %v1839_v24, 0.0  ;;  %v379_v27 = vsel %vm339_vm0, %v1842_v25, 0.0  ;;  %v1852_v29 = vld [vmem:[%s1776_s30 + $0x78] sm:$0xff]  ;;  %v382_v30 = vsel %vm339_vm0, %v1849_v28, 0.0  ;;  %v1859_v32 = vld [vmem:[%s1776_s30 + $0x80] sm:$0xff]  ;;  %v1862_v33 = vld [vmem:[%s1776_s30 + $0x88] sm:$0xff] }
  0x16   : > { %344 = vadd.xlane.f32.xlu0 %v343_v6  ;;  %350 = vadd.xlane.f32.xlu1 %v349_v7  ;;  %v385_v31 = vsel %vm339_vm0, %v1852_v29, 0.0  ;;  %v388_v34 = vsel %vm339_vm0, %v1859_v32, 0.0  ;;  %v391_v35 = vsel %vm339_vm0, %v1862_v33, 0.0  ;;  %v1869_v36 = vld [vmem:[%s1776_s30 + $0x90] sm:$0xff]  ;;  %v1872_v37 = vld [vmem:[%s1776_s30 + $0x98] sm:$0xff]  ;;  %v1879_v40 = vld [vmem:[%s1776_s30 + $0xa0] sm:$0xff] }
  0x17   : > { %v394_v38 = vsel %vm339_vm0, %v1869_v36, 0.0  ;;  %v397_v39 = vsel %vm339_vm0, %v1872_v37, 0.0  ;;  %v1882_v41 = vld [vmem:[%s1776_s30 + $0xa8] sm:$0xff]  ;;  %v400_v42 = vsel %vm339_vm0, %v1879_v40, 0.0  ;;  %v1889_v44 = vld [vmem:[%s1776_s30 + $0xb0] sm:$0xff]  ;;  %v1892_v45 = vld [vmem:[%s1776_s30 + $0xb8] sm:$0xff] }
  0x18   : > { %v403_v43 = vsel %vm339_vm0, %v1882_v41, 0.0  ;;  %v406_v46 = vsel %vm339_vm0, %v1889_v44, 0.0  ;;  %v409_v47 = vsel %vm339_vm0, %v1892_v45, 0.0  ;;  %v1899_v48 = vld [vmem:[%s1776_s30 + $0xc0] sm:$0xff]  ;;  %v1902_v49 = vld [vmem:[%s1776_s30 + $0xc8] sm:$0xff]  ;;  %v1909_v52 = vld [vmem:[%s1776_s30 + $0xd0] sm:$0xff] }
  0x19   : > { %v412_v50 = vsel %vm339_vm0, %v1899_v48, 0.0  ;;  %v415_v51 = vsel %vm339_vm0, %v1902_v49, 0.0  ;;  %v1912_v53 = vld [vmem:[%s1776_s30 + $0xd8] sm:$0xff]  ;;  %v418_v54 = vsel %vm339_vm0, %v1909_v52, 0.0  ;;  %v1919_v56 = vld [vmem:[%s1776_s30 + $0xe0] sm:$0xff]  ;;  %v1922_v57 = vld [vmem:[%s1776_s30 + $0xe8] sm:$0xff] }
  0x1a   : > { %353 = vadd.xlane.f32.xlu0 %v352_v10  ;;  %356 = vadd.xlane.f32.xlu1 %v355_v11  ;;  %v421_v55 = vsel %vm339_vm0, %v1912_v53, 0.0  ;;  %v424_v58 = vsel %vm339_vm0, %v1919_v56, 0.0  ;;  %v427_v59 = vsel %vm339_vm0, %v1922_v57, 0.0  ;;  %v1929_v60 = vld [vmem:[%s1776_s30 + $0xf0] sm:$0xff]  ;;  %v1932_v61 = vld [vmem:[%s1776_s30 + $0xf8] sm:$0xff] }
  0x1b   : > { %v430_v62 = vsel %vm339_vm0, %v1929_v60, 0.0  ;;  %v433_v63 = vsel %vm339_vm0, %v1932_v61, 0.0 }
  0x1e   : > { %359 = vadd.xlane.f32.xlu0 %v358_v14  ;;  %362 = vadd.xlane.f32.xlu1 %v361_v15 }
  0x22   : > { %365 = vadd.xlane.f32.xlu0 %v364_v18  ;;  %368 = vadd.xlane.f32.xlu1 %v367_v19 }
  0x26   : > { %371 = vadd.xlane.f32.xlu0 %v370_v22  ;;  %374 = vadd.xlane.f32.xlu1 %v373_v23 }
  0x2a   : > { %377 = vadd.xlane.f32.xlu0 %v376_v26  ;;  %380 = vadd.xlane.f32.xlu1 %v379_v27 }
  0x2e   : > { %383 = vadd.xlane.f32.xlu0 %v382_v30  ;;  %386 = vadd.xlane.f32.xlu1 %v385_v31 }
  0x32   : > { %389 = vadd.xlane.f32.xlu0 %v388_v34  ;;  %392 = vadd.xlane.f32.xlu1 %v391_v35 }
  0x36   : > { %395 = vadd.xlane.f32.xlu0 %v394_v38  ;;  %398 = vadd.xlane.f32.xlu1 %v397_v39 }
  0x3a   : > { %401 = vadd.xlane.f32.xlu0 %v400_v42  ;;  %404 = vadd.xlane.f32.xlu1 %v403_v43 }
  0x3e   : > { %407 = vadd.xlane.f32.xlu0 %v406_v46  ;;  %410 = vadd.xlane.f32.xlu1 %v409_v47 }
  0x42   : > { %413 = vadd.xlane.f32.xlu0 %v412_v50  ;;  %416 = vadd.xlane.f32.xlu1 %v415_v51 }
  0x46   : > { %419 = vadd.xlane.f32.xlu0 %v418_v54  ;;  %422 = vadd.xlane.f32.xlu1 %v421_v55 }
  0x4a   : > { %425 = vadd.xlane.f32.xlu0 %v424_v58  ;;  %428 = vadd.xlane.f32.xlu1 %v427_v59 }
  0x4e   : > { %431 = vadd.xlane.f32.xlu0 %v430_v62  ;;  %434 = vadd.xlane.f32.xlu1 %v433_v63 }
  0x9f   : > { %v342_v3 = vpop.xlane.xlu0 %341  ;;  %v348_v4 = vpop.xlane.xlu1 %347 }
  0xa0   : > { %v437_v6 = vmul.f32 0.0625, %v342_v3  ;;  %v439_v7 = vmul.f32 0.0625, %v348_v4 }
  0xa2   : > { %v1939_v10 = vsub.f32 %v1779_v0, %v437_v6  ;;  %v1942_v11 = vsub.f32 %v1782_v1, %v439_v7 }
  0xa3   : > { %v345_v14 = vpop.xlane.xlu0 %344  ;;  %v351_v15 = vpop.xlane.xlu1 %350 }
  0xa4   : > { %v438_v18 = vmul.f32 0.0625, %v345_v14  ;;  %v440_v19 = vmul.f32 0.0625, %v351_v15  ;;  %v501_v22 = vmul.f32 %v1939_v10, %v1939_v10  ;;  %v503_v23 = vmul.f32 %v1942_v11, %v1942_v11 }
  0xa6   : > { %v1949_v26 = vsub.f32 %v1785_v2, %v438_v18  ;;  %v1952_v27 = vsub.f32 %v1792_v5, %v440_v19  ;;  %v533_v0 = vsel %vm339_vm0, %v501_v22, 0.0  ;;  %v539_v31 = vsel %vm339_vm0, %v503_v23, 0.0 }
  0xa7   : > { %534 = vadd.xlane.f32.xlu0 %v533_v0  ;;  %v354_v1 = vpop.xlane.xlu0 %353  ;;  %v357_v30 = vpop.xlane.xlu1 %356 }
  0xa8   : > { %v441_v34 = vmul.f32 0.0625, %v354_v1  ;;  %v442_v35 = vmul.f32 0.0625, %v357_v30  ;;  %v502_v38 = vmul.f32 %v1949_v26, %v1949_v26  ;;  %v504_v39 = vmul.f32 %v1952_v27, %v1952_v27 }
  0xaa   : > { %v1961_v2 = vsub.f32 %v1799_v8, %v441_v34  ;;  %v1964_v5 = vsub.f32 %v1802_v9, %v442_v35  ;;  %v536_v42 = vsel %vm339_vm0, %v502_v38, 0.0  ;;  %v542_v47 = vsel %vm339_vm0, %v504_v39, 0.0 }
  0xab   : > { %540 = vadd.xlane.f32.xlu0 %v539_v31  ;;  %537 = vadd.xlane.f32.xlu1 %v536_v42  ;;  %v360_v43 = vpop.xlane.xlu0 %359  ;;  %v363_v46 = vpop.xlane.xlu1 %362 }
  0xac   : > { %v443_v50 = vmul.f32 0.0625, %v360_v43  ;;  %v444_v51 = vmul.f32 0.0625, %v363_v46  ;;  %v505_v54 = vmul.f32 %v1961_v2, %v1961_v2  ;;  %v506_v8 = vmul.f32 %v1964_v5, %v1964_v5 }
  0xae   : > { %v1973_v55 = vsub.f32 %v1809_v12, %v443_v50  ;;  %v1976_v9 = vsub.f32 %v1812_v13, %v444_v51  ;;  %v545_v58 = vsel %vm339_vm0, %v505_v54, 0.0  ;;  %v548_v63 = vsel %vm339_vm0, %v506_v8, 0.0 }
  0xaf   : > { %543 = vadd.xlane.f32.xlu1 %v542_v47  ;;  %546 = vadd.xlane.f32.xlu0 %v545_v58  ;;  %v366_v59 = vpop.xlane.xlu0 %365  ;;  %v369_v62 = vpop.xlane.xlu1 %368 }
  0xb0   : > { %v445_v3 = vmul.f32 0.0625, %v366_v59  ;;  %v446_v4 = vmul.f32 0.0625, %v369_v62  ;;  %v507_v6 = vmul.f32 %v1973_v55, %v1973_v55  ;;  %v508_v12 = vmul.f32 %v1976_v9, %v1976_v9 }
  0xb2   : > { %v1985_v7 = vsub.f32 %v1819_v16, %v445_v3  ;;  %v1988_v13 = vsub.f32 %v1822_v17, %v446_v4  ;;  %v551_v14 = vsel %vm339_vm0, %v507_v6, 0.0  ;;  %v554_v19 = vsel %vm339_vm0, %v508_v12, 0.0 }
  0xb3   : > { %549 = vadd.xlane.f32.xlu1 %v548_v63  ;;  %552 = vadd.xlane.f32.xlu0 %v551_v14  ;;  %v372_v15 = vpop.xlane.xlu0 %371  ;;  %v375_v18 = vpop.xlane.xlu1 %374 }
  0xb4   : > { %v447_v22 = vmul.f32 0.0625, %v372_v15  ;;  %v448_v23 = vmul.f32 0.0625, %v375_v18  ;;  %v509_v0 = vmul.f32 %v1985_v7, %v1985_v7  ;;  %v510_v16 = vmul.f32 %v1988_v13, %v1988_v13 }
  0xb6   : > { %v1997_v1 = vsub.f32 %v1829_v20, %v447_v22  ;;  %v2000_v17 = vsub.f32 %v1832_v21, %v448_v23  ;;  %v557_v30 = vsel %vm339_vm0, %v509_v0, 0.0  ;;  %v560_v35 = vsel %vm339_vm0, %v510_v16, 0.0 }
  0xb7   : > { %555 = vadd.xlane.f32.xlu1 %v554_v19  ;;  %558 = vadd.xlane.f32.xlu0 %v557_v30  ;;  %v378_v31 = vpop.xlane.xlu0 %377  ;;  %v381_v34 = vpop.xlane.xlu1 %380 }
  0xb8   : > { %v449_v38 = vmul.f32 0.0625, %v378_v31  ;;  %v450_v39 = vmul.f32 0.0625, %v381_v34  ;;  %v511_v42 = vmul.f32 %v1997_v1, %v1997_v1  ;;  %v512_v20 = vmul.f32 %v2000_v17, %v2000_v17 }
  0xba   : > { %v2009_v43 = vsub.f32 %v1839_v24, %v449_v38  ;;  %v2012_v21 = vsub.f32 %v1842_v25, %v450_v39  ;;  %v563_v46 = vsel %vm339_vm0, %v511_v42, 0.0  ;;  %v566_v51 = vsel %vm339_vm0, %v512_v20, 0.0 }
  0xbb   : > { %561 = vadd.xlane.f32.xlu1 %v560_v35  ;;  %564 = vadd.xlane.f32.xlu0 %v563_v46  ;;  %v384_v47 = vpop.xlane.xlu0 %383  ;;  %v387_v50 = vpop.xlane.xlu1 %386 }
  0xbc   : > { %v451_v54 = vmul.f32 0.0625, %v384_v47  ;;  %v452_v8 = vmul.f32 0.0625, %v387_v50  ;;  %v513_v58 = vmul.f32 %v2009_v43, %v2009_v43  ;;  %v514_v24 = vmul.f32 %v2012_v21, %v2012_v21 }
  0xbe   : > { %v2021_v59 = vsub.f32 %v1849_v28, %v451_v54  ;;  %v2024_v25 = vsub.f32 %v1852_v29, %v452_v8  ;;  %v569_v62 = vsel %vm339_vm0, %v513_v58, 0.0  ;;  %v572_v4 = vsel %vm339_vm0, %v514_v24, 0.0  ;;  %v900_v58 = vld [vmem:[%s2496_s5] sm:$0xff] }
  0xbf   : > { %567 = vadd.xlane.f32.xlu1 %v566_v51  ;;  %570 = vadd.xlane.f32.xlu0 %v569_v62  ;;  %v390_v63 = vpop.xlane.xlu0 %389  ;;  %v393_v3 = vpop.xlane.xlu1 %392 }
  0xc0   : > { %v453_v6 = vmul.f32 0.0625, %v390_v63  ;;  %v454_v12 = vmul.f32 0.0625, %v393_v3  ;;  %v515_v14 = vmul.f32 %v2021_v59, %v2021_v59  ;;  %v516_v28 = vmul.f32 %v2024_v25, %v2024_v25 }
  0xc2   : > { %v2033_v15 = vsub.f32 %v1859_v32, %v453_v6  ;;  %v2036_v29 = vsub.f32 %v1862_v33, %v454_v12  ;;  %v575_v18 = vsel %vm339_vm0, %v515_v14, 0.0  ;;  %v578_v23 = vsel %vm339_vm0, %v516_v28, 0.0  ;;  %v852_v14 = vld [vmem:[%s2078_s14] sm:$0xff]  ;;  %v853_v28 = vld [vmem:[%s2078_s14 + $0x8] sm:$0xff] }
  0xc3   : > { %573 = vadd.xlane.f32.xlu1 %v572_v4  ;;  %576 = vadd.xlane.f32.xlu0 %v575_v18  ;;  %v396_v19 = vpop.xlane.xlu0 %395  ;;  %v399_v22 = vpop.xlane.xlu1 %398  ;;  %v849_v18 = vld [vmem:[%s2495_s4] sm:$0xff] }
  0xc4   : > { %v455_v0 = vmul.f32 0.0625, %v396_v19  ;;  %v456_v16 = vmul.f32 0.0625, %v399_v22  ;;  %v517_v30 = vmul.f32 %v2033_v15, %v2033_v15  ;;  %v518_v32 = vmul.f32 %v2036_v29, %v2036_v29 }
  0xc6   : > { %v2045_v31 = vsub.f32 %v1869_v36, %v455_v0  ;;  %v2048_v33 = vsub.f32 %v1872_v37, %v456_v16  ;;  %v581_v34 = vsel %vm339_vm0, %v517_v30, 0.0  ;;  %v584_v39 = vsel %vm339_vm0, %v518_v32, 0.0  ;;  %v855_v16 = vld [vmem:[%s2078_s14 + $0x18] sm:$0xff] }
  0xc7   : > { %579 = vadd.xlane.f32.xlu1 %v578_v23  ;;  %582 = vadd.xlane.f32.xlu0 %v581_v34  ;;  %v402_v35 = vpop.xlane.xlu0 %401  ;;  %v405_v38 = vpop.xlane.xlu1 %404  ;;  %v884_v0 = vpack.c.bf16 %v853_v28, %v852_v14 }
  0xc8   : > { %v457_v42 = vmul.f32 0.0625, %v402_v35  ;;  %v458_v20 = vmul.f32 0.0625, %v405_v38  ;;  %v519_v46 = vmul.f32 %v2045_v31, %v2045_v31  ;;  %v520_v36 = vmul.f32 %v2048_v33, %v2048_v33 }
  0xc9   : > { %1544 = vmatprep.mubr.msk.bf16.mxu1 %vm339_vm0, %v884_v0 }
  0xca   : > { %v2057_v37 = vsub.f32 %v1879_v40, %v457_v42  ;;  %v2060_v47 = vsub.f32 %v1882_v41, %v458_v20  ;;  %v587_v50 = vsel %vm339_vm0, %v519_v46, 0.0  ;;  %v590_v8 = vsel %vm339_vm0, %v520_v36, 0.0  ;;  %v901_v40 = vld [vmem:[%s2496_s5 + $0x8] sm:$0xff] }
  0xcb   : > { %585 = vadd.xlane.f32.xlu1 %v584_v39  ;;  %588 = vadd.xlane.f32.xlu0 %v587_v50  ;;  %v408_v51 = vpop.xlane.xlu0 %407  ;;  %v411_v54 = vpop.xlane.xlu1 %410  ;;  %v902_v3 = vpack.c.bf16 %v901_v40, %v900_v58 }
  0xcc   : > { %v459_v24 = vmul.f32 0.0625, %v408_v51  ;;  %v460_v62 = vmul.f32 0.0625, %v411_v54  ;;  %v521_v41 = vmul.f32 %v2057_v37, %v2057_v37  ;;  %v522_v63 = vmul.f32 %v2060_v47, %v2060_v47 }
  0xcd   : > { %1542 = vmatprep.subr.bf16.mxu1 %v902_v3 }
  0xce   : > { %v2081_v4 = vsub.f32 %v1889_v44, %v459_v24  ;;  %v2084_v6 = vsub.f32 %v1892_v45, %v460_v62  ;;  %v593_v12 = vsel %vm339_vm0, %v521_v41, 0.0  ;;  %v596_v23 = vsel %vm339_vm0, %v522_v63, 0.0  ;;  %v850_v44 = vld [vmem:[%s2495_s4 + $0x8] sm:$0xff]  ;;  %v854_v45 = vld [vmem:[%s2078_s14 + $0x10] sm:$0xff]  ;;  %1543 = vmatpush3.bf16.msra.mxu1 %v902_v3  ;;  %v856_v3 = vld [vmem:[%s2078_s14 + $0x20] sm:$0xff] }
  0xcf   : > { %591 = vadd.xlane.f32.xlu1 %v590_v8  ;;  %594 = vadd.xlane.f32.xlu0 %v593_v12  ;;  %v414_v19 = vpop.xlane.xlu0 %413  ;;  %v417_v22 = vpop.xlane.xlu1 %416  ;;  %v851_v38 = vpack.c.bf16 %v850_v44, %v849_v18  ;;  %v885_v39 = vpack.c.bf16 %v855_v16, %v854_v45  ;;  %v857_v12 = vld [vmem:[%s2078_s14 + $0x28] sm:$0xff] }
  0xd0   : > { %v461_v30 = vmul.f32 0.0625, %v414_v19  ;;  %v462_v32 = vmul.f32 0.0625, %v417_v22  ;;  %v523_v34 = vmul.f32 %v2081_v4, %v2081_v4  ;;  %v524_v35 = vmul.f32 %v2084_v6, %v2084_v6  ;;  %v859_v19 = vld [vmem:[%s2078_s14 + $0x38] sm:$0xff] }
  0xd1   : > { %1576 = vmatprep.subr.bf16.mxu0 %v851_v38  ;;  %1545 = vmatmul.mubr.msk.bf16.vlgmr.msra.gmra.mrb[0].mxu1 %vm339_vm0, %v885_v39  ;;  %v886_v22 = vpack.c.bf16 %v857_v12, %v856_v3  ;;  %v866_v12 = vld [vmem:[%s2078_s14 + $0x70] sm:$0xff] }
  0xd2   : > { %v2104_v42 = vsub.f32 %v1899_v48, %v461_v30  ;;  %v2107_v20 = vsub.f32 %v1902_v49, %v462_v32  ;;  %v599_v46 = vsel %vm339_vm0, %v523_v34, 0.0  ;;  %v602_v51 = vsel %vm339_vm0, %v524_v35, 0.0  ;;  %1577 = vmatpush3.bf16.msra.mxu0 %v851_v38 }
  0xd3   : > { %597 = vadd.xlane.f32.xlu1 %v596_v23  ;;  %600 = vadd.xlane.f32.xlu0 %v599_v46  ;;  %v420_v36 = vpop.xlane.xlu0 %419  ;;  %v423_v50 = vpop.xlane.xlu1 %422 }
  0xd4   : > { %v463_v54 = vmul.f32 0.0625, %v420_v36  ;;  %v464_v8 = vmul.f32 0.0625, %v423_v50  ;;  %v525_v58 = vmul.f32 %v2104_v42, %v2104_v42  ;;  %v526_v48 = vmul.f32 %v2107_v20, %v2107_v20  ;;  %1548 = vmatprep.mubr.msk.bf16.mxu1 %vm339_vm0, %v886_v22  ;;  %v860_v36 = vld [vmem:[%s2078_s14 + $0x40] sm:$0xff]  ;;  %v861_v50 = vld [vmem:[%s2078_s14 + $0x48] sm:$0xff]  ;;  %v871_v22 = vld [vmem:[%s2078_s14 + $0x98] sm:$0xff] }
  0xd6   : > { %v2117_v49 = vsub.f32 %v1909_v52, %v463_v54  ;;  %v2120_v40 = vsub.f32 %v1912_v53, %v464_v8  ;;  %v605_v24 = vsel %vm339_vm0, %v525_v58, 0.0  ;;  %v608_v63 = vsel %vm339_vm0, %v526_v48, 0.0  ;;  %v858_v53 = vld [vmem:[%s2078_s14 + $0x30] sm:$0xff]  ;;  %v863_v58 = vld [vmem:[%s2078_s14 + $0x58] sm:$0xff] }
  0xd7   : > { %603 = vadd.xlane.f32.xlu1 %v602_v51  ;;  %606 = vadd.xlane.f32.xlu0 %v605_v24  ;;  %v426_v62 = vpop.xlane.xlu0 %425  ;;  %v429_v41 = vpop.xlane.xlu1 %428  ;;  %v887_v23 = vpack.c.bf16 %v859_v19, %v858_v53  ;;  %v862_v8 = vld [vmem:[%s2078_s14 + $0x50] sm:$0xff] }
  0xd8   : > { %v465_v14 = vmul.f32 0.0625, %v426_v62  ;;  %v466_v28 = vmul.f32 0.0625, %v429_v41  ;;  %v527_v18 = vmul.f32 %v2117_v49, %v2117_v49  ;;  %v528_v52 = vmul.f32 %v2120_v40, %v2120_v40  ;;  %v864_v41 = vld [vmem:[%s2078_s14 + $0x60] sm:$0xff]  ;;  %v870_v19 = vld [vmem:[%s2078_s14 + $0x90] sm:$0xff] }
  0xd9   : > { %1549 = vmatmul.mubr.msk.bf16.gmra.mrb[4].mxu1 %vm339_vm0, %v887_v23  ;;  %v889_v48 = vpack.c.bf16 %v863_v58, %v862_v8  ;;  %v893_v23 = vpack.c.bf16 %v871_v22, %v870_v19  ;;  %v882_v8 = vld [vmem:[%s2078_s14 + $0xf0] sm:$0xff]  ;;  %v883_v58 = vld [vmem:[%s2078_s14 + $0xf8] sm:$0xff] }
  0xda   : > { %v2133_v0 = vsub.f32 %v1919_v56, %v465_v14  ;;  %v2136_v44 = vsub.f32 %v1922_v57, %v466_v28  ;;  %v611_v45 = vsel %vm339_vm0, %v527_v18, 0.0  ;;  %v614_v32 = vsel %vm339_vm0, %v528_v52, 0.0  ;;  %v867_v14 = vld [vmem:[%s2078_s14 + $0x78] sm:$0xff]  ;;  %v868_v18 = vld [vmem:[%s2078_s14 + $0x80] sm:$0xff]  ;;  %v869_v52 = vld [vmem:[%s2078_s14 + $0x88] sm:$0xff] }
  0xdb   : > { %609 = vadd.xlane.f32.xlu1 %v608_v63  ;;  %612 = vadd.xlane.f32.xlu0 %v611_v45  ;;  %v432_v16 = vpop.xlane.xlu0 %431  ;;  %v435_v30 = vpop.xlane.xlu1 %434  ;;  %v865_v63 = vld [vmem:[%s2078_s14 + $0x68] sm:$0xff]  ;;  %v891_v28 = vpack.c.bf16 %v867_v14, %v866_v12  ;;  %v892_v53 = vpack.c.bf16 %v869_v52, %v868_v18  ;;  %v872_v45 = vld [vmem:[%s2078_s14 + $0xa0] sm:$0xff] }
  0xdc   : > { %v467_v34 = vmul.f32 0.0625, %v432_v16  ;;  %v468_v35 = vmul.f32 0.0625, %v435_v30  ;;  %v529_v56 = vmul.f32 %v2133_v0, %v2133_v0  ;;  %v530_v57 = vmul.f32 %v2136_v44, %v2136_v44  ;;  %v873_v16 = vld [vmem:[%s2078_s14 + $0xa8] sm:$0xff] }
  0xdd   : > { %v890_v3 = vpack.c.bf16 %v865_v63, %v864_v41  ;;  %v894_v30 = vpack.c.bf16 %v873_v16, %v872_v45 }
  0xde   : > { %v2147_v38 = vsub.f32 %v1929_v60, %v467_v34  ;;  %v2150_v39 = vsub.f32 %v1932_v61, %v468_v35  ;;  %v617_v46 = vsel %vm339_vm0, %v529_v56, 0.0  ;;  %v620_v51 = vsel %vm339_vm0, %v530_v57, 0.0  ;;  %v875_v34 = vld [vmem:[%s2078_s14 + $0xb8] sm:$0xff]  ;;  %v876_v56 = vld [vmem:[%s2078_s14 + $0xc0] sm:$0xff]  ;;  %v877_v57 = vld [vmem:[%s2078_s14 + $0xc8] sm:$0xff] }
  0xdf   : > { %615 = vadd.xlane.f32.xlu1 %v614_v32  ;;  %618 = vadd.xlane.f32.xlu0 %v617_v46  ;;  %v888_v61 = vpack.c.bf16 %v861_v50, %v860_v36  ;;  %v874_v32 = vld [vmem:[%s2078_s14 + $0xb0] sm:$0xff]  ;;  %v896_v46 = vpack.c.bf16 %v877_v57, %v876_v56  ;;  %v879_v50 = vld [vmem:[%s2078_s14 + $0xd8] sm:$0xff] }
  0xe0   : > { %v531_v54 = vmul.f32 %v2147_v38, %v2147_v38  ;;  %v532_v60 = vmul.f32 %v2150_v39, %v2150_v39  ;;  %v895_v35 = vpack.c.bf16 %v875_v34, %v874_v32  ;;  %v878_v36 = vld [vmem:[%s2078_s14 + $0xd0] sm:$0xff] }
  0xe1   : > { %1552 = vmatprep.mubr.msk.bf16.mxu1 %vm339_vm0, %v888_v61 }
  0xe2   : > { %v623_v24 = vsel %vm339_vm0, %v531_v54, 0.0  ;;  %v626_v62 = vsel %vm339_vm0, %v532_v60, 0.0  ;;  %1553 = vmatmul.mubr.msk.bf16.gmra.mrb[8].mxu1 %vm339_vm0, %v889_v48  ;;  %v880_v54 = vld [vmem:[%s2078_s14 + $0xe0] sm:$0xff]  ;;  %v881_v60 = vld [vmem:[%s2078_s14 + $0xe8] sm:$0xff]  ;;  %v899_v48 = vpack.c.bf16 %v883_v58, %v882_v8 }
  0xe3   : > { %621 = vadd.xlane.f32.xlu1 %v620_v51  ;;  %624 = vadd.xlane.f32.xlu0 %v623_v24  ;;  %v897_v51 = vpack.c.bf16 %v879_v50, %v878_v36  ;;  %v898_v61 = vpack.c.bf16 %v881_v60, %v880_v54  ;;  %v2200_v60 = vld [vmem:[%s2493_s2] ss:$0 sm:$0xff] }
  0xe4   : > { %1556 = vmatprep.mubr.msk.bf16.mxu1 %vm339_vm0, %v890_v3 }
  0xe7   : > { %627 = vadd.xlane.f32.xlu1 %v626_v62 }
  0xea   : > { %1557 = vmatmul.mubr.msk.bf16.gmra.mrb[12].mxu1 %vm339_vm0, %v891_v28 }
  0xeb   : > { %1560 = vmatprep.mubr.msk.bf16.mxu1 %vm339_vm0, %v892_v53 }
  0xf2   : > { %1561 = vmatmul.mubr.msk.bf16.gmra.mrb[16].mxu1 %vm339_vm0, %v893_v23 }
  0xf3   : > { %1564 = vmatprep.mubr.msk.bf16.mxu1 %vm339_vm0, %v894_v30 }
  0xfa   : > { %1565 = vmatmul.mubr.msk.bf16.gmra.mrb[20].mxu1 %vm339_vm0, %v895_v35 }
  0xfb   : > { %1568 = vmatprep.mubr.msk.bf16.mxu1 %vm339_vm0, %v896_v46 }
 0x102   : > { %1569 = vmatmul.mubr.msk.bf16.gmra.mrb[24].mxu1 %vm339_vm0, %v897_v51 }
 0x103   : > { %1572 = vmatprep.mubr.msk.bf16.mxu1 %vm339_vm0, %v898_v61 }
 0x10a   : > { %1573 = vmatmul.mubr.msk.bf16.gmra.mrb[28].mxu1 %vm339_vm0, %v899_v48 }
 0x134   : > { %v535_v24 = vpop.xlane.xlu0 %534 }
 0x135   : > { %v629_v62 = vmul.f32 0.0625, %v535_v24 }
 0x137   : > { %v661_v41 = vadd.f32 1e-05, %v629_v62 }
 0x138   : > { %v538_v63 = vpop.xlane.xlu1 %537  ;;  %v541_v3 = vpop.xlane.xlu0 %540 }
 0x139   : > { %1650 = vrsqrt.f32 %v661_v41  ;;  %v630_v12 = vmul.f32 0.0625, %v538_v63  ;;  %v631_v14 = vmul.f32 0.0625, %v541_v3 }
 0x13b   : > { %v662_v28 = vadd.f32 1e-05, %v630_v12  ;;  %v663_v18 = vadd.f32 1e-05, %v631_v14  ;;  %v2208_v14 = vld [vmem:[%s2494_s3] ss:$0 sm:$0xff] }
 0x13c   : > { %v544_v52 = vpop.xlane.xlu1 %543  ;;  %v547_v53 = vpop.xlane.xlu0 %546 }
 0x13d   : > { %1652 = vrsqrt.f32 %v662_v28  ;;  %v632_v19 = vmul.f32 0.0625, %v544_v52  ;;  %v633_v22 = vmul.f32 0.0625, %v547_v53 }
 0x13e   : > { %1654 = vrsqrt.f32 %v663_v18 }
 0x13f   : > { %v664_v23 = vadd.f32 1e-05, %v632_v19  ;;  %v665_v45 = vadd.f32 1e-05, %v633_v22 }
 0x140   : > { %v550_v16 = vpop.xlane.xlu1 %549  ;;  %v553_v30 = vpop.xlane.xlu0 %552 }
 0x141   : > { %1656 = vrsqrt.f32 %v664_v23  ;;  %v634_v32 = vmul.f32 0.0625, %v550_v16  ;;  %v635_v34 = vmul.f32 0.0625, %v553_v30 }
 0x142   : > { %1658 = vrsqrt.f32 %v665_v45 }
 0x143   : > { %v1651_v35 = vpop.eup %1650  ;;  %v666_v56 = vadd.f32 1e-05, %v634_v32  ;;  %v667_v57 = vadd.f32 1e-05, %v635_v34 }
 0x144   : > { %v556_v46 = vpop.xlane.xlu1 %555  ;;  %v559_v36 = vpop.xlane.xlu0 %558  ;;  %v725_v50 = vmul.f32 %v1651_v35, %v1939_v10 }
 0x145   : > { %1660 = vrsqrt.f32 %v666_v56  ;;  %v636_v51 = vmul.f32 0.0625, %v556_v46  ;;  %v637_v54 = vmul.f32 0.0625, %v559_v36 }
 0x146   : > { %1662 = vrsqrt.f32 %v667_v57  ;;  %v763_v63 = vmul.f32 %v2200_v60, %v725_v50 }
 0x147   : > { %v1653_v61 = vpop.eup %1652  ;;  %v668_v8 = vadd.f32 1e-05, %v636_v51  ;;  %v669_v58 = vadd.f32 1e-05, %v637_v54 }
 0x148   : > { %v1655_v48 = vpop.eup %1654  ;;  %v562_v24 = vpop.xlane.xlu1 %561  ;;  %v726_v41 = vmul.f32 %v1653_v61, %v1949_v26 }
 0x149   : > { %v565_v62 = vpop.xlane.xlu0 %564  ;;  %v727_v10 = vmul.f32 %v1655_v48, %v1942_v11  ;;  %1664 = vrsqrt.f32 %v668_v8  ;;  %v638_v3 = vmul.f32 0.0625, %v562_v24  ;;  %v801_v11 = vadd.f32 %v2208_v14, %v763_v63 }
 0x14a   : > { %v639_v12 = vmul.f32 0.0625, %v565_v62  ;;  %1666 = vrsqrt.f32 %v669_v58  ;;  %v764_v28 = vmul.f32 %v2200_v60, %v726_v41 }
 0x14b   : > { %v1657_v18 = vpop.eup %1656  ;;  %v670_v52 = vadd.f32 1e-05, %v638_v3  ;;  %v765_v16 = vmul.f32 %v2200_v60, %v727_v10 }
 0x14c   : > { %v671_v53 = vadd.f32 1e-05, %v639_v12  ;;  %v1659_v19 = vpop.eup %1658  ;;  %v728_v26 = vmul.f32 %v1657_v18, %v1952_v27  ;;  %v568_v22 = vpop.xlane.xlu1 %567  ;;  %v802_v45 = vadd.f32 %v2208_v14, %v764_v28 }
 0x14d   : > { %v571_v23 = vpop.xlane.xlu0 %570  ;;  %v729_v30 = vmul.f32 %v1659_v19, %v1961_v2  ;;  %1668 = vrsqrt.f32 %v670_v52  ;;  %v640_v32 = vmul.f32 0.0625, %v568_v22  ;;  %v803_v61 = vadd.f32 %v2208_v14, %v765_v16 }
 0x14e   : > { %v641_v34 = vmul.f32 0.0625, %v571_v23  ;;  %1670 = vrsqrt.f32 %v671_v53  ;;  %v833_v35 = vpack.c.bf16 %v802_v45, %v801_v11  ;;  %v766_v56 = vmul.f32 %v2200_v60, %v728_v26 }
 0x14f   : > { %v1661_v57 = vpop.eup %1660  ;;  %v672_v46 = vadd.f32 1e-05, %v640_v32  ;;  %v767_v8 = vmul.f32 %v2200_v60, %v729_v30 }
 0x150   : > { %v673_v27 = vadd.f32 1e-05, %v641_v34  ;;  %v1663_v36 = vpop.eup %1662  ;;  %v730_v50 = vmul.f32 %v1661_v57, %v1964_v5  ;;  %v574_v51 = vpop.xlane.xlu1 %573  ;;  %1578 = vmatprep.mubr.msk.bf16.mxu0 %vm339_vm0, %v833_v35  ;;  %v804_v2 = vadd.f32 %v2208_v14, %v766_v56 }
 0x151   : > { %v577_v54 = vpop.xlane.xlu0 %576  ;;  %v731_v58 = vmul.f32 %v1663_v36, %v1973_v55  ;;  %1672 = vrsqrt.f32 %v672_v46  ;;  %v642_v48 = vmul.f32 0.0625, %v574_v51  ;;  %v805_v52 = vadd.f32 %v2208_v14, %v767_v8 }
 0x152   : > { %v643_v24 = vmul.f32 0.0625, %v577_v54  ;;  %1674 = vrsqrt.f32 %v673_v27  ;;  %v834_v62 = vpack.c.bf16 %v804_v2, %v803_v61  ;;  %v768_v41 = vmul.f32 %v2200_v60, %v730_v50 }
 0x153   : > { %v1665_v5 = vpop.eup %1664  ;;  %v674_v63 = vadd.f32 1e-05, %v642_v48  ;;  %v769_v53 = vmul.f32 %v2200_v60, %v731_v58 }
 0x154   : > { %v675_v10 = vadd.f32 1e-05, %v643_v24  ;;  %v1667_v3 = vpop.eup %1666  ;;  %v732_v12 = vmul.f32 %v1665_v5, %v1976_v9  ;;  %v580_v28 = vpop.xlane.xlu1 %579  ;;  %1579 = vmatmul.mubr.msk.bf16.vlgmr.msra.gmra.mrb[0].mxu0 %vm339_vm0, %v834_v62  ;;  %v806_v55 = vadd.f32 %v2208_v14, %v768_v41 }
 0x155   : > { %v583_v18 = vpop.xlane.xlu0 %582  ;;  %v733_v19 = vmul.f32 %v1667_v3, %v1985_v7  ;;  %1676 = vrsqrt.f32 %v674_v63  ;;  %v644_v26 = vmul.f32 0.0625, %v580_v28  ;;  %v807_v56 = vadd.f32 %v2208_v14, %v769_v53 }
 0x156   : > { %v645_v22 = vmul.f32 0.0625, %v583_v18  ;;  %1678 = vrsqrt.f32 %v675_v10  ;;  %v835_v23 = vpack.c.bf16 %v806_v55, %v805_v52  ;;  %v770_v11 = vmul.f32 %v2200_v60, %v732_v12 }
 0x157   : > { %v1669_v9 = vpop.eup %1668  ;;  %v676_v45 = vadd.f32 1e-05, %v644_v26  ;;  %v771_v57 = vmul.f32 %v2200_v60, %v733_v19 }
 0x158   : > { %v677_v16 = vadd.f32 1e-05, %v645_v22  ;;  %v1671_v30 = vpop.eup %1670  ;;  %v734_v32 = vmul.f32 %v1669_v9, %v1988_v13  ;;  %v586_v34 = vpop.xlane.xlu1 %585  ;;  %1582 = vmatprep.mubr.msk.bf16.mxu0 %vm339_vm0, %v835_v23  ;;  %v808_v7 = vadd.f32 %v2208_v14, %v770_v11 }
 0x159   : > { %v589_v35 = vpop.xlane.xlu0 %588  ;;  %v735_v46 = vmul.f32 %v1671_v30, %v1997_v1  ;;  %1680 = vrsqrt.f32 %v676_v45  ;;  %v646_v27 = vmul.f32 0.0625, %v586_v34  ;;  %v809_v24 = vadd.f32 %v2208_v14, %v771_v57 }
 0x15a   : > { %v647_v36 = vmul.f32 0.0625, %v589_v35  ;;  %1682 = vrsqrt.f32 %v677_v16  ;;  %v836_v50 = vpack.c.bf16 %v808_v7, %v807_v56  ;;  %v772_v51 = vmul.f32 %v2200_v60, %v734_v32 }
 0x15b   : > { %v1673_v13 = vpop.eup %1672  ;;  %v678_v54 = vadd.f32 1e-05, %v646_v27  ;;  %v773_v62 = vmul.f32 %v2200_v60, %v735_v46 }
 0x15c   : > { %v679_v61 = vadd.f32 1e-05, %v647_v36  ;;  %v1675_v2 = vpop.eup %1674  ;;  %v736_v8 = vmul.f32 %v1673_v13, %v2000_v17  ;;  %v592_v58 = vpop.xlane.xlu1 %591  ;;  %1583 = vmatmul.mubr.msk.bf16.gmra.mrb[4].mxu0 %vm339_vm0, %v836_v50  ;;  %v810_v1 = vadd.f32 %v2208_v14, %v772_v51 }
 0x15d   : > { %v595_v48 = vpop.xlane.xlu0 %594  ;;  %v737_v41 = vmul.f32 %v1675_v2, %v2009_v43  ;;  %1684 = vrsqrt.f32 %v678_v54  ;;  %v648_v5 = vmul.f32 0.0625, %v592_v58  ;;  %v811_v19 = vadd.f32 %v2208_v14, %v773_v62 }
 0x15e   : > { %v649_v63 = vmul.f32 0.0625, %v595_v48  ;;  %1686 = vrsqrt.f32 %v679_v61  ;;  %v837_v10 = vpack.c.bf16 %v810_v1, %v809_v24  ;;  %v774_v3 = vmul.f32 %v2200_v60, %v736_v8 }
 0x15f   : > { %v1677_v17 = vpop.eup %1676  ;;  %v680_v12 = vadd.f32 1e-05, %v648_v5  ;;  %v775_v26 = vmul.f32 %v2200_v60, %v737_v41 }
 0x160   : > { %v681_v28 = vadd.f32 1e-05, %v649_v63  ;;  %v1679_v18 = vpop.eup %1678  ;;  %v738_v52 = vmul.f32 %v1677_v17, %v2012_v21  ;;  %v598_v55 = vpop.xlane.xlu1 %597  ;;  %1586 = vmatprep.mubr.msk.bf16.mxu0 %vm339_vm0, %v837_v10  ;;  %v812_v43 = vadd.f32 %v2208_v14, %v774_v3 }
 0x161   : > { %v601_v53 = vpop.xlane.xlu0 %600  ;;  %v739_v22 = vmul.f32 %v1679_v18, %v2021_v59  ;;  %1688 = vrsqrt.f32 %v680_v12  ;;  %v650_v23 = vmul.f32 0.0625, %v598_v55  ;;  %v813_v7 = vadd.f32 %v2208_v14, %v775_v26 }
 0x162   : > { %v651_v11 = vmul.f32 0.0625, %v601_v53  ;;  %1690 = vrsqrt.f32 %v681_v28  ;;  %v838_v9 = vpack.c.bf16 %v812_v43, %v811_v19  ;;  %v776_v45 = vmul.f32 %v2200_v60, %v738_v52 }
 0x163   : > { %v1681_v21 = vpop.eup %1680  ;;  %v682_v16 = vadd.f32 1e-05, %v650_v23  ;;  %v777_v57 = vmul.f32 %v2200_v60, %v739_v22 }
 0x164   : > { %v683_v30 = vadd.f32 1e-05, %v651_v11  ;;  %v1683_v32 = vpop.eup %1682  ;;  %v740_v34 = vmul.f32 %v1681_v21, %v2024_v25  ;;  %v604_v35 = vpop.xlane.xlu1 %603  ;;  %1587 = vmatmul.mubr.msk.bf16.gmra.mrb[8].mxu0 %vm339_vm0, %v838_v9  ;;  %v814_v59 = vadd.f32 %v2208_v14, %v776_v45 }
 0x165   : > { %v607_v56 = vpop.xlane.xlu0 %606  ;;  %v741_v46 = vmul.f32 %v1683_v32, %v2033_v15  ;;  %1692 = vrsqrt.f32 %v682_v16  ;;  %v652_v27 = vmul.f32 0.0625, %v604_v35  ;;  %v815_v48 = vadd.f32 %v2208_v14, %v777_v57 }
 0x166   : > { %v653_v36 = vmul.f32 0.0625, %v607_v56  ;;  %1694 = vrsqrt.f32 %v683_v30  ;;  %v839_v50 = vpack.c.bf16 %v814_v59, %v813_v7  ;;  %v778_v51 = vmul.f32 %v2200_v60, %v740_v34 }
 0x167   : > { %v1685_v25 = vpop.eup %1684  ;;  %v684_v13 = vadd.f32 1e-05, %v652_v27  ;;  %v779_v24 = vmul.f32 %v2200_v60, %v741_v46 }
 0x168   : > { %v685_v54 = vadd.f32 1e-05, %v653_v36  ;;  %v1687_v61 = vpop.eup %1686  ;;  %v742_v2 = vmul.f32 %v1685_v25, %v2036_v29  ;;  %v610_v8 = vpop.xlane.xlu1 %609  ;;  %1590 = vmatprep.mubr.msk.bf16.mxu0 %vm339_vm0, %v839_v50  ;;  %v816_v15 = vadd.f32 %v2208_v14, %v778_v51 }
 0x169   : > { %v613_v58 = vpop.xlane.xlu0 %612  ;;  %v743_v1 = vmul.f32 %v1687_v61, %v2045_v31  ;;  %1696 = vrsqrt.f32 %v684_v13  ;;  %v654_v62 = vmul.f32 0.0625, %v610_v8  ;;  %v817_v52 = vadd.f32 %v2208_v14, %v779_v24 }
 0x16a   : > { %v655_v41 = vmul.f32 0.0625, %v613_v58  ;;  %1698 = vrsqrt.f32 %v685_v54  ;;  %v840_v5 = vpack.c.bf16 %v816_v15, %v815_v48  ;;  %v780_v63 = vmul.f32 %v2200_v60, %v742_v2 }
 0x16b   : > { %v1689_v29 = vpop.eup %1688  ;;  %v686_v10 = vadd.f32 1e-05, %v654_v62  ;;  %v781_v55 = vmul.f32 %v2200_v60, %v743_v1 }
 0x16c   : > { %v687_v3 = vadd.f32 1e-05, %v655_v41  ;;  %v1691_v17 = vpop.eup %1690  ;;  %v744_v12 = vmul.f32 %v1689_v29, %v2048_v33  ;;  %v616_v28 = vpop.xlane.xlu1 %615  ;;  %1591 = vmatmul.mubr.msk.bf16.gmra.mrb[12].mxu0 %vm339_vm0, %v840_v5  ;;  %v818_v31 = vadd.f32 %v2208_v14, %v780_v63 }
 0x16d   : > { %v619_v18 = vpop.xlane.xlu0 %618  ;;  %v745_v53 = vmul.f32 %v1691_v17, %v2057_v37  ;;  %1700 = vrsqrt.f32 %v686_v10  ;;  %v656_v19 = vmul.f32 0.0625, %v616_v28  ;;  %v819_v30 = vadd.f32 %v2208_v14, %v781_v55 }
 0x16e   : > { %v657_v43 = vmul.f32 0.0625, %v619_v18  ;;  %1702 = vrsqrt.f32 %v687_v3  ;;  %v841_v26 = vpack.c.bf16 %v818_v31, %v817_v52  ;;  %v782_v22 = vmul.f32 %v2200_v60, %v744_v12 }
 0x16f   : > { %v1693_v33 = vpop.eup %1692  ;;  %v688_v23 = vadd.f32 1e-05, %v656_v19  ;;  %v783_v32 = vmul.f32 %v2200_v60, %v745_v53 }
 0x170   : > { %v689_v11 = vadd.f32 1e-05, %v657_v43  ;;  %v1695_v9 = vpop.eup %1694  ;;  %v746_v45 = vmul.f32 %v1693_v33, %v2060_v47  ;;  %v622_v21 = vpop.xlane.xlu1 %621  ;;  %1594 = vmatprep.mubr.msk.bf16.mxu0 %vm339_vm0, %v841_v26  ;;  %v820_v37 = vadd.f32 %v2208_v14, %v782_v22 }
 0x171   : > { %v625_v16 = vpop.xlane.xlu0 %624  ;;  %v747_v34 = vmul.f32 %v1695_v9, %v2081_v4  ;;  %1704 = vrsqrt.f32 %v688_v23  ;;  %v658_v35 = vmul.f32 0.0625, %v622_v21  ;;  %v821_v51 = vadd.f32 %v2208_v14, %v783_v32 }
 0x172   : > { %v659_v56 = vmul.f32 0.0625, %v625_v16  ;;  %1706 = vrsqrt.f32 %v689_v11  ;;  %v842_v7 = vpack.c.bf16 %v820_v37, %v819_v30  ;;  %v784_v59 = vmul.f32 %v2200_v60, %v746_v45 }
 0x173   : > { %v1697_v47 = vpop.eup %1696  ;;  %v690_v57 = vadd.f32 1e-05, %v658_v35  ;;  %v785_v25 = vmul.f32 %v2200_v60, %v747_v34 }
 0x174   : > { %v691_v46 = vadd.f32 1e-05, %v659_v56  ;;  %v1699_v27 = vpop.eup %1698  ;;  %v748_v36 = vmul.f32 %v1697_v47, %v2084_v6  ;;  %v628_v50 = vpop.xlane.xlu1 %627  ;;  %1595 = vmatmul.mubr.msk.bf16.gmra.mrb[16].mxu0 %vm339_vm0, %v842_v7  ;;  %v822_v4 = vadd.f32 %v2208_v14, %v784_v59 }
 0x175   : > { %v749_v13 = vmul.f32 %v1699_v27, %v2104_v42  ;;  %1708 = vrsqrt.f32 %v690_v57  ;;  %v660_v54 = vmul.f32 0.0625, %v628_v50  ;;  %v823_v15 = vadd.f32 %v2208_v14, %v785_v25 }
 0x176   : > { %1710 = vrsqrt.f32 %v691_v46  ;;  %v843_v61 = vpack.c.bf16 %v822_v4, %v821_v51  ;;  %v786_v2 = vmul.f32 %v2200_v60, %v748_v36 }
 0x177   : > { %v1701_v8 = vpop.eup %1700  ;;  %v692_v58 = vadd.f32 1e-05, %v660_v54  ;;  %v787_v1 = vmul.f32 %v2200_v60, %v749_v13 }
 0x178   : > { %v1703_v6 = vpop.eup %1702  ;;  %v750_v48 = vmul.f32 %v1701_v8, %v2107_v20  ;;  %1598 = vmatprep.mubr.msk.bf16.mxu0 %vm339_vm0, %v843_v61  ;;  %v824_v24 = vadd.f32 %v2208_v14, %v786_v2 }
 0x179   : > { %v751_v42 = vmul.f32 %v1703_v6, %v2117_v49  ;;  %1712 = vrsqrt.f32 %v692_v58  ;;  %v825_v20 = vadd.f32 %v2208_v14, %v787_v1 }
 0x17a   : > { %v844_v62 = vpack.c.bf16 %v824_v24, %v823_v15  ;;  %v788_v41 = vmul.f32 %v2200_v60, %v750_v48 }
 0x17b   : > { %v1705_v5 = vpop.eup %1704  ;;  %v789_v3 = vmul.f32 %v2200_v60, %v751_v42  ;;  %v2363_v42 = vld [vmem:[%s2497_s6] ss:$0 sm:$0xff] }
 0x17c   : > { %v1707_v63 = vpop.eup %1706  ;;  %v752_v29 = vmul.f32 %v1705_v5, %v2120_v40  ;;  %1599 = vmatmul.mubr.msk.bf16.gmra.mrb[20].mxu0 %vm339_vm0, %v844_v62  ;;  %v826_v10 = vadd.f32 %v2208_v14, %v788_v41 }
 0x17d   : > { %v753_v17 = vmul.f32 %v1707_v63, %v2133_v0  ;;  %v827_v40 = vadd.f32 %v2208_v14, %v789_v3 }
 0x17e   : > { %v845_v12 = vpack.c.bf16 %v826_v10, %v825_v20  ;;  %v790_v49 = vmul.f32 %v2200_v60, %v752_v29 }
 0x17f   : > { %v1709_v28 = vpop.eup %1708  ;;  %v791_v55 = vmul.f32 %v2200_v60, %v753_v17 }
 0x180   : > { %v1711_v18 = vpop.eup %1710  ;;  %v754_v52 = vmul.f32 %v1709_v28, %v2136_v44  ;;  %1602 = vmatprep.mubr.msk.bf16.mxu0 %vm339_vm0, %v845_v12  ;;  %v828_v31 = vadd.f32 %v2208_v14, %v790_v49 }
 0x181   : > { %v755_v53 = vmul.f32 %v1711_v18, %v2147_v38  ;;  %v829_v44 = vadd.f32 %v2208_v14, %v791_v55 }
 0x182   : > { %v846_v19 = vpack.c.bf16 %v828_v31, %v827_v40  ;;  %v792_v0 = vmul.f32 %v2200_v60, %v754_v52 }
 0x183   : > { %v1713_v43 = vpop.eup %1712  ;;  %v793_v33 = vmul.f32 %v2200_v60, %v755_v53 }
 0x184   : > { %v756_v26 = vmul.f32 %v1713_v43, %v2150_v39  ;;  %1603 = vmatmul.mubr.msk.bf16.gmra.mrb[24].mxu0 %vm339_vm0, %v846_v19  ;;  %v830_v22 = vadd.f32 %v2208_v14, %v792_v0 }
 0x185   : > { %v831_v38 = vadd.f32 %v2208_v14, %v793_v33 }
 0x186   : > { %v847_v23 = vpack.c.bf16 %v830_v22, %v829_v44  ;;  %v794_v11 = vmul.f32 %v2200_v60, %v756_v26 }
 0x188   : > { %1606 = vmatprep.mubr.msk.bf16.mxu0 %vm339_vm0, %v847_v23  ;;  %v832_v9 = vadd.f32 %v2208_v14, %v794_v11 }
 0x18a   : > { %v848_v45 = vpack.c.bf16 %v832_v9, %v831_v38 }
 0x18c   : > { %1607 = vmatmul.mubr.msk.bf16.gmra.mrb[28].mxu0 %vm339_vm0, %v848_v45 }
 0x1a4   : > { %v1546_v39 = vpop.f32.mrb[0].mxu1 }
 0x1a5   : > { %v985_v21 = vpop.f32.mrb[1].mxu1 }
 0x1a6   : > { %v1547_v16 = vpop.f32.mrb[2].mxu1 }
 0x1a7   : > { %v988_v30 = vpop.f32.mrb[3].mxu1 }
 0x1ac   : > { %v1550_v37 = vpop.f32.mrb[4].mxu1 }
 0x1ad   : > { %v1001_v32 = vpop.f32.mrb[5].mxu1 }
 0x1ae   : > { %v1551_v34 = vpop.f32.mrb[6].mxu1 }
 0x1af   : > { %v1004_v35 = vpop.f32.mrb[7].mxu1 }
 0x1b5   : > { %v1554_v56 = vpop.f32.mrb[8].mxu1 }
 0x1b6   : > { %v1017_v7 = vpop.f32.mrb[9].mxu1 }
 0x1b7   : > { %v1555_v60 = vpop.f32.mrb[10].mxu1 }
 0x1b8   : > { %v2318_v59 = vpop.f32.mrb[11].mxu1 }
 0x1bd   : > { %v2320_v47 = vpop.f32.mrb[12].mxu1 }
 0x1be   : > { %v2322_v57 = vpop.f32.mrb[13].mxu1 }
 0x1bf   : > { %v2324_v14 = vpop.f32.mrb[14].mxu1 }
 0x1c0   : > { %v2326_v46 = vpop.f32.mrb[15].mxu1 }
 0x1c5   : > { %v2328_v27 = vpop.f32.mrb[16].mxu1 }
 0x1c6   : > { %v2330_v36 = vpop.f32.mrb[17].mxu1 }
 0x1c7   : > { %v2332_v50 = vpop.f32.mrb[18].mxu1 }
 0x1c8   : > { %v2334_v51 = vpop.f32.mrb[19].mxu1 }
 0x1cd   : > { %v2336_v4 = vpop.f32.mrb[20].mxu1 }
 0x1ce   : > { %v2338_v25 = vpop.f32.mrb[21].mxu1 }
 0x1cf   : > { %v2340_v13 = vpop.f32.mrb[22].mxu1 }
 0x1d0   : > { %v2342_v54 = vpop.f32.mrb[23].mxu1 }
 0x1d5   : > { %v2344_v61 = vpop.f32.mrb[24].mxu1 }
 0x1d6   : > { %v2346_v2 = vpop.f32.mrb[25].mxu1 }
 0x1d7   : > { %v2348_v8 = vpop.f32.mrb[26].mxu1 }
 0x1d8   : > { %v2350_v58 = vpop.f32.mrb[27].mxu1 }
 0x1dd   : > { %v2352_v6 = vpop.f32.mrb[28].mxu1 }
 0x1de   : > { %v2354_v48 = vpop.f32.mrb[29].mxu1 }
 0x1df   : > { %v2356_v15 = vpop.f32.mrb[30].mxu1 }
 0x1e0   : > { %v2358_v24 = vpop.f32.mrb[31].mxu1 }
 0x227   : > { %v1580_v1 = vpop.f32.mrb[0].mxu0 }
 0x228   : > { %v1203_v62 = vadd.f32 %v1580_v1, %v1546_v39  ;;  %v1194_v41 = vpop.f32.mrb[1].mxu0 }
 0x229   : > { %v1195_v5 = vadd.f32 %v1194_v41, %v985_v21  ;;  %v1581_v63 = vpop.f32.mrb[2].mxu0 }
 0x22a   : > { %v1330_v29 = vadd.f32 %v2363_v42, %v1203_v62  ;;  %v1206_v20 = vadd.f32 %v1581_v63, %v1547_v16  ;;  %v1197_v10 = vpop.f32.mrb[3].mxu0 }
 0x22b   : > { %v1328_v3 = vadd.f32 %v2363_v42, %v1195_v5  ;;  %v1198_v17 = vadd.f32 %v1197_v10, %v988_v30 }
 0x22c   : > { %1362 = vst.msk [vmem:[%s2369_s29 + $0x10] sm:$0xff] %vm339_vm0, %v1330_v29  ;;  %v1331_v12 = vadd.f32 %v2363_v42, %v1206_v20 }
 0x22d   : > { %1360 = vst.msk [vmem:[%s2369_s29] sm:$0xff] %vm339_vm0, %v1328_v3  ;;  %v1329_v49 = vadd.f32 %v2363_v42, %v1198_v17 }
 0x22e   : > { %1363 = vst.msk [vmem:[%s2369_s29 + $0x18] sm:$0xff] %vm339_vm0, %v1331_v12 }
 0x22f   : > { %1361 = vst.msk [vmem:[%s2369_s29 + $0x8] sm:$0xff] %vm339_vm0, %v1329_v49  ;;  %v1584_v28 = vpop.f32.mrb[4].mxu0 }
 0x230   : > { %v1219_v18 = vadd.f32 %v1584_v28, %v1550_v37  ;;  %v1210_v52 = vpop.f32.mrb[5].mxu0 }
 0x231   : > { %v1211_v40 = vadd.f32 %v1210_v52, %v1001_v32  ;;  %v1585_v31 = vpop.f32.mrb[6].mxu0 }
 0x232   : > { %v1334_v55 = vadd.f32 %v2363_v42, %v1219_v18  ;;  %v1222_v53 = vadd.f32 %v1585_v31, %v1551_v34  ;;  %v1213_v19 = vpop.f32.mrb[7].mxu0 }
 0x233   : > { %v1332_v0 = vadd.f32 %v2363_v42, %v1211_v40  ;;  %v1214_v43 = vadd.f32 %v1213_v19, %v1004_v35 }
 0x234   : > { %1366 = vst.msk [vmem:[%s2369_s29 + $0x30] sm:$0xff] %vm339_vm0, %v1334_v55  ;;  %v1335_v26 = vadd.f32 %v2363_v42, %v1222_v53 }
 0x235   : > { %1364 = vst.msk [vmem:[%s2369_s29 + $0x20] sm:$0xff] %vm339_vm0, %v1332_v0  ;;  %v1333_v44 = vadd.f32 %v2363_v42, %v1214_v43 }
 0x236   : > { %1367 = vst.msk [vmem:[%s2369_s29 + $0x38] sm:$0xff] %vm339_vm0, %v1335_v26 }
 0x237   : > { %1365 = vst.msk [vmem:[%s2369_s29 + $0x28] sm:$0xff] %vm339_vm0, %v1333_v44  ;;  %v1588_v22 = vpop.f32.mrb[8].mxu0 }
 0x238   : > { %v1235_v33 = vadd.f32 %v1588_v22, %v1554_v56  ;;  %v1226_v23 = vpop.f32.mrb[9].mxu0 }
 0x239   : > { %v1227_v11 = vadd.f32 %v1226_v23, %v1017_v7  ;;  %v1589_v38 = vpop.f32.mrb[10].mxu0 }
 0x23a   : > { %v1338_v9 = vadd.f32 %v2363_v42, %v1235_v33  ;;  %v1238_v45 = vadd.f32 %v1589_v38, %v1555_v60  ;;  %v1229_v39 = vpop.f32.mrb[11].mxu0 }
 0x23b   : > { %v1336_v21 = vadd.f32 %v2363_v42, %v1227_v11  ;;  %v1230_v16 = vadd.f32 %v1229_v39, %v2318_v59 }
 0x23c   : > { %1370 = vst.msk [vmem:[%s2369_s29 + $0x50] sm:$0xff] %vm339_vm0, %v1338_v9  ;;  %v1339_v30 = vadd.f32 %v2363_v42, %v1238_v45 }
 0x23d   : > { %1368 = vst.msk [vmem:[%s2369_s29 + $0x40] sm:$0xff] %vm339_vm0, %v1336_v21  ;;  %v1337_v37 = vadd.f32 %v2363_v42, %v1230_v16 }
 0x23e   : > { %1371 = vst.msk [vmem:[%s2369_s29 + $0x58] sm:$0xff] %vm339_vm0, %v1339_v30 }
 0x23f   : > { %1369 = vst.msk [vmem:[%s2369_s29 + $0x48] sm:$0xff] %vm339_vm0, %v1337_v37  ;;  %v1592_v32 = vpop.f32.mrb[12].mxu0 }
 0x240   : > { %v1251_v34 = vadd.f32 %v1592_v32, %v2320_v47  ;;  %v1242_v35 = vpop.f32.mrb[13].mxu0 }
 0x241   : > { %v1243_v56 = vadd.f32 %v1242_v35, %v2322_v57  ;;  %v1593_v7 = vpop.f32.mrb[14].mxu0 }
 0x242   : > { %v1342_v60 = vadd.f32 %v2363_v42, %v1251_v34  ;;  %v1254_v59 = vadd.f32 %v1593_v7, %v2324_v14  ;;  %v1245_v1 = vpop.f32.mrb[15].mxu0 }
 0x243   : > { %v1340_v62 = vadd.f32 %v2363_v42, %v1243_v56  ;;  %v1246_v41 = vadd.f32 %v1245_v1, %v2326_v46 }
 0x244   : > { %1374 = vst.msk [vmem:[%s2369_s29 + $0x70] sm:$0xff] %vm339_vm0, %v1342_v60  ;;  %v1343_v5 = vadd.f32 %v2363_v42, %v1254_v59 }
 0x245   : > { %1372 = vst.msk [vmem:[%s2369_s29 + $0x60] sm:$0xff] %vm339_vm0, %v1340_v62  ;;  %v1341_v47 = vadd.f32 %v2363_v42, %v1246_v41 }
 0x246   : > { %1375 = vst.msk [vmem:[%s2369_s29 + $0x78] sm:$0xff] %vm339_vm0, %v1343_v5 }
 0x247   : > { %1373 = vst.msk [vmem:[%s2369_s29 + $0x68] sm:$0xff] %vm339_vm0, %v1341_v47  ;;  %v1596_v57 = vpop.f32.mrb[16].mxu0 }
 0x248   : > { %v1267_v14 = vadd.f32 %v1596_v57, %v2328_v27  ;;  %v1258_v46 = vpop.f32.mrb[17].mxu0 }
 0x249   : > { %v1259_v63 = vadd.f32 %v1258_v46, %v2330_v36  ;;  %v1597_v29 = vpop.f32.mrb[18].mxu0 }
 0x24a   : > { %v1346_v20 = vadd.f32 %v2363_v42, %v1267_v14  ;;  %v1270_v10 = vadd.f32 %v1597_v29, %v2332_v50  ;;  %v1261_v3 = vpop.f32.mrb[19].mxu0 }
 0x24b   : > { %v1344_v17 = vadd.f32 %v2363_v42, %v1259_v63  ;;  %v1262_v12 = vadd.f32 %v1261_v3, %v2334_v51 }
 0x24c   : > { %1378 = vst.msk [vmem:[%s2369_s29 + $0x90] sm:$0xff] %vm339_vm0, %v1346_v20  ;;  %v1347_v49 = vadd.f32 %v2363_v42, %v1270_v10 }
 0x24d   : > { %1376 = vst.msk [vmem:[%s2369_s29 + $0x80] sm:$0xff] %vm339_vm0, %v1344_v17  ;;  %v1345_v27 = vadd.f32 %v2363_v42, %v1262_v12 }
 0x24e   : > { %1379 = vst.msk [vmem:[%s2369_s29 + $0x98] sm:$0xff] %vm339_vm0, %v1347_v49 }
 0x24f   : > { %1377 = vst.msk [vmem:[%s2369_s29 + $0x88] sm:$0xff] %vm339_vm0, %v1345_v27  ;;  %v1600_v36 = vpop.f32.mrb[20].mxu0 }
 0x250   : > { %v1283_v50 = vadd.f32 %v1600_v36, %v2336_v4  ;;  %v1274_v51 = vpop.f32.mrb[21].mxu0 }
 0x251   : > { %v1275_v28 = vadd.f32 %v1274_v51, %v2338_v25  ;;  %v1601_v18 = vpop.f32.mrb[22].mxu0 }
 0x252   : > { %v1350_v52 = vadd.f32 %v2363_v42, %v1283_v50  ;;  %v1286_v40 = vadd.f32 %v1601_v18, %v2340_v13  ;;  %v1277_v31 = vpop.f32.mrb[23].mxu0 }
 0x253   : > { %v1348_v55 = vadd.f32 %v2363_v42, %v1275_v28  ;;  %v1278_v53 = vadd.f32 %v1277_v31, %v2342_v54 }
 0x254   : > { %1382 = vst.msk [vmem:[%s2369_s29 + $0xb0] sm:$0xff] %vm339_vm0, %v1350_v52  ;;  %v1351_v19 = vadd.f32 %v2363_v42, %v1286_v40 }
 0x255   : > { %1380 = vst.msk [vmem:[%s2369_s29 + $0xa0] sm:$0xff] %vm339_vm0, %v1348_v55  ;;  %v1349_v4 = vadd.f32 %v2363_v42, %v1278_v53 }
 0x256   : > { %1383 = vst.msk [vmem:[%s2369_s29 + $0xb8] sm:$0xff] %vm339_vm0, %v1351_v19 }
 0x257   : > { %1381 = vst.msk [vmem:[%s2369_s29 + $0xa8] sm:$0xff] %vm339_vm0, %v1349_v4  ;;  %v1604_v25 = vpop.f32.mrb[24].mxu0 }
 0x258   : > { %v1299_v13 = vadd.f32 %v1604_v25, %v2344_v61  ;;  %v1290_v54 = vpop.f32.mrb[25].mxu0 }
 0x259   : > { %v1291_v0 = vadd.f32 %v1290_v54, %v2346_v2  ;;  %v1605_v43 = vpop.f32.mrb[26].mxu0 }
 0x25a   : > { %v1354_v26 = vadd.f32 %v2363_v42, %v1299_v13  ;;  %v1302_v44 = vadd.f32 %v1605_v43, %v2348_v8  ;;  %v1293_v22 = vpop.f32.mrb[27].mxu0 }
 0x25b   : > { %v1352_v33 = vadd.f32 %v2363_v42, %v1291_v0  ;;  %v1294_v23 = vadd.f32 %v1293_v22, %v2350_v58 }
 0x25c   : > { %1386 = vst.msk [vmem:[%s2369_s29 + $0xd0] sm:$0xff] %vm339_vm0, %v1354_v26  ;;  %v1355_v11 = vadd.f32 %v2363_v42, %v1302_v44 }
 0x25d   : > { %1384 = vst.msk [vmem:[%s2369_s29 + $0xc0] sm:$0xff] %vm339_vm0, %v1352_v33  ;;  %v1353_v61 = vadd.f32 %v2363_v42, %v1294_v23 }
 0x25e   : > { %1387 = vst.msk [vmem:[%s2369_s29 + $0xd8] sm:$0xff] %vm339_vm0, %v1355_v11 }
 0x25f   : > { %1385 = vst.msk [vmem:[%s2369_s29 + $0xc8] sm:$0xff] %vm339_vm0, %v1353_v61  ;;  %v1608_v2 = vpop.f32.mrb[28].mxu0 }
 0x260   : > { %v1315_v8 = vadd.f32 %v1608_v2, %v2352_v6  ;;  %v1306_v58 = vpop.f32.mrb[29].mxu0 }
 0x261   : > { %v1307_v38 = vadd.f32 %v1306_v58, %v2354_v48  ;;  %v1609_v9 = vpop.f32.mrb[30].mxu0 }
 0x262   : > { %v1358_v45 = vadd.f32 %v2363_v42, %v1315_v8  ;;  %v1318_v39 = vadd.f32 %v1609_v9, %v2356_v15  ;;  %v1309_v21 = vpop.f32.mrb[31].mxu0 }
 0x263   : > { %v1356_v16 = vadd.f32 %v2363_v42, %v1307_v38  ;;  %v1310_v30 = vadd.f32 %v1309_v21, %v2358_v24 }
 0x264   : > { %1390 = vst.msk [vmem:[%s2369_s29 + $0xf0] sm:$0xff] %vm339_vm0, %v1358_v45  ;;  %v1359_v37 = vadd.f32 %v2363_v42, %v1318_v39 }
 0x265   : > { %1388 = vst.msk [vmem:[%s2369_s29 + $0xe0] sm:$0xff] %vm339_vm0, %v1356_v16  ;;  %v1357_v6 = vadd.f32 %v2363_v42, %v1310_v30 }
 0x266   : > { %1391 = vst.msk [vmem:[%s2369_s29 + $0xf8] sm:$0xff] %vm339_vm0, %v1359_v37 }
 0x267   : > { %1389 = vst.msk [vmem:[%s2369_s29 + $0xe8] sm:$0xff] %vm339_vm0, %v1357_v6 }
 0x268 PF: > { %s17_s24 = sadd.s32 1, %s1720_s24  }
 0x269   : > { %p14_p4 = scmp.ge.s32.totalorder %s17_s24, 4  }
 0x26b   :  { %16 = sbr.rel (!%p14_p4) target bundleno = 1 (0x1), region = 81 }

// kernel: encoder_up_layer.6
= control target key start
LH: loop header
LB: loop body
LE: loop exit
PB: predicated region body
PF: predicated region fallthrough
CT: control target
= control target key end

     0   :  { %s7508_s29 = smov 0   ;;  %s10460_s0 = inlined_call_operand.vmem [shape: f32[16,32,16], index: 0, kind: input, shape index: {}]   ;;  %s10461_s1 = inlined_call_operand.vmem [shape: f32[2,32,32], index: 1, kind: input, shape index: {}]   ;;  %s10462_s2 = inlined_call_operand.vmem [shape: f32[1,16], index: 2, kind: input, shape index: {}]   ;;  %s10463_s3 = inlined_call_operand.vmem [shape: f32[1,16], index: 3, kind: input, shape index: {}]   ;;  %s10464_s4 = inlined_call_operand.vmem [shape: f32[16,48], index: 4, kind: input, shape index: {}]   ;;  %s10465_s5 = inlined_call_operand.vmem [shape: f32[1,48], index: 5, kind: input, shape index: {}]   ;;  %s10466_s6 = inlined_call_operand.vmem [shape: f32[16,16], index: 6, kind: input, shape index: {}]   ;;  %s10467_s7 = inlined_call_operand.vmem [shape: f32[1,16], index: 7, kind: input, shape index: {}]   ;;  %s10468_s8 = inlined_call_operand.vmem [shape: f32[1,16], index: 8, kind: input, shape index: {}]   ;;  %s10469_s9 = inlined_call_operand.vmem [shape: f32[1,16], index: 9, kind: input, shape index: {}]   ;;  %s10470_s10 = inlined_call_operand.vmem [shape: f32[16,64], index: 10, kind: input, shape index: {}]   ;;  %s10471_s11 = inlined_call_operand.vmem [shape: f32[1,64], index: 11, kind: input, shape index: {}]   ;;  %s10472_s12 = inlined_call_operand.vmem [shape: f32[64,16], index: 12, kind: input, shape index: {}]   ;;  %s10473_s13 = inlined_call_operand.vmem [shape: f32[1,16], index: 13, kind: input, shape index: {}]   ;;  %s10474_s14 = inlined_call_operand.vmem [shape: f32[16,32,16], index: 14, kind: output, shape index: {}]  }
   0x1 LB: > { %s6046_s30 = sadd.s32 4294967295, %s7426_s29   ;;  %p6050_p0 = scmp.ge.s32.totalorder %s7426_s29, 1  ;;  %s7426_s29 = sphi %s7508_s29, %s24_s29  }
   0x2   : > { %p414_p1 = scmp.lt.s32.totalorder %s7426_s29, 3 }
   0x4   : > { %p415_p2 = pnand %p6050_p0, %p414_p1 }
   0x6   : > { %418 = sbr.rel (%p415_p2) target bundleno = 3349 (0xd15), region = 76 }
   0xd   : > { %s6051_s15 = sshll.u32 %s6046_s30, 3  ;;  %vm511_vm0 = vcmask 130048   ;;  %s7428_s17 = smov 112   ;;  %vm1320_vm1 = vcmask 64512   ;;  %vm1851_vm2 = vcmask 261120   ;;  %vm4214_vm3 = vcmask 1043456  }
   0xe   : > { %p463_p3 = scmp.lt.s32.totalorder %s6051_s15, 15  ;;  %s7429_s18 = smov 96   ;;  %vm5714_vm4 = vcmask 523264  }
   0xf   : > { %s7430_s28 = smov 104   ;;  %s7431_s30 = smov 120  }
  0x10   : > { %s10710_s15 = smov (!%p463_p3, %s6051_s15), 15 }
  0x11   : > { %s6211_s16 = sshll.u32 %s10710_s15, 5 }
  0x12   : > { %s7524_s19 = scalar_lea.vmem %s10460_s0, %s6211_s16  ;;  %s10328_s24 = scalar_lea.vmem %s10474_s14, %s6211_s16 }
  0x13   : > { %v7527_v0 = vld [vmem:[%s7524_s19] sm:$0xff]  ;;  %v7530_v1 = vld [vmem:[%s7524_s19 + $0x10] sm:$0xff]  ;;  %v7533_v2 = vld [vmem:[%s7524_s19 + $0x8] sm:$0xff] }
  0x14   : > { %v512_v3 = vsel %vm511_vm0, %v7527_v0, 0.0  ;;  %v518_v4 = vsel %vm511_vm0, %v7530_v1, 0.0  ;;  %v7540_v5 = vld [vmem:[%s7524_s19 + $0x18] sm:$0xff]  ;;  %v515_v6 = vsel %vm511_vm0, %v7533_v2, 0.0  ;;  %v7547_v8 = vld [vmem:[%s7524_s19 + $0x20] sm:$0xff]  ;;  %v7550_v9 = vld [vmem:[%s7524_s19 + $0x28] sm:$0xff] }
  0x15   : > { %513 = vadd.xlane.f32.xlu0 %v512_v3  ;;  %519 = vadd.xlane.f32.xlu1 %v518_v4  ;;  %v521_v7 = vsel %vm511_vm0, %v7540_v5, 0.0  ;;  %v524_v10 = vsel %vm511_vm0, %v7547_v8, 0.0  ;;  %v527_v11 = vsel %vm511_vm0, %v7550_v9, 0.0  ;;  %v7557_v12 = vld [vmem:[%s7524_s19 + $0x30] sm:$0xff]  ;;  %v7560_v13 = vld [vmem:[%s7524_s19 + $0x38] sm:$0xff]  ;;  %v7567_v16 = vld [vmem:[%s7524_s19 + $0x40] sm:$0xff] }
  0x16   : > { %v530_v14 = vsel %vm511_vm0, %v7557_v12, 0.0  ;;  %v533_v15 = vsel %vm511_vm0, %v7560_v13, 0.0  ;;  %v7570_v17 = vld [vmem:[%s7524_s19 + $0x48] sm:$0xff]  ;;  %v536_v18 = vsel %vm511_vm0, %v7567_v16, 0.0  ;;  %v7577_v20 = vld [vmem:[%s7524_s19 + $0x50] sm:$0xff]  ;;  %v7580_v21 = vld [vmem:[%s7524_s19 + $0x58] sm:$0xff] }
  0x17   : > { %v539_v19 = vsel %vm511_vm0, %v7570_v17, 0.0  ;;  %v542_v22 = vsel %vm511_vm0, %v7577_v20, 0.0  ;;  %v545_v23 = vsel %vm511_vm0, %v7580_v21, 0.0  ;;  %v7587_v24 = vld [vmem:[%s7524_s19 + $0x60] sm:$0xff]  ;;  %v7590_v25 = vld [vmem:[%s7524_s19 + $0x68] sm:$0xff]  ;;  %v7597_v28 = vld [vmem:[%s7524_s19 + $0x70] sm:$0xff] }
  0x18   : > { %v548_v26 = vsel %vm511_vm0, %v7587_v24, 0.0  ;;  %v551_v27 = vsel %vm511_vm0, %v7590_v25, 0.0  ;;  %v7600_v29 = vld [vmem:[%s7524_s19 + $0x78] sm:$0xff]  ;;  %v554_v30 = vsel %vm511_vm0, %v7597_v28, 0.0  ;;  %v7607_v32 = vld [vmem:[%s7524_s19 + $0x80] sm:$0xff]  ;;  %v7610_v33 = vld [vmem:[%s7524_s19 + $0x88] sm:$0xff] }
  0x19   : > { %516 = vadd.xlane.f32.xlu0 %v515_v6  ;;  %522 = vadd.xlane.f32.xlu1 %v521_v7  ;;  %v557_v31 = vsel %vm511_vm0, %v7600_v29, 0.0  ;;  %v560_v34 = vsel %vm511_vm0, %v7607_v32, 0.0  ;;  %v563_v35 = vsel %vm511_vm0, %v7610_v33, 0.0  ;;  %v7617_v36 = vld [vmem:[%s7524_s19 + $0x90] sm:$0xff]  ;;  %v7620_v37 = vld [vmem:[%s7524_s19 + $0x98] sm:$0xff]  ;;  %v7627_v40 = vld [vmem:[%s7524_s19 + $0xa0] sm:$0xff] }
  0x1a   : > { %v566_v38 = vsel %vm511_vm0, %v7617_v36, 0.0  ;;  %v569_v39 = vsel %vm511_vm0, %v7620_v37, 0.0  ;;  %v7630_v41 = vld [vmem:[%s7524_s19 + $0xa8] sm:$0xff]  ;;  %v572_v42 = vsel %vm511_vm0, %v7627_v40, 0.0  ;;  %v7637_v44 = vld [vmem:[%s7524_s19 + $0xb0] sm:$0xff]  ;;  %v7640_v45 = vld [vmem:[%s7524_s19 + $0xb8] sm:$0xff] }
  0x1b   : > { %v575_v43 = vsel %vm511_vm0, %v7630_v41, 0.0  ;;  %v578_v46 = vsel %vm511_vm0, %v7637_v44, 0.0  ;;  %v581_v47 = vsel %vm511_vm0, %v7640_v45, 0.0  ;;  %v7647_v48 = vld [vmem:[%s7524_s19 + $0xc0] sm:$0xff]  ;;  %v7650_v49 = vld [vmem:[%s7524_s19 + $0xc8] sm:$0xff]  ;;  %v7657_v52 = vld [vmem:[%s7524_s19 + $0xd0] sm:$0xff] }
  0x1c   : > { %v584_v50 = vsel %vm511_vm0, %v7647_v48, 0.0  ;;  %v587_v51 = vsel %vm511_vm0, %v7650_v49, 0.0  ;;  %v7660_v53 = vld [vmem:[%s7524_s19 + $0xd8] sm:$0xff]  ;;  %v590_v54 = vsel %vm511_vm0, %v7657_v52, 0.0  ;;  %v7667_v56 = vld [vmem:[%s7524_s19 + $0xe0] sm:$0xff]  ;;  %v7670_v57 = vld [vmem:[%s7524_s19 + $0xe8] sm:$0xff] }
  0x1d   : > { %525 = vadd.xlane.f32.xlu0 %v524_v10  ;;  %528 = vadd.xlane.f32.xlu1 %v527_v11  ;;  %v593_v55 = vsel %vm511_vm0, %v7660_v53, 0.0  ;;  %v596_v58 = vsel %vm511_vm0, %v7667_v56, 0.0  ;;  %v599_v59 = vsel %vm511_vm0, %v7670_v57, 0.0 }
  0x21   : > { %531 = vadd.xlane.f32.xlu0 %v530_v14  ;;  %534 = vadd.xlane.f32.xlu1 %v533_v15 }
  0x25   : > { %537 = vadd.xlane.f32.xlu0 %v536_v18  ;;  %540 = vadd.xlane.f32.xlu1 %v539_v19 }
  0x29   : > { %543 = vadd.xlane.f32.xlu0 %v542_v22  ;;  %546 = vadd.xlane.f32.xlu1 %v545_v23 }
  0x2d   : > { %549 = vadd.xlane.f32.xlu0 %v548_v26  ;;  %552 = vadd.xlane.f32.xlu1 %v551_v27 }
  0x31   : > { %555 = vadd.xlane.f32.xlu0 %v554_v30  ;;  %558 = vadd.xlane.f32.xlu1 %v557_v31  ;;  %v7697_v31 = vld [vmem:[%s7524_s19 + $0xf0] sm:$0xff] }
  0x35   : > { %561 = vadd.xlane.f32.xlu0 %v560_v34  ;;  %564 = vadd.xlane.f32.xlu1 %v563_v35 }
  0x39   : > { %567 = vadd.xlane.f32.xlu0 %v566_v38  ;;  %570 = vadd.xlane.f32.xlu1 %v569_v39  ;;  %v602_v38 = vsel %vm511_vm0, %v7697_v31, 0.0 }
  0x3d   : > { %573 = vadd.xlane.f32.xlu0 %v572_v42  ;;  %576 = vadd.xlane.f32.xlu1 %v575_v43 }
  0x41   : > { %579 = vadd.xlane.f32.xlu0 %v578_v46  ;;  %582 = vadd.xlane.f32.xlu1 %v581_v47 }
  0x45   : > { %585 = vadd.xlane.f32.xlu0 %v584_v50  ;;  %588 = vadd.xlane.f32.xlu1 %v587_v51  ;;  %v7712_v50 = vld [vmem:[%s7524_s19 + $0xf8] sm:$0xff] }
  0x49   : > { %591 = vadd.xlane.f32.xlu0 %v590_v54  ;;  %594 = vadd.xlane.f32.xlu1 %v593_v55  ;;  %v605_v54 = vsel %vm511_vm0, %v7712_v50, 0.0 }
  0x4d   : > { %597 = vadd.xlane.f32.xlu0 %v596_v58  ;;  %600 = vadd.xlane.f32.xlu1 %v599_v59 }
  0xa2   : > { %v514_v60 = vpop.xlane.xlu0 %513  ;;  %v520_v61 = vpop.xlane.xlu1 %519 }
  0xa3   : > { %v609_v62 = vmul.f32 0.0625, %v514_v60  ;;  %v611_v63 = vmul.f32 0.0625, %v520_v61 }
  0xa5   : > { %v7677_v3 = vsub.f32 %v7527_v0, %v609_v62  ;;  %v7680_v4 = vsub.f32 %v7530_v1, %v611_v63 }
  0xa6   : > { %v517_v6 = vpop.xlane.xlu0 %516  ;;  %v523_v7 = vpop.xlane.xlu1 %522 }
  0xa7   : > { %v610_v10 = vmul.f32 0.0625, %v517_v6  ;;  %v612_v11 = vmul.f32 0.0625, %v523_v7  ;;  %v673_v14 = vmul.f32 %v7677_v3, %v7677_v3  ;;  %v675_v15 = vmul.f32 %v7680_v4, %v7680_v4 }
  0xa9   : > { %v7687_v18 = vsub.f32 %v7533_v2, %v610_v10  ;;  %v7690_v0 = vsub.f32 %v7540_v5, %v612_v11  ;;  %v705_v1 = vsel %vm511_vm0, %v673_v14, 0.0  ;;  %v711_v19 = vsel %vm511_vm0, %v675_v15, 0.0 }
  0xaa   : > { %706 = vadd.xlane.f32.xlu0 %v705_v1  ;;  %v526_v22 = vpop.xlane.xlu0 %525  ;;  %v529_v23 = vpop.xlane.xlu1 %528 }
  0xab   : > { %v674_v26 = vmul.f32 %v7687_v18, %v7687_v18  ;;  %v613_v27 = vmul.f32 0.0625, %v526_v22  ;;  %v614_v30 = vmul.f32 0.0625, %v529_v23  ;;  %v676_v2 = vmul.f32 %v7690_v0, %v7690_v0 }
  0xad   : > { %v708_v5 = vsel %vm511_vm0, %v674_v26, 0.0  ;;  %v7703_v34 = vsub.f32 %v7547_v8, %v613_v27  ;;  %v7706_v35 = vsub.f32 %v7550_v9, %v614_v30  ;;  %v714_v43 = vsel %vm511_vm0, %v676_v2, 0.0 }
  0xae   : > { %712 = vadd.xlane.f32.xlu0 %v711_v19  ;;  %709 = vadd.xlane.f32.xlu1 %v708_v5  ;;  %v532_v39 = vpop.xlane.xlu0 %531  ;;  %v535_v42 = vpop.xlane.xlu1 %534 }
  0xaf   : > { %v615_v46 = vmul.f32 0.0625, %v532_v39  ;;  %v616_v47 = vmul.f32 0.0625, %v535_v42  ;;  %v677_v8 = vmul.f32 %v7703_v34, %v7703_v34  ;;  %v678_v59 = vmul.f32 %v7706_v35, %v7706_v35 }
  0xb1   : > { %v7717_v51 = vsub.f32 %v7557_v12, %v615_v46  ;;  %v7720_v9 = vsub.f32 %v7560_v13, %v616_v47  ;;  %v717_v60 = vsel %vm511_vm0, %v677_v8, 0.0  ;;  %v720_v6 = vsel %vm511_vm0, %v678_v59, 0.0 }
  0xb2   : > { %603 = vadd.xlane.f32.xlu0 %v602_v38  ;;  %715 = vadd.xlane.f32.xlu1 %v714_v43  ;;  %v538_v55 = vpop.xlane.xlu0 %537  ;;  %v541_v58 = vpop.xlane.xlu1 %540 }
  0xb3   : > { %v617_v61 = vmul.f32 0.0625, %v538_v55  ;;  %v618_v62 = vmul.f32 0.0625, %v541_v58  ;;  %v679_v12 = vmul.f32 %v7717_v51, %v7717_v51  ;;  %v680_v11 = vmul.f32 %v7720_v9, %v7720_v9 }
  0xb5   : > { %v7730_v63 = vsub.f32 %v7567_v16, %v617_v61  ;;  %v7733_v13 = vsub.f32 %v7570_v17, %v618_v62  ;;  %v723_v14 = vsel %vm511_vm0, %v679_v12, 0.0  ;;  %v726_v22 = vsel %vm511_vm0, %v680_v11, 0.0 }
  0xb6   : > { %606 = vadd.xlane.f32.xlu1 %v605_v54  ;;  %718 = vadd.xlane.f32.xlu0 %v717_v60  ;;  %v544_v7 = vpop.xlane.xlu0 %543  ;;  %v547_v10 = vpop.xlane.xlu1 %546 }
  0xb7   : > { %v619_v15 = vmul.f32 0.0625, %v544_v7  ;;  %v620_v1 = vmul.f32 0.0625, %v547_v10  ;;  %v681_v16 = vmul.f32 %v7730_v63, %v7730_v63  ;;  %v682_v27 = vmul.f32 %v7733_v13, %v7733_v13 }
  0xb9   : > { %v7742_v19 = vsub.f32 %v7577_v20, %v619_v15  ;;  %v7745_v17 = vsub.f32 %v7580_v21, %v620_v1  ;;  %v729_v30 = vsel %vm511_vm0, %v681_v16, 0.0  ;;  %v732_v39 = vsel %vm511_vm0, %v682_v27, 0.0 }
  0xba   : > { %721 = vadd.xlane.f32.xlu1 %v720_v6  ;;  %724 = vadd.xlane.f32.xlu0 %v723_v14  ;;  %v550_v23 = vpop.xlane.xlu0 %549  ;;  %v553_v26 = vpop.xlane.xlu1 %552 }
  0xbb   : > { %v621_v2 = vmul.f32 0.0625, %v550_v23  ;;  %v622_v5 = vmul.f32 0.0625, %v553_v26  ;;  %v683_v20 = vmul.f32 %v7742_v19, %v7742_v19  ;;  %v684_v46 = vmul.f32 %v7745_v17, %v7745_v17 }
  0xbd   : > { %v7754_v38 = vsub.f32 %v7587_v24, %v621_v2  ;;  %v7757_v21 = vsub.f32 %v7590_v25, %v622_v5  ;;  %v735_v47 = vsel %vm511_vm0, %v683_v20, 0.0  ;;  %v738_v58 = vsel %vm511_vm0, %v684_v46, 0.0 }
  0xbe   : > { %727 = vadd.xlane.f32.xlu1 %v726_v22  ;;  %730 = vadd.xlane.f32.xlu0 %v729_v30  ;;  %v556_v42 = vpop.xlane.xlu0 %555  ;;  %v559_v43 = vpop.xlane.xlu1 %558 }
  0xbf   : > { %v623_v8 = vmul.f32 0.0625, %v556_v42  ;;  %v624_v54 = vmul.f32 0.0625, %v559_v43  ;;  %v685_v24 = vmul.f32 %v7754_v38, %v7754_v38  ;;  %v686_v61 = vmul.f32 %v7757_v21, %v7757_v21 }
  0xc1   : > { %v7766_v55 = vsub.f32 %v7597_v28, %v623_v8  ;;  %v7769_v25 = vsub.f32 %v7600_v29, %v624_v54  ;;  %v741_v62 = vsel %vm511_vm0, %v685_v24, 0.0  ;;  %v744_v10 = vsel %vm511_vm0, %v686_v61, 0.0 }
  0xc2   : > { %733 = vadd.xlane.f32.xlu1 %v732_v39  ;;  %736 = vadd.xlane.f32.xlu0 %v735_v47  ;;  %v562_v59 = vpop.xlane.xlu0 %561  ;;  %v565_v60 = vpop.xlane.xlu1 %564 }
  0xc3   : > { %v625_v12 = vmul.f32 0.0625, %v562_v59  ;;  %v626_v6 = vmul.f32 0.0625, %v565_v60  ;;  %v687_v28 = vmul.f32 %v7766_v55, %v7766_v55  ;;  %v688_v15 = vmul.f32 %v7769_v25, %v7769_v25  ;;  %v1022_v60 = vld [vmem:[%s10464_s4 + $0x8] sm:$0xff] }
  0xc5   : > { %v7778_v7 = vsub.f32 %v7607_v32, %v625_v12  ;;  %v7781_v29 = vsub.f32 %v7610_v33, %v626_v6  ;;  %v747_v1 = vsel %vm511_vm0, %v687_v28, 0.0  ;;  %v750_v26 = vsel %vm511_vm0, %v688_v15, 0.0 }
  0xc6   : > { %739 = vadd.xlane.f32.xlu1 %v738_v58  ;;  %742 = vadd.xlane.f32.xlu0 %v741_v62  ;;  %v568_v11 = vpop.xlane.xlu0 %567  ;;  %v571_v14 = vpop.xlane.xlu1 %570 }
  0xc7   : > { %v627_v16 = vmul.f32 0.0625, %v568_v11  ;;  %v628_v22 = vmul.f32 0.0625, %v571_v14  ;;  %v689_v32 = vmul.f32 %v7778_v7, %v7778_v7  ;;  %v690_v2 = vmul.f32 %v7781_v29, %v7781_v29 }
  0xc9   : > { %v7790_v23 = vsub.f32 %v7617_v36, %v627_v16  ;;  %v7793_v33 = vsub.f32 %v7620_v37, %v628_v22  ;;  %v753_v5 = vsel %vm511_vm0, %v689_v32, 0.0  ;;  %v756_v43 = vsel %vm511_vm0, %v690_v2, 0.0 }
  0xca   : > { %745 = vadd.xlane.f32.xlu1 %v744_v10  ;;  %748 = vadd.xlane.f32.xlu0 %v747_v1  ;;  %v574_v27 = vpop.xlane.xlu0 %573  ;;  %v577_v30 = vpop.xlane.xlu1 %576 }
  0xcb   : > { %v629_v20 = vmul.f32 0.0625, %v574_v27  ;;  %v630_v39 = vmul.f32 0.0625, %v577_v30  ;;  %v691_v36 = vmul.f32 %v7790_v23, %v7790_v23  ;;  %v692_v8 = vmul.f32 %v7793_v33, %v7793_v33 }
  0xcd   : > { %v7802_v42 = vsub.f32 %v7627_v40, %v629_v20  ;;  %v7805_v37 = vsub.f32 %v7630_v41, %v630_v39  ;;  %v759_v54 = vsel %vm511_vm0, %v691_v36, 0.0  ;;  %v1021_v41 = vld [vmem:[%s10464_s4] sm:$0xff]  ;;  %v762_v62 = vsel %vm511_vm0, %v692_v8, 0.0 }
  0xce   : > { %751 = vadd.xlane.f32.xlu1 %v750_v26  ;;  %754 = vadd.xlane.f32.xlu0 %v753_v5  ;;  %v580_v46 = vpop.xlane.xlu0 %579  ;;  %v583_v47 = vpop.xlane.xlu1 %582  ;;  %v1023_v28 = vpack.c.bf16 %v1022_v60, %v1021_v41 }
  0xcf   : > { %v631_v24 = vmul.f32 0.0625, %v580_v46  ;;  %v632_v58 = vmul.f32 0.0625, %v583_v47  ;;  %v693_v40 = vmul.f32 %v7802_v42, %v7802_v42 }
  0xd0   : > { %6429 = vmatprep.subr.bf16.mxu0 %v1023_v28 }
  0xd1   : > { %v7814_v59 = vsub.f32 %v7637_v44, %v631_v24  ;;  %v7823_v61 = vsub.f32 %v7640_v45, %v632_v58  ;;  %v694_v44 = vmul.f32 %v7805_v37, %v7805_v37  ;;  %v765_v10 = vsel %vm511_vm0, %v693_v40, 0.0  ;;  %6430 = vmatpush3.bf16.msra.mxu0 %v1023_v28 }
  0xd2   : > { %757 = vadd.xlane.f32.xlu1 %v756_v43  ;;  %760 = vadd.xlane.f32.xlu0 %v759_v54  ;;  %v586_v12 = vpop.xlane.xlu0 %585  ;;  %v589_v6 = vpop.xlane.xlu1 %588 }
  0xd3   : > { %v633_v11 = vmul.f32 0.0625, %v586_v12  ;;  %v634_v14 = vmul.f32 0.0625, %v589_v6  ;;  %v695_v15 = vmul.f32 %v7814_v59, %v7814_v59  ;;  %v768_v16 = vsel %vm511_vm0, %v694_v44, 0.0 }
  0xd4   : > { %v696_v26 = vmul.f32 %v7823_v61, %v7823_v61 }
  0xd5   : > { %v7832_v1 = vsub.f32 %v7647_v48, %v633_v11  ;;  %v7835_v45 = vsub.f32 %v7650_v49, %v634_v14  ;;  %v771_v27 = vsel %vm511_vm0, %v695_v15, 0.0 }
  0xd6   : > { %763 = vadd.xlane.f32.xlu1 %v762_v62  ;;  %766 = vadd.xlane.f32.xlu0 %v765_v10  ;;  %v592_v22 = vpop.xlane.xlu0 %591  ;;  %v595_v32 = vpop.xlane.xlu1 %594  ;;  %v774_v20 = vsel %vm511_vm0, %v696_v26, 0.0 }
  0xd7   : > { %v635_v30 = vmul.f32 0.0625, %v592_v22  ;;  %v636_v2 = vmul.f32 0.0625, %v595_v32  ;;  %v697_v48 = vmul.f32 %v7832_v1, %v7832_v1  ;;  %v698_v43 = vmul.f32 %v7835_v45, %v7835_v45 }
  0xd9   : > { %v7844_v5 = vsub.f32 %v7657_v52, %v635_v30  ;;  %v7847_v49 = vsub.f32 %v7660_v53, %v636_v2  ;;  %v777_v46 = vsel %vm511_vm0, %v697_v48, 0.0  ;;  %v780_v53 = vsel %vm511_vm0, %v698_v43, 0.0 }
  0xda   : > { %769 = vadd.xlane.f32.xlu1 %v768_v16  ;;  %772 = vadd.xlane.f32.xlu0 %v771_v27  ;;  %v598_v39 = vpop.xlane.xlu0 %597  ;;  %v601_v36 = vpop.xlane.xlu1 %600 }
  0xdb   : > { %v637_v47 = vmul.f32 0.0625, %v598_v39  ;;  %v638_v8 = vmul.f32 0.0625, %v601_v36  ;;  %v699_v52 = vmul.f32 %v7844_v5, %v7844_v5  ;;  %v700_v40 = vmul.f32 %v7847_v49, %v7847_v49 }
  0xdd   : > { %v7856_v54 = vsub.f32 %v7667_v56, %v637_v47  ;;  %v7860_v24 = vsub.f32 %v7670_v57, %v638_v8  ;;  %v783_v58 = vsel %vm511_vm0, %v699_v52, 0.0  ;;  %v786_v56 = vsel %vm511_vm0, %v700_v40, 0.0 }
  0xde   : > { %775 = vadd.xlane.f32.xlu1 %v774_v20  ;;  %778 = vadd.xlane.f32.xlu0 %v777_v46 }
  0xdf   : > { %v701_v41 = vmul.f32 %v7856_v54, %v7856_v54  ;;  %v702_v62 = vmul.f32 %v7860_v24, %v7860_v24 }
  0xe1   : > { %v789_v60 = vsel %vm511_vm0, %v701_v41, 0.0  ;;  %v792_v57 = vsel %vm511_vm0, %v702_v62, 0.0 }
  0xe2   : > { %781 = vadd.xlane.f32.xlu1 %v780_v53  ;;  %784 = vadd.xlane.f32.xlu0 %v783_v58 }
  0xe6   : > { %787 = vadd.xlane.f32.xlu1 %v786_v56  ;;  %790 = vadd.xlane.f32.xlu0 %v789_v60  ;;  %v7887_v60 = vld [vmem:[%s10462_s2] ss:$0 sm:$0xff] }
  0xea   : > { %793 = vadd.xlane.f32.xlu1 %v792_v57 }
 0x137   : > { %v707_v12 = vpop.xlane.xlu0 %706 }
 0x138   : > { %v801_v6 = vmul.f32 0.0625, %v707_v12 }
 0x13a   : > { %v833_v44 = vadd.f32 1e-05, %v801_v6 }
 0x13b   : > { %v710_v28 = vpop.xlane.xlu1 %709  ;;  %v713_v10 = vpop.xlane.xlu0 %712 }
 0x13c   : > { %6940 = vrsqrt.f32 %v833_v44  ;;  %v802_v11 = vmul.f32 0.0625, %v710_v28  ;;  %v803_v14 = vmul.f32 0.0625, %v713_v10 }
 0x13e   : > { %v834_v15 = vadd.f32 1e-05, %v802_v11  ;;  %v835_v16 = vadd.f32 1e-05, %v803_v14 }
 0x13f   : > { %v716_v22 = vpop.xlane.xlu1 %715  ;;  %v604_v32 = vpop.xlane.xlu0 %603 }
 0x140   : > { %6942 = vrsqrt.f32 %v834_v15  ;;  %v804_v26 = vmul.f32 0.0625, %v716_v22  ;;  %v639_v27 = vmul.f32 0.0625, %v604_v32  ;;  %v7895_v15 = vld [vmem:[%s10463_s3] ss:$0 sm:$0xff] }
 0x141   : > { %6944 = vrsqrt.f32 %v835_v16 }
 0x142   : > { %v836_v30 = vadd.f32 1e-05, %v804_v26  ;;  %v7873_v2 = vsub.f32 %v7697_v31, %v639_v27 }
 0x143   : > { %v607_v48 = vpop.xlane.xlu1 %606  ;;  %v719_v20 = vpop.xlane.xlu0 %718 }
 0x144   : > { %6946 = vrsqrt.f32 %v836_v30  ;;  %v640_v39 = vmul.f32 0.0625, %v607_v48  ;;  %v805_v36 = vmul.f32 0.0625, %v719_v20  ;;  %v703_v43 = vmul.f32 %v7873_v2, %v7873_v2 }
 0x146   : > { %v6941_v46 = vpop.eup %6940  ;;  %v7878_v47 = vsub.f32 %v7712_v50, %v640_v39  ;;  %v837_v8 = vadd.f32 1e-05, %v805_v36  ;;  %v795_v52 = vsel %vm511_vm0, %v703_v43, 0.0 }
 0x147   : > { %v722_v53 = vpop.xlane.xlu1 %721  ;;  %796 = vadd.xlane.f32.xlu0 %v795_v52  ;;  %v725_v58 = vpop.xlane.xlu0 %724  ;;  %v897_v31 = vmul.f32 %v6941_v46, %v7677_v3 }
 0x148   : > { %6948 = vrsqrt.f32 %v837_v8  ;;  %v806_v40 = vmul.f32 0.0625, %v722_v53  ;;  %v807_v41 = vmul.f32 0.0625, %v725_v58  ;;  %v704_v56 = vmul.f32 %v7878_v47, %v7878_v47 }
 0x149   : > { %v935_v10 = vmul.f32 %v7887_v60, %v897_v31 }
 0x14a   : > { %v6943_v50 = vpop.eup %6942  ;;  %v838_v62 = vadd.f32 1e-05, %v806_v40  ;;  %v839_v57 = vadd.f32 1e-05, %v807_v41  ;;  %v798_v12 = vsel %vm511_vm0, %v704_v56, 0.0 }
 0x14b   : > { %v6945_v6 = vpop.eup %6944  ;;  %799 = vadd.xlane.f32.xlu1 %v798_v12  ;;  %v728_v44 = vpop.xlane.xlu1 %727  ;;  %v898_v28 = vmul.f32 %v6943_v50, %v7687_v18  ;;  %v973_v48 = vadd.f32 %v7895_v15, %v935_v10 }
 0x14c   : > { %v731_v3 = vpop.xlane.xlu0 %730  ;;  %6950 = vrsqrt.f32 %v838_v62  ;;  %v808_v11 = vmul.f32 0.0625, %v728_v44  ;;  %v899_v16 = vmul.f32 %v6945_v6, %v7680_v4 }
 0x14d   : > { %v809_v14 = vmul.f32 0.0625, %v731_v3  ;;  %6952 = vrsqrt.f32 %v839_v57  ;;  %v936_v22 = vmul.f32 %v7887_v60, %v898_v28 }
 0x14e   : > { %v6947_v32 = vpop.eup %6946  ;;  %v840_v26 = vadd.f32 1e-05, %v808_v11  ;;  %v937_v36 = vmul.f32 %v7887_v60, %v899_v16 }
 0x14f   : > { %v841_v27 = vadd.f32 1e-05, %v809_v14  ;;  %v734_v30 = vpop.xlane.xlu1 %733  ;;  %v974_v20 = vadd.f32 %v7895_v15, %v936_v22  ;;  %v900_v39 = vmul.f32 %v6947_v32, %v7690_v0 }
 0x150   : > { %v737_v18 = vpop.xlane.xlu0 %736  ;;  %6954 = vrsqrt.f32 %v840_v26  ;;  %v810_v43 = vmul.f32 0.0625, %v734_v30  ;;  %v975_v41 = vadd.f32 %v7895_v15, %v937_v36 }
 0x151   : > { %v811_v46 = vmul.f32 0.0625, %v737_v18  ;;  %6956 = vrsqrt.f32 %v841_v27  ;;  %v1005_v4 = vpack.c.bf16 %v974_v20, %v973_v48  ;;  %v938_v8 = vmul.f32 %v7887_v60, %v900_v39 }
 0x152   : > { %v6949_v52 = vpop.eup %6948  ;;  %v842_v53 = vadd.f32 1e-05, %v810_v43 }
 0x153   : > { %v843_v58 = vadd.f32 1e-05, %v811_v46  ;;  %v740_v31 = vpop.xlane.xlu1 %739  ;;  %6431 = vmatprep.mubr.msk.bf16.mxu0 %vm511_vm0, %v1005_v4  ;;  %v976_v0 = vadd.f32 %v7895_v15, %v938_v8  ;;  %v901_v56 = vmul.f32 %v6949_v52, %v7703_v34 }
 0x154   : > { %v743_v40 = vpop.xlane.xlu0 %742  ;;  %6958 = vrsqrt.f32 %v842_v53  ;;  %v812_v50 = vmul.f32 0.0625, %v740_v31 }
 0x155   : > { %v813_v62 = vmul.f32 0.0625, %v743_v40  ;;  %6960 = vrsqrt.f32 %v843_v58  ;;  %v1006_v57 = vpack.c.bf16 %v976_v0, %v975_v41  ;;  %v939_v14 = vmul.f32 %v7887_v60, %v901_v56 }
 0x156   : > { %v6951_v12 = vpop.eup %6950  ;;  %v844_v6 = vadd.f32 1e-05, %v812_v50 }
 0x157   : > { %v845_v44 = vadd.f32 1e-05, %v813_v62  ;;  %v6953_v3 = vpop.eup %6952  ;;  %v746_v28 = vpop.xlane.xlu1 %745  ;;  %6432 = vmatmul.mubr.msk.bf16.vlgmr.msra.gmra.mrb[0].mxu0 %vm511_vm0, %v1006_v57  ;;  %v902_v11 = vmul.f32 %v6951_v12, %v7706_v35  ;;  %v977_v39 = vadd.f32 %v7895_v15, %v939_v14 }
 0x158   : > { %v749_v10 = vpop.xlane.xlu0 %748  ;;  %6962 = vrsqrt.f32 %v844_v6  ;;  %v814_v16 = vmul.f32 0.0625, %v746_v28  ;;  %v903_v22 = vmul.f32 %v6953_v3, %v7717_v51 }
 0x159   : > { %v815_v34 = vmul.f32 0.0625, %v749_v10  ;;  %6964 = vrsqrt.f32 %v845_v44  ;;  %v940_v32 = vmul.f32 %v7887_v60, %v902_v11 }
 0x15a   : > { %v6955_v26 = vpop.eup %6954  ;;  %v846_v27 = vadd.f32 1e-05, %v814_v16  ;;  %v941_v43 = vmul.f32 %v7887_v60, %v903_v22 }
 0x15b   : > { %v847_v30 = vadd.f32 1e-05, %v815_v34  ;;  %v6957_v18 = vpop.eup %6956  ;;  %v752_v48 = vpop.xlane.xlu1 %751  ;;  %v978_v35 = vadd.f32 %v7895_v15, %v940_v32  ;;  %v904_v36 = vmul.f32 %v6955_v26, %v7720_v9 }
 0x15c   : > { %v755_v20 = vpop.xlane.xlu0 %754  ;;  %6966 = vrsqrt.f32 %v846_v27  ;;  %v816_v46 = vmul.f32 0.0625, %v752_v48  ;;  %v905_v52 = vmul.f32 %v6957_v18, %v7730_v63  ;;  %v979_v9 = vadd.f32 %v7895_v15, %v941_v43 }
 0x15d   : > { %v817_v51 = vmul.f32 0.0625, %v755_v20  ;;  %6968 = vrsqrt.f32 %v847_v30  ;;  %v1007_v4 = vpack.c.bf16 %v978_v35, %v977_v39  ;;  %v942_v8 = vmul.f32 %v7887_v60, %v904_v36 }
 0x15e   : > { %v6959_v53 = vpop.eup %6958  ;;  %v848_v58 = vadd.f32 1e-05, %v816_v46  ;;  %v943_v62 = vmul.f32 %v7887_v60, %v905_v52 }
 0x15f   : > { %v849_v31 = vadd.f32 1e-05, %v817_v51  ;;  %v6961_v40 = vpop.eup %6960  ;;  %v758_v41 = vpop.xlane.xlu1 %757  ;;  %6435 = vmatprep.mubr.msk.bf16.mxu0 %vm511_vm0, %v1007_v4  ;;  %v980_v56 = vadd.f32 %v7895_v15, %v942_v8  ;;  %v906_v50 = vmul.f32 %v6959_v53, %v7733_v13 }
 0x160   : > { %v761_v0 = vpop.xlane.xlu0 %760  ;;  %6970 = vrsqrt.f32 %v848_v58  ;;  %v818_v57 = vmul.f32 0.0625, %v758_v41  ;;  %v907_v63 = vmul.f32 %v6961_v40, %v7742_v19  ;;  %v981_v13 = vadd.f32 %v7895_v15, %v943_v62 }
 0x161   : > { %v819_v12 = vmul.f32 0.0625, %v761_v0  ;;  %6972 = vrsqrt.f32 %v849_v31  ;;  %v1008_v6 = vpack.c.bf16 %v980_v56, %v979_v9  ;;  %v944_v44 = vmul.f32 %v7887_v60, %v906_v50 }
 0x162   : > { %v6963_v3 = vpop.eup %6962  ;;  %v850_v28 = vadd.f32 1e-05, %v818_v57  ;;  %v945_v19 = vmul.f32 %v7887_v60, %v907_v63 }
 0x163   : > { %v851_v10 = vadd.f32 1e-05, %v819_v12  ;;  %v6965_v11 = vpop.eup %6964  ;;  %v764_v14 = vpop.xlane.xlu1 %763  ;;  %6436 = vmatmul.mubr.msk.bf16.gmra.mrb[4].mxu0 %vm511_vm0, %v1008_v6  ;;  %v982_v34 = vadd.f32 %v7895_v15, %v944_v44  ;;  %v908_v22 = vmul.f32 %v6963_v3, %v7745_v17 }
 0x164   : > { %v767_v16 = vpop.xlane.xlu0 %766  ;;  %6974 = vrsqrt.f32 %v850_v28  ;;  %v820_v32 = vmul.f32 0.0625, %v764_v14  ;;  %v909_v18 = vmul.f32 %v6965_v11, %v7754_v38  ;;  %v983_v17 = vadd.f32 %v7895_v15, %v945_v19 }
 0x165   : > { %v821_v26 = vmul.f32 0.0625, %v767_v16  ;;  %6976 = vrsqrt.f32 %v851_v10  ;;  %v1009_v27 = vpack.c.bf16 %v982_v34, %v981_v13  ;;  %v946_v30 = vmul.f32 %v7887_v60, %v908_v22 }
 0x166   : > { %v6967_v48 = vpop.eup %6966  ;;  %v852_v20 = vadd.f32 1e-05, %v820_v32  ;;  %v947_v4 = vmul.f32 %v7887_v60, %v909_v18 }
 0x167   : > { %v853_v39 = vadd.f32 1e-05, %v821_v26  ;;  %v6969_v35 = vpop.eup %6968  ;;  %v770_v36 = vpop.xlane.xlu1 %769  ;;  %6439 = vmatprep.mubr.msk.bf16.mxu0 %vm511_vm0, %v1009_v27  ;;  %v984_v46 = vadd.f32 %v7895_v15, %v946_v30  ;;  %v910_v51 = vmul.f32 %v6967_v48, %v7757_v21 }
 0x168   : > { %v773_v43 = vpop.xlane.xlu0 %772  ;;  %6978 = vrsqrt.f32 %v852_v20  ;;  %v822_v8 = vmul.f32 0.0625, %v770_v36  ;;  %v911_v38 = vmul.f32 %v6969_v35, %v7766_v55  ;;  %v985_v21 = vadd.f32 %v7895_v15, %v947_v4 }
 0x169   : > { %v823_v52 = vmul.f32 0.0625, %v773_v43  ;;  %6980 = vrsqrt.f32 %v853_v39  ;;  %v1010_v53 = vpack.c.bf16 %v984_v46, %v983_v17  ;;  %v948_v58 = vmul.f32 %v7887_v60, %v910_v51 }
 0x16a   : > { %v6971_v31 = vpop.eup %6970  ;;  %v854_v40 = vadd.f32 1e-05, %v822_v8  ;;  %v949_v55 = vmul.f32 %v7887_v60, %v911_v38 }
 0x16b   : > { %v855_v41 = vadd.f32 1e-05, %v823_v52  ;;  %v6973_v0 = vpop.eup %6972  ;;  %v776_v9 = vpop.xlane.xlu1 %775  ;;  %6440 = vmatmul.mubr.msk.bf16.gmra.mrb[8].mxu0 %vm511_vm0, %v1010_v53  ;;  %v986_v50 = vadd.f32 %v7895_v15, %v948_v58  ;;  %v912_v62 = vmul.f32 %v6971_v31, %v7769_v25 }
 0x16c   : > { %v779_v56 = vpop.xlane.xlu0 %778  ;;  %6982 = vrsqrt.f32 %v854_v40  ;;  %v824_v57 = vmul.f32 0.0625, %v776_v9  ;;  %v913_v44 = vmul.f32 %v6973_v0, %v7778_v7  ;;  %v987_v25 = vadd.f32 %v7895_v15, %v949_v55 }
 0x16d   : > { %v825_v12 = vmul.f32 0.0625, %v779_v56  ;;  %6984 = vrsqrt.f32 %v855_v41  ;;  %v1011_v63 = vpack.c.bf16 %v986_v50, %v985_v21  ;;  %v950_v6 = vmul.f32 %v7887_v60, %v912_v62 }
 0x16e   : > { %v6975_v3 = vpop.eup %6974  ;;  %v856_v28 = vadd.f32 1e-05, %v824_v57  ;;  %v951_v22 = vmul.f32 %v7887_v60, %v913_v44 }
 0x16f   : > { %v857_v10 = vadd.f32 1e-05, %v825_v12  ;;  %v6977_v11 = vpop.eup %6976  ;;  %v782_v14 = vpop.xlane.xlu1 %781  ;;  %6443 = vmatprep.mubr.msk.bf16.mxu0 %vm511_vm0, %v1011_v63  ;;  %v988_v13 = vadd.f32 %v7895_v15, %v950_v6  ;;  %v914_v34 = vmul.f32 %v6975_v3, %v7781_v29 }
 0x170   : > { %v785_v16 = vpop.xlane.xlu0 %784  ;;  %6986 = vrsqrt.f32 %v856_v28  ;;  %v826_v19 = vmul.f32 0.0625, %v782_v14  ;;  %v915_v7 = vmul.f32 %v6977_v11, %v7790_v23  ;;  %v989_v29 = vadd.f32 %v7895_v15, %v951_v22 }
 0x171   : > { %v827_v32 = vmul.f32 0.0625, %v785_v16  ;;  %6988 = vrsqrt.f32 %v857_v10  ;;  %v1012_v26 = vpack.c.bf16 %v988_v13, %v987_v25  ;;  %v952_v27 = vmul.f32 %v7887_v60, %v914_v34 }
 0x172   : > { %v6979_v30 = vpop.eup %6978  ;;  %v858_v18 = vadd.f32 1e-05, %v826_v19  ;;  %v953_v23 = vmul.f32 %v7887_v60, %v915_v7 }
 0x173   : > { %v859_v48 = vadd.f32 1e-05, %v827_v32  ;;  %v6981_v20 = vpop.eup %6980  ;;  %v788_v39 = vpop.xlane.xlu1 %787  ;;  %6444 = vmatmul.mubr.msk.bf16.gmra.mrb[12].mxu0 %vm511_vm0, %v1012_v26  ;;  %v990_v36 = vadd.f32 %v7895_v15, %v952_v27  ;;  %v916_v43 = vmul.f32 %v6979_v30, %v7793_v33 }
 0x174   : > { %v791_v35 = vpop.xlane.xlu0 %790  ;;  %6990 = vrsqrt.f32 %v858_v18  ;;  %v828_v17 = vmul.f32 0.0625, %v788_v39  ;;  %v917_v8 = vmul.f32 %v6981_v20, %v7802_v42  ;;  %v991_v33 = vadd.f32 %v7895_v15, %v953_v23 }
 0x175   : > { %v829_v46 = vmul.f32 0.0625, %v791_v35  ;;  %6992 = vrsqrt.f32 %v859_v48  ;;  %v1013_v51 = vpack.c.bf16 %v990_v36, %v989_v29  ;;  %v954_v4 = vmul.f32 %v7887_v60, %v916_v43 }
 0x176   : > { %v6983_v52 = vpop.eup %6982  ;;  %v860_v38 = vadd.f32 1e-05, %v828_v17  ;;  %v955_v0 = vmul.f32 %v7887_v60, %v917_v8 }
 0x177   : > { %v861_v53 = vadd.f32 1e-05, %v829_v46  ;;  %v6985_v58 = vpop.eup %6984  ;;  %v794_v31 = vpop.xlane.xlu1 %793  ;;  %6447 = vmatprep.mubr.msk.bf16.mxu0 %vm511_vm0, %v1013_v51  ;;  %v992_v40 = vadd.f32 %v7895_v15, %v954_v4  ;;  %v918_v41 = vmul.f32 %v6983_v52, %v7805_v37 }
 0x178   : > { %6994 = vrsqrt.f32 %v860_v38  ;;  %v830_v9 = vmul.f32 0.0625, %v794_v31  ;;  %v919_v56 = vmul.f32 %v6985_v58, %v7814_v59  ;;  %v993_v57 = vadd.f32 %v7895_v15, %v955_v0 }
 0x179   : > { %6996 = vrsqrt.f32 %v861_v53  ;;  %v1014_v42 = vpack.c.bf16 %v992_v40, %v991_v33  ;;  %v956_v21 = vmul.f32 %v7887_v60, %v918_v41  ;;  %v8009_v40 = vld [vmem:[%s10465_s5] ss:$0 sm:$0xff] }
 0x17a   : > { %v6987_v50 = vpop.eup %6986  ;;  %v862_v62 = vadd.f32 1e-05, %v830_v9  ;;  %v957_v63 = vmul.f32 %v7887_v60, %v919_v56 }
 0x17b   : > { %v6989_v55 = vpop.eup %6988  ;;  %6448 = vmatmul.mubr.msk.bf16.gmra.mrb[16].mxu0 %vm511_vm0, %v1014_v42  ;;  %v994_v12 = vadd.f32 %v7895_v15, %v956_v21  ;;  %v920_v37 = vmul.f32 %v6987_v50, %v7823_v61 }
 0x17c   : > { %6998 = vrsqrt.f32 %v862_v62  ;;  %v921_v59 = vmul.f32 %v6989_v55, %v7832_v1  ;;  %v995_v10 = vadd.f32 %v7895_v15, %v957_v63 }
 0x17d   : > { %v1015_v6 = vpack.c.bf16 %v994_v12, %v993_v57  ;;  %v958_v44 = vmul.f32 %v7887_v60, %v920_v37 }
 0x17e   : > { %v6991_v3 = vpop.eup %6990  ;;  %v959_v61 = vmul.f32 %v7887_v60, %v921_v59 }
 0x17f   : > { %v6993_v28 = vpop.eup %6992  ;;  %6451 = vmatprep.mubr.msk.bf16.mxu0 %vm511_vm0, %v1015_v6  ;;  %v996_v11 = vadd.f32 %v7895_v15, %v958_v44  ;;  %v922_v14 = vmul.f32 %v6991_v3, %v7835_v45 }
 0x180   : > { %v923_v16 = vmul.f32 %v6993_v28, %v7844_v5  ;;  %v997_v22 = vadd.f32 %v7895_v15, %v959_v61 }
 0x181   : > { %v1016_v25 = vpack.c.bf16 %v996_v11, %v995_v10  ;;  %v960_v1 = vmul.f32 %v7887_v60, %v922_v14 }
 0x182   : > { %v6995_v13 = vpop.eup %6994  ;;  %v961_v7 = vmul.f32 %v7887_v60, %v923_v16 }
 0x183   : > { %v6997_v34 = vpop.eup %6996  ;;  %6452 = vmatmul.mubr.msk.bf16.gmra.mrb[20].mxu0 %vm511_vm0, %v1016_v25  ;;  %v998_v19 = vadd.f32 %v7895_v15, %v960_v1  ;;  %v924_v32 = vmul.f32 %v6995_v13, %v7847_v49 }
 0x184   : > { %v925_v45 = vmul.f32 %v6997_v34, %v7856_v54  ;;  %v999_v30 = vadd.f32 %v7895_v15, %v961_v7 }
 0x185   : > { %v1017_v26 = vpack.c.bf16 %v998_v19, %v997_v22  ;;  %v962_v5 = vmul.f32 %v7887_v60, %v924_v32 }
 0x186   : > { %v6999_v27 = vpop.eup %6998  ;;  %v963_v20 = vmul.f32 %v7887_v60, %v925_v45 }
 0x187   : > { %6455 = vmatprep.mubr.msk.bf16.mxu0 %vm511_vm0, %v1017_v26  ;;  %v1000_v18 = vadd.f32 %v7895_v15, %v962_v5  ;;  %v926_v48 = vmul.f32 %v6999_v27, %v7860_v24 }
 0x188   : > { %v1001_v54 = vadd.f32 %v7895_v15, %v963_v20 }
 0x189   : > { %v1018_v39 = vpack.c.bf16 %v1000_v18, %v999_v30  ;;  %v964_v49 = vmul.f32 %v7887_v60, %v926_v48 }
 0x18b   : > { %6456 = vmatmul.mubr.msk.bf16.gmra.mrb[24].mxu0 %vm511_vm0, %v1018_v39  ;;  %v1002_v35 = vadd.f32 %v7895_v15, %v964_v49 }
 0x18d   : > { %v1019_v29 = vpack.c.bf16 %v1002_v35, %v1001_v54 }
 0x18f   : > { %6459 = vmatprep.mubr.msk.bf16.mxu0 %vm511_vm0, %v1019_v29 }
 0x1d4   : > { %v797_v36 = vpop.xlane.xlu0 %796 }
 0x1d5   : > { %v831_v43 = vmul.f32 0.0625, %v797_v36 }
 0x1d7   : > { %v863_v23 = vadd.f32 1e-05, %v831_v43 }
 0x1d8   : > { %v800_v17 = vpop.xlane.xlu1 %799 }
 0x1d9   : > { %7000 = vrsqrt.f32 %v863_v23  ;;  %v832_v24 = vmul.f32 0.0625, %v800_v17 }
 0x1db   : > { %v864_v46 = vadd.f32 1e-05, %v832_v24 }
 0x1dd   : > { %7002 = vrsqrt.f32 %v864_v46 }
 0x1e3   : > { %v7001_v51 = vpop.eup %7000 }
 0x1e4   : > { %v927_v4 = vmul.f32 %v7001_v51, %v7873_v2 }
 0x1e6   : > { %v965_v38 = vmul.f32 %v7887_v60, %v927_v4 }
 0x1e7   : > { %v7003_v8 = vpop.eup %7002 }
 0x1e8   : > { %v928_v52 = vmul.f32 %v7003_v8, %v7878_v47  ;;  %v1003_v58 = vadd.f32 %v7895_v15, %v965_v38 }
 0x1ea   : > { %v966_v53 = vmul.f32 %v7887_v60, %v928_v52 }
 0x1ec   : > { %v1004_v31 = vadd.f32 %v7895_v15, %v966_v53 }
 0x1ee   : > { %v1020_v33 = vpack.c.bf16 %v1004_v31, %v1003_v58 }
 0x1f0   : > { %6460 = vmatmul.mubr.msk.bf16.gmra.mrb[28].mxu0 %vm511_vm0, %v1020_v33 }
 0x22a   : > { %v6433_v2 = vpop.f32.mrb[0].mxu0 }
 0x22b   : > { %v1122_v41 = vadd.f32 %v6433_v2, %v8009_v40  ;;  %v1113_v47 = vpop.f32.mrb[1].mxu0 }
 0x22c   : > { %v1114_v0 = vadd.f32 %v8009_v40, %v1113_v47  ;;  %v6434_v9 = vpop.f32.mrb[2].mxu0 }
 0x22d   : > { %v1125_v60 = vadd.f32 %v6434_v9, %v8009_v40  ;;  %v1116_v56 = vpop.f32.mrb[3].mxu0  ;;  %v1252_v42 = vmul.f32 0.35355338, %v1122_v41 }
 0x22e   : > { %v1117_v15 = vadd.f32 %v8009_v40, %v1116_v56  ;;  %v1250_v62 = vmul.f32 0.35355338, %v1114_v0 }
 0x22f   : > { %v1253_v21 = vmul.f32 0.35355338, %v1125_v60  ;;  %v8015_v50 = vpack.c.bf16 %v1125_v60, %v1122_v41 }
 0x230   : > { %v1251_v55 = vmul.f32 0.35355338, %v1117_v15  ;;  %v8017_v57 = vpack.c.bf16 %v1117_v15, %v1114_v0 }
 0x231   : > { %v8019_v12 = vpack.c.bf16 %v1253_v21, %v1252_v42  ;;  %1318 = vrot.lane.b32.xlu1 %v8015_v50, %s7428_s17 }
 0x232   : > { %1316 = vrot.lane.b32.xlu0 %v8017_v57, %s7428_s17  ;;  %v8025_v37 = vpack.c.bf16 %v1251_v55, %v1250_v62 }
 0x234   : > { %6467 = vmatprep.mubr.msk.bf16.mxu1 %vm1320_vm1, %v8025_v37 }
 0x236   : > { %v6437_v63 = vpop.f32.mrb[4].mxu0 }
 0x237   : > { %v1138_v59 = vadd.f32 %v6437_v63, %v8009_v40  ;;  %v1129_v6 = vpop.f32.mrb[5].mxu0 }
 0x238   : > { %v1130_v44 = vadd.f32 %v8009_v40, %v1129_v6  ;;  %v6438_v3 = vpop.f32.mrb[6].mxu0 }
 0x239   : > { %v1141_v28 = vadd.f32 %v6438_v3, %v8009_v40  ;;  %v1132_v10 = vpop.f32.mrb[7].mxu0  ;;  %v1256_v14 = vmul.f32 0.35355338, %v1138_v59 }
 0x23a   : > { %v1133_v11 = vadd.f32 %v8009_v40, %v1132_v10  ;;  %v1254_v25 = vmul.f32 0.35355338, %v1130_v44 }
 0x23b   : > { %v1257_v61 = vmul.f32 0.35355338, %v1141_v28  ;;  %v8033_v16 = vpack.c.bf16 %v1141_v28, %v1138_v59 }
 0x23c   : > { %v1255_v1 = vmul.f32 0.35355338, %v1133_v11  ;;  %v8035_v13 = vpack.c.bf16 %v1133_v11, %v1130_v44 }
 0x23d   : > { %v8037_v34 = vpack.c.bf16 %v1257_v61, %v1256_v14 }
 0x23e   : > { %v8039_v22 = vpack.c.bf16 %v1255_v1, %v1254_v25  ;;  %1384 = vrot.lane.b32.xlu1 %v8035_v13, %s7428_s17  ;;  %v6441_v19 = vpop.f32.mrb[8].mxu0 }
 0x23f   : > { %v1154_v32 = vadd.f32 %v6441_v19, %v8009_v40  ;;  %v1145_v7 = vpop.f32.mrb[9].mxu0 }
 0x240   : > { %v1146_v45 = vadd.f32 %v8009_v40, %v1145_v7  ;;  %v6442_v26 = vpop.f32.mrb[10].mxu0 }
 0x241   : > { %v1157_v5 = vadd.f32 %v6442_v26, %v8009_v40  ;;  %v1148_v27 = vpop.f32.mrb[11].mxu0  ;;  %v1260_v18 = vmul.f32 0.35355338, %v1154_v32 }
 0x242   : > { %v1149_v30 = vadd.f32 %v8009_v40, %v1148_v27  ;;  %1386 = vrot.lane.b32.xlu1 %v8033_v16, %s7428_s17  ;;  %v1258_v39 = vmul.f32 0.35355338, %v1146_v45 }
 0x243   : > { %v1261_v48 = vmul.f32 0.35355338, %v1157_v5  ;;  %v8049_v20 = vpack.c.bf16 %v1157_v5, %v1154_v32 }
 0x244   : > { %v1259_v49 = vmul.f32 0.35355338, %v1149_v30  ;;  %v8051_v54 = vpack.c.bf16 %v1149_v30, %v1146_v45 }
 0x245   : > { %v8053_v35 = vpack.c.bf16 %v1261_v48, %v1260_v18 }
 0x246   : > { %v8055_v29 = vpack.c.bf16 %v1259_v49, %v1258_v39  ;;  %1453 = vrot.lane.b32.xlu1 %v8049_v20, %s7428_s17  ;;  %1451 = vrot.lane.b32.xlu0 %v8051_v54, %s7428_s17  ;;  %v6445_v36 = vpop.f32.mrb[12].mxu0 }
 0x247   : > { %10553 = vst [vmem:[#allocation2_spill] sm:$0xff] %v8053_v35  ;;  %v1170_v43 = vadd.f32 %v6445_v36, %v8009_v40  ;;  %v1161_v23 = vpop.f32.mrb[13].mxu0 }
 0x248   : > { %v1162_v17 = vadd.f32 %v8009_v40, %v1161_v23  ;;  %v6446_v24 = vpop.f32.mrb[14].mxu0 }
 0x249   : > { %v1173_v46 = vadd.f32 %v6446_v24, %v8009_v40  ;;  %v1164_v51 = vpop.f32.mrb[15].mxu0  ;;  %v1264_v8 = vmul.f32 0.35355338, %v1170_v43 }
 0x24a   : > { %v1165_v4 = vadd.f32 %v8009_v40, %v1164_v51  ;;  %v1262_v53 = vmul.f32 0.35355338, %v1162_v17 }
 0x24b   : > { %v1265_v52 = vmul.f32 0.35355338, %v1173_v46  ;;  %v8065_v38 = vpack.c.bf16 %v1173_v46, %v1170_v43 }
 0x24c   : > { %v1263_v58 = vmul.f32 0.35355338, %v1165_v4  ;;  %v8067_v31 = vpack.c.bf16 %v1165_v4, %v1162_v17 }
 0x24d   : > { %v8069_v33 = vpack.c.bf16 %v1265_v52, %v1264_v8  ;;  %1520 = vrot.lane.b32.xlu1 %v8065_v38, %s7428_s17 }
 0x24e   : > { %v8073_v2 = vpack.c.bf16 %v1263_v58, %v1262_v53  ;;  %1518 = vrot.lane.b32.xlu0 %v8067_v31, %s7428_s17  ;;  %v6449_v41 = vpop.f32.mrb[16].mxu0 }
 0x24f   : > { %10554 = vst [vmem:[#allocation3_spill] sm:$0xff] %v8069_v33  ;;  %v1186_v47 = vadd.f32 %v6449_v41, %v8009_v40  ;;  %v1177_v0 = vpop.f32.mrb[17].mxu0 }
 0x250   : > { %10555 = vst [vmem:[#allocation4_spill] sm:$0xff] %v8073_v2  ;;  %v1178_v9 = vadd.f32 %v8009_v40, %v1177_v0  ;;  %v6450_v60 = vpop.f32.mrb[18].mxu0 }
 0x251   : > { %v1189_v56 = vadd.f32 %v6450_v60, %v8009_v40  ;;  %v1180_v15 = vpop.f32.mrb[19].mxu0  ;;  %v1268_v21 = vmul.f32 0.35355338, %v1186_v47 }
 0x252   : > { %v1181_v42 = vadd.f32 %v8009_v40, %v1180_v15  ;;  %v1266_v63 = vmul.f32 0.35355338, %v1178_v9 }
 0x253   : > { %v1269_v62 = vmul.f32 0.35355338, %v1189_v56  ;;  %v8081_v55 = vpack.c.bf16 %v1189_v56, %v1186_v47 }
 0x254   : > { %v1267_v59 = vmul.f32 0.35355338, %v1181_v42  ;;  %v8083_v6 = vpack.c.bf16 %v1181_v42, %v1178_v9 }
 0x255   : > { %10556 = vst [vmem:[#allocation5_spill] sm:$0xff] %v8081_v55  ;;  %v8085_v44 = vpack.c.bf16 %v1269_v62, %v1268_v21  ;;  %1587 = vrot.lane.b32.xlu1 %v8081_v55, %s7428_s17 }
 0x256   : > { %10557 = vst [vmem:[#allocation6_spill] sm:$0xff] %v8083_v6  ;;  %v8089_v3 = vpack.c.bf16 %v1267_v59, %v1266_v63  ;;  %1585 = vrot.lane.b32.xlu0 %v8083_v6, %s7428_s17  ;;  %v6453_v28 = vpop.f32.mrb[20].mxu0 }
 0x257   : > { %10558 = vst [vmem:[#allocation7_spill] sm:$0xff] %v8085_v44  ;;  %v1202_v10 = vadd.f32 %v6453_v28, %v8009_v40  ;;  %v1193_v11 = vpop.f32.mrb[21].mxu0 }
 0x258   : > { %10559 = vst [vmem:[#allocation8_spill] sm:$0xff] %v8089_v3  ;;  %v1194_v14 = vadd.f32 %v8009_v40, %v1193_v11  ;;  %v6454_v61 = vpop.f32.mrb[22].mxu0  ;;  %6499 = vmatprep.mubr.msk.bf16.mxu0 %vm1320_vm1, %v8089_v3 }
 0x259   : > { %v1205_v25 = vadd.f32 %v6454_v61, %v8009_v40  ;;  %v1196_v1 = vpop.f32.mrb[23].mxu0  ;;  %v1272_v32 = vmul.f32 0.35355338, %v1202_v10 }
 0x25a   : > { %v1197_v19 = vadd.f32 %v8009_v40, %v1196_v1  ;;  %v1270_v26 = vmul.f32 0.35355338, %v1194_v14 }
 0x25b   : > { %v1273_v7 = vmul.f32 0.35355338, %v1205_v25  ;;  %v8099_v45 = vpack.c.bf16 %v1205_v25, %v1202_v10 }
 0x25c   : > { %v1271_v5 = vmul.f32 0.35355338, %v1197_v19  ;;  %v8101_v27 = vpack.c.bf16 %v1197_v19, %v1194_v14 }
 0x25d   : > { %10560 = vst [vmem:[#allocation9_spill] sm:$0xff] %v8099_v45  ;;  %v8103_v30 = vpack.c.bf16 %v1273_v7, %v1272_v32  ;;  %1654 = vrot.lane.b32.xlu1 %v8099_v45, %s7428_s17 }
 0x25e   : > { %10561 = vst [vmem:[#allocation10_spill] sm:$0xff] %v8101_v27  ;;  %v8107_v18 = vpack.c.bf16 %v1271_v5, %v1270_v26  ;;  %1652 = vrot.lane.b32.xlu0 %v8101_v27, %s7428_s17  ;;  %v6457_v48 = vpop.f32.mrb[24].mxu0 }
 0x25f   : > { %10562 = vst [vmem:[#allocation11_spill] sm:$0xff] %v8103_v30  ;;  %v1218_v39 = vadd.f32 %v6457_v48, %v8009_v40  ;;  %v1209_v49 = vpop.f32.mrb[25].mxu0 }
 0x260   : > { %10563 = vst [vmem:[#allocation12_spill] sm:$0xff] %v8107_v18  ;;  %v1210_v36 = vadd.f32 %v8009_v40, %v1209_v49  ;;  %v6458_v43 = vpop.f32.mrb[26].mxu0 }
 0x261   : > { %v1221_v23 = vadd.f32 %v6458_v43, %v8009_v40  ;;  %v1212_v17 = vpop.f32.mrb[27].mxu0  ;;  %v1276_v46 = vmul.f32 0.35355338, %v1218_v39 }
 0x262   : > { %v1213_v24 = vadd.f32 %v8009_v40, %v1212_v17  ;;  %v1274_v8 = vmul.f32 0.35355338, %v1210_v36 }
 0x263   : > { %v1277_v51 = vmul.f32 0.35355338, %v1221_v23  ;;  %v8115_v4 = vpack.c.bf16 %v1221_v23, %v1218_v39 }
 0x264   : > { %v1275_v52 = vmul.f32 0.35355338, %v1213_v24  ;;  %v8117_v53 = vpack.c.bf16 %v1213_v24, %v1210_v36 }
 0x265   : > { %10564 = vst [vmem:[#allocation13_spill] sm:$0xff] %v8115_v4  ;;  %v8119_v58 = vpack.c.bf16 %v1277_v51, %v1276_v46  ;;  %1721 = vrot.lane.b32.xlu1 %v8115_v4, %s7428_s17 }
 0x266   : > { %10565 = vst [vmem:[#allocation14_spill] sm:$0xff] %v8117_v53  ;;  %v8123_v41 = vpack.c.bf16 %v1275_v52, %v1274_v8  ;;  %1719 = vrot.lane.b32.xlu0 %v8117_v53, %s7428_s17 }
 0x267   : > { %10566 = vst [vmem:[#allocation15_spill] sm:$0xff] %v8119_v58 }
 0x268   : > { %10567 = vst [vmem:[#allocation16_spill] sm:$0xff] %v8123_v41 }
 0x2a3   : > { %v1319_v9 = vpop.permute.xlu1 %1318 }
 0x2a4   : > { %v1317_v47 = vpop.permute.xlu0 %1316  ;;  %v1331_v60 = vsel %vm1320_vm1, %v1319_v9, 0 }
 0x2a5   : > { %6893 = vmatprep.subr.msk.bf16.mxu1 %vm1320_vm1, %v1317_v47  ;;  %v1328_v0 = vsel %vm1320_vm1, %v1317_v47, 0 }
 0x2a6   : > { %6464 = vmatpush3.bf16.xpose.msra.mxu1 %v1328_v0 }
 0x2a7   : > { %6894 = vmatprep.subr.msk.bf16.mxu1 %vm1320_vm1, %v1319_v9 }
 0x2ae   : > { %6466 = vmatpush3.bf16.xpose.msra.mxu1 %v1331_v60 }
 0x2b0   : > { %v1385_v56 = vpop.permute.xlu1 %1384 }
 0x2b1   : > { %6895 = vmatprep.subr.msk.bf16.mxu1 %vm1320_vm1, %v1385_v56  ;;  %v1395_v15 = vsel %vm1320_vm1, %v1385_v56, 0 }
 0x2b4   : > { %v1387_v42 = vpop.permute.xlu1 %1386 }
 0x2b5   : > { %6468 = vmatmul.mubr.msk.bf16.vlgmr.msra.gmra.mrb[0].mxu1 %vm1320_vm1, %v8019_v12  ;;  %v1398_v21 = vsel %vm1320_vm1, %v1387_v42, 0 }
 0x2b6   : > { %6472 = vmatpush3.bf16.xpose.msra.mxu1 %v1395_v15  ;;  %6475 = vmatprep.mubr.msk.bf16.mxu1 %vm1320_vm1, %v8039_v22 }
 0x2b7   : > { %6896 = vmatprep.subr.msk.bf16.mxu1 %vm1320_vm1, %v1387_v42 }
 0x2b8   : > { %v1452_v62 = vpop.permute.xlu0 %1451  ;;  %v1454_v63 = vpop.permute.xlu1 %1453 }
 0x2b9   : > { %v1462_v25 = vsel %vm1320_vm1, %v1452_v62, 0  ;;  %v1465_v46 = vsel %vm1320_vm1, %v1454_v63, 0 }
 0x2be   : > { %6474 = vmatpush3.bf16.xpose.msra.mxu1 %v1398_v21 }
 0x2bf   : > { %6897 = vmatprep.subr.msk.bf16.mxu1 %vm1320_vm1, %v1452_v62  ;;  %v1521_v1 = vpop.permute.xlu1 %1520 }
 0x2c0   : > { %v1519_v28 = vpop.permute.xlu0 %1518  ;;  %v1532_v56 = vsel %vm1320_vm1, %v1521_v1, 0 }
 0x2c1   : > { %v1529_v52 = vsel %vm1320_vm1, %v1519_v28, 0 }
 0x2c3   : > { %v6461_v59 = vpop.f32.mrb[28].mxu0 }
 0x2c4   : > { %v1234_v10 = vadd.f32 %v6461_v59, %v8009_v40  ;;  %v1225_v11 = vpop.f32.mrb[29].mxu0 }
 0x2c5   : > { %v1226_v14 = vadd.f32 %v8009_v40, %v1225_v11  ;;  %v6462_v61 = vpop.f32.mrb[30].mxu0  ;;  %6476 = vmatmul.mubr.msk.bf16.vlgmr.msra.gmra.mrb[4].mxu1 %vm1320_vm1, %v8037_v34 }
 0x2c6   : > { %v1237_v19 = vadd.f32 %v6462_v61, %v8009_v40  ;;  %v1228_v32 = vpop.f32.mrb[31].mxu0  ;;  %6480 = vmatpush3.bf16.xpose.msra.mxu1 %v1462_v25  ;;  %6483 = vmatprep.mubr.msk.bf16.mxu1 %vm1320_vm1, %v8055_v29  ;;  %v1280_v26 = vmul.f32 0.35355338, %v1234_v10 }
 0x2c7   : > { %v1229_v7 = vadd.f32 %v8009_v40, %v1228_v32  ;;  %6898 = vmatprep.subr.msk.bf16.mxu1 %vm1320_vm1, %v1454_v63  ;;  %v1278_v49 = vmul.f32 0.35355338, %v1226_v14  ;;  %v1588_v24 = vpop.permute.xlu1 %1587 }
 0x2c8   : > { %v1281_v5 = vmul.f32 0.35355338, %v1237_v19  ;;  %v8150_v48 = vpack.c.bf16 %v1237_v19, %v1234_v10  ;;  %v1586_v39 = vpop.permute.xlu0 %1585  ;;  %v1599_v51 = vsel %vm1320_vm1, %v1588_v24, 0  ;;  %v8244_v19 = vld [vmem:[%s10461_s1 + $0x10] sm:$0xff] }
 0x2c9   : > { %v1279_v36 = vmul.f32 0.35355338, %v1229_v7  ;;  %v8152_v43 = vpack.c.bf16 %v1229_v7, %v1226_v14  ;;  %6901 = vmatprep.subr.msk.bf16.mxu0 %vm1320_vm1, %v1586_v39  ;;  %v1596_v23 = vsel %vm1320_vm1, %v1586_v39, 0  ;;  %v8249_v7 = vld [vmem:[%s10461_s1] sm:$0xff]  ;;  %v8257_v39 = vld [vmem:[%s10461_s1 + $0x8] sm:$0xff] }
 0x2ca   : > { %10568 = vst [vmem:[#allocation17_spill] sm:$0xff] %v8150_v48  ;;  %v8156_v17 = vpack.c.bf16 %v1281_v5, %v1280_v26  ;;  %1788 = vrot.lane.b32.xlu1 %v8150_v48, %s7428_s17  ;;  %6496 = vmatpush3.bf16.xpose.msra.mxu0 %v1596_v23 }
 0x2cb   : > { %10569 = vst [vmem:[#allocation18_spill] sm:$0xff] %v8152_v43  ;;  %v8160_v40 = vpack.c.bf16 %v1279_v36, %v1278_v49  ;;  %1786 = vrot.lane.b32.xlu0 %v8152_v43, %s7428_s17  ;;  %6902 = vmatprep.subr.msk.bf16.mxu0 %vm1320_vm1, %v1588_v24  ;;  %s7432_s17 = smov 88  }
 0x2cc   : > { %10570 = vst [vmem:[#allocation19_spill] sm:$0xff] %v8156_v17 }
 0x2cd   : > { %10571 = vst [vmem:[#allocation20_spill] sm:$0xff] %v8160_v40 }
 0x2ce   : > { %2222 = vrot.lane.b32.xlu1 %v8015_v50, %s7429_s18  ;;  %6482 = vmatpush3.bf16.xpose.msra.mxu1 %v1465_v46  ;;  %v8267_v46 = vld [vmem:[%s10461_s1 + $0x18] sm:$0xff] }
 0x2cf   : > { %2220 = vrot.lane.b32.xlu0 %v8017_v57, %s7429_s18  ;;  %6899 = vmatprep.subr.msk.bf16.mxu1 %vm1320_vm1, %v1519_v28  ;;  %v1655_v47 = vpop.permute.xlu1 %1654 }
 0x2d0   : > { %v1653_v8 = vpop.permute.xlu0 %1652  ;;  %v1666_v21 = vsel %vm1320_vm1, %v1655_v47, 0 }
 0x2d1   : > { %v1663_v42 = vsel %vm1320_vm1, %v1653_v8, 0 }
 0x2d2   : > { %2342 = vrot.lane.b32.xlu1 %v8051_v54, %s7429_s18  ;;  %6498 = vmatpush3.bf16.xpose.msra.mxu0 %v1599_v51 }
 0x2d3   : > { %2281 = vrot.lane.b32.xlu0 %v8035_v13, %s7429_s18 }
 0x2d5   : > { %6484 = vmatmul.mubr.msk.bf16.vlgmr.msra.gmra.mrb[8].mxu1 %vm1320_vm1, %v8053_v35 }
 0x2d6   : > { %2344 = vrot.lane.b32.xlu1 %v8049_v20, %s7429_s18  ;;  %6488 = vmatpush3.bf16.xpose.msra.mxu1 %v1529_v52 }
 0x2d7   : > { %6491 = vmatprep.mubr.msk.bf16.mxu1 %vm1320_vm1, %v8073_v2  ;;  %2283 = vrot.lane.b32.xlu0 %v8033_v16, %s7429_s18  ;;  %v1722_v60 = vpop.permute.xlu1 %1721 }
 0x2d8   : > { %6900 = vmatprep.subr.msk.bf16.mxu1 %vm1320_vm1, %v1521_v1  ;;  %v1720_v0 = vpop.permute.xlu0 %1719  ;;  %v1733_v15 = vsel %vm1320_vm1, %v1722_v60, 0 }
 0x2d9   : > { %6500 = vmatmul.mubr.msk.bf16.vlgmr.msra.gmra.mrb[32].mxu0 %vm1320_vm1, %v8085_v44  ;;  %6905 = vmatprep.subr.msk.bf16.mxu0 %vm1320_vm1, %v1720_v0  ;;  %v1730_v9 = vsel %vm1320_vm1, %v1720_v0, 0 }
 0x2da   : > { %2464 = vrot.lane.b32.xlu1 %v8083_v6, %s7429_s18  ;;  %6512 = vmatpush3.bf16.xpose.msra.mxu0 %v1730_v9 }
 0x2db   : > { %6515 = vmatprep.mubr.msk.bf16.mxu0 %vm1320_vm1, %v8123_v41  ;;  %2403 = vrot.lane.b32.xlu0 %v8067_v31, %s7429_s18 }
 0x2dc   : > { %6906 = vmatprep.subr.msk.bf16.mxu0 %vm1320_vm1, %v1722_v60 }
 0x2de   : > { %2466 = vrot.lane.b32.xlu1 %v8081_v55, %s7429_s18  ;;  %6490 = vmatpush3.bf16.xpose.msra.mxu1 %v1532_v56 }
 0x2df   : > { %2405 = vrot.lane.b32.xlu0 %v8065_v38, %s7429_s18  ;;  %6903 = vmatprep.subr.msk.bf16.mxu1 %vm1320_vm1, %v1653_v8 }
 0x2e2   : > { %2588 = vrot.lane.b32.xlu1 %v8115_v4, %s7429_s18  ;;  %6514 = vmatpush3.bf16.xpose.msra.mxu0 %v1733_v15 }
 0x2e3   : > { %2525 = vrot.lane.b32.xlu0 %v8101_v27, %s7429_s18 }
 0x2e5   : > { %6492 = vmatmul.mubr.msk.bf16.vlgmr.msra.gmra.mrb[12].mxu1 %vm1320_vm1, %v8069_v33 }
 0x2e6   : > { %2649 = vrot.lane.b32.xlu1 %v8150_v48, %s7429_s18  ;;  %6504 = vmatpush3.bf16.xpose.msra.mxu1 %v1663_v42 }
 0x2e7   : > { %6507 = vmatprep.mubr.msk.bf16.mxu1 %vm1320_vm1, %v8107_v18  ;;  %2586 = vrot.lane.b32.xlu0 %v8117_v53, %s7429_s18 }
 0x2e8   : > { %6904 = vmatprep.subr.msk.bf16.mxu1 %vm1320_vm1, %v1655_v47 }
 0x2e9   : > { %6516 = vmatmul.mubr.msk.bf16.vlgmr.msra.gmra.mrb[36].mxu0 %vm1320_vm1, %v8119_v58 }
 0x2eb   : > { %2527 = vrot.lane.b32.xlu0 %v8099_v45, %s7429_s18 }
 0x2ee   : > { %6506 = vmatpush3.bf16.xpose.msra.mxu1 %v1666_v21 }
 0x2ef   : > { %2647 = vrot.lane.b32.xlu0 %v8152_v43, %s7429_s18 }
 0x2f5   : > { %6508 = vmatmul.mubr.msk.bf16.vlgmr.msra.gmra.mrb[16].mxu1 %vm1320_vm1, %v8103_v30 }
 0x2f6   : > { %6523 = vmatprep.mubr.msk.bf16.mxu1 %vm1320_vm1, %v8160_v40 }
 0x33c   : > { %v1789_v62 = vpop.permute.xlu1 %1788 }
 0x33d   : > { %v1787_v63 = vpop.permute.xlu0 %1786  ;;  %v1800_v11 = vsel %vm1320_vm1, %v1789_v62, 0 }
 0x33e   : > { %6907 = vmatprep.subr.msk.bf16.mxu1 %vm1320_vm1, %v1787_v63  ;;  %v1797_v59 = vsel %vm1320_vm1, %v1787_v63, 0 }
 0x33f   : > { %6520 = vmatpush3.bf16.xpose.msra.mxu1 %v1797_v59 }
 0x340   : > { %6908 = vmatprep.subr.msk.bf16.mxu1 %vm1320_vm1, %v1789_v62  ;;  %v2223_v28 = vpop.permute.xlu1 %2222 }
 0x341   : > { %v2221_v10 = vpop.permute.xlu0 %2220 }
 0x342   : > { %6527 = vmatprep.subr.bf16.mxu0 %v2221_v10 }
 0x343   : > { %6528 = vmatpush3.bf16.msra.mxu0 %v2221_v10 }
 0x344   : > { %6529 = vmatprep.subr.bf16.mxu0 %v2223_v28  ;;  %v2343_v14 = vpop.permute.xlu1 %2342 }
 0x345   : > { %v8233_v61 = vpop.permute.xlu0 %2281 }
 0x347   : > { %6522 = vmatpush3.bf16.xpose.msra.mxu1 %v1800_v11  ;;  %6530 = vmatpush3.bf16.msra.mxu0 %v2223_v28 }
 0x348   : > { %6535 = vmatprep.subr.bf16.mxu0 %v8233_v61  ;;  %6543 = vmatprep.subr.bf16.mxu1 %v2343_v14  ;;  %v2345_v25 = vpop.permute.xlu1 %2344 }
 0x34c   : > { %v8238_v1 = vpop.permute.xlu1 %2464 }
 0x34d   : > { %10572 = vst [vmem:[#allocation21_spill] sm:$0xff] %v8238_v1 }
 0x34e   : > { %6524 = vmatmul.mubr.msk.bf16.vlgmr.msra.gmra.mrb[20].mxu1 %vm1320_vm1, %v8156_v17 }
 0x34f   : > { %6544 = vmatpush3.bf16.msra.mxu1 %v2343_v14 }
 0x350   : > { %6545 = vmatprep.subr.bf16.mxu1 %v2345_v25  ;;  %v8411_v44 = vpop.permute.xlu1 %2466 }
 0x351   : > { %10574 = vst [vmem:[#allocation23_spill] sm:$0xff] %v8411_v44 }
 0x353   : > { %6546 = vmatpush3.bf16.msra.mxu1 %v2345_v25 }
 0x354   : > { %6559 = vmatprep.subr.bf16.mxu1 %v8238_v1  ;;  %v8415_v45 = vpop.permute.xlu1 %2588 }
 0x355   : > { %10576 = vst [vmem:[#allocation25_spill] sm:$0xff] %v8415_v45 }
 0x358   : > { %v8419_v27 = vpop.permute.xlu1 %2649 }
 0x359   : > { %10578 = vst [vmem:[#allocation27_spill] sm:$0xff] %v8419_v27 }
 0x388   : > { %v6469_v32 = vpop.f32.mrb[0].mxu1 }
 0x389   : > { %v8252_v26 = vadd.f32 %v6469_v32, %v8244_v19  ;;  %v1367_v5 = vpop.f32.mrb[1].mxu1 }
 0x38a   : > { %v6470_v49 = vpop.f32.mrb[2].mxu1  ;;  %v8260_v36 = vadd.f32 %v1367_v5, %v8249_v7 }
 0x38b   : > { %v1370_v23 = vpop.f32.mrb[3].mxu1  ;;  %v1858_v24 = vsel %vm1851_vm2, %v8252_v26, -inf  ;;  %v8275_v52 = vadd.f32 %v6470_v49, %v8267_v46 }
 0x38c   : > { %v8270_v51 = vadd.f32 %v1370_v23, %v8257_v39  ;;  %1859 = vmax.xlane.f32.xlu0 %v1858_v24  ;;  %v1852_v47 = vsel %vm1851_vm2, %v8260_v36, -inf }
 0x38d   : > { %v1861_v0 = vsel %vm1851_vm2, %v8275_v52, -inf }
 0x38e   : > { %v1855_v8 = vsel %vm1851_vm2, %v8270_v51, -inf }
 0x38f   : > { %1856 = vmax.xlane.f32.xlu1 %v1855_v8 }
 0x390   : > { %1853 = vmax.xlane.f32.xlu0 %v1852_v47 }
 0x394   : > { %1862 = vmax.xlane.f32.xlu0 %v1861_v0 }
 0x398   : > { %v6477_v9 = vpop.f32.mrb[4].mxu1 }
 0x399   : > { %v8282_v60 = vadd.f32 %v6477_v9, %v8244_v19  ;;  %v1434_v56 = vpop.f32.mrb[5].mxu1 }
 0x39a   : > { %v6478_v15 = vpop.f32.mrb[6].mxu1  ;;  %v8285_v42 = vadd.f32 %v1434_v56, %v8249_v7 }
 0x39b   : > { %v8288_v21 = vadd.f32 %v6478_v15, %v8267_v46  ;;  %v1437_v62 = vpop.f32.mrb[7].mxu1  ;;  %v1870_v63 = vsel %vm1851_vm2, %v8282_v60, -inf }
 0x39c   : > { %1871 = vmax.xlane.f32.xlu0 %v1870_v63  ;;  %v8293_v59 = vadd.f32 %v1437_v62, %v8257_v39  ;;  %v1864_v10 = vsel %vm1851_vm2, %v8285_v42, -inf }
 0x39d   : > { %v1873_v28 = vsel %vm1851_vm2, %v8288_v21, -inf }
 0x39e   : > { %1874 = vmax.xlane.f32.xlu1 %v1873_v28  ;;  %v1867_v11 = vsel %vm1851_vm2, %v8293_v59, -inf }
 0x3a0   : > { %1865 = vmax.xlane.f32.xlu0 %v1864_v10 }
 0x3a2   : > { %1868 = vmax.xlane.f32.xlu1 %v1867_v11 }
 0x3a8   : > { %v6485_v14 = vpop.f32.mrb[8].mxu1 }
 0x3a9   : > { %v8302_v25 = vadd.f32 %v6485_v14, %v8244_v19  ;;  %v1501_v32 = vpop.f32.mrb[9].mxu1 }
 0x3aa   : > { %v6486_v5 = vpop.f32.mrb[10].mxu1  ;;  %v8315_v15 = vadd.f32 %v1501_v32, %v8249_v7 }
 0x3ab   : > { %v8305_v49 = vadd.f32 %v6486_v5, %v8267_v46  ;;  %v1504_v23 = vpop.f32.mrb[11].mxu1  ;;  %v1882_v24 = vsel %vm1851_vm2, %v8302_v25, -inf }
 0x3ac   : > { %1883 = vmax.xlane.f32.xlu0 %v1882_v24  ;;  %v6501_v8 = vpop.f32.mrb[32].mxu0  ;;  %v8323_v10 = vadd.f32 %v1504_v23, %v8257_v39  ;;  %v1876_v32 = vsel %vm1851_vm2, %v8315_v15, -inf }
 0x3ad   : > { %v8310_v47 = vadd.f32 %v6501_v8, %v8244_v19  ;;  %v1635_v0 = vpop.f32.mrb[33].mxu0  ;;  %v1885_v9 = vsel %vm1851_vm2, %v8305_v49, -inf }
 0x3ae   : > { %1886 = vmax.xlane.f32.xlu1 %v1885_v9  ;;  %v6502_v56 = vpop.f32.mrb[34].mxu0  ;;  %v8328_v14 = vadd.f32 %v1635_v0, %v8249_v7  ;;  %v1879_v24 = vsel %vm1851_vm2, %v8323_v10, -inf }
 0x3af   : > { %v8318_v62 = vadd.f32 %v6502_v56, %v8267_v46  ;;  %v1638_v63 = vpop.f32.mrb[35].mxu0  ;;  %v1906_v28 = vsel %vm1851_vm2, %v8310_v47, -inf }
 0x3b0   : > { %1907 = vmax.xlane.f32.xlu0 %v1906_v28  ;;  %v8333_v5 = vadd.f32 %v1638_v63, %v8257_v39  ;;  %v1900_v23 = vsel %vm1851_vm2, %v8328_v14, -inf }
 0x3b1   : > { %v1909_v11 = vsel %vm1851_vm2, %v8318_v62, -inf }
 0x3b2   : > { %1910 = vmax.xlane.f32.xlu1 %v1909_v11  ;;  %v1903_v56 = vsel %vm1851_vm2, %v8333_v5, -inf }
 0x3b4   : > { %1877 = vmax.xlane.f32.xlu0 %v1876_v32 }
 0x3b6   : > { %1880 = vmax.xlane.f32.xlu1 %v1879_v24 }
 0x3b8   : > { %v6493_v8 = vpop.f32.mrb[12].mxu1  ;;  %1901 = vmax.xlane.f32.xlu0 %v1900_v23 }
 0x3b9   : > { %v8340_v9 = vadd.f32 %v6493_v8, %v8244_v19  ;;  %v1568_v0 = vpop.f32.mrb[13].mxu1 }
 0x3ba   : > { %v6494_v28 = vpop.f32.mrb[14].mxu1  ;;  %1904 = vmax.xlane.f32.xlu1 %v1903_v56  ;;  %v8355_v56 = vadd.f32 %v1568_v0, %v8249_v7 }
 0x3bb   : > { %v8345_v63 = vadd.f32 %v6494_v28, %v8267_v46  ;;  %v1571_v11 = vpop.f32.mrb[15].mxu1  ;;  %v1894_v32 = vsel %vm1851_vm2, %v8340_v9, -inf }
 0x3bc   : > { %1895 = vmax.xlane.f32.xlu0 %v1894_v32  ;;  %v6517_v24 = vpop.f32.mrb[36].mxu0  ;;  %v1888_v0 = vsel %vm1851_vm2, %v8355_v56, -inf }
 0x3bd   : > { %v8350_v23 = vadd.f32 %v6517_v24, %v8244_v19  ;;  %v1769_v8 = vpop.f32.mrb[37].mxu0  ;;  %v1897_v40 = vsel %vm1851_vm2, %v8345_v63, -inf  ;;  %v8363_v24 = vadd.f32 %v1571_v11, %v8257_v39 }
 0x3be   : > { %1898 = vmax.xlane.f32.xlu1 %v1897_v40  ;;  %v6518_v17 = vpop.f32.mrb[38].mxu0  ;;  %v8368_v40 = vadd.f32 %v1769_v8, %v8249_v7 }
 0x3bf   : > { %v8358_v28 = vadd.f32 %v6518_v17, %v8267_v46  ;;  %v1772_v58 = vpop.f32.mrb[39].mxu0  ;;  %v1930_v32 = vsel %vm1851_vm2, %v8350_v23, -inf }
 0x3c0   : > { %1931 = vmax.xlane.f32.xlu0 %v1930_v32  ;;  %v8373_v17 = vadd.f32 %v1772_v58, %v8257_v39  ;;  %v1891_v32 = vsel %vm1851_vm2, %v8363_v24, -inf  ;;  %v1924_v11 = vsel %vm1851_vm2, %v8368_v40, -inf }
 0x3c1   : > { %v1933_v48 = vsel %vm1851_vm2, %v8358_v28, -inf }
 0x3c2   : > { %1934 = vmax.xlane.f32.xlu1 %v1933_v48  ;;  %v1927_v41 = vsel %vm1851_vm2, %v8373_v17, -inf }
 0x3c4   : > { %1889 = vmax.xlane.f32.xlu0 %v1888_v0 }
 0x3c6   : > { %1892 = vmax.xlane.f32.xlu1 %v1891_v32 }
 0x3c8   : > { %v6509_v43 = vpop.f32.mrb[16].mxu1  ;;  %1925 = vmax.xlane.f32.xlu0 %v1924_v11 }
 0x3c9   : > { %v8380_v48 = vadd.f32 %v6509_v43, %v8244_v19  ;;  %v1702_v8 = vpop.f32.mrb[17].mxu1 }
 0x3ca   : > { %v6510_v0 = vpop.f32.mrb[18].mxu1  ;;  %1928 = vmax.xlane.f32.xlu1 %v1927_v41  ;;  %v8385_v58 = vadd.f32 %v1702_v8, %v8249_v7 }
 0x3cb   : > { %v8388_v30 = vadd.f32 %v6510_v0, %v8267_v46  ;;  %v1705_v32 = vpop.f32.mrb[19].mxu1  ;;  %v1918_v4 = vsel %vm1851_vm2, %v8380_v48, -inf  ;;  %v8401_v0 = vpop.permute.xlu0 %2283 }
 0x3cc   : > { %1919 = vmax.xlane.f32.xlu0 %v1918_v4  ;;  %v8393_v43 = vadd.f32 %v1705_v32, %v8257_v39  ;;  %v1912_v41 = vsel %vm1851_vm2, %v8385_v58, -inf }
 0x3cd   : > { %v1921_v11 = vsel %vm1851_vm2, %v8388_v30, -inf }
 0x3ce   : > { %1922 = vmax.xlane.f32.xlu1 %v1921_v11  ;;  %v1915_v8 = vsel %vm1851_vm2, %v8393_v43, -inf }
 0x3cf   : > { %v8403_v53 = vpop.permute.xlu0 %2403 }
 0x3d0   : > { %1913 = vmax.xlane.f32.xlu0 %v1912_v41 }
 0x3d2   : > { %1916 = vmax.xlane.f32.xlu1 %v1915_v8 }
 0x3d3   : > { %v8405_v4 = vpop.permute.xlu0 %2405 }
 0x3d7   : > { %v8407_v32 = vpop.permute.xlu0 %2525 }
 0x3db   : > { %v8409_v18 = vpop.permute.xlu0 %2586 }
 0x3dc   : > { %10573 = vst [vmem:[#allocation22_spill] sm:$0xff] %v8409_v18 }
 0x3df   : > { %v8413_v11 = vpop.permute.xlu0 %2527 }
 0x3e0   : > { %10575 = vst [vmem:[#allocation24_spill] sm:$0xff] %v8413_v11 }
 0x3e3   : > { %v8417_v41 = vpop.permute.xlu0 %2647 }
 0x3e4   : > { %10577 = vst [vmem:[#allocation26_spill] sm:$0xff] %v8417_v41 }
 0x419   : > { %v1860_v8 = vpop.xlane.xlu0 %1859 }
 0x41a   : > { %v1950_v3 = vsub.f32 %v8252_v26, %v1860_v8 }
 0x41c   : > { %v1984_v33 = vmul.f32 1.442695, %v1950_v3  ;;  %v1857_v55 = vpop.xlane.xlu1 %1856 }
 0x41d   : > { %v1854_v6 = vpop.xlane.xlu0 %1853  ;;  %v1949_v18 = vsub.f32 %v8270_v51, %v1857_v55 }
 0x41e   : > { %v1948_v1 = vsub.f32 %v8260_v36, %v1854_v6  ;;  %7004 = vpow2.f32 %v1984_v33 }
 0x41f   : > { %v1982_v35 = vmul.f32 1.442695, %v1949_v18 }
 0x420   : > { %v1980_v44 = vmul.f32 1.442695, %v1948_v1 }
 0x421   : > { %v6525_v2 = vpop.f32.mrb[20].mxu1  ;;  %v1863_v11 = vpop.xlane.xlu0 %1862 }
 0x422   : > { %v8425_v45 = vadd.f32 %v6525_v2, %v8244_v19  ;;  %v1951_v41 = vsub.f32 %v8275_v52, %v1863_v11  ;;  %v1836_v27 = vpop.f32.mrb[21].mxu1  ;;  %7006 = vpow2.f32 %v1980_v44 }
 0x423   : > { %v6526_v26 = vpop.f32.mrb[22].mxu1  ;;  %v8429_v8 = vadd.f32 %v1836_v27, %v8249_v7 }
 0x424   : > { %v1986_v3 = vmul.f32 1.442695, %v1951_v41  ;;  %v8432_v33 = vadd.f32 %v6526_v26, %v8267_v46  ;;  %v1839_v55 = vpop.f32.mrb[23].mxu1  ;;  %v1942_v6 = vsel %vm1851_vm2, %v8425_v45, -inf }
 0x425   : > { %1943 = vmax.xlane.f32.xlu0 %v1942_v6  ;;  %v8437_v2 = vadd.f32 %v1839_v55, %v8257_v39  ;;  %v1936_v27 = vsel %vm1851_vm2, %v8429_v8, -inf }
 0x426   : > { %7008 = vpow2.f32 %v1986_v3  ;;  %v1945_v44 = vsel %vm1851_vm2, %v8432_v33, -inf }
 0x427   : > { %1946 = vmax.xlane.f32.xlu1 %v1945_v44  ;;  %7010 = vpow2.f32 %v1982_v35  ;;  %v1939_v7 = vsel %vm1851_vm2, %v8437_v2, -inf }
 0x428   : > { %v8443_v18 = vpop.eup %7004 }
 0x429   : > { %1937 = vmax.xlane.f32.xlu0 %v1936_v27  ;;  %v1872_v1 = vpop.xlane.xlu0 %1871  ;;  %v2050_v35 = vsel %vm1851_vm2, %v8443_v18, 0.0 }
 0x42a   : > { %v1954_v19 = vsub.f32 %v8282_v60, %v1872_v1 }
 0x42b   : > { %v1875_v36 = vpop.xlane.xlu1 %1874  ;;  %1940 = vmax.xlane.f32.xlu1 %v1939_v7 }
 0x42c   : > { %v1992_v39 = vmul.f32 1.442695, %v1954_v19  ;;  %v1955_v46 = vsub.f32 %v8288_v21, %v1875_v36  ;;  %v8451_v51 = vpop.eup %7006 }
 0x42d   : > { %2051 = vadd.xlane.f32.xlu0 %v2050_v35  ;;  %v1866_v52 = vpop.xlane.xlu0 %1865  ;;  %v2044_v21 = vsel %vm1851_vm2, %v8451_v51, 0.0 }
 0x42e   : > { %7012 = vpow2.f32 %v1992_v39  ;;  %v1994_v11 = vmul.f32 1.442695, %v1955_v46  ;;  %v1952_v41 = vsub.f32 %v8285_v42, %v1866_v52 }
 0x42f   : > { %v1869_v60 = vpop.xlane.xlu1 %1868 }
 0x430   : > { %v8454_v26 = vpop.eup %7008  ;;  %7014 = vpow2.f32 %v1994_v11  ;;  %v1988_v3 = vmul.f32 1.442695, %v1952_v41  ;;  %v1953_v55 = vsub.f32 %v8293_v59, %v1869_v60 }
 0x431   : > { %2045 = vadd.xlane.f32.xlu0 %v2044_v21  ;;  %v2053_v6 = vsel %vm1851_vm2, %v8454_v26, 0.0  ;;  %v8461_v44 = vpop.eup %7010 }
 0x432   : > { %7016 = vpow2.f32 %v1988_v3  ;;  %v1990_v27 = vmul.f32 1.442695, %v1953_v55  ;;  %2054 = vadd.xlane.f32.xlu1 %v2053_v6  ;;  %v2047_v42 = vsel %vm1851_vm2, %v8461_v44, 0.0 }
 0x434   : > { %7018 = vpow2.f32 %v1990_v27 }
 0x436   : > { %2048 = vadd.xlane.f32.xlu1 %v2047_v42 }
 0x438   : > { %v8465_v1 = vpop.eup %7012 }
 0x439   : > { %v1884_v59 = vpop.xlane.xlu0 %1883  ;;  %v2062_v19 = vsel %vm1851_vm2, %v8465_v1, 0.0 }
 0x43a   : > { %v8469_v7 = vpop.eup %7014  ;;  %v1958_v36 = vsub.f32 %v8302_v25, %v1884_v59  ;;  %2063 = vadd.xlane.f32.xlu0 %v2062_v19 }
 0x43b   : > { %v1887_v39 = vpop.xlane.xlu1 %1886  ;;  %v2065_v46 = vsel %vm1851_vm2, %v8469_v7, 0.0 }
 0x43c   : > { %v8474_v35 = vpop.eup %7016  ;;  %v2000_v52 = vmul.f32 1.442695, %v1958_v36  ;;  %v1959_v11 = vsub.f32 %v8305_v49, %v1887_v39  ;;  %2066 = vadd.xlane.f32.xlu1 %v2065_v46 }
 0x43d   : > { %v1908_v41 = vpop.xlane.xlu0 %1907  ;;  %v2056_v60 = vsel %vm1851_vm2, %v8474_v35, 0.0 }
 0x43e   : > { %v8479_v3 = vpop.eup %7018  ;;  %7020 = vpow2.f32 %v2000_v52  ;;  %v2002_v55 = vmul.f32 1.442695, %v1959_v11  ;;  %v1966_v25 = vsub.f32 %v8310_v47, %v1908_v41  ;;  %2057 = vadd.xlane.f32.xlu0 %v2056_v60 }
 0x43f   : > { %v1911_v21 = vpop.xlane.xlu1 %1910  ;;  %v2059_v6 = vsel %vm1851_vm2, %v8479_v3, 0.0 }
 0x440   : > { %7022 = vpow2.f32 %v2002_v55  ;;  %v2016_v27 = vmul.f32 1.442695, %v1966_v25  ;;  %v1967_v49 = vsub.f32 %v8318_v62, %v1911_v21  ;;  %2060 = vadd.xlane.f32.xlu1 %v2059_v6 }
 0x441   : > { %v1878_v42 = vpop.xlane.xlu0 %1877 }
 0x442   : > { %7024 = vpow2.f32 %v2016_v27  ;;  %v2018_v59 = vmul.f32 1.442695, %v1967_v49  ;;  %v1956_v19 = vsub.f32 %v8315_v15, %v1878_v42 }
 0x443   : > { %v1881_v36 = vpop.xlane.xlu1 %1880 }
 0x444   : > { %7026 = vpow2.f32 %v2018_v59  ;;  %v1996_v39 = vmul.f32 1.442695, %v1956_v19  ;;  %v1957_v47 = vsub.f32 %v8323_v10, %v1881_v36 }
 0x445   : > { %v1902_v46 = vpop.xlane.xlu0 %1901 }
 0x446   : > { %7028 = vpow2.f32 %v1996_v39  ;;  %v1998_v52 = vmul.f32 1.442695, %v1957_v47  ;;  %v1964_v11 = vsub.f32 %v8328_v14, %v1902_v46 }
 0x447   : > { %v1905_v41 = vpop.xlane.xlu1 %1904 }
 0x448   : > { %v8488_v60 = vpop.eup %7020  ;;  %7030 = vpow2.f32 %v1998_v52  ;;  %v2012_v62 = vmul.f32 1.442695, %v1964_v11  ;;  %v1965_v55 = vsub.f32 %v8333_v5, %v1905_v41 }
 0x449   : > { %v1896_v25 = vpop.xlane.xlu0 %1895  ;;  %v2074_v15 = vsel %vm1851_vm2, %v8488_v60, 0.0 }
 0x44a   : > { %v8493_v21 = vpop.eup %7022  ;;  %7032 = vpow2.f32 %v2012_v62  ;;  %v2014_v10 = vmul.f32 1.442695, %v1965_v55  ;;  %v1962_v6 = vsub.f32 %v8340_v9, %v1896_v25  ;;  %2075 = vadd.xlane.f32.xlu0 %v2074_v15 }
 0x44b   : > { %v1899_v27 = vpop.xlane.xlu1 %1898  ;;  %v2077_v14 = vsel %vm1851_vm2, %v8493_v21, 0.0 }
 0x44c   : > { %v8498_v49 = vpop.eup %7024  ;;  %7034 = vpow2.f32 %v2014_v10  ;;  %v2008_v42 = vmul.f32 1.442695, %v1962_v6  ;;  %v1963_v5 = vsub.f32 %v8345_v63, %v1899_v27  ;;  %2078 = vadd.xlane.f32.xlu1 %v2077_v14 }
 0x44d   : > { %v1932_v59 = vpop.xlane.xlu0 %1931  ;;  %v2098_v19 = vsel %vm1851_vm2, %v8498_v49, 0.0 }
 0x44e   : > { %v8503_v36 = vpop.eup %7026  ;;  %7036 = vpow2.f32 %v2008_v42  ;;  %v2010_v9 = vmul.f32 1.442695, %v1963_v5  ;;  %v1974_v39 = vsub.f32 %v8350_v23, %v1932_v59  ;;  %2099 = vadd.xlane.f32.xlu0 %v2098_v19 }
 0x44f   : > { %v1935_v47 = vpop.xlane.xlu1 %1934  ;;  %v2101_v46 = vsel %vm1851_vm2, %v8503_v36, 0.0 }
 0x450   : > { %v8508_v52 = vpop.eup %7028  ;;  %7038 = vpow2.f32 %v2010_v9  ;;  %v2032_v63 = vmul.f32 1.442695, %v1974_v39  ;;  %v1975_v11 = vsub.f32 %v8358_v28, %v1935_v47  ;;  %2102 = vadd.xlane.f32.xlu1 %v2101_v46 }
 0x451   : > { %v1890_v41 = vpop.xlane.xlu0 %1889  ;;  %v2068_v62 = vsel %vm1851_vm2, %v8508_v52, 0.0 }
 0x452   : > { %v8513_v55 = vpop.eup %7030  ;;  %7040 = vpow2.f32 %v2032_v63  ;;  %v2034_v23 = vmul.f32 1.442695, %v1975_v11  ;;  %v1960_v25 = vsub.f32 %v8355_v56, %v1890_v41  ;;  %2069 = vadd.xlane.f32.xlu0 %v2068_v62 }
 0x453   : > { %v1893_v15 = vpop.xlane.xlu1 %1892  ;;  %v2071_v10 = vsel %vm1851_vm2, %v8513_v55, 0.0 }
 0x454   : > { %v8518_v6 = vpop.eup %7032  ;;  %7042 = vpow2.f32 %v2034_v23  ;;  %v2004_v28 = vmul.f32 1.442695, %v1960_v25  ;;  %v1961_v27 = vsub.f32 %v8363_v24, %v1893_v15  ;;  %2072 = vadd.xlane.f32.xlu1 %v2071_v10 }
 0x455   : > { %v8521_v14 = vpop.xlane.xlu0 %1925  ;;  %v2092_v42 = vsel %vm1851_vm2, %v8518_v6, 0.0 }
 0x456   : > { %v8525_v5 = vpop.eup %7034  ;;  %7044 = vpow2.f32 %v2004_v28  ;;  %v2006_v56 = vmul.f32 1.442695, %v1961_v27  ;;  %2093 = vadd.xlane.f32.xlu0 %v2092_v42 }
 0x457   : > { %v1929_v59 = vpop.xlane.xlu1 %1928  ;;  %v2095_v19 = vsel %vm1851_vm2, %v8525_v5, 0.0 }
 0x458   : > { %v8529_v9 = vpop.eup %7036  ;;  %7046 = vpow2.f32 %v2006_v56  ;;  %v1973_v24 = vsub.f32 %v8373_v17, %v1929_v59  ;;  %2096 = vadd.xlane.f32.xlu1 %v2095_v19 }
 0x459   : > { %v1920_v39 = vpop.xlane.xlu0 %1919  ;;  %v2086_v47 = vsel %vm1851_vm2, %v8529_v9, 0.0 }
 0x45a   : > { %v8534_v46 = vpop.eup %7038  ;;  %v2030_v63 = vmul.f32 1.442695, %v1973_v24  ;;  %v1970_v11 = vsub.f32 %v8380_v48, %v1920_v39  ;;  %2087 = vadd.xlane.f32.xlu0 %v2086_v47 }
 0x45b   : > { %v1923_v41 = vpop.xlane.xlu1 %1922  ;;  %v2089_v62 = vsel %vm1851_vm2, %v8534_v46, 0.0 }
 0x45c   : > { %v8539_v23 = vpop.eup %7040  ;;  %7048 = vpow2.f32 %v2030_v63  ;;  %v2024_v25 = vmul.f32 1.442695, %v1970_v11  ;;  %2090 = vadd.xlane.f32.xlu1 %v2089_v62  ;;  %v1971_v28 = vsub.f32 %v8388_v30, %v1923_v41 }
 0x45d   : > { %v1914_v17 = vpop.xlane.xlu0 %1913  ;;  %v2122_v15 = vsel %vm1851_vm2, %v8539_v23, 0.0 }
 0x45e   : > { %v8543_v10 = vpop.eup %7042  ;;  %7050 = vpow2.f32 %v2024_v25  ;;  %v1968_v48 = vsub.f32 %v8385_v58, %v1914_v17  ;;  %2123 = vadd.xlane.f32.xlu0 %v2122_v15  ;;  %v2026_v39 = vmul.f32 1.442695, %v1971_v28 }
 0x45f   : > { %v1917_v27 = vpop.xlane.xlu1 %1916  ;;  %v2125_v42 = vsel %vm1851_vm2, %v8543_v10, 0.0 }
 0x460   : > { %v8549_v56 = vpop.eup %7044  ;;  %v2020_v59 = vmul.f32 1.442695, %v1968_v48  ;;  %2126 = vadd.xlane.f32.xlu1 %v2125_v42  ;;  %v1969_v30 = vsub.f32 %v8393_v43, %v1917_v27  ;;  %v1972_v27 = vsub.f32 %v8368_v40, %v8521_v14 }
 0x461   : > { %v2080_v19 = vsel %vm1851_vm2, %v8549_v56, 0.0 }
 0x462   : > { %v8553_v24 = vpop.eup %7046  ;;  %7052 = vpow2.f32 %v2020_v59  ;;  %2081 = vadd.xlane.f32.xlu0 %v2080_v19  ;;  %v2022_v63 = vmul.f32 1.442695, %v1969_v30  ;;  %v2028_v42 = vmul.f32 1.442695, %v1972_v27 }
 0x463   : > { %v2083_v58 = vsel %vm1851_vm2, %v8553_v24, 0.0  ;;  %7054 = vpow2.f32 %v2026_v39 }
 0x464   : > { %2084 = vadd.xlane.f32.xlu1 %v2083_v58  ;;  %7056 = vpow2.f32 %v2022_v63 }
 0x465   : > { %7058 = vpow2.f32 %v2028_v42 }
 0x466   : > { %v8558_v47 = vpop.eup %7048 }
 0x467   : > { %v2119_v11 = vsel %vm1851_vm2, %v8558_v47, 0.0 }
 0x468   : > { %v8562_v41 = vpop.eup %7050  ;;  %2120 = vadd.xlane.f32.xlu1 %v2119_v11 }
 0x469   : > { %v2110_v62 = vsel %vm1851_vm2, %v8562_v41, 0.0 }
 0x46c   : > { %v8566_v43 = vpop.eup %7052  ;;  %2111 = vadd.xlane.f32.xlu1 %v2110_v62 }
 0x46d   : > { %v2104_v25 = vsel %vm1851_vm2, %v8566_v43, 0.0  ;;  %v8570_v17 = vpop.eup %7054 }
 0x46e   : > { %v2113_v15 = vsel %vm1851_vm2, %v8570_v17, 0.0  ;;  %v8574_v28 = vpop.eup %7056 }
 0x46f   : > { %v2107_v48 = vsel %vm1851_vm2, %v8574_v28, 0.0  ;;  %v8584_v59 = vpop.eup %7058 }
 0x470   : > { %2105 = vadd.xlane.f32.xlu1 %v2104_v25  ;;  %v2116_v19 = vsel %vm1851_vm2, %v8584_v59, 0.0 }
 0x474   : > { %2114 = vadd.xlane.f32.xlu1 %v2113_v15 }
 0x478   : > { %2731 = vrot.lane.b32.xlu0 %v8017_v57, %s7430_s28  ;;  %2108 = vadd.xlane.f32.xlu1 %v2107_v48 }
 0x489   : > { %2733 = vrot.lane.b32.xlu1 %v8015_v50, %s7430_s28 }
 0x497   : > { %2117 = vadd.xlane.f32.xlu0 %v2116_v19 }
 0x4b2   : > { %v1944_v39 = vpop.xlane.xlu0 %1943 }
 0x4b3   : > { %v1978_v30 = vsub.f32 %v8425_v45, %v1944_v39 }
 0x4b4   : > { %v1947_v58 = vpop.xlane.xlu1 %1946 }
 0x4b5   : > { %v2040_v63 = vmul.f32 1.442695, %v1978_v30  ;;  %v1979_v11 = vsub.f32 %v8432_v33, %v1947_v58 }
 0x4b6   : > { %v1938_v62 = vpop.xlane.xlu0 %1937 }
 0x4b7   : > { %7060 = vpow2.f32 %v2040_v63  ;;  %v2042_v40 = vmul.f32 1.442695, %v1979_v11  ;;  %v1976_v14 = vsub.f32 %v8429_v8, %v1938_v62 }
 0x4b8   : > { %v1941_v25 = vpop.xlane.xlu1 %1940 }
 0x4b9   : > { %7062 = vpow2.f32 %v2042_v40  ;;  %v2036_v15 = vmul.f32 1.442695, %v1976_v14  ;;  %v1977_v48 = vsub.f32 %v8437_v2, %v1941_v25 }
 0x4ba   : > { %v2052_v27 = vpop.xlane.xlu0 %2051 }
 0x4bb   : > { %7064 = vpow2.f32 %v2036_v15  ;;  %v2038_v42 = vmul.f32 1.442695, %v1977_v48 }
 0x4bd   : > { %7066 = vpow2.f32 %v2038_v42 }
 0x4be   : > { %v2046_v19 = vpop.xlane.xlu0 %2045 }
 0x4bf   : > { %v2055_v45 = vpop.xlane.xlu1 %2054 }
 0x4c0   : > { %7068 = vrcp.f32 %v2055_v45 }
 0x4c1   : > { %v8592_v39 = vpop.eup %7060  ;;  %7070 = vrcp.f32 %v2046_v19 }
 0x4c2   : > { %v2134_v33 = vsel %vm1851_vm2, %v8592_v39, 0.0  ;;  %7072 = vrcp.f32 %v2052_v27 }
 0x4c3   : > { %v8596_v30 = vpop.eup %7062  ;;  %v2049_v8 = vpop.xlane.xlu1 %2048  ;;  %2135 = vadd.xlane.f32.xlu0 %v2134_v33 }
 0x4c4   : > { %7074 = vrcp.f32 %v2049_v8  ;;  %v2137_v2 = vsel %vm1851_vm2, %v8596_v30, 0.0 }
 0x4c5   : > { %v8600_v58 = vpop.eup %7064  ;;  %2138 = vadd.xlane.f32.xlu1 %v2137_v2 }
 0x4c6   : > { %v2128_v63 = vsel %vm1851_vm2, %v8600_v58, 0.0 }
 0x4c7   : > { %v8604_v11 = vpop.eup %7066  ;;  %2129 = vadd.xlane.f32.xlu0 %v2128_v63  ;;  %v2064_v62 = vpop.xlane.xlu0 %2063 }
 0x4c8   : > { %v2131_v40 = vsel %vm1851_vm2, %v8604_v11, 0.0 }
 0x4c9   : > { %v2067_v14 = vpop.xlane.xlu1 %2066  ;;  %2132 = vadd.xlane.f32.xlu1 %v2131_v40 }
 0x4ca   : > { %v7069_v25 = vpop.eup %7068  ;;  %7076 = vrcp.f32 %v2067_v14 }
 0x4cb   : > { %v2058_v15 = vpop.xlane.xlu0 %2057  ;;  %v7071_v48 = vpop.eup %7070  ;;  %v2175_v45 = vmul.f32 %v7069_v25, %v8454_v26 }
 0x4cc   : > { %7078 = vrcp.f32 %v2058_v15  ;;  %v7073_v27 = vpop.eup %7072  ;;  %v2172_v33 = vmul.f32 %v7071_v48, %v8451_v51 }
 0x4cd   : > { %7080 = vrcp.f32 %v2064_v62  ;;  %v2061_v42 = vpop.xlane.xlu1 %2060  ;;  %v2174_v2 = vmul.f32 %v7073_v27, %v8443_v18 }
 0x4ce   : > { %v7075_v19 = vpop.eup %7074  ;;  %7082 = vrcp.f32 %v2061_v42 }
 0x4cf   : > { %v2173_v8 = vmul.f32 %v7075_v19, %v8461_v44  ;;  %v2205_v40 = vpack.c.bf16 %v2175_v45, %v2174_v2 }
 0x4d1   : > { %v2204_v63 = vpack.c.bf16 %v2173_v8, %v2172_v33 }
 0x4d3   : > { %6531 = vmatprep.mubr.msk.bf16.mxu0 %vm1851_vm2, %v2204_v63 }
 0x4d4   : > { %6532 = vmatmul.mubr.msk.bf16.vlgmr.msra.gmra.mrb[40].mxu0 %vm1851_vm2, %v2205_v40  ;;  %v7077_v14 = vpop.eup %7076 }
 0x4d5   : > { %6536 = vmatpush3.bf16.msra.mxu0 %v8233_v61  ;;  %v2179_v51 = vmul.f32 %v7077_v14, %v8469_v7 }
 0x4d6   : > { %v7079_v62 = vpop.eup %7078  ;;  %6537 = vmatprep.subr.bf16.mxu0 %v8401_v0 }
 0x4d7   : > { %v7081_v26 = vpop.eup %7080  ;;  %v2076_v25 = vpop.xlane.xlu0 %2075  ;;  %v2176_v44 = vmul.f32 %v7079_v62, %v8474_v35 }
 0x4d8   : > { %v7083_v15 = vpop.eup %7082  ;;  %v2178_v27 = vmul.f32 %v7081_v26, %v8465_v1 }
 0x4d9   : > { %6538 = vmatpush3.bf16.msra.mxu0 %v8401_v0  ;;  %v2079_v18 = vpop.xlane.xlu1 %2078  ;;  %v2177_v48 = vmul.f32 %v7083_v15, %v8479_v3 }
 0x4da   : > { %6551 = vmatprep.subr.bf16.mxu0 %v8403_v53  ;;  %2727 = vrot.lane.b32.xlu1 %v8025_v37, %s7431_s30  ;;  %v2207_v19 = vpack.c.bf16 %v2179_v51, %v2178_v27  ;;  %7084 = vrcp.f32 %v2079_v18  ;;  %v10579_v51 = vld [vmem:[#allocation2_spill] sm:$0xff] }
 0x4db   : > { %v2100_v61 = vpop.xlane.xlu0 %2099  ;;  %v2206_v42 = vpack.c.bf16 %v2177_v48, %v2176_v44  ;;  %v10581_v44 = vld [vmem:[#allocation21_spill] sm:$0xff] }
 0x4dd   : > { %v2103_v45 = vpop.xlane.xlu1 %2102  ;;  %2802 = vrot.lane.b32.xlu0 %v8035_v13, %s7430_s28  ;;  %6539 = vmatprep.mubr.msk.bf16.mxu0 %vm1851_vm2, %v2206_v42 }
 0x4de   : > { %2804 = vrot.lane.b32.xlu1 %v8033_v16, %s7430_s28  ;;  %6540 = vmatmul.mubr.msk.bf16.vlgmr.msra.gmra.mrb[44].mxu0 %vm1851_vm2, %v2207_v19  ;;  %v10584_v19 = vld [vmem:[#allocation5_spill] sm:$0xff] }
 0x4df   : > { %6552 = vmatpush3.bf16.msra.mxu0 %v8403_v53  ;;  %v2070_v0 = vpop.xlane.xlu0 %2069 }
 0x4e0   : > { %6553 = vmatprep.subr.bf16.mxu0 %v8405_v4  ;;  %7086 = vrcp.f32 %v2070_v0 }
 0x4e1   : > { %7088 = vrcp.f32 %v2076_v25  ;;  %v2073_v37 = vpop.xlane.xlu1 %2072  ;;  %2729 = vrot.lane.b32.xlu0 %v8019_v12, %s7431_s30 }
 0x4e2   : > { %7090 = vrcp.f32 %v2073_v37  ;;  %2798 = vrot.lane.b32.xlu1 %v8039_v22, %s7431_s30 }
 0x4e3   : > { %6554 = vmatpush3.bf16.msra.mxu0 %v8405_v4  ;;  %v2094_v1 = vpop.xlane.xlu0 %2093 }
 0x4e4   : > { %6567 = vmatprep.subr.bf16.mxu0 %v8407_v32  ;;  %7092 = vrcp.f32 %v2094_v1  ;;  %v7085_v7 = vpop.eup %7084  ;;  %v10586_v1 = vld [vmem:[#allocation3_spill] sm:$0xff] }
 0x4e5   : > { %v2097_v53 = vpop.xlane.xlu1 %2096  ;;  %2873 = vrot.lane.b32.xlu0 %v8051_v54, %s7430_s28  ;;  %v2183_v8 = vmul.f32 %v7085_v7, %v8493_v21 }
 0x4e6   : > { %7094 = vrcp.f32 %v2097_v53  ;;  %2875 = vrot.lane.b32.xlu1 %v8049_v20, %s7430_s28 }
 0x4e7   : > { %7096 = vrcp.f32 %v2103_v45  ;;  %v2088_v12 = vpop.xlane.xlu0 %2087  ;;  %v10585_v45 = vld [vmem:[#allocation22_spill] sm:$0xff] }
 0x4e8   : > { %7098 = vrcp.f32 %v2100_v61  ;;  %v10582_v61 = vld [vmem:[#allocation23_spill] sm:$0xff] }
 0x4e9   : > { %v2091_v35 = vpop.xlane.xlu1 %2090  ;;  %2800 = vrot.lane.b32.xlu0 %v8037_v34, %s7431_s30 }
 0x4ea   : > { %v7087_v22 = vpop.eup %7086  ;;  %2869 = vrot.lane.b32.xlu1 %v8055_v29, %s7431_s30  ;;  %7100 = vrcp.f32 %v2091_v35 }
 0x4eb   : > { %v7089_v4 = vpop.eup %7088  ;;  %v8646_v3 = vpop.xlane.xlu0 %2123  ;;  %v2180_v63 = vmul.f32 %v7087_v22, %v8508_v52  ;;  %v10588_v22 = vld [vmem:[#allocation25_spill] sm:$0xff] }
 0x4ec   : > { %v7091_v33 = vpop.eup %7090  ;;  %v2182_v14 = vmul.f32 %v7089_v4, %v8488_v60 }
 0x4ed   : > { %v8649_v2 = vpop.xlane.xlu1 %2126  ;;  %2944 = vrot.lane.b32.xlu0 %v8067_v31, %s7430_s28  ;;  %v2181_v40 = vmul.f32 %v7091_v33, %v8513_v55  ;;  %v10580_v55 = vld [vmem:[#allocation4_spill] sm:$0xff]  ;;  %v10589_v33 = vld [vmem:[#allocation10_spill] sm:$0xff] }
 0x4ee   : > { %v7093_v34 = vpop.eup %7092  ;;  %2946 = vrot.lane.b32.xlu1 %v8065_v38, %s7430_s28  ;;  %v2209_v21 = vpack.c.bf16 %v2183_v8, %v2182_v14 }
 0x4ef   : > { %v2082_v29 = vpop.xlane.xlu0 %2081  ;;  %v2208_v62 = vpack.c.bf16 %v2181_v40, %v2180_v63  ;;  %v2188_v52 = vmul.f32 %v7093_v34, %v8518_v6  ;;  %v10583_v6 = vld [vmem:[#allocation6_spill] sm:$0xff]  ;;  %v10590_v34 = vld [vmem:[#allocation9_spill] sm:$0xff] }
 0x4f0   : > { %v7095_v26 = vpop.eup %7094  ;;  %7102 = vrcp.f32 %v2082_v29 }
 0x4f1   : > { %v7097_v25 = vpop.eup %7096  ;;  %7104 = vrcp.f32 %v2088_v12  ;;  %v2085_v15 = vpop.xlane.xlu1 %2084  ;;  %2871 = vrot.lane.b32.xlu0 %v10579_v51, %s7431_s30  ;;  %6547 = vmatprep.mubr.msk.bf16.mxu1 %vm1851_vm2, %v2208_v62  ;;  %v2189_v60 = vmul.f32 %v7095_v26, %v8525_v5  ;;  %v10587_v12 = vld [vmem:[#allocation8_spill] sm:$0xff]  ;;  %v10591_v26 = vld [vmem:[#allocation7_spill] sm:$0xff] }
 0x4f2   : > { %7106 = vrcp.f32 %v2085_v15  ;;  %2940 = vrot.lane.b32.xlu1 %v10580_v55, %s7431_s30  ;;  %6548 = vmatmul.mubr.msk.bf16.vlgmr.msra.gmra.mrb[24].mxu1 %vm1851_vm2, %v2209_v21  ;;  %v7099_v18 = vpop.eup %7098  ;;  %v2191_v27 = vmul.f32 %v7097_v25, %v8503_v36  ;;  %v10594_v21 = vld [vmem:[#allocation14_spill] sm:$0xff]  ;;  %v10595_v25 = vld [vmem:[#allocation13_spill] sm:$0xff]  ;;  %v10597_v51 = vld [vmem:[#allocation11_spill] sm:$0xff] }
 0x4f3   : > { %6560 = vmatpush3.bf16.msra.mxu1 %v10581_v44  ;;  %v2212_v48 = vpack.c.bf16 %v2189_v60, %v2188_v52  ;;  %v2190_v5 = vmul.f32 %v7099_v18, %v8498_v49  ;;  %v8694_v14 = vpop.permute.xlu0 %2731  ;;  %v10596_v15 = vld [vmem:[#allocation26_spill] sm:$0xff]  ;;  %v10600_v18 = vld [vmem:[#allocation17_spill] sm:$0xff] }
 0x4f4   : > { %6561 = vmatprep.subr.bf16.mxu1 %v10582_v61  ;;  %v7101_v36 = vpop.eup %7100  ;;  %v10599_v60 = vld [vmem:[#allocation18_spill] sm:$0xff] }
 0x4f5   : > { %v8669_v42 = vpop.xlane.xlu1 %2120  ;;  %3015 = vrot.lane.b32.xlu0 %v10583_v6, %s7430_s28  ;;  %6563 = vmatprep.mubr.msk.bf16.mxu1 %vm1851_vm2, %v2212_v48  ;;  %v2213_v0 = vpack.c.bf16 %v2191_v27, %v2190_v5  ;;  %v2187_v35 = vmul.f32 %v7101_v36, %v8534_v46  ;;  %v10602_v36 = vld [vmem:[#allocation19_spill] sm:$0xff] }
 0x4f6   : > { %3017 = vrot.lane.b32.xlu1 %v10584_v19, %s7430_s28 }
 0x4f7   : > { %6562 = vmatpush3.bf16.msra.mxu1 %v10582_v61  ;;  %v10601_v61 = vld [vmem:[#allocation15_spill] sm:$0xff] }
 0x4f8   : > { %6575 = vmatprep.subr.bf16.mxu1 %v10585_v45 }
 0x4f9   : > { %v2112_v37 = vpop.xlane.xlu1 %2111  ;;  %2942 = vrot.lane.b32.xlu0 %v10586_v1, %s7431_s30 }
 0x4fa   : > { %v7103_v53 = vpop.eup %7102  ;;  %3011 = vrot.lane.b32.xlu1 %v10587_v12, %s7431_s30  ;;  %6564 = vmatmul.mubr.msk.bf16.vlgmr.msra.gmra.mrb[28].mxu1 %vm1851_vm2, %v2213_v0 }
 0x4fb   : > { %v7105_v49 = vpop.eup %7104  ;;  %6576 = vmatpush3.bf16.msra.mxu1 %v10585_v45  ;;  %v2184_v8 = vmul.f32 %v7103_v53, %v8549_v56  ;;  %v10593_v56 = vld [vmem:[#allocation24_spill] sm:$0xff] }
 0x4fc   : > { %v7107_v7 = vpop.eup %7106  ;;  %6577 = vmatprep.subr.bf16.mxu1 %v10588_v22  ;;  %v2186_v40 = vmul.f32 %v7105_v49, %v8529_v9  ;;  %v10592_v9 = vld [vmem:[#allocation12_spill] sm:$0xff] }
 0x4fd   : > { %v2106_v4 = vpop.xlane.xlu1 %2105  ;;  %3086 = vrot.lane.b32.xlu0 %v10589_v33, %s7430_s28  ;;  %v2185_v63 = vmul.f32 %v7107_v7, %v8553_v24  ;;  %v10603_v53 = vld [vmem:[#allocation20_spill] sm:$0xff] }
 0x4fe   : > { %3088 = vrot.lane.b32.xlu1 %v10590_v34, %s7430_s28  ;;  %v2211_v29 = vpack.c.bf16 %v2187_v35, %v2186_v40 }
 0x4ff   : > { %6578 = vmatpush3.bf16.msra.mxu1 %v10588_v22  ;;  %v2210_v46 = vpack.c.bf16 %v2185_v63, %v2184_v8 }
 0x500   : > { %6909 = vmatprep.subr.msk.bf16.mxu1 %vm1320_vm1, %v8694_v14 }
 0x501   : > { %v2115_v62 = vpop.xlane.xlu1 %2114  ;;  %3013 = vrot.lane.b32.xlu0 %v10591_v26, %s7431_s30  ;;  %6555 = vmatprep.mubr.msk.bf16.mxu0 %vm1851_vm2, %v2210_v46 }
 0x502   : > { %3082 = vrot.lane.b32.xlu1 %v10592_v9, %s7431_s30  ;;  %6556 = vmatmul.mubr.msk.bf16.vlgmr.msra.gmra.mrb[48].mxu0 %vm1851_vm2, %v2211_v29  ;;  %7108 = vrcp.f32 %v2115_v62 }
 0x503   : > { %6568 = vmatpush3.bf16.msra.mxu0 %v8407_v32  ;;  %7110 = vrcp.f32 %v2106_v4  ;;  %v10598_v32 = vld [vmem:[#allocation16_spill] sm:$0xff] }
 0x504   : > { %6569 = vmatprep.subr.bf16.mxu0 %v10593_v56  ;;  %7112 = vrcp.f32 %v2112_v37 }
 0x505   : > { %v2109_v24 = vpop.xlane.xlu1 %2108  ;;  %3157 = vrot.lane.b32.xlu0 %v10594_v21, %s7430_s28 }
 0x506   : > { %7114 = vrcp.f32 %v2109_v24  ;;  %3159 = vrot.lane.b32.xlu1 %v10595_v25, %s7430_s28 }
 0x507   : > { %6570 = vmatpush3.bf16.msra.mxu0 %v10593_v56  ;;  %7116 = vrcp.f32 %v8649_v2 }
 0x508   : > { %6583 = vmatprep.subr.bf16.mxu0 %v10596_v15  ;;  %7118 = vrcp.f32 %v8669_v42 }
 0x509   : > { %3084 = vrot.lane.b32.xlu0 %v10597_v51, %s7431_s30  ;;  %7120 = vrcp.f32 %v8646_v3  ;;  %v2742_v3 = vsel %vm1320_vm1, %v8694_v14, 0  ;;  %v2734_v2 = vpop.permute.xlu1 %2733 }
 0x50a   : > { %3153 = vrot.lane.b32.xlu1 %v10598_v32, %s7431_s30 }
 0x50c   : > { %v7109_v52 = vpop.eup %7108 }
 0x50d   : > { %3228 = vrot.lane.b32.xlu0 %v10599_v60, %s7430_s28  ;;  %v7111_v55 = vpop.eup %7110  ;;  %v2195_v27 = vmul.f32 %v7109_v52, %v8570_v17 }
 0x50e   : > { %3230 = vrot.lane.b32.xlu1 %v10600_v18, %s7430_s28  ;;  %v7113_v44 = vpop.eup %7112  ;;  %v2192_v5 = vmul.f32 %v7111_v55, %v8566_v43  ;;  %v10604_v43 = vld [vmem:[#allocation27_spill] sm:$0xff] }
 0x50f   : > { %v2194_v0 = vmul.f32 %v7113_v44, %v8562_v41 }
 0x510   : > { %v7115_v48 = vpop.eup %7114 }
 0x511   : > { %3155 = vrot.lane.b32.xlu0 %v10601_v61, %s7431_s30  ;;  %v2193_v45 = vmul.f32 %v7115_v48, %v8574_v28  ;;  %v2215_v1 = vpack.c.bf16 %v2195_v27, %v2194_v0 }
 0x512   : > { %3226 = vrot.lane.b32.xlu1 %v10602_v36, %s7431_s30 }
 0x513   : > { %v2214_v37 = vpack.c.bf16 %v2193_v45, %v2192_v5 }
 0x515   : > { %3224 = vrot.lane.b32.xlu0 %v10603_v53, %s7431_s30  ;;  %6571 = vmatprep.mubr.msk.bf16.mxu0 %vm1851_vm2, %v2214_v37 }
 0x516   : > { %3663 = vrot.lane.b32.xlu1 %v8015_v50, %s7432_s17  ;;  %6572 = vmatmul.mubr.msk.bf16.vlgmr.msra.gmra.mrb[52].mxu0 %vm1851_vm2, %v2215_v1 }
 0x517   : > { %6584 = vmatpush3.bf16.msra.mxu0 %v10596_v15 }
 0x518   : > { %6585 = vmatprep.subr.bf16.mxu0 %v10604_v43 }
 0x519   : > { %3661 = vrot.lane.b32.xlu0 %v8017_v57, %s7432_s17  ;;  %v7117_v57 = vpop.eup %7116 }
 0x51a   : > { %3783 = vrot.lane.b32.xlu1 %v8051_v54, %s7432_s17  ;;  %v2199_v54 = vmul.f32 %v7117_v57, %v8543_v10  ;;  %v2745_v10 = vsel %vm1320_vm1, %v2734_v2, 0 }
 0x51b   : > { %6586 = vmatpush3.bf16.msra.mxu0 %v10604_v43 }
 0x51d   : > { %3722 = vrot.lane.b32.xlu0 %v8035_v13, %s7432_s17 }
 0x51e   : > { %3785 = vrot.lane.b32.xlu1 %v8049_v20, %s7432_s17 }
 0x521   : > { %3724 = vrot.lane.b32.xlu0 %v8033_v16, %s7432_s17  ;;  %v7119_v16 = vpop.eup %7118 }
 0x522   : > { %3846 = vrot.lane.b32.xlu1 %v8065_v38, %s7432_s17  ;;  %v7121_v13 = vpop.eup %7120  ;;  %v2197_v41 = vmul.f32 %v7119_v16, %v8558_v47 }
 0x523   : > { %v2198_v17 = vmul.f32 %v7121_v13, %v8539_v23 }
 0x524   : > { %v2118_v50 = vpop.xlane.xlu0 %2117 }
 0x525   : > { %7122 = vrcp.f32 %v2118_v50  ;;  %3844 = vrot.lane.b32.xlu0 %v8067_v31, %s7432_s17  ;;  %v2217_v31 = vpack.c.bf16 %v2199_v54, %v2198_v17 }
 0x526   : > { %3907 = vrot.lane.b32.xlu1 %v10584_v19, %s7432_s17 }
 0x529   : > { %3905 = vrot.lane.b32.xlu0 %v10583_v6, %s7432_s17 }
 0x52f   : > { %v7123_v20 = vpop.eup %7122 }
 0x530   : > { %v2196_v38 = vmul.f32 %v7123_v20, %v8584_v59 }
 0x532   : > { %v2216_v28 = vpack.c.bf16 %v2197_v41, %v2196_v38 }
 0x534   : > { %6579 = vmatprep.mubr.msk.bf16.mxu1 %vm1851_vm2, %v2216_v28 }
 0x535   : > { %6580 = vmatmul.mubr.msk.bf16.vlgmr.msra.gmra.mrb[32].mxu1 %vm1851_vm2, %v2217_v31 }
 0x536   : > { %6592 = vmatpush3.bf16.xpose.msra.mxu1 %v2742_v3 }
 0x537   : > { %6910 = vmatprep.subr.msk.bf16.mxu1 %vm1320_vm1, %v2734_v2 }
 0x53e   : > { %6594 = vmatpush3.bf16.xpose.msra.mxu1 %v2745_v10 }
 0x550   : > { %v2136_v59 = vpop.xlane.xlu0 %2135 }
 0x552   : > { %v2139_v47 = vpop.xlane.xlu1 %2138 }
 0x553   : > { %7124 = vrcp.f32 %v2139_v47 }
 0x554   : > { %v2130_v23 = vpop.xlane.xlu0 %2129 }
 0x555   : > { %7126 = vrcp.f32 %v2130_v23 }
 0x556   : > { %7128 = vrcp.f32 %v2136_v59  ;;  %v2133_v42 = vpop.xlane.xlu1 %2132 }
 0x557   : > { %7130 = vrcp.f32 %v2133_v42 }
 0x558   : > { %v2803_v6 = vpop.permute.xlu0 %2802 }
 0x559   : > { %6911 = vmatprep.subr.msk.bf16.mxu0 %vm1320_vm1, %v2803_v6 }
 0x55a   : > { %v2728_v19 = vpop.permute.xlu1 %2727 }
 0x55b   : > { %6595 = vmatprep.mubr.msk.bf16.mxu1 %vm1320_vm1, %v2728_v19 }
 0x55c   : > { %v2730_v12 = vpop.permute.xlu0 %2729 }
 0x55d   : > { %6596 = vmatmul.mubr.msk.bf16.vlgmr.msra.gmra.mrb[36].mxu1 %vm1320_vm1, %v2730_v12  ;;  %v7125_v49 = vpop.eup %7124 }
 0x55e   : > { %v2805_v7 = vpop.permute.xlu1 %2804  ;;  %v2203_v63 = vmul.f32 %v7125_v49, %v8596_v30  ;;  %v2813_v30 = vsel %vm1320_vm1, %v2803_v6, 0 }
 0x55f   : > { %v7127_v35 = vpop.eup %7126  ;;  %v2816_v32 = vsel %vm1320_vm1, %v2805_v7, 0 }
 0x560   : > { %v7129_v22 = vpop.eup %7128  ;;  %v2874_v4 = vpop.permute.xlu0 %2873  ;;  %v2200_v46 = vmul.f32 %v7127_v35, %v8600_v58 }
 0x561   : > { %v7131_v8 = vpop.eup %7130  ;;  %6913 = vmatprep.subr.msk.bf16.mxu1 %vm1320_vm1, %v2874_v4  ;;  %v2884_v40 = vsel %vm1320_vm1, %v2874_v4, 0  ;;  %v2202_v62 = vmul.f32 %v7129_v22, %v8592_v39 }
 0x562   : > { %v2799_v14 = vpop.permute.xlu1 %2798  ;;  %6608 = vmatpush3.bf16.xpose.msra.mxu1 %v2884_v40  ;;  %v2201_v29 = vmul.f32 %v7131_v8, %v8604_v11 }
 0x563   : > { %v2219_v56 = vpack.c.bf16 %v2203_v63, %v2202_v62 }
 0x564   : > { %v2801_v26 = vpop.permute.xlu0 %2800  ;;  %v2218_v9 = vpack.c.bf16 %v2201_v29, %v2200_v46 }
 0x566   : > { %v2876_v24 = vpop.permute.xlu1 %2875  ;;  %6587 = vmatprep.mubr.msk.bf16.mxu0 %vm1851_vm2, %v2218_v9 }
 0x567   : > { %6588 = vmatmul.mubr.msk.bf16.vlgmr.msra.gmra.mrb[56].mxu0 %vm1851_vm2, %v2219_v56  ;;  %6914 = vmatprep.subr.msk.bf16.mxu1 %vm1320_vm1, %v2876_v24  ;;  %v2887_v39 = vsel %vm1320_vm1, %v2876_v24, 0 }
 0x568   : > { %6600 = vmatpush3.bf16.xpose.msra.mxu0 %v2813_v30  ;;  %6603 = vmatprep.mubr.msk.bf16.mxu0 %vm1320_vm1, %v2799_v14  ;;  %v2945_v58 = vpop.permute.xlu0 %2944 }
 0x569   : > { %6912 = vmatprep.subr.msk.bf16.mxu0 %vm1320_vm1, %v2805_v7  ;;  %v2955_v61 = vsel %vm1320_vm1, %v2945_v58, 0 }
 0x56a   : > { %v2870_v11 = vpop.permute.xlu1 %2869  ;;  %6610 = vmatpush3.bf16.xpose.msra.mxu1 %v2887_v39 }
 0x56b   : > { %6611 = vmatprep.mubr.msk.bf16.mxu1 %vm1320_vm1, %v2870_v11 }
 0x56c   : > { %v2872_v15 = vpop.permute.xlu0 %2871 }
 0x56e   : > { %v2947_v51 = vpop.permute.xlu1 %2946 }
 0x56f   : > { %v2958_v1 = vsel %vm1320_vm1, %v2947_v51, 0 }
 0x570   : > { %6602 = vmatpush3.bf16.xpose.msra.mxu0 %v2816_v32  ;;  %v3016_v52 = vpop.permute.xlu0 %3015 }
 0x571   : > { %6915 = vmatprep.subr.msk.bf16.mxu0 %vm1320_vm1, %v2945_v58  ;;  %6612 = vmatmul.mubr.msk.bf16.vlgmr.msra.gmra.mrb[40].mxu1 %vm1320_vm1, %v2872_v15  ;;  %v3026_v55 = vsel %vm1320_vm1, %v3016_v52, 0 }
 0x572   : > { %6917 = vmatprep.subr.msk.bf16.mxu1 %vm1320_vm1, %v3016_v52  ;;  %v2941_v44 = vpop.permute.xlu1 %2940 }
 0x573   : > { %6624 = vmatpush3.bf16.xpose.msra.mxu1 %v3026_v55 }
 0x574   : > { %v2943_v48 = vpop.permute.xlu0 %2942 }
 0x576   : > { %v3018_v27 = vpop.permute.xlu1 %3017 }
 0x577   : > { %6604 = vmatmul.mubr.msk.bf16.vlgmr.msra.gmra.mrb[60].mxu0 %vm1320_vm1, %v2801_v26  ;;  %6918 = vmatprep.subr.msk.bf16.mxu1 %vm1320_vm1, %v3018_v27  ;;  %v3029_v0 = vsel %vm1320_vm1, %v3018_v27, 0 }
 0x578   : > { %6616 = vmatpush3.bf16.xpose.msra.mxu0 %v2955_v61  ;;  %6619 = vmatprep.mubr.msk.bf16.mxu0 %vm1320_vm1, %v2941_v44  ;;  %v3087_v5 = vpop.permute.xlu0 %3086 }
 0x579   : > { %6916 = vmatprep.subr.msk.bf16.mxu0 %vm1320_vm1, %v2947_v51  ;;  %v3097_v13 = vsel %vm1320_vm1, %v3087_v5, 0 }
 0x57a   : > { %v3012_v45 = vpop.permute.xlu1 %3011 }
 0x57b   : > { %6626 = vmatpush3.bf16.xpose.msra.mxu1 %v3029_v0  ;;  %6627 = vmatprep.mubr.msk.bf16.mxu1 %vm1320_vm1, %v3012_v45 }
 0x57c   : > { %v3014_v36 = vpop.permute.xlu0 %3013 }
 0x57e   : > { %v3089_v37 = vpop.permute.xlu1 %3088 }
 0x57f   : > { %v3100_v28 = vsel %vm1320_vm1, %v3089_v37, 0 }
 0x580   : > { %6618 = vmatpush3.bf16.xpose.msra.mxu0 %v2958_v1  ;;  %v3158_v53 = vpop.permute.xlu0 %3157 }
 0x581   : > { %6919 = vmatprep.subr.msk.bf16.mxu0 %vm1320_vm1, %v3087_v5  ;;  %6921 = vmatprep.subr.msk.bf16.mxu1 %vm1320_vm1, %v3158_v53  ;;  %v3168_v43 = vsel %vm1320_vm1, %v3158_v53, 0 }
 0x582   : > { %6628 = vmatmul.mubr.msk.bf16.vlgmr.msra.gmra.mrb[44].mxu1 %vm1320_vm1, %v3014_v36  ;;  %v3083_v50 = vpop.permute.xlu1 %3082 }
 0x583   : > { %6640 = vmatpush3.bf16.xpose.msra.mxu1 %v3168_v43 }
 0x584   : > { %v3085_v57 = vpop.permute.xlu0 %3084 }
 0x586   : > { %v3160_v16 = vpop.permute.xlu1 %3159 }
 0x587   : > { %6620 = vmatmul.mubr.msk.bf16.vlgmr.msra.gmra.mrb[64].mxu0 %vm1320_vm1, %v2943_v48  ;;  %6922 = vmatprep.subr.msk.bf16.mxu1 %vm1320_vm1, %v3160_v16  ;;  %v3171_v38 = vsel %vm1320_vm1, %v3160_v16, 0 }
 0x588   : > { %6632 = vmatpush3.bf16.xpose.msra.mxu0 %v3097_v13  ;;  %6635 = vmatprep.mubr.msk.bf16.mxu0 %vm1320_vm1, %v3083_v50  ;;  %v3229_v20 = vpop.permute.xlu0 %3228 }
 0x589   : > { %6920 = vmatprep.subr.msk.bf16.mxu0 %vm1320_vm1, %v3089_v37  ;;  %v3239_v59 = vsel %vm1320_vm1, %v3229_v20, 0 }
 0x58a   : > { %v3154_v54 = vpop.permute.xlu1 %3153 }
 0x58b   : > { %6642 = vmatpush3.bf16.xpose.msra.mxu1 %v3171_v38  ;;  %6643 = vmatprep.mubr.msk.bf16.mxu1 %vm1320_vm1, %v3154_v54  ;;  %v8917_v38 = vld [vmem:[%s10461_s1 + $0x20] sm:$0xff] }
 0x58c   : > { %v3156_v41 = vpop.permute.xlu0 %3155 }
 0x58e   : > { %v3231_v17 = vpop.permute.xlu1 %3230 }
 0x58f   : > { %v3242_v23 = vsel %vm1320_vm1, %v3231_v17, 0 }
 0x590   : > { %6634 = vmatpush3.bf16.xpose.msra.mxu0 %v3100_v28  ;;  %v3225_v31 = vpop.permute.xlu0 %3224  ;;  %v8925_v28 = vld [vmem:[%s10461_s1 + $0x28] sm:$0xff] }
 0x591   : > { %6923 = vmatprep.subr.msk.bf16.mxu0 %vm1320_vm1, %v3229_v20  ;;  %v8912_v20 = vld [vmem:[%s10461_s1 + $0x30] sm:$0xff] }
 0x592   : > { %6644 = vmatmul.mubr.msk.bf16.vlgmr.msra.gmra.mrb[48].mxu1 %vm1320_vm1, %v3156_v41  ;;  %v3227_v3 = vpop.permute.xlu1 %3226 }
 0x594   : > { %v3662_v2 = vpop.permute.xlu0 %3661 }
 0x595   : > { %6655 = vmatprep.subr.bf16.mxu1 %v3662_v2 }
 0x596   : > { %v3664_v10 = vpop.permute.xlu1 %3663  ;;  %6656 = vmatpush3.bf16.msra.mxu1 %v3662_v2 }
 0x597   : > { %6636 = vmatmul.mubr.msk.bf16.vlgmr.msra.gmra.mrb[68].mxu0 %vm1320_vm1, %v3085_v57  ;;  %6657 = vmatprep.subr.bf16.mxu1 %v3664_v10 }
 0x598   : > { %6648 = vmatpush3.bf16.xpose.msra.mxu0 %v3239_v59  ;;  %6651 = vmatprep.mubr.msk.bf16.mxu0 %vm1320_vm1, %v3225_v31  ;;  %v3723_v42 = vpop.permute.xlu0 %3722  ;;  %v8935_v59 = vld [vmem:[%s10461_s1 + $0x38] sm:$0xff] }
 0x599   : > { %6924 = vmatprep.subr.msk.bf16.mxu0 %vm1320_vm1, %v3231_v17 }
 0x59a   : > { %v8817_v47 = vpop.permute.xlu1 %3783  ;;  %6658 = vmatpush3.bf16.msra.mxu1 %v3664_v10 }
 0x59b   : > { %6671 = vmatprep.subr.bf16.mxu1 %v8817_v47 }
 0x59c   : > { %v3725_v6 = vpop.permute.xlu0 %3724 }
 0x5a0   : > { %6650 = vmatpush3.bf16.xpose.msra.mxu0 %v3242_v23  ;;  %v8834_v4 = vpop.permute.xlu0 %3844 }
 0x5a1   : > { %6663 = vmatprep.subr.bf16.mxu0 %v3723_v42 }
 0x5a7   : > { %6652 = vmatmul.mubr.msk.bf16.vlgmr.msra.gmra.mrb[72].mxu0 %vm1320_vm1, %v3227_v3  ;;  %v8822_v19 = vpop.f32.mrb[40].mxu0 }
 0x5a8   : > { %6664 = vmatpush3.bf16.msra.mxu0 %v3723_v42  ;;  %v8824_v12 = vpop.f32.mrb[41].mxu0 }
 0x5a9   : > { %6665 = vmatprep.subr.bf16.mxu0 %v3725_v6  ;;  %v8826_v49 = vpop.f32.mrb[42].mxu0 }
 0x5aa   : > { %v8830_v35 = vpop.f32.mrb[43].mxu0 }
 0x5ac   : > { %6666 = vmatpush3.bf16.msra.mxu0 %v3725_v6 }
 0x5ad   : > { %6679 = vmatprep.subr.bf16.mxu0 %v8834_v4 }
 0x5b1   : > { %v8837_v8 = vpop.f32.mrb[44].mxu0 }
 0x5b2   : > { %v8839_v63 = vpop.f32.mrb[45].mxu0 }
 0x5b3   : > { %v8841_v40 = vpop.f32.mrb[46].mxu0 }
 0x5b4   : > { %v8845_v46 = vpop.f32.mrb[47].mxu0 }
 0x5c5   : > { %v8849_v62 = vpop.f32.mrb[24].mxu1 }
 0x5c6   : > { %10605 = vst [vmem:[#allocation2_spill] sm:$0xff] %v8849_v62  ;;  %v8851_v26 = vpop.f32.mrb[25].mxu1 }
 0x5c7   : > { %10606 = vst [vmem:[#allocation4_spill] sm:$0xff] %v8851_v26  ;;  %v8853_v9 = vpop.f32.mrb[26].mxu1 }
 0x5c8   : > { %10607 = vst [vmem:[#allocation21_spill] sm:$0xff] %v8853_v9  ;;  %v8857_v24 = vpop.f32.mrb[27].mxu1 }
 0x5c9   : > { %10608 = vst [vmem:[#allocation23_spill] sm:$0xff] %v8857_v24 }
 0x5cd   : > { %v8861_v58 = vpop.f32.mrb[28].mxu1 }
 0x5ce   : > { %10609 = vst [vmem:[#allocation6_spill] sm:$0xff] %v8861_v58  ;;  %v8863_v39 = vpop.f32.mrb[29].mxu1 }
 0x5cf   : > { %10610 = vst [vmem:[#allocation5_spill] sm:$0xff] %v8863_v39  ;;  %v8865_v11 = vpop.f32.mrb[30].mxu1 }
 0x5d0   : > { %10611 = vst [vmem:[#allocation22_spill] sm:$0xff] %v8865_v11  ;;  %v8869_v51 = vpop.f32.mrb[31].mxu1 }
 0x5d1   : > { %10612 = vst [vmem:[#allocation3_spill] sm:$0xff] %v8869_v51 }
 0x5d5   : > { %v8873_v52 = vpop.f32.mrb[48].mxu0 }
 0x5d6   : > { %10613 = vst [vmem:[#allocation8_spill] sm:$0xff] %v8873_v52  ;;  %v8875_v55 = vpop.f32.mrb[49].mxu0 }
 0x5d7   : > { %10614 = vst [vmem:[#allocation25_spill] sm:$0xff] %v8875_v55  ;;  %v8877_v44 = vpop.f32.mrb[50].mxu0 }
 0x5d8   : > { %10615 = vst [vmem:[#allocation10_spill] sm:$0xff] %v8877_v44  ;;  %v8881_v27 = vpop.f32.mrb[51].mxu0 }
 0x5d9   : > { %10616 = vst [vmem:[#allocation9_spill] sm:$0xff] %v8881_v27 }
 0x5e9   : > { %v8885_v5 = vpop.f32.mrb[52].mxu0 }
 0x5ea   : > { %10617 = vst [vmem:[#allocation7_spill] sm:$0xff] %v8885_v5  ;;  %v8887_v45 = vpop.f32.mrb[53].mxu0 }
 0x5eb   : > { %10618 = vst [vmem:[#allocation12_spill] sm:$0xff] %v8887_v45  ;;  %v8889_v0 = vpop.f32.mrb[54].mxu0 }
 0x5ec   : > { %10619 = vst [vmem:[#allocation24_spill] sm:$0xff] %v8889_v0  ;;  %v8893_v37 = vpop.f32.mrb[55].mxu0 }
 0x5ed   : > { %10620 = vst [vmem:[#allocation14_spill] sm:$0xff] %v8893_v37 }
 0x608   : > { %v8897_v53 = vpop.f32.mrb[32].mxu1 }
 0x609   : > { %10621 = vst [vmem:[#allocation13_spill] sm:$0xff] %v8897_v53  ;;  %v8899_v43 = vpop.f32.mrb[33].mxu1 }
 0x60a   : > { %10622 = vst [vmem:[#allocation26_spill] sm:$0xff] %v8899_v43  ;;  %v8901_v50 = vpop.f32.mrb[34].mxu1 }
 0x60b   : > { %10623 = vst [vmem:[#allocation11_spill] sm:$0xff] %v8901_v50  ;;  %v8905_v16 = vpop.f32.mrb[35].mxu1 }
 0x60c   : > { %10624 = vst [vmem:[#allocation16_spill] sm:$0xff] %v8905_v16 }
 0x630   : > { %v6597_v54 = vpop.f32.mrb[36].mxu1 }
 0x631   : > { %v8920_v41 = vadd.f32 %v6597_v54, %v8912_v20  ;;  %v2781_v17 = vpop.f32.mrb[37].mxu1 }
 0x632   : > { %v6598_v31 = vpop.f32.mrb[38].mxu1  ;;  %v8928_v3 = vadd.f32 %v2781_v17, %v8917_v38 }
 0x633   : > { %v2784_v2 = vpop.f32.mrb[39].mxu1  ;;  %v3299_v10 = vsel %vm1851_vm2, %v8920_v41, -inf  ;;  %v8943_v6 = vadd.f32 %v6598_v31, %v8935_v59 }
 0x634   : > { %v8938_v23 = vadd.f32 %v2784_v2, %v8925_v28  ;;  %3300 = vmax.xlane.f32.xlu0 %v3299_v10  ;;  %v3293_v54 = vsel %vm1851_vm2, %v8928_v3, -inf }
 0x635   : > { %v3302_v2 = vsel %vm1851_vm2, %v8943_v6, -inf }
 0x636   : > { %v3296_v42 = vsel %vm1851_vm2, %v8938_v23, -inf }
 0x637   : > { %3297 = vmax.xlane.f32.xlu1 %v3296_v42 }
 0x638   : > { %3294 = vmax.xlane.f32.xlu0 %v3293_v54 }
 0x63a   : > { %v8947_v17 = vpop.f32.mrb[56].mxu0 }
 0x63b   : > { %10625 = vst [vmem:[#allocation18_spill] sm:$0xff] %v8947_v17  ;;  %v8949_v57 = vpop.f32.mrb[57].mxu0 }
 0x63c   : > { %10626 = vst [vmem:[#allocation17_spill] sm:$0xff] %v8949_v57  ;;  %v8953_v13 = vpop.f32.mrb[58].mxu0  ;;  %3303 = vmax.xlane.f32.xlu0 %v3302_v2 }
 0x63d   : > { %10627 = vst [vmem:[#allocation15_spill] sm:$0xff] %v8953_v13  ;;  %v8957_v31 = vpop.f32.mrb[59].mxu0 }
 0x63e   : > { %10628 = vst [vmem:[#allocation19_spill] sm:$0xff] %v8957_v31 }
 0x644   : > { %v6613_v36 = vpop.f32.mrb[40].mxu1 }
 0x645   : > { %v8962_v54 = vadd.f32 %v6613_v36, %v8912_v20  ;;  %v2923_v1 = vpop.f32.mrb[41].mxu1 }
 0x646   : > { %v6614_v15 = vpop.f32.mrb[42].mxu1  ;;  %v8965_v32 = vadd.f32 %v2923_v1, %v8917_v38 }
 0x647   : > { %v8968_v48 = vadd.f32 %v6614_v15, %v8935_v59  ;;  %v2926_v2 = vpop.f32.mrb[43].mxu1  ;;  %v3323_v10 = vsel %vm1851_vm2, %v8962_v54, -inf }
 0x648   : > { %3324 = vmax.xlane.f32.xlu0 %v3323_v10  ;;  %v8973_v61 = vadd.f32 %v2926_v2, %v8925_v28  ;;  %v3317_v15 = vsel %vm1851_vm2, %v8965_v32, -inf }
 0x649   : > { %v3326_v36 = vsel %vm1851_vm2, %v8968_v48, -inf }
 0x64a   : > { %v6605_v42 = vpop.f32.mrb[60].mxu0  ;;  %3327 = vmax.xlane.f32.xlu1 %v3326_v36  ;;  %v3320_v2 = vsel %vm1851_vm2, %v8973_v61, -inf }
 0x64b   : > { %v8978_v56 = vadd.f32 %v6605_v42, %v8912_v20  ;;  %v2852_v1 = vpop.f32.mrb[61].mxu0 }
 0x64c   : > { %v6606_v30 = vpop.f32.mrb[62].mxu0  ;;  %3318 = vmax.xlane.f32.xlu0 %v3317_v15  ;;  %v8988_v29 = vadd.f32 %v2852_v1, %v8917_v38 }
 0x64d   : > { %v8983_v14 = vadd.f32 %v6606_v30, %v8935_v59  ;;  %v2855_v10 = vpop.f32.mrb[63].mxu0  ;;  %v3311_v42 = vsel %vm1851_vm2, %v8978_v56, -inf }
 0x64e   : > { %3321 = vmax.xlane.f32.xlu1 %v3320_v2  ;;  %v8993_v36 = vadd.f32 %v2855_v10, %v8925_v28  ;;  %v3305_v30 = vsel %vm1851_vm2, %v8988_v29, -inf }
 0x64f   : > { %v3314_v15 = vsel %vm1851_vm2, %v8983_v14, -inf }
 0x650   : > { %3312 = vmax.xlane.f32.xlu0 %v3311_v42  ;;  %v3308_v1 = vsel %vm1851_vm2, %v8993_v36, -inf }
 0x652   : > { %3315 = vmax.xlane.f32.xlu1 %v3314_v15 }
 0x654   : > { %3306 = vmax.xlane.f32.xlu0 %v3305_v30 }
 0x655   : > { %v6629_v7 = vpop.f32.mrb[44].mxu1 }
 0x656   : > { %v9002_v2 = vadd.f32 %v6629_v7, %v8912_v20  ;;  %v3065_v22 = vpop.f32.mrb[45].mxu1  ;;  %3309 = vmax.xlane.f32.xlu1 %v3308_v1 }
 0x657   : > { %v6630_v42 = vpop.f32.mrb[46].mxu1  ;;  %v9005_v10 = vadd.f32 %v3065_v22, %v8917_v38 }
 0x658   : > { %v9008_v17 = vadd.f32 %v6630_v42, %v8935_v59  ;;  %v3068_v15 = vpop.f32.mrb[47].mxu1  ;;  %v3347_v30 = vsel %vm1851_vm2, %v9002_v2, -inf }
 0x659   : > { %3348 = vmax.xlane.f32.xlu0 %v3347_v30  ;;  %v9013_v13 = vadd.f32 %v3068_v15, %v8925_v28  ;;  %v3341_v42 = vsel %vm1851_vm2, %v9005_v10, -inf }
 0x65a   : > { %v6621_v57 = vpop.f32.mrb[64].mxu0  ;;  %v3350_v7 = vsel %vm1851_vm2, %v9008_v17, -inf }
 0x65b   : > { %v2994_v1 = vpop.f32.mrb[65].mxu0  ;;  %3351 = vmax.xlane.f32.xlu1 %v3350_v7  ;;  %v9018_v22 = vadd.f32 %v6621_v57, %v8912_v20  ;;  %v3344_v15 = vsel %vm1851_vm2, %v9013_v13, -inf }
 0x65c   : > { %v6622_v31 = vpop.f32.mrb[66].mxu0  ;;  %v9028_v50 = vadd.f32 %v2994_v1, %v8917_v38 }
 0x65d   : > { %v2997_v53 = vpop.f32.mrb[67].mxu0  ;;  %3342 = vmax.xlane.f32.xlu0 %v3341_v42  ;;  %v9023_v30 = vadd.f32 %v6622_v31, %v8935_v59  ;;  %v3335_v57 = vsel %vm1851_vm2, %v9018_v22, -inf }
 0x65e   : > { %v9033_v7 = vadd.f32 %v2997_v53, %v8925_v28  ;;  %v3329_v31 = vsel %vm1851_vm2, %v9028_v50, -inf }
 0x65f   : > { %3345 = vmax.xlane.f32.xlu1 %v3344_v15  ;;  %v3338_v42 = vsel %vm1851_vm2, %v9023_v30, -inf }
 0x660   : > { %v3332_v16 = vsel %vm1851_vm2, %v9033_v7, -inf }
 0x661   : > { %3336 = vmax.xlane.f32.xlu0 %v3335_v57 }
 0x663   : > { %3339 = vmax.xlane.f32.xlu1 %v3338_v42 }
 0x665   : > { %3330 = vmax.xlane.f32.xlu0 %v3329_v31  ;;  %v6645_v43 = vpop.f32.mrb[48].mxu1 }
 0x666   : > { %v9040_v15 = vadd.f32 %v6645_v43, %v8912_v20  ;;  %v3207_v1 = vpop.f32.mrb[49].mxu1 }
 0x667   : > { %3333 = vmax.xlane.f32.xlu1 %v3332_v16  ;;  %v6646_v57 = vpop.f32.mrb[50].mxu1  ;;  %v9045_v53 = vadd.f32 %v3207_v1, %v8917_v38 }
 0x668   : > { %v9048_v5 = vadd.f32 %v6646_v57, %v8935_v59  ;;  %v3210_v42 = vpop.f32.mrb[51].mxu1  ;;  %v3371_v31 = vsel %vm1851_vm2, %v9040_v15, -inf }
 0x669   : > { %3372 = vmax.xlane.f32.xlu0 %v3371_v31  ;;  %v9053_v43 = vadd.f32 %v3210_v42, %v8925_v28  ;;  %v3365_v57 = vsel %vm1851_vm2, %v9045_v53, -inf }
 0x66a   : > { %v6637_v0 = vpop.f32.mrb[68].mxu0  ;;  %v3374_v45 = vsel %vm1851_vm2, %v9048_v5, -inf }
 0x66b   : > { %v3136_v16 = vpop.f32.mrb[69].mxu0  ;;  %3375 = vmax.xlane.f32.xlu1 %v3374_v45  ;;  %v9058_v1 = vadd.f32 %v6637_v0, %v8912_v20  ;;  %v3368_v42 = vsel %vm1851_vm2, %v9053_v43, -inf }
 0x66c   : > { %v6638_v37 = vpop.f32.mrb[70].mxu0  ;;  %v9068_v11 = vadd.f32 %v3136_v16, %v8917_v38 }
 0x66d   : > { %v3139_v58 = vpop.f32.mrb[71].mxu0  ;;  %3366 = vmax.xlane.f32.xlu0 %v3365_v57  ;;  %v9063_v31 = vadd.f32 %v6638_v37, %v8935_v59  ;;  %v3359_v45 = vsel %vm1851_vm2, %v9058_v1, -inf }
 0x66e   : > { %v9073_v0 = vadd.f32 %v3139_v58, %v8925_v28  ;;  %v3353_v37 = vsel %vm1851_vm2, %v9068_v11, -inf }
 0x66f   : > { %3369 = vmax.xlane.f32.xlu1 %v3368_v42  ;;  %v3362_v57 = vsel %vm1851_vm2, %v9063_v31, -inf }
 0x670   : > { %v3356_v42 = vsel %vm1851_vm2, %v9073_v0, -inf }
 0x671   : > { %3360 = vmax.xlane.f32.xlu0 %v3359_v45 }
 0x673   : > { %3363 = vmax.xlane.f32.xlu1 %v3362_v57 }
 0x675   : > { %3354 = vmax.xlane.f32.xlu0 %v3353_v37 }
 0x677   : > { %3357 = vmax.xlane.f32.xlu1 %v3356_v42 }
 0x67a   : > { %v6653_v16 = vpop.f32.mrb[72].mxu0 }
 0x67b   : > { %v9082_v39 = vadd.f32 %v6653_v16, %v8912_v20  ;;  %v3278_v45 = vpop.f32.mrb[73].mxu0 }
 0x67c   : > { %v6654_v51 = vpop.f32.mrb[74].mxu0  ;;  %v9085_v58 = vadd.f32 %v3278_v45, %v8917_v38  ;;  %v9111_v45 = vpop.permute.xlu0 %3905 }
 0x67d   : > { %v3281_v52 = vpop.f32.mrb[75].mxu0  ;;  %v3383_v57 = vsel %vm1851_vm2, %v9082_v39, -inf  ;;  %v9098_v20 = vadd.f32 %v6654_v51, %v8935_v59 }
 0x67e   : > { %3384 = vmax.xlane.f32.xlu0 %v3383_v57  ;;  %v3377_v37 = vsel %vm1851_vm2, %v9085_v58, -inf  ;;  %v9101_v38 = vadd.f32 %v3281_v52, %v8925_v28 }
 0x67f   : > { %v3386_v42 = vsel %vm1851_vm2, %v9098_v20, -inf }
 0x680   : > { %v3380_v16 = vsel %vm1851_vm2, %v9101_v38, -inf }
 0x682   : > { %3378 = vmax.xlane.f32.xlu0 %v3377_v37 }
 0x688   : > { %3968 = vrot.lane.b32.xlu1 %v10590_v34, %s7432_s17  ;;  %v9107_v34 = vpop.permute.xlu1 %3785 }
 0x68c   : > { %4027 = vrot.lane.b32.xlu1 %v10594_v21, %s7432_s17  ;;  %v9109_v21 = vpop.permute.xlu1 %3846 }
 0x698   : > { %3966 = vrot.lane.b32.xlu0 %v10589_v33, %s7432_s17  ;;  %v9113_v33 = vpop.permute.xlu1 %3907 }
 0x6b0   : > { %3387 = vmax.xlane.f32.xlu1 %v3386_v42 }
 0x6b4   : > { %3381 = vmax.xlane.f32.xlu1 %v3380_v16 }
 0x6c1   : > { %v3301_v51 = vpop.xlane.xlu0 %3300 }
 0x6c2   : > { %v3391_v52 = vsub.f32 %v8920_v41, %v3301_v51 }
 0x6c4   : > { %v3425_v28 = vmul.f32 1.442695, %v3391_v52  ;;  %v3298_v59 = vpop.xlane.xlu1 %3297 }
 0x6c5   : > { %v3295_v57 = vpop.xlane.xlu0 %3294  ;;  %v3390_v42 = vsub.f32 %v8938_v23, %v3298_v59 }
 0x6c6   : > { %7132 = vpow2.f32 %v3425_v28  ;;  %v3389_v37 = vsub.f32 %v8928_v3, %v3295_v57 }
 0x6c7   : > { %v3423_v27 = vmul.f32 1.442695, %v3390_v42 }
 0x6c8   : > { %v3421_v16 = vmul.f32 1.442695, %v3389_v37 }
 0x6c9   : > { %v3304_v44 = vpop.xlane.xlu0 %3303 }
 0x6ca   : > { %7134 = vpow2.f32 %v3421_v16  ;;  %v3392_v55 = vsub.f32 %v8943_v6, %v3304_v44 }
 0x6cc   : > { %v3427_v62 = vmul.f32 1.442695, %v3392_v55 }
 0x6ce   : > { %7136 = vpow2.f32 %v3427_v62 }
 0x6cf   : > { %7138 = vpow2.f32 %v3423_v27 }
 0x6d0   : > { %v9119_v9 = vpop.eup %7132 }
 0x6d1   : > { %v3491_v41 = vsel %vm1851_vm2, %v9119_v9, 0.0 }
 0x6d2   : > { %3492 = vadd.xlane.f32.xlu0 %v3491_v41 }
 0x6d4   : > { %v9123_v51 = vpop.eup %7134 }
 0x6d5   : > { %v3325_v3 = vpop.xlane.xlu0 %3324  ;;  %v3485_v23 = vsel %vm1851_vm2, %v9123_v51, 0.0 }
 0x6d6   : > { %v3399_v52 = vsub.f32 %v8962_v54, %v3325_v3  ;;  %3486 = vadd.xlane.f32.xlu0 %v3485_v23 }
 0x6d7   : > { %v3328_v44 = vpop.xlane.xlu1 %3327 }
 0x6d8   : > { %v9128_v6 = vpop.eup %7136  ;;  %v3441_v62 = vmul.f32 1.442695, %v3399_v52  ;;  %v3400_v55 = vsub.f32 %v8968_v48, %v3328_v44 }
 0x6d9   : > { %v3319_v27 = vpop.xlane.xlu0 %3318  ;;  %v3494_v28 = vsel %vm1851_vm2, %v9128_v6, 0.0  ;;  %v9133_v59 = vpop.eup %7138 }
 0x6da   : > { %7140 = vpow2.f32 %v3441_v62  ;;  %v3443_v57 = vmul.f32 1.442695, %v3400_v55  ;;  %v3397_v37 = vsub.f32 %v8965_v32, %v3319_v27  ;;  %3495 = vadd.xlane.f32.xlu1 %v3494_v28  ;;  %v3488_v48 = vsel %vm1851_vm2, %v9133_v59, 0.0 }
 0x6db   : > { %v3322_v42 = vpop.xlane.xlu1 %3321 }
 0x6dc   : > { %7142 = vpow2.f32 %v3443_v57  ;;  %v3437_v54 = vmul.f32 1.442695, %v3397_v37  ;;  %v3398_v16 = vsub.f32 %v8973_v61, %v3322_v42 }
 0x6dd   : > { %v3313_v41 = vpop.xlane.xlu0 %3312 }
 0x6de   : > { %7144 = vpow2.f32 %v3437_v54  ;;  %v3439_v3 = vmul.f32 1.442695, %v3398_v16  ;;  %v3395_v23 = vsub.f32 %v8978_v56, %v3313_v41  ;;  %3489 = vadd.xlane.f32.xlu1 %v3488_v48 }
 0x6df   : > { %v3316_v52 = vpop.xlane.xlu1 %3315 }
 0x6e0   : > { %7146 = vpow2.f32 %v3439_v3  ;;  %v3433_v44 = vmul.f32 1.442695, %v3395_v23  ;;  %v3396_v32 = vsub.f32 %v8983_v14, %v3316_v52 }
 0x6e1   : > { %v3307_v62 = vpop.xlane.xlu0 %3306 }
 0x6e2   : > { %7148 = vpow2.f32 %v3433_v44  ;;  %v3435_v55 = vmul.f32 1.442695, %v3396_v32  ;;  %v3393_v27 = vsub.f32 %v8988_v29, %v3307_v62 }
 0x6e3   : > { %v3310_v61 = vpop.xlane.xlu1 %3309 }
 0x6e4   : > { %v9142_v28 = vpop.eup %7140  ;;  %7150 = vpow2.f32 %v3435_v55  ;;  %v3429_v57 = vmul.f32 1.442695, %v3393_v27  ;;  %v3394_v37 = vsub.f32 %v8993_v36, %v3310_v61 }
 0x6e5   : > { %v3515_v56 = vsel %vm1851_vm2, %v9142_v28, 0.0 }
 0x6e6   : > { %v9147_v42 = vpop.eup %7142  ;;  %7152 = vpow2.f32 %v3429_v57  ;;  %v3431_v54 = vmul.f32 1.442695, %v3394_v37  ;;  %v3349_v14 = vpop.xlane.xlu0 %3348  ;;  %3516 = vadd.xlane.f32.xlu0 %v3515_v56 }
 0x6e7   : > { %v3407_v16 = vsub.f32 %v9002_v2, %v3349_v14  ;;  %v3518_v29 = vsel %vm1851_vm2, %v9147_v42, 0.0 }
 0x6e8   : > { %v9152_v41 = vpop.eup %7144  ;;  %7154 = vpow2.f32 %v3431_v54  ;;  %v3352_v48 = vpop.xlane.xlu1 %3351  ;;  %3519 = vadd.xlane.f32.xlu1 %v3518_v29 }
 0x6e9   : > { %v3457_v36 = vmul.f32 1.442695, %v3407_v16  ;;  %v3408_v3 = vsub.f32 %v9008_v17, %v3352_v48  ;;  %v3509_v23 = vsel %vm1851_vm2, %v9152_v41, 0.0 }
 0x6ea   : > { %v9157_v52 = vpop.eup %7146  ;;  %v3343_v44 = vpop.xlane.xlu0 %3342  ;;  %3510 = vadd.xlane.f32.xlu0 %v3509_v23 }
 0x6eb   : > { %7156 = vpow2.f32 %v3457_v36  ;;  %v3405_v2 = vsub.f32 %v9005_v10, %v3343_v44  ;;  %v3512_v32 = vsel %vm1851_vm2, %v9157_v52, 0.0  ;;  %v3459_v55 = vmul.f32 1.442695, %v3408_v3 }
 0x6ec   : > { %v9162_v62 = vpop.eup %7148  ;;  %v3346_v27 = vpop.xlane.xlu1 %3345  ;;  %3513 = vadd.xlane.f32.xlu1 %v3512_v32 }
 0x6ed   : > { %v3453_v61 = vmul.f32 1.442695, %v3405_v2  ;;  %v3406_v17 = vsub.f32 %v9013_v13, %v3346_v27  ;;  %v3503_v57 = vsel %vm1851_vm2, %v9162_v62, 0.0 }
 0x6ee   : > { %v9167_v37 = vpop.eup %7150  ;;  %v3337_v56 = vpop.xlane.xlu0 %3336  ;;  %3504 = vadd.xlane.f32.xlu0 %v3503_v57 }
 0x6ef   : > { %7158 = vpow2.f32 %v3453_v61  ;;  %v3455_v10 = vmul.f32 1.442695, %v3406_v17  ;;  %v3403_v54 = vsub.f32 %v9018_v22, %v3337_v56  ;;  %v3506_v14 = vsel %vm1851_vm2, %v9167_v37, 0.0 }
 0x6f0   : > { %v9172_v16 = vpop.eup %7152  ;;  %7160 = vpow2.f32 %v3459_v55  ;;  %v3340_v29 = vpop.xlane.xlu1 %3339  ;;  %3507 = vadd.xlane.f32.xlu1 %v3506_v14 }
 0x6f1   : > { %7162 = vpow2.f32 %v3455_v10  ;;  %v3449_v13 = vmul.f32 1.442695, %v3403_v54  ;;  %v3497_v48 = vsel %vm1851_vm2, %v9172_v16, 0.0  ;;  %v3404_v22 = vsub.f32 %v9023_v30, %v3340_v29 }
 0x6f2   : > { %v9176_v36 = vpop.eup %7154  ;;  %v3331_v3 = vpop.xlane.xlu0 %3330  ;;  %3498 = vadd.xlane.f32.xlu0 %v3497_v48 }
 0x6f3   : > { %7164 = vpow2.f32 %v3449_v13  ;;  %v3401_v23 = vsub.f32 %v9028_v50, %v3331_v3  ;;  %v3500_v44 = vsel %vm1851_vm2, %v9176_v36, 0.0  ;;  %v3451_v17 = vmul.f32 1.442695, %v3404_v22 }
 0x6f4   : > { %v3334_v2 = vpop.xlane.xlu1 %3333  ;;  %3501 = vadd.xlane.f32.xlu1 %v3500_v44 }
 0x6f5   : > { %v9182_v32 = vpop.eup %7156  ;;  %v3445_v55 = vmul.f32 1.442695, %v3401_v23  ;;  %v3402_v57 = vsub.f32 %v9033_v7, %v3334_v2 }
 0x6f6   : > { %v9184_v27 = vpop.xlane.xlu0 %3372  ;;  %v3539_v61 = vsel %vm1851_vm2, %v9182_v32, 0.0 }
 0x6f7   : > { %7166 = vpow2.f32 %v3445_v55  ;;  %3540 = vadd.xlane.f32.xlu0 %v3539_v61  ;;  %v3447_v13 = vmul.f32 1.442695, %v3402_v57 }
 0x6f8   : > { %v3376_v30 = vpop.xlane.xlu1 %3375  ;;  %7168 = vpow2.f32 %v3451_v17 }
 0x6f9   : > { %v9189_v50 = vpop.eup %7158  ;;  %v3416_v56 = vsub.f32 %v9048_v5, %v3376_v30 }
 0x6fa   : > { %v9192_v10 = vpop.eup %7160  ;;  %v9194_v54 = vpop.xlane.xlu0 %3366  ;;  %v3533_v14 = vsel %vm1851_vm2, %v9189_v50, 0.0 }
 0x6fb   : > { %v9198_v29 = vpop.eup %7162  ;;  %v3475_v48 = vmul.f32 1.442695, %v3416_v56  ;;  %3534 = vadd.xlane.f32.xlu0 %v3533_v14  ;;  %v3542_v44 = vsel %vm1851_vm2, %v9192_v10, 0.0 }
 0x6fc   : > { %v3370_v7 = vpop.xlane.xlu1 %3369  ;;  %v3536_v3 = vsel %vm1851_vm2, %v9198_v29, 0.0 }
 0x6fd   : > { %v9202_v22 = vpop.eup %7164  ;;  %7170 = vpow2.f32 %v3475_v48  ;;  %v3414_v5 = vsub.f32 %v9053_v43, %v3370_v7  ;;  %3537 = vadd.xlane.f32.xlu1 %v3536_v3 }
 0x6fe   : > { %v3361_v23 = vpop.xlane.xlu0 %3360  ;;  %7172 = vpow2.f32 %v3447_v13  ;;  %v3527_v17 = vsel %vm1851_vm2, %v9202_v22, 0.0 }
 0x6ff   : > { %v3471_v2 = vmul.f32 1.442695, %v3414_v5  ;;  %v3411_v55 = vsub.f32 %v9058_v1, %v3361_v23  ;;  %3543 = vadd.xlane.f32.xlu0 %v3542_v44 }
 0x700   : > { %v3364_v61 = vpop.xlane.xlu1 %3363 }
 0x701   : > { %v9210_v57 = vpop.eup %7166  ;;  %7174 = vpow2.f32 %v3471_v2  ;;  %v3465_v30 = vmul.f32 1.442695, %v3411_v55  ;;  %v3412_v43 = vsub.f32 %v9063_v31, %v3364_v61  ;;  %3528 = vadd.xlane.f32.xlu1 %v3527_v17 }
 0x702   : > { %v3521_v13 = vsel %vm1851_vm2, %v9210_v57, 0.0  ;;  %v9215_v48 = vpop.eup %7168 }
 0x703   : > { %7176 = vpow2.f32 %v3465_v30  ;;  %v3467_v56 = vmul.f32 1.442695, %v3412_v43  ;;  %v3530_v31 = vsel %vm1851_vm2, %v9215_v48, 0.0 }
 0x704   : > { %v3358_v14 = vpop.xlane.xlu1 %3357 }
 0x705   : > { %v3410_v1 = vsub.f32 %v9073_v0, %v3358_v14  ;;  %3522 = vadd.xlane.f32.xlu1 %v3521_v13  ;;  %7178 = vpow2.f32 %v3467_v56  ;;  %v3415_v14 = vsub.f32 %v9040_v15, %v9184_v27  ;;  %v3355_v13 = vpop.xlane.xlu0 %3354 }
 0x707   : > { %v9218_v7 = vpop.eup %7170  ;;  %v3463_v3 = vmul.f32 1.442695, %v3410_v1  ;;  %v3473_v1 = vmul.f32 1.442695, %v3415_v14 }
 0x708   : > { %v3566_v5 = vsel %vm1851_vm2, %v9218_v7, 0.0  ;;  %v9224_v23 = vpop.eup %7172 }
 0x709   : > { %3567 = vadd.xlane.f32.xlu0 %v3566_v5  ;;  %3531 = vadd.xlane.f32.xlu1 %v3530_v31  ;;  %7180 = vpow2.f32 %v3463_v3  ;;  %v3524_v2 = vsel %vm1851_vm2, %v9224_v23, 0.0  ;;  %v3413_v3 = vsub.f32 %v9045_v53, %v9194_v54  ;;  %v9250_v5 = vpop.permute.xlu1 %3968 }
 0x70a   : > { %7182 = vpow2.f32 %v3473_v1 }
 0x70b   : > { %v9226_v44 = vpop.eup %7174  ;;  %v3385_v31 = vpop.xlane.xlu0 %3384 }
 0x70c   : > { %v3560_v0 = vsel %vm1851_vm2, %v9226_v44, 0.0 }
 0x70d   : > { %v9232_v55 = vpop.eup %7176  ;;  %3561 = vadd.xlane.f32.xlu0 %v3560_v0  ;;  %3525 = vadd.xlane.f32.xlu1 %v3524_v2  ;;  %v3469_v0 = vmul.f32 1.442695, %v3413_v3  ;;  %v3409_v2 = vsub.f32 %v9068_v11, %v3355_v13 }
 0x70e   : > { %v3551_v61 = vsel %vm1851_vm2, %v9232_v55, 0.0 }
 0x70f   : > { %v9236_v17 = vpop.eup %7178  ;;  %7184 = vpow2.f32 %v3469_v0 }
 0x710   : > { %v3554_v30 = vsel %vm1851_vm2, %v9236_v17, 0.0 }
 0x711   : > { %3552 = vadd.xlane.f32.xlu0 %v3551_v61  ;;  %v3461_v61 = vmul.f32 1.442695, %v3409_v2 }
 0x713   : > { %v9240_v43 = vpop.eup %7180  ;;  %7186 = vpow2.f32 %v3461_v61 }
 0x714   : > { %v3548_v56 = vsel %vm1851_vm2, %v9240_v43, 0.0  ;;  %v9257_v53 = vpop.eup %7182 }
 0x715   : > { %3555 = vadd.xlane.f32.xlu0 %v3554_v30  ;;  %v3419_v30 = vsub.f32 %v9082_v39, %v3385_v31  ;;  %v3563_v13 = vsel %vm1851_vm2, %v9257_v53, 0.0 }
 0x717   : > { %v3481_v15 = vmul.f32 1.442695, %v3419_v30 }
 0x719   : > { %3549 = vadd.xlane.f32.xlu0 %v3548_v56  ;;  %v3379_v56 = vpop.xlane.xlu0 %3378  ;;  %7188 = vpow2.f32 %v3481_v15  ;;  %v9262_v39 = vpop.eup %7184 }
 0x71a   : > { %v3417_v27 = vsub.f32 %v9085_v58, %v3379_v56  ;;  %v3557_v0 = vsel %vm1851_vm2, %v9262_v39, 0.0 }
 0x71c   : > { %v3477_v1 = vmul.f32 1.442695, %v3417_v27 }
 0x71d   : > { %v9267_v2 = vpop.eup %7186 }
 0x71e   : > { %4029 = vrot.lane.b32.xlu1 %v10595_v25, %s7432_s17  ;;  %v9254_v25 = vpop.permute.xlu1 %4027 }
 0x723   : > { %v9271_v61 = vpop.eup %7188 }
 0x724   : > { %v3575_v56 = vsel %vm1851_vm2, %v9271_v61, 0.0 }
 0x73d   : > { %v3388_v14 = vpop.xlane.xlu1 %3387 }
 0x73e   : > { %v3420_v54 = vsub.f32 %v9098_v20, %v3388_v14  ;;  %v3545_v20 = vsel %vm1851_vm2, %v9267_v2, 0.0 }
 0x740   : > { %v3483_v3 = vmul.f32 1.442695, %v3420_v54 }
 0x741   : > { %v3382_v11 = vpop.xlane.xlu1 %3381 }
 0x742   : > { %7190 = vpow2.f32 %v3483_v3  ;;  %v3418_v31 = vsub.f32 %v9101_v38, %v3382_v11  ;;  %3564 = vadd.xlane.f32.xlu1 %v3563_v13 }
 0x743   : > { %7192 = vpow2.f32 %v3477_v1  ;;  %v9287_v1 = vpop.permute.xlu0 %3966 }
 0x744   : > { %v3479_v58 = vmul.f32 1.442695, %v3418_v31 }
 0x746   : > { %7194 = vpow2.f32 %v3479_v58  ;;  %3558 = vadd.xlane.f32.xlu1 %v3557_v0 }
 0x74a   : > { %3546 = vadd.xlane.f32.xlu1 %v3545_v20 }
 0x74c   : > { %v9273_v30 = vpop.eup %7190 }
 0x74d   : > { %v3578_v38 = vsel %vm1851_vm2, %v9273_v30, 0.0  ;;  %v9279_v15 = vpop.eup %7192 }
 0x74e   : > { %3579 = vadd.xlane.f32.xlu0 %v3578_v38  ;;  %3576 = vadd.xlane.f32.xlu1 %v3575_v56  ;;  %v3569_v54 = vsel %vm1851_vm2, %v9279_v15, 0.0 }
 0x750   : > { %v9281_v27 = vpop.eup %7194 }
 0x751   : > { %v3572_v14 = vsel %vm1851_vm2, %v9281_v27, 0.0 }
 0x752   : > { %3573 = vadd.xlane.f32.xlu0 %v3572_v14  ;;  %3570 = vadd.xlane.f32.xlu1 %v3569_v54 }
 0x75f   : > { %v3493_v3 = vpop.xlane.xlu0 %3492 }
 0x763   : > { %4090 = vrot.lane.b32.xlu1 %v10600_v18, %s7432_s17  ;;  %v3487_v11 = vpop.xlane.xlu0 %3486 }
 0x767   : > { %v3496_v13 = vpop.xlane.xlu1 %3495 }
 0x768   : > { %4088 = vrot.lane.b32.xlu0 %v10599_v60, %s7432_s17  ;;  %7196 = vrcp.f32 %v3496_v13 }
 0x769   : > { %7198 = vrcp.f32 %v3487_v11 }
 0x76a   : > { %7200 = vrcp.f32 %v3493_v3 }
 0x76b   : > { %v3490_v31 = vpop.xlane.xlu1 %3489 }
 0x76c   : > { %7202 = vrcp.f32 %v3490_v31 }
 0x772   : > { %v7197_v58 = vpop.eup %7196 }
 0x773   : > { %v3517_v0 = vpop.xlane.xlu0 %3516  ;;  %v7199_v20 = vpop.eup %7198  ;;  %v3616_v54 = vmul.f32 %v7197_v58, %v9128_v6 }
 0x774   : > { %v7201_v38 = vpop.eup %7200  ;;  %v3613_v26 = vmul.f32 %v7199_v20, %v9123_v51 }
 0x775   : > { %v3520_v56 = vpop.xlane.xlu1 %3519  ;;  %v3615_v60 = vmul.f32 %v7201_v38, %v9119_v9 }
 0x776   : > { %v7203_v14 = vpop.eup %7202  ;;  %7204 = vrcp.f32 %v3520_v56 }
 0x777   : > { %v3511_v18 = vpop.xlane.xlu0 %3510  ;;  %v3614_v24 = vmul.f32 %v7203_v14, %v9133_v59  ;;  %v3646_v13 = vpack.c.bf16 %v3616_v54, %v3615_v60 }
 0x778   : > { %7206 = vrcp.f32 %v3511_v18 }
 0x779   : > { %7208 = vrcp.f32 %v3517_v0  ;;  %v3514_v3 = vpop.xlane.xlu1 %3513  ;;  %v3645_v11 = vpack.c.bf16 %v3614_v24, %v3613_v26 }
 0x77a   : > { %7210 = vrcp.f32 %v3514_v3 }
 0x77b   : > { %6659 = vmatprep.mubr.msk.bf16.mxu1 %vm1851_vm2, %v3645_v11  ;;  %v3505_v31 = vpop.xlane.xlu0 %3504 }
 0x77c   : > { %6660 = vmatmul.mubr.msk.bf16.vlgmr.msra.gmra.mrb[52].mxu1 %vm1851_vm2, %v3646_v13 }
 0x77d   : > { %6672 = vmatpush3.bf16.msra.mxu1 %v8817_v47  ;;  %v3508_v6 = vpop.xlane.xlu1 %3507 }
 0x77e   : > { %6673 = vmatprep.subr.bf16.mxu1 %v9107_v34  ;;  %7212 = vrcp.f32 %v3508_v6 }
 0x77f   : > { %v3499_v51 = vpop.xlane.xlu0 %3498 }
 0x780   : > { %7214 = vrcp.f32 %v3499_v51  ;;  %v7205_v9 = vpop.eup %7204 }
 0x781   : > { %7216 = vrcp.f32 %v3505_v31  ;;  %6674 = vmatpush3.bf16.msra.mxu1 %v9107_v34  ;;  %v3502_v26 = vpop.xlane.xlu1 %3501  ;;  %v3624_v0 = vmul.f32 %v7205_v9, %v9147_v42 }
 0x782   : > { %v7207_v24 = vpop.eup %7206  ;;  %7218 = vrcp.f32 %v3502_v26  ;;  %6687 = vmatprep.subr.bf16.mxu1 %v9111_v45 }
 0x783   : > { %v7209_v59 = vpop.eup %7208  ;;  %v3621_v20 = vmul.f32 %v7207_v24, %v9152_v41 }
 0x784   : > { %v7211_v58 = vpop.eup %7210  ;;  %v3541_v47 = vpop.xlane.xlu0 %3540  ;;  %v3623_v56 = vmul.f32 %v7209_v59, %v9142_v28 }
 0x785   : > { %v3622_v38 = vmul.f32 %v7211_v58, %v9157_v52 }
 0x786   : > { %v3650_v18 = vpack.c.bf16 %v3624_v0, %v3623_v56 }
 0x787   : > { %v3649_v14 = vpack.c.bf16 %v3622_v38, %v3621_v20 }
 0x788   : > { %v3535_v54 = vpop.xlane.xlu0 %3534  ;;  %v7213_v34 = vpop.eup %7212 }
 0x789   : > { %7220 = vrcp.f32 %v3535_v54  ;;  %6675 = vmatprep.mubr.msk.bf16.mxu1 %vm1851_vm2, %v3649_v14  ;;  %v3620_v52 = vmul.f32 %v7213_v34, %v9167_v37 }
 0x78a   : > { %v7215_v60 = vpop.eup %7214  ;;  %7222 = vrcp.f32 %v3541_v47  ;;  %v3538_v3 = vpop.xlane.xlu1 %3537  ;;  %6676 = vmatmul.mubr.msk.bf16.vlgmr.msra.gmra.mrb[56].mxu1 %vm1851_vm2, %v3650_v18 }
 0x78b   : > { %v7217_v42 = vpop.eup %7216  ;;  %7224 = vrcp.f32 %v3538_v3  ;;  %6688 = vmatpush3.bf16.msra.mxu1 %v9111_v45  ;;  %v3617_v11 = vmul.f32 %v7215_v60, %v9172_v16 }
 0x78c   : > { %v7219_v41 = vpop.eup %7218  ;;  %6689 = vmatprep.subr.bf16.mxu1 %v9113_v33  ;;  %v3544_v28 = vpop.xlane.xlu0 %3543  ;;  %v3619_v31 = vmul.f32 %v7217_v42, %v9162_v62 }
 0x78d   : > { %7226 = vrcp.f32 %v3544_v28  ;;  %v3618_v13 = vmul.f32 %v7219_v41, %v9176_v36 }
 0x78e   : > { %v3529_v6 = vpop.xlane.xlu1 %3528  ;;  %v3648_v45 = vpack.c.bf16 %v3620_v52, %v3619_v31 }
 0x78f   : > { %6690 = vmatpush3.bf16.msra.mxu1 %v9113_v33  ;;  %v3647_v51 = vpack.c.bf16 %v3618_v13, %v3617_v11 }
 0x790   : > { %6703 = vmatprep.subr.bf16.mxu1 %v9254_v25 }
 0x791   : > { %6667 = vmatprep.mubr.msk.bf16.mxu0 %vm1851_vm2, %v3647_v51 }
 0x792   : > { %v3523_v37 = vpop.xlane.xlu1 %3522  ;;  %6668 = vmatmul.mubr.msk.bf16.vlgmr.msra.gmra.mrb[76].mxu0 %vm1851_vm2, %v3648_v45 }
 0x793   : > { %v7221_v9 = vpop.eup %7220  ;;  %6680 = vmatpush3.bf16.msra.mxu0 %v8834_v4 }
 0x794   : > { %v7223_v16 = vpop.eup %7222  ;;  %6681 = vmatprep.subr.bf16.mxu0 %v9109_v21  ;;  %v3629_v26 = vmul.f32 %v7221_v9, %v9189_v50 }
 0x795   : > { %v7225_v36 = vpop.eup %7224  ;;  %v3631_v59 = vmul.f32 %v7223_v16, %v9182_v32 }
 0x796   : > { %v3532_v62 = vpop.xlane.xlu1 %3531  ;;  %v3630_v33 = vmul.f32 %v7225_v36, %v9198_v29 }
 0x797   : > { %v7227_v24 = vpop.eup %7226  ;;  %6682 = vmatpush3.bf16.msra.mxu0 %v9109_v21  ;;  %7228 = vrcp.f32 %v3532_v62 }
 0x798   : > { %v3632_v58 = vmul.f32 %v7227_v24, %v9192_v10  ;;  %6695 = vmatprep.subr.bf16.mxu0 %v9287_v1  ;;  %v3653_v4 = vpack.c.bf16 %v3630_v33, %v3629_v26  ;;  %7230 = vrcp.f32 %v3523_v37 }
 0x799   : > { %7232 = vrcp.f32 %v3529_v6 }
 0x79a   : > { %v3526_v0 = vpop.xlane.xlu1 %3525  ;;  %6691 = vmatprep.mubr.msk.bf16.mxu1 %vm1851_vm2, %v3653_v4  ;;  %v3654_v47 = vpack.c.bf16 %v3632_v58, %v3631_v59 }
 0x79b   : > { %7234 = vrcp.f32 %v3526_v0 }
 0x79c   : > { %6692 = vmatmul.mubr.msk.bf16.vlgmr.msra.gmra.mrb[60].mxu1 %vm1851_vm2, %v3654_v47 }
 0x79d   : > { %6704 = vmatpush3.bf16.msra.mxu1 %v9254_v25  ;;  %v3568_v25 = vpop.xlane.xlu0 %3567 }
 0x79e   : > { %v4030_v21 = vpop.permute.xlu1 %4029 }
 0x79f   : > { %6705 = vmatprep.subr.bf16.mxu1 %v4030_v21 }
 0x7a1   : > { %6706 = vmatpush3.bf16.msra.mxu1 %v4030_v21  ;;  %v7229_v32 = vpop.eup %7228 }
 0x7a2   : > { %v7231_v50 = vpop.eup %7230  ;;  %v3628_v20 = vmul.f32 %v7229_v32, %v9215_v48  ;;  %v3562_v48 = vpop.xlane.xlu0 %3561 }
 0x7a3   : > { %v7233_v10 = vpop.eup %7232  ;;  %v3625_v38 = vmul.f32 %v7231_v50, %v9210_v57 }
 0x7a4   : > { %v3627_v14 = vmul.f32 %v7233_v10, %v9202_v22  ;;  %v1249_v22 = vld [vmem:[%s10466_s6 + $0x8] sm:$0xff] }
 0x7a5   : > { %v7235_v29 = vpop.eup %7234 }
 0x7a6   : > { %v3626_v56 = vmul.f32 %v7235_v29, %v9224_v23  ;;  %v3652_v18 = vpack.c.bf16 %v3628_v20, %v3627_v14  ;;  %v3553_v34 = vpop.xlane.xlu0 %3552  ;;  %v4165_v23 = vpack.c.bf16 %v1249_v22, %v1249_v22 }
 0x7a8   : > { %v3651_v54 = vpack.c.bf16 %v3626_v56, %v3625_v38  ;;  %6925 = vmatprep.subr.msk.bf16.mxu1 %vm4214_vm3, %v4165_v23  ;;  %v1248_v38 = vld [vmem:[%s10466_s6] sm:$0xff] }
 0x7a9   : > { %v2724_v56 = vpack.c.bf16 %v1248_v38, %v1248_v38  ;;  %v10634_v38 = vld [vmem:[#allocation4_spill] sm:$0xff] }
 0x7aa   : > { %6683 = vmatprep.mubr.msk.bf16.mxu0 %vm1851_vm2, %v3651_v54  ;;  %v3556_v57 = vpop.xlane.xlu0 %3555 }
 0x7ab   : > { %6684 = vmatmul.mubr.msk.bf16.vlgmr.msra.gmra.mrb[80].mxu0 %vm1851_vm2, %v3652_v18 }
 0x7ac   : > { %6696 = vmatpush3.bf16.msra.mxu0 %v9287_v1 }
 0x7ad   : > { %6697 = vmatprep.subr.bf16.mxu0 %v9250_v5 }
 0x7ae   : > { %v3550_v3 = vpop.xlane.xlu0 %3549 }
 0x7b0   : > { %6698 = vmatpush3.bf16.msra.mxu0 %v9250_v5 }
 0x7cf   : > { %v3565_v60 = vpop.xlane.xlu1 %3564 }
 0x7d0   : > { %7236 = vrcp.f32 %v3565_v60 }
 0x7d1   : > { %7238 = vrcp.f32 %v3562_v48 }
 0x7d2   : > { %7240 = vrcp.f32 %v3568_v25 }
 0x7d3   : > { %v3559_v42 = vpop.xlane.xlu1 %3558 }
 0x7d4   : > { %7242 = vrcp.f32 %v3559_v42 }
 0x7d5   : > { %7244 = vrcp.f32 %v3556_v57 }
 0x7d6   : > { %7246 = vrcp.f32 %v3550_v3 }
 0x7d7   : > { %7248 = vrcp.f32 %v3553_v34  ;;  %v3547_v5 = vpop.xlane.xlu1 %3546 }
 0x7d8   : > { %7250 = vrcp.f32 %v3547_v5 }
 0x7da   : > { %v7237_v1 = vpop.eup %7236 }
 0x7db   : > { %v3577_v41 = vpop.xlane.xlu1 %3576  ;;  %v3580_v52 = vpop.xlane.xlu0 %3579  ;;  %v3639_v31 = vmul.f32 %v7237_v1, %v9257_v53  ;;  %v4216_v53 = vsel %vm4214_vm3, %v4165_v23, 0 }
 0x7dc   : > { %v7239_v28 = vpop.eup %7238  ;;  %7252 = vrcp.f32 %v3577_v41 }
 0x7dd   : > { %v7241_v11 = vpop.eup %7240  ;;  %7254 = vrcp.f32 %v3580_v52  ;;  %v3638_v9 = vmul.f32 %v7239_v28, %v9226_v44 }
 0x7de   : > { %v7243_v13 = vpop.eup %7242  ;;  %v3640_v36 = vmul.f32 %v7241_v11, %v9218_v7 }
 0x7df   : > { %v7245_v6 = vpop.eup %7244  ;;  %v3571_v51 = vpop.xlane.xlu1 %3570  ;;  %v3637_v37 = vmul.f32 %v7243_v13, %v9262_v39 }
 0x7e0   : > { %v3574_v45 = vpop.xlane.xlu0 %3573  ;;  %v7247_v16 = vpop.eup %7246  ;;  %7256 = vrcp.f32 %v3571_v51  ;;  %v3636_v24 = vmul.f32 %v7245_v6, %v9236_v17  ;;  %v3658_v59 = vpack.c.bf16 %v3640_v36, %v3639_v31 }
 0x7e1   : > { %v7249_v62 = vpop.eup %7248  ;;  %7258 = vrcp.f32 %v3574_v45  ;;  %v3657_v26 = vpack.c.bf16 %v3638_v9, %v3637_v37  ;;  %v3634_v44 = vmul.f32 %v7247_v16, %v9240_v43 }
 0x7e2   : > { %v7251_v33 = vpop.eup %7250  ;;  %v3635_v4 = vmul.f32 %v7249_v62, %v9232_v55 }
 0x7e3   : > { %6707 = vmatprep.mubr.msk.bf16.mxu1 %vm1851_vm2, %v3657_v26  ;;  %v3633_v39 = vmul.f32 %v7251_v33, %v9267_v2  ;;  %v4091_v21 = vpop.permute.xlu1 %4090 }
 0x7e4   : > { %v4089_v58 = vpop.permute.xlu0 %4088  ;;  %6708 = vmatmul.mubr.msk.bf16.vlgmr.msra.gmra.mrb[64].mxu1 %vm1851_vm2, %v3658_v59  ;;  %v3656_v0 = vpack.c.bf16 %v3636_v24, %v3635_v4 }
 0x7e5   : > { %6711 = vmatprep.subr.bf16.mxu0 %v4089_v58  ;;  %v3655_v7 = vpack.c.bf16 %v3634_v44, %v3633_v39  ;;  %6720 = vmatpush3.bf16.msra.mxu1 %v4216_v53 }
 0x7e6   : > { %v7253_v47 = vpop.eup %7252  ;;  %6926 = vmatprep.subr.msk.bf16.mxu1 %vm4214_vm3, %v2724_v56 }
 0x7e7   : > { %6699 = vmatprep.mubr.msk.bf16.mxu0 %vm1851_vm2, %v3655_v7  ;;  %v7255_v17 = vpop.eup %7254  ;;  %v3643_v43 = vmul.f32 %v7253_v47, %v9271_v61  ;;  %v4428_v61 = vsel %vm4214_vm3, %v2724_v56, 0  ;;  %v10639_v56 = vld [vmem:[#allocation9_spill] sm:$0xff] }
 0x7e8   : > { %6700 = vmatmul.mubr.msk.bf16.vlgmr.msra.gmra.mrb[84].mxu0 %vm1851_vm2, %v3656_v0  ;;  %v3644_v55 = vmul.f32 %v7255_v17, %v9273_v30 }
 0x7e9   : > { %6712 = vmatpush3.bf16.msra.mxu0 %v4089_v58 }
 0x7ea   : > { %v7257_v32 = vpop.eup %7256  ;;  %6713 = vmatprep.subr.bf16.mxu0 %v4091_v21  ;;  %v3660_v20 = vpack.c.bf16 %v3644_v55, %v3643_v43  ;;  %v10629_v55 = vpack.c.bf16 %v8830_v35, %v8824_v12  ;;  %v10636_v35 = vld [vmem:[#allocation21_spill] sm:$0xff] }
 0x7eb   : > { %v7259_v2 = vpop.eup %7258  ;;  %v3641_v50 = vmul.f32 %v7257_v32, %v9279_v15 }
 0x7ec   : > { %v3642_v10 = vmul.f32 %v7259_v2, %v9281_v27 }
 0x7ed   : > { %6714 = vmatpush3.bf16.msra.mxu0 %v4091_v21 }
 0x7ee   : > { %v3659_v29 = vpack.c.bf16 %v3642_v10, %v3641_v50  ;;  %v10630_v50 = vpack.c.bf16 %v8826_v49, %v8822_v19  ;;  %v10631_v10 = vpack.c.bf16 %v8845_v46, %v8839_v63  ;;  %v10637_v19 = vld [vmem:[#allocation2_spill] sm:$0xff]  ;;  %v10640_v63 = vld [vmem:[#allocation25_spill] sm:$0xff] }
 0x7ef   : > { %v10638_v49 = vpack.c.bf16 %v10636_v35, %v10637_v19  ;;  %v10641_v46 = vpack.c.bf16 %v10639_v56, %v10640_v63 }
 0x7f0   : > { %6715 = vmatprep.mubr.msk.bf16.mxu0 %vm1851_vm2, %v3659_v29  ;;  %v10632_v29 = vpack.c.bf16 %v8841_v40, %v8837_v8  ;;  %v10642_v8 = vld [vmem:[#allocation10_spill] sm:$0xff]  ;;  %v10643_v40 = vld [vmem:[#allocation8_spill] sm:$0xff] }
 0x7f1   : > { %6716 = vmatmul.mubr.msk.bf16.vlgmr.msra.gmra.mrb[88].mxu0 %vm1851_vm2, %v3660_v20  ;;  %v10633_v20 = vld [vmem:[#allocation23_spill] sm:$0xff] }
 0x7f2   : > { %v10635_v12 = vpack.c.bf16 %v10633_v20, %v10634_v38  ;;  %v7394_v20 = vld [vmem:[%s7524_s19 + $0x28] sm:$0xff] }
 0x84f   : > { %v6661_v30 = vpop.f32.mrb[52].mxu1 }
 0x850   : > { %v3707_v15 = vpop.f32.mrb[53].mxu1 }
 0x851   : > { %v6662_v14 = vpop.f32.mrb[54].mxu1 }
 0x852   : > { %v4150_v27 = vpack.c.bf16 %v6662_v14, %v6661_v30  ;;  %v3710_v54 = vpop.f32.mrb[55].mxu1  ;;  %v10645_v30 = vld [vmem:[#allocation3_spill] sm:$0xff] }
 0x853   : > { %v4149_v18 = vpack.c.bf16 %v3710_v54, %v3707_v15  ;;  %v10646_v15 = vld [vmem:[#allocation5_spill] sm:$0xff]  ;;  %v10649_v54 = vld [vmem:[#allocation6_spill] sm:$0xff] }
 0x854   : > { %v10647_v14 = vpack.c.bf16 %v10645_v30, %v10646_v15  ;;  %v7396_v30 = vld [vmem:[%s7524_s19 + $0x40] sm:$0xff] }
 0x855   : > { %6721 = vmatprep.mubr.msk.bf16.mxu1 %vm1320_vm1, %v4149_v18 }
 0x856   : > { %6722 = vmatmul.mubr.msk.bf16.vlgmr.msra.gmra.mrb[68].mxu1 %vm1320_vm1, %v4150_v27  ;;  %v10648_v27 = vld [vmem:[#allocation22_spill] sm:$0xff] }
 0x857   : > { %6754 = vmatpush3.bf16.msra.mxu1 %v4428_v61  ;;  %v10644_v61 = vpack.c.bf16 %v10642_v8, %v10643_v40  ;;  %v10650_v18 = vpack.c.bf16 %v10648_v27, %v10649_v54 }
 0x85d   : > { %v6677_v25 = vpop.f32.mrb[56].mxu1 }
 0x85e   : > { %v3829_v48 = vpop.f32.mrb[57].mxu1 }
 0x85f   : > { %v6678_v34 = vpop.f32.mrb[58].mxu1 }
 0x860   : > { %v4154_v57 = vpack.c.bf16 %v6678_v34, %v6677_v25  ;;  %v3832_v60 = vpop.f32.mrb[59].mxu1  ;;  %v10651_v25 = vld [vmem:[#allocation14_spill] sm:$0xff] }
 0x861   : > { %v4153_v22 = vpack.c.bf16 %v3832_v60, %v3829_v48  ;;  %v10652_v48 = vld [vmem:[#allocation12_spill] sm:$0xff]  ;;  %v10655_v60 = vld [vmem:[#allocation7_spill] sm:$0xff] }
 0x862   : > { %v10653_v34 = vpack.c.bf16 %v10651_v25, %v10652_v48  ;;  %v7398_v48 = vld [vmem:[%s7524_s19 + $0x48] sm:$0xff] }
 0x865   : > { %v6669_v23 = vpop.f32.mrb[76].mxu0 }
 0x866   : > { %v3768_v3 = vpop.f32.mrb[77].mxu0 }
 0x867   : > { %v6670_v42 = vpop.f32.mrb[78].mxu0 }
 0x868   : > { %v4152_v5 = vpack.c.bf16 %v6670_v42, %v6669_v23  ;;  %v3771_v1 = vpop.f32.mrb[79].mxu0  ;;  %v10657_v23 = vld [vmem:[#allocation16_spill] sm:$0xff] }
 0x869   : > { %v4151_v41 = vpack.c.bf16 %v3771_v1, %v3768_v3  ;;  %v10658_v3 = vld [vmem:[#allocation26_spill] sm:$0xff]  ;;  %v10661_v1 = vld [vmem:[#allocation13_spill] sm:$0xff] }
 0x86a   : > { %v10659_v42 = vpack.c.bf16 %v10657_v23, %v10658_v3 }
 0x86b   : > { %6725 = vmatprep.mubr.msk.bf16.mxu1 %vm1320_vm1, %v4151_v41 }
 0x86c   : > { %6726 = vmatmul.mubr.msk.bf16.gmra.mrb[72].mxu1 %vm1320_vm1, %v4152_v5  ;;  %v10660_v5 = vld [vmem:[#allocation11_spill] sm:$0xff] }
 0x86d   : > { %6729 = vmatprep.mubr.msk.bf16.mxu1 %vm1320_vm1, %v4153_v22  ;;  %v10662_v41 = vpack.c.bf16 %v10660_v5, %v10661_v1 }
 0x86f   : > { %v6693_v52 = vpop.f32.mrb[60].mxu1 }
 0x870   : > { %v3951_v28 = vpop.f32.mrb[61].mxu1 }
 0x871   : > { %v6694_v11 = vpop.f32.mrb[62].mxu1 }
 0x872   : > { %v4158_v13 = vpack.c.bf16 %v6694_v11, %v6693_v52  ;;  %v3954_v31 = vpop.f32.mrb[63].mxu1  ;;  %v10663_v52 = vld [vmem:[#allocation19_spill] sm:$0xff] }
 0x873   : > { %v4157_v6 = vpack.c.bf16 %v3954_v31, %v3951_v28  ;;  %v10664_v28 = vld [vmem:[#allocation17_spill] sm:$0xff]  ;;  %v10667_v31 = vld [vmem:[#allocation18_spill] sm:$0xff] }
 0x874   : > { %6730 = vmatmul.mubr.msk.bf16.gmra.mrb[76].mxu1 %vm1320_vm1, %v4154_v57  ;;  %v10654_v57 = vld [vmem:[#allocation24_spill] sm:$0xff]  ;;  %v10665_v11 = vpack.c.bf16 %v10663_v52, %v10664_v28 }
 0x875   : > { %v10656_v22 = vpack.c.bf16 %v10654_v57, %v10655_v60  ;;  %v7399_v60 = vld [vmem:[%s7524_s19 + $0x50] sm:$0xff] }
 0x87e   : > { %v6685_v51 = vpop.f32.mrb[80].mxu0 }
 0x87f   : > { %v3890_v45 = vpop.f32.mrb[81].mxu0 }
 0x880   : > { %v6686_v37 = vpop.f32.mrb[82].mxu0 }
 0x881   : > { %v4156_v9 = vpack.c.bf16 %v6686_v37, %v6685_v51  ;;  %v3893_v16 = vpop.f32.mrb[83].mxu0 }
 0x882   : > { %v4155_v36 = vpack.c.bf16 %v3893_v16, %v3890_v45  ;;  %v9450_v45 = vld [vmem:[%s10467_s7] ss:$0 sm:$0xff] }
 0x884   : > { %6733 = vmatprep.mubr.msk.bf16.mxu1 %vm1320_vm1, %v4155_v36  ;;  %v7389_v36 = vld [vmem:[%s7524_s19] sm:$0xff] }
 0x885   : > { %6734 = vmatmul.mubr.msk.bf16.gmra.mrb[80].mxu1 %vm1320_vm1, %v4156_v9  ;;  %v7388_v9 = vld [vmem:[%s7524_s19 + $0x10] sm:$0xff] }
 0x886   : > { %6737 = vmatprep.mubr.msk.bf16.mxu1 %vm1320_vm1, %v4157_v6 }
 0x88d   : > { %6738 = vmatmul.mubr.msk.bf16.gmra.mrb[84].mxu1 %vm1320_vm1, %v4158_v13  ;;  %v10666_v13 = vld [vmem:[#allocation15_spill] sm:$0xff] }
 0x88e   : > { %v10668_v6 = vpack.c.bf16 %v10666_v13, %v10667_v31 }
 0x8b7   : > { %v6709_v62 = vpop.f32.mrb[64].mxu1 }
 0x8b8   : > { %v4073_v26 = vpop.f32.mrb[65].mxu1 }
 0x8b9   : > { %v6710_v33 = vpop.f32.mrb[66].mxu1 }
 0x8ba   : > { %v4162_v24 = vpack.c.bf16 %v6710_v33, %v6709_v62  ;;  %v4076_v59 = vpop.f32.mrb[67].mxu1 }
 0x8bb   : > { %v4161_v53 = vpack.c.bf16 %v4076_v59, %v4073_v26  ;;  %v6701_v58 = vpop.f32.mrb[84].mxu0  ;;  %v7390_v59 = vld [vmem:[%s7524_s19 + $0x8] sm:$0xff] }
 0x8bc   : > { %v4012_v39 = vpop.f32.mrb[85].mxu0 }
 0x8bd   : > { %v6702_v44 = vpop.f32.mrb[86].mxu0 }
 0x8be   : > { %v4160_v4 = vpack.c.bf16 %v6702_v44, %v6701_v58  ;;  %v4015_v7 = vpop.f32.mrb[87].mxu0 }
 0x8bf   : > { %v4159_v0 = vpack.c.bf16 %v4015_v7, %v4012_v39  ;;  %v7391_v39 = vld [vmem:[%s7524_s19 + $0x18] sm:$0xff] }
 0x8c1   : > { %6741 = vmatprep.mubr.msk.bf16.mxu1 %vm1320_vm1, %v4159_v0 }
 0x8c2   : > { %6742 = vmatmul.mubr.msk.bf16.gmra.mrb[88].mxu1 %vm1320_vm1, %v4160_v4 }
 0x8c3   : > { %6745 = vmatprep.mubr.msk.bf16.mxu1 %vm1320_vm1, %v4161_v53 }
 0x8c4   : > { %v6717_v47 = vpop.f32.mrb[88].mxu0 }
 0x8c5   : > { %v4134_v17 = vpop.f32.mrb[89].mxu0 }
 0x8c6   : > { %v6718_v21 = vpop.f32.mrb[90].mxu0 }
 0x8c7   : > { %v4164_v32 = vpack.c.bf16 %v6718_v21, %v6717_v47  ;;  %v4137_v2 = vpop.f32.mrb[91].mxu0 }
 0x8c8   : > { %v4163_v43 = vpack.c.bf16 %v4137_v2, %v4134_v17 }
 0x8ca   : > { %6746 = vmatmul.mubr.msk.bf16.gmra.mrb[92].mxu1 %vm1320_vm1, %v4162_v24 }
 0x8cb   : > { %6749 = vmatprep.mubr.msk.bf16.mxu1 %vm1320_vm1, %v4163_v43 }
 0x8d2   : > { %6750 = vmatmul.mubr.msk.bf16.gmra.mrb[96].mxu1 %vm1320_vm1, %v4164_v32  ;;  %v7392_v32 = vld [vmem:[%s7524_s19 + $0x20] sm:$0xff] }
 0x8d3   : > { %6755 = vmatprep.mubr.msk.bf16.mxu1 %vm1320_vm1, %v10629_v55 }
 0x8da   : > { %6756 = vmatmul.mubr.msk.bf16.vlgmr.msra.gmra.mrb[68].mxu1 %vm1320_vm1, %v10630_v50 }
 0x8db   : > { %6759 = vmatprep.mubr.msk.bf16.mxu1 %vm1320_vm1, %v10631_v10  ;;  %v7393_v10 = vld [vmem:[%s7524_s19 + $0x38] sm:$0xff] }
 0x8e2   : > { %6760 = vmatmul.mubr.msk.bf16.gmra.mrb[72].mxu1 %vm1320_vm1, %v10632_v29 }
 0x8e3   : > { %6763 = vmatprep.mubr.msk.bf16.mxu1 %vm1320_vm1, %v10635_v12  ;;  %v7395_v12 = vld [vmem:[%s7524_s19 + $0x30] sm:$0xff] }
 0x8ea   : > { %6764 = vmatmul.mubr.msk.bf16.gmra.mrb[76].mxu1 %vm1320_vm1, %v10638_v49 }
 0x8eb   : > { %6767 = vmatprep.mubr.msk.bf16.mxu1 %vm1320_vm1, %v10641_v46 }
 0x8f2   : > { %6768 = vmatmul.mubr.msk.bf16.gmra.mrb[80].mxu1 %vm1320_vm1, %v10644_v61 }
 0x8f3   : > { %6771 = vmatprep.mubr.msk.bf16.mxu1 %vm1320_vm1, %v10647_v14 }
 0x8fa   : > { %6772 = vmatmul.mubr.msk.bf16.gmra.mrb[84].mxu1 %vm1320_vm1, %v10650_v18  ;;  %v7397_v18 = vld [vmem:[%s7524_s19 + $0x58] sm:$0xff] }
 0x8fb   : > { %6775 = vmatprep.mubr.msk.bf16.mxu1 %vm1320_vm1, %v10653_v34 }
 0x902   : > { %6776 = vmatmul.mubr.msk.bf16.gmra.mrb[88].mxu1 %vm1320_vm1, %v10656_v22 }
 0x903   : > { %6779 = vmatprep.mubr.msk.bf16.mxu1 %vm1320_vm1, %v10659_v42 }
 0x90a   : > { %6780 = vmatmul.mubr.msk.bf16.gmra.mrb[92].mxu1 %vm1320_vm1, %v10662_v41 }
 0x90b   : > { %6783 = vmatprep.mubr.msk.bf16.mxu1 %vm1320_vm1, %v10665_v11  ;;  %v7400_v11 = vld [vmem:[%s7524_s19 + $0x60] sm:$0xff] }
 0x912   : > { %6784 = vmatmul.mubr.msk.bf16.gmra.mrb[96].mxu1 %vm1320_vm1, %v10668_v6 }
 0x9ad   : > { %v6757_v51 = vpop.f32.mrb[68].mxu1 }
 0x9ae   : > { %v4464_v37 = vpop.f32.mrb[69].mxu1  ;;  %v4593_v16 = vadd.f32 %v7388_v9, %v6757_v51 }
 0x9af   : > { %v4591_v62 = vadd.f32 %v7389_v36, %v4464_v37  ;;  %v6758_v26 = vpop.f32.mrb[70].mxu1  ;;  %v7401_v37 = vld [vmem:[%s7524_s19 + $0x78] sm:$0xff] }
 0x9b0   : > { %v4467_v33 = vpop.f32.mrb[71].mxu1  ;;  %v9459_v58 = vadd.f32 %v9450_v45, %v4593_v16  ;;  %v4594_v44 = vadd.f32 %v7391_v39, %v6758_v26  ;;  %v7402_v16 = vld [vmem:[%s7524_s19 + $0x68] sm:$0xff]  ;;  %v7403_v26 = vld [vmem:[%s7524_s19 + $0x70] sm:$0xff] }
 0x9b1   : > { %v9455_v24 = vadd.f32 %v9450_v45, %v4591_v62  ;;  %v4592_v53 = vadd.f32 %v7390_v59, %v4467_v33 }
 0x9b2   : > { %v9470_v21 = vadd.f32 %v9450_v45, %v4594_v44  ;;  %v4670_v55 = vsel %vm511_vm0, %v9459_v58, 0.0 }
 0x9b3   : > { %v9463_v4 = vadd.f32 %v9450_v45, %v4592_v53  ;;  %v4664_v7 = vsel %vm511_vm0, %v9455_v24, 0.0 }
 0x9b4   : > { %4665 = vadd.xlane.f32.xlu0 %v4664_v7  ;;  %v4673_v56 = vsel %vm511_vm0, %v9470_v21, 0.0 }
 0x9b5   : > { %v6761_v0 = vpop.f32.mrb[72].mxu1  ;;  %v4667_v47 = vsel %vm511_vm0, %v9463_v4, 0.0 }
 0x9b6   : > { %4668 = vadd.xlane.f32.xlu1 %v4667_v47  ;;  %v4480_v17 = vpop.f32.mrb[73].mxu1  ;;  %v4597_v35 = vadd.f32 %v7395_v12, %v6761_v0 }
 0x9b7   : > { %v4595_v2 = vadd.f32 %v7392_v32, %v4480_v17  ;;  %v6762_v43 = vpop.f32.mrb[74].mxu1  ;;  %v7404_v32 = vld [vmem:[%s7524_s19 + $0x80] sm:$0xff] }
 0x9b8   : > { %4671 = vadd.xlane.f32.xlu0 %v4670_v55  ;;  %v4483_v50 = vpop.f32.mrb[75].mxu1  ;;  %v4598_v29 = vadd.f32 %v7393_v10, %v6762_v43  ;;  %v9492_v61 = vadd.f32 %v9450_v45, %v4597_v35  ;;  %v7405_v10 = vld [vmem:[%s7524_s19 + $0x98] sm:$0xff]  ;;  %v7407_v35 = vld [vmem:[%s7524_s19 + $0x90] sm:$0xff] }
 0x9b9   : > { %v4596_v38 = vadd.f32 %v7394_v20, %v4483_v50  ;;  %v9479_v19 = vadd.f32 %v9450_v45, %v4595_v2  ;;  %v7406_v20 = vld [vmem:[%s7524_s19 + $0x88] sm:$0xff] }
 0x9ba   : > { %v9487_v63 = vadd.f32 %v9450_v45, %v4598_v29  ;;  %v4682_v42 = vsel %vm511_vm0, %v9492_v61, 0.0 }
 0x9bb   : > { %v9482_v49 = vadd.f32 %v9450_v45, %v4596_v38  ;;  %v4676_v27 = vsel %vm511_vm0, %v9479_v19, 0.0 }
 0x9bc   : > { %4674 = vadd.xlane.f32.xlu0 %v4673_v56  ;;  %v4685_v57 = vsel %vm511_vm0, %v9487_v63, 0.0 }
 0x9bd   : > { %v6765_v46 = vpop.f32.mrb[76].mxu1  ;;  %v4679_v8 = vsel %vm511_vm0, %v9482_v49, 0.0 }
 0x9be   : > { %4680 = vadd.xlane.f32.xlu1 %v4679_v8  ;;  %v4496_v40 = vpop.f32.mrb[77].mxu1  ;;  %v4601_v22 = vadd.f32 %v7399_v60, %v6765_v46  ;;  %v7409_v60 = vld [vmem:[%s7524_s19 + $0xb8] sm:$0xff] }
 0x9bf   : > { %v4599_v15 = vadd.f32 %v7396_v30, %v4496_v40  ;;  %v6766_v14 = vpop.f32.mrb[78].mxu1 }
 0x9c0   : > { %4677 = vadd.xlane.f32.xlu0 %v4676_v27  ;;  %v4499_v54 = vpop.f32.mrb[79].mxu1  ;;  %v4602_v25 = vadd.f32 %v7397_v18, %v6766_v14  ;;  %v9516_v28 = vadd.f32 %v9450_v45, %v4601_v22  ;;  %v7408_v18 = vld [vmem:[%s7524_s19 + $0xa0] sm:$0xff] }
 0x9c1   : > { %v4600_v34 = vadd.f32 %v7398_v48, %v4499_v54  ;;  %v9503_v23 = vadd.f32 %v9450_v45, %v4599_v15 }
 0x9c2   : > { %4686 = vadd.xlane.f32.xlu1 %v4685_v57  ;;  %v9511_v5 = vadd.f32 %v9450_v45, %v4602_v25  ;;  %v4694_v39 = vsel %vm511_vm0, %v9516_v28, 0.0 }
 0x9c3   : > { %v9506_v3 = vadd.f32 %v9450_v45, %v4600_v34  ;;  %v4688_v6 = vsel %vm511_vm0, %v9503_v23, 0.0 }
 0x9c4   : > { %4683 = vadd.xlane.f32.xlu0 %v4682_v42  ;;  %v4697_v62 = vsel %vm511_vm0, %v9511_v5, 0.0  ;;  %v7410_v42 = vld [vmem:[%s7524_s19 + $0xa8] sm:$0xff] }
 0x9c5   : > { %v6769_v1 = vpop.f32.mrb[80].mxu1  ;;  %v4691_v41 = vsel %vm511_vm0, %v9506_v3, 0.0 }
 0x9c6   : > { %4692 = vadd.xlane.f32.xlu1 %v4691_v41  ;;  %v4512_v52 = vpop.f32.mrb[81].mxu1  ;;  %v4605_v33 = vadd.f32 %v7403_v26, %v6769_v1 }
 0x9c7   : > { %v4603_v13 = vadd.f32 %v7400_v11, %v4512_v52  ;;  %v6770_v31 = vpop.f32.mrb[82].mxu1  ;;  %v7411_v52 = vld [vmem:[%s7524_s19 + $0xb0] sm:$0xff] }
 0x9c8   : > { %4689 = vadd.xlane.f32.xlu0 %v4688_v6  ;;  %v4515_v51 = vpop.f32.mrb[83].mxu1  ;;  %v4606_v9 = vadd.f32 %v7401_v37, %v6770_v31  ;;  %v9540_v17 = vadd.f32 %v9450_v45, %v4605_v33 }
 0x9c9   : > { %v4604_v36 = vadd.f32 %v7402_v16, %v4515_v51  ;;  %v9527_v59 = vadd.f32 %v9450_v45, %v4603_v13 }
 0x9ca   : > { %4698 = vadd.xlane.f32.xlu1 %v4697_v62  ;;  %v9535_v44 = vadd.f32 %v9450_v45, %v4606_v9  ;;  %10672 = vst [vmem:[#allocation4_spill] sm:$0xff] %v9540_v17  ;;  %v4706_v40 = vsel %vm511_vm0, %v9540_v17, 0.0  ;;  %v7412_v62 = vld [vmem:[%s7524_s19 + $0xc0] sm:$0xff] }
 0x9cb   : > { %10669 = vst [vmem:[#allocation20_spill] sm:$0xff] %v9527_v59  ;;  %v9530_v53 = vadd.f32 %v9450_v45, %v4604_v36  ;;  %v4700_v55 = vsel %vm511_vm0, %v9527_v59, 0.0 }
 0x9cc   : > { %4695 = vadd.xlane.f32.xlu0 %v4694_v39  ;;  %10671 = vst [vmem:[#allocation23_spill] sm:$0xff] %v9535_v44  ;;  %v4709_v12 = vsel %vm511_vm0, %v9535_v44, 0.0 }
 0x9cd   : > { %10670 = vst [vmem:[#allocation27_spill] sm:$0xff] %v9530_v53  ;;  %v6773_v7 = vpop.f32.mrb[84].mxu1  ;;  %v4703_v0 = vsel %vm511_vm0, %v9530_v53, 0.0 }
 0x9ce   : > { %4704 = vadd.xlane.f32.xlu1 %v4703_v0  ;;  %v4528_v47 = vpop.f32.mrb[85].mxu1  ;;  %v4609_v56 = vadd.f32 %v7407_v35, %v6773_v7  ;;  %v7413_v0 = vld [vmem:[%s7524_s19 + $0xd8] sm:$0xff] }
 0x9cf   : > { %v4607_v2 = vadd.f32 %v7404_v32, %v4528_v47  ;;  %v6774_v43 = vpop.f32.mrb[86].mxu1  ;;  %v7414_v32 = vld [vmem:[%s7524_s19 + $0xc8] sm:$0xff] }
 0x9d0   : > { %4701 = vadd.xlane.f32.xlu0 %v4700_v55  ;;  %v4531_v50 = vpop.f32.mrb[87].mxu1  ;;  %v4610_v29 = vadd.f32 %v7405_v10, %v6774_v43  ;;  %v9564_v54 = vadd.f32 %v9450_v45, %v4609_v56  ;;  %v7415_v55 = vld [vmem:[%s7524_s19 + $0xd0] sm:$0xff] }
 0x9d1   : > { %v4608_v38 = vadd.f32 %v7406_v20, %v4531_v50  ;;  %v9551_v46 = vadd.f32 %v9450_v45, %v4607_v2  ;;  %v7416_v56 = vld [vmem:[%s7524_s19 + $0xf0] sm:$0xff] }
 0x9d2   : > { %4710 = vadd.xlane.f32.xlu1 %v4709_v12  ;;  %v9559_v30 = vadd.f32 %v9450_v45, %v4610_v29  ;;  %10676 = vst [vmem:[#allocation25_spill] sm:$0xff] %v9564_v54  ;;  %v4718_v6 = vsel %vm511_vm0, %v9564_v54, 0.0 }
 0x9d3   : > { %10673 = vst [vmem:[#allocation21_spill] sm:$0xff] %v9551_v46  ;;  %v9554_v8 = vadd.f32 %v9450_v45, %v4608_v38  ;;  %v4712_v34 = vsel %vm511_vm0, %v9551_v46, 0.0 }
 0x9d4   : > { %4707 = vadd.xlane.f32.xlu0 %v4706_v40  ;;  %10675 = vst [vmem:[#allocation9_spill] sm:$0xff] %v9559_v30  ;;  %v4721_v41 = vsel %vm511_vm0, %v9559_v30, 0.0 }
 0x9d5   : > { %10674 = vst [vmem:[#allocation2_spill] sm:$0xff] %v9554_v8  ;;  %v6777_v15 = vpop.f32.mrb[88].mxu1  ;;  %v4715_v14 = vsel %vm511_vm0, %v9554_v8, 0.0 }
 0x9d6   : > { %4716 = vadd.xlane.f32.xlu1 %v4715_v14  ;;  %v4544_v27 = vpop.f32.mrb[89].mxu1  ;;  %v4613_v11 = vadd.f32 %v7411_v52, %v6777_v15 }
 0x9d7   : > { %v4611_v25 = vadd.f32 %v7408_v18, %v4544_v27  ;;  %v6778_v48 = vpop.f32.mrb[90].mxu1  ;;  %v7417_v27 = vld [vmem:[%s7524_s19 + $0xe0] sm:$0xff] }
 0x9d8   : > { %4713 = vadd.xlane.f32.xlu0 %v4712_v34  ;;  %v4547_v57 = vpop.f32.mrb[91].mxu1  ;;  %v4614_v22 = vadd.f32 %v7409_v60, %v6778_v48  ;;  %v9588_v36 = vadd.f32 %v9450_v45, %v4613_v11  ;;  %v7418_v60 = vld [vmem:[%s7524_s19 + $0xf8] sm:$0xff] }
 0x9d9   : > { %v4612_v1 = vadd.f32 %v7410_v42, %v4547_v57  ;;  %v9575_v13 = vadd.f32 %v9450_v45, %v4611_v25  ;;  %v7419_v42 = vld [vmem:[%s7524_s19 + $0xe8] sm:$0xff] }
 0x9da   : > { %4722 = vadd.xlane.f32.xlu1 %v4721_v41  ;;  %v9583_v51 = vadd.f32 %v9450_v45, %v4614_v22  ;;  %10680 = vst [vmem:[#allocation5_spill] sm:$0xff] %v9588_v36  ;;  %v4730_v20 = vsel %vm511_vm0, %v9588_v36, 0.0 }
 0x9db   : > { %10677 = vst [vmem:[#allocation10_spill] sm:$0xff] %v9575_v13  ;;  %v9578_v31 = vadd.f32 %v9450_v45, %v4612_v1  ;;  %v4724_v39 = vsel %vm511_vm0, %v9575_v13, 0.0 }
 0x9dc   : > { %4719 = vadd.xlane.f32.xlu0 %v4718_v6  ;;  %10679 = vst [vmem:[#allocation3_spill] sm:$0xff] %v9583_v51  ;;  %v4733_v43 = vsel %vm511_vm0, %v9583_v51, 0.0 }
 0x9dd   : > { %10678 = vst [vmem:[#allocation8_spill] sm:$0xff] %v9578_v31  ;;  %v6781_v37 = vpop.f32.mrb[92].mxu1  ;;  %v4727_v9 = vsel %vm511_vm0, %v9578_v31, 0.0 }
 0x9de   : > { %4728 = vadd.xlane.f32.xlu1 %v4727_v9  ;;  %v4560_v16 = vpop.f32.mrb[93].mxu1  ;;  %v4617_v50 = vadd.f32 %v7415_v55, %v6781_v37 }
 0x9df   : > { %v4615_v26 = vadd.f32 %v7412_v62, %v4560_v16  ;;  %v6782_v33 = vpop.f32.mrb[94].mxu1 }
 0x9e0   : > { %4725 = vadd.xlane.f32.xlu0 %v4724_v39  ;;  %v4563_v7 = vpop.f32.mrb[95].mxu1  ;;  %v4618_v47 = vadd.f32 %v7413_v0, %v6782_v33  ;;  %v9613_v14 = vadd.f32 %v9450_v45, %v4617_v50 }
 0x9e1   : > { %v4616_v2 = vadd.f32 %v7414_v32, %v4563_v7  ;;  %v9599_v10 = vadd.f32 %v9450_v45, %v4615_v26 }
 0x9e2   : > { %4734 = vadd.xlane.f32.xlu1 %v4733_v43  ;;  %v9607_v38 = vadd.f32 %v9450_v45, %v4618_v47  ;;  %10684 = vst [vmem:[#allocation12_spill] sm:$0xff] %v9613_v14  ;;  %v4742_v6 = vsel %vm511_vm0, %v9613_v14, 0.0 }
 0x9e3   : > { %10681 = vst [vmem:[#allocation22_spill] sm:$0xff] %v9599_v10  ;;  %v9602_v29 = vadd.f32 %v9450_v45, %v4616_v2  ;;  %v4736_v48 = vsel %vm511_vm0, %v9599_v10, 0.0 }
 0x9e4   : > { %4731 = vadd.xlane.f32.xlu0 %v4730_v20  ;;  %10683 = vst [vmem:[#allocation14_spill] sm:$0xff] %v9607_v38  ;;  %v4745_v41 = vsel %vm511_vm0, %v9607_v38, 0.0 }
 0x9e5   : > { %10682 = vst [vmem:[#allocation6_spill] sm:$0xff] %v9602_v29  ;;  %v6785_v12 = vpop.f32.mrb[96].mxu1  ;;  %v4739_v35 = vsel %vm511_vm0, %v9602_v29, 0.0 }
 0x9e6   : > { %v4621_v40 = vadd.f32 %v7416_v56, %v6785_v12  ;;  %4740 = vadd.xlane.f32.xlu1 %v4739_v35  ;;  %v4576_v15 = vpop.f32.mrb[97].mxu1 }
 0x9e7   : > { %v4619_v18 = vadd.f32 %v7417_v27, %v4576_v15  ;;  %v6786_v25 = vpop.f32.mrb[98].mxu1 }
 0x9e8   : > { %v9619_v34 = vadd.f32 %v9450_v45, %v4621_v40  ;;  %4737 = vadd.xlane.f32.xlu0 %v4736_v48  ;;  %v4579_v57 = vpop.f32.mrb[99].mxu1  ;;  %v4622_v22 = vadd.f32 %v7418_v60, %v6786_v25 }
 0x9e9   : > { %v4620_v1 = vadd.f32 %v7419_v42, %v4579_v57  ;;  %v9626_v52 = vadd.f32 %v9450_v45, %v4619_v18 }
 0x9ea   : > { %10685 = vst [vmem:[#allocation24_spill] sm:$0xff] %v9619_v34  ;;  %4746 = vadd.xlane.f32.xlu1 %v4745_v41  ;;  %v9634_v37 = vadd.f32 %v9450_v45, %v4622_v22  ;;  %v4754_v26 = vsel %vm511_vm0, %v9619_v34, 0.0 }
 0x9eb   : > { %10686 = vst [vmem:[#allocation7_spill] sm:$0xff] %v9626_v52  ;;  %v9629_v11 = vadd.f32 %v9450_v45, %v4620_v1  ;;  %v4748_v16 = vsel %vm511_vm0, %v9626_v52, 0.0 }
 0x9ec   : > { %4743 = vadd.xlane.f32.xlu0 %v4742_v6  ;;  %10688 = vst [vmem:[#allocation26_spill] sm:$0xff] %v9634_v37  ;;  %v4757_v62 = vsel %vm511_vm0, %v9634_v37, 0.0 }
 0x9ed   : > { %10687 = vst [vmem:[#allocation16_spill] sm:$0xff] %v9629_v11  ;;  %v4751_v9 = vsel %vm511_vm0, %v9629_v11, 0.0 }
 0x9ee   : > { %4752 = vadd.xlane.f32.xlu1 %v4751_v9 }
 0x9f0   : > { %4749 = vadd.xlane.f32.xlu0 %v4748_v16 }
 0x9f2   : > { %4758 = vadd.xlane.f32.xlu1 %v4757_v62 }
 0x9f4   : > { %4755 = vadd.xlane.f32.xlu0 %v4754_v26 }
 0xa41   : > { %v4666_v33 = vpop.xlane.xlu0 %4665 }
 0xa42   : > { %v4760_v39 = vmul.f32 0.0625, %v4666_v33 }
 0xa43   : > { %v4669_v45 = vpop.xlane.xlu1 %4668 }
 0xa44   : > { %v9645_v7 = vsub.f32 %v9455_v24, %v4760_v39  ;;  %v4761_v0 = vmul.f32 0.0625, %v4669_v45 }
 0xa45   : > { %v4672_v47 = vpop.xlane.xlu0 %4671 }
 0xa46   : > { %v9648_v32 = vsub.f32 %v9463_v4, %v4761_v0  ;;  %v4762_v2 = vmul.f32 0.0625, %v4672_v47  ;;  %v4824_v43 = vmul.f32 %v9645_v7, %v9645_v7 }
 0xa48   : > { %v9653_v55 = vsub.f32 %v9459_v58, %v4762_v2  ;;  %v4856_v50 = vsel %vm511_vm0, %v4824_v43, 0.0  ;;  %v4825_v20 = vmul.f32 %v9648_v32, %v9648_v32 }
 0xa49   : > { %v4675_v12 = vpop.xlane.xlu0 %4674  ;;  %4857 = vadd.xlane.f32.xlu0 %v4856_v50 }
 0xa4a   : > { %v4763_v35 = vmul.f32 0.0625, %v4675_v12  ;;  %v4859_v56 = vsel %vm511_vm0, %v4825_v20, 0.0  ;;  %v4826_v40 = vmul.f32 %v9653_v55, %v9653_v55 }
 0xa4b   : > { %v4681_v15 = vpop.xlane.xlu1 %4680  ;;  %4860 = vadd.xlane.f32.xlu1 %v4859_v56 }
 0xa4c   : > { %v9662_v27 = vsub.f32 %v9470_v21, %v4763_v35  ;;  %v4765_v18 = vmul.f32 0.0625, %v4681_v15  ;;  %v4862_v25 = vsel %vm511_vm0, %v4826_v40, 0.0 }
 0xa4d   : > { %v4678_v48 = vpop.xlane.xlu0 %4677  ;;  %4863 = vadd.xlane.f32.xlu0 %v4862_v25 }
 0xa4e   : > { %v9666_v57 = vsub.f32 %v9482_v49, %v4765_v18  ;;  %v4764_v60 = vmul.f32 0.0625, %v4678_v48  ;;  %v4827_v22 = vmul.f32 %v9662_v27, %v9662_v27 }
 0xa4f   : > { %v4687_v42 = vpop.xlane.xlu1 %4686 }
 0xa50   : > { %v9671_v1 = vsub.f32 %v9479_v19, %v4764_v60  ;;  %v4767_v41 = vmul.f32 0.0625, %v4687_v42  ;;  %v4865_v6 = vsel %vm511_vm0, %v4827_v22, 0.0  ;;  %v4829_v9 = vmul.f32 %v9666_v57, %v9666_v57 }
 0xa51   : > { %v4684_v16 = vpop.xlane.xlu0 %4683  ;;  %4866 = vadd.xlane.f32.xlu1 %v4865_v6 }
 0xa52   : > { %v9677_v62 = vsub.f32 %v9487_v63, %v4767_v41  ;;  %v4766_v26 = vmul.f32 0.0625, %v4684_v16  ;;  %v4828_v33 = vmul.f32 %v9671_v1, %v9671_v1  ;;  %v4871_v45 = vsel %vm511_vm0, %v4829_v9, 0.0 }
 0xa53   : > { %v4693_v39 = vpop.xlane.xlu1 %4692 }
 0xa54   : > { %v9683_v0 = vsub.f32 %v9492_v61, %v4766_v26  ;;  %v4769_v47 = vmul.f32 0.0625, %v4693_v39  ;;  %v4868_v2 = vsel %vm511_vm0, %v4828_v33, 0.0  ;;  %v4831_v43 = vmul.f32 %v9677_v62, %v9677_v62 }
 0xa55   : > { %v4690_v50 = vpop.xlane.xlu0 %4689  ;;  %4869 = vadd.xlane.f32.xlu0 %v4868_v2  ;;  %4872 = vadd.xlane.f32.xlu1 %v4871_v45 }
 0xa56   : > { %v9689_v20 = vsub.f32 %v9506_v3, %v4769_v47  ;;  %v4768_v12 = vmul.f32 0.0625, %v4690_v50  ;;  %v4830_v35 = vmul.f32 %v9683_v0, %v9683_v0  ;;  %v4877_v40 = vsel %vm511_vm0, %v4831_v43, 0.0 }
 0xa57   : > { %v4699_v56 = vpop.xlane.xlu1 %4698 }
 0xa58   : > { %v9695_v15 = vsub.f32 %v9503_v23, %v4768_v12  ;;  %v4771_v18 = vmul.f32 0.0625, %v4699_v56  ;;  %v4874_v25 = vsel %vm511_vm0, %v4830_v35, 0.0  ;;  %v4833_v48 = vmul.f32 %v9689_v20, %v9689_v20 }
 0xa59   : > { %v4696_v60 = vpop.xlane.xlu0 %4695  ;;  %4875 = vadd.xlane.f32.xlu0 %v4874_v25  ;;  %4878 = vadd.xlane.f32.xlu1 %v4877_v40 }
 0xa5a   : > { %v9701_v22 = vsub.f32 %v9511_v5, %v4771_v18  ;;  %v4770_v42 = vmul.f32 0.0625, %v4696_v60  ;;  %v4832_v41 = vmul.f32 %v9695_v15, %v9695_v15  ;;  %v4883_v9 = vsel %vm511_vm0, %v4833_v48, 0.0 }
 0xa5b   : > { %v4705_v6 = vpop.xlane.xlu1 %4704 }
 0xa5c   : > { %v9707_v16 = vsub.f32 %v9516_v28, %v4770_v42  ;;  %v4773_v26 = vmul.f32 0.0625, %v4705_v6  ;;  %v4880_v33 = vsel %vm511_vm0, %v4832_v41, 0.0  ;;  %v4835_v39 = vmul.f32 %v9701_v22, %v9701_v22 }
 0xa5d   : > { %v4702_v45 = vpop.xlane.xlu0 %4701  ;;  %4881 = vadd.xlane.f32.xlu0 %v4880_v33  ;;  %4884 = vadd.xlane.f32.xlu1 %v4883_v9 }
 0xa5e   : > { %v9713_v47 = vsub.f32 %v9530_v53, %v4773_v26  ;;  %v4772_v2 = vmul.f32 0.0625, %v4702_v45  ;;  %v4834_v43 = vmul.f32 %v9707_v16, %v9707_v16  ;;  %v4889_v12 = vsel %vm511_vm0, %v4835_v39, 0.0 }
 0xa5f   : > { %v4711_v50 = vpop.xlane.xlu1 %4710 }
 0xa60   : > { %v9719_v35 = vsub.f32 %v9527_v59, %v4772_v2  ;;  %v4775_v56 = vmul.f32 0.0625, %v4711_v50  ;;  %v4886_v40 = vsel %vm511_vm0, %v4834_v43, 0.0  ;;  %v4837_v18 = vmul.f32 %v9713_v47, %v9713_v47 }
 0xa61   : > { %v4708_v25 = vpop.xlane.xlu0 %4707  ;;  %4887 = vadd.xlane.f32.xlu0 %v4886_v40  ;;  %4890 = vadd.xlane.f32.xlu1 %v4889_v12 }
 0xa62   : > { %v9725_v48 = vsub.f32 %v9535_v44, %v4775_v56  ;;  %v4774_v60 = vmul.f32 0.0625, %v4708_v25  ;;  %v4836_v42 = vmul.f32 %v9719_v35, %v9719_v35  ;;  %v4895_v6 = vsel %vm511_vm0, %v4837_v18, 0.0 }
 0xa63   : > { %v4717_v41 = vpop.xlane.xlu1 %4716 }
 0xa64   : > { %v9731_v9 = vsub.f32 %v9540_v17, %v4774_v60  ;;  %v4777_v26 = vmul.f32 0.0625, %v4717_v41  ;;  %v4892_v33 = vsel %vm511_vm0, %v4836_v42, 0.0  ;;  %v4839_v39 = vmul.f32 %v9725_v48, %v9725_v48 }
 0xa65   : > { %v4714_v45 = vpop.xlane.xlu0 %4713  ;;  %4893 = vadd.xlane.f32.xlu0 %v4892_v33  ;;  %4896 = vadd.xlane.f32.xlu1 %v4895_v6 }
 0xa66   : > { %v9737_v2 = vsub.f32 %v9554_v8, %v4777_v26  ;;  %v4776_v43 = vmul.f32 0.0625, %v4714_v45  ;;  %v4838_v50 = vmul.f32 %v9731_v9, %v9731_v9  ;;  %v4901_v56 = vsel %vm511_vm0, %v4839_v39, 0.0 }
 0xa67   : > { %v4723_v12 = vpop.xlane.xlu1 %4722 }
 0xa68   : > { %v9743_v40 = vsub.f32 %v9551_v46, %v4776_v43  ;;  %v4779_v18 = vmul.f32 0.0625, %v4723_v12  ;;  %v4898_v25 = vsel %vm511_vm0, %v4838_v50, 0.0  ;;  %v4841_v60 = vmul.f32 %v9737_v2, %v9737_v2 }
 0xa69   : > { %v4720_v42 = vpop.xlane.xlu0 %4719  ;;  %4899 = vadd.xlane.f32.xlu0 %v4898_v25  ;;  %4902 = vadd.xlane.f32.xlu1 %v4901_v56 }
 0xa6a   : > { %v9749_v41 = vsub.f32 %v9559_v30, %v4779_v18  ;;  %v4778_v6 = vmul.f32 0.0625, %v4720_v42  ;;  %v4840_v26 = vmul.f32 %v9743_v40, %v9743_v40  ;;  %v4907_v39 = vsel %vm511_vm0, %v4841_v60, 0.0 }
 0xa6b   : > { %v4729_v33 = vpop.xlane.xlu1 %4728 }
 0xa6c   : > { %v9755_v45 = vsub.f32 %v9564_v54, %v4778_v6  ;;  %v4781_v43 = vmul.f32 0.0625, %v4729_v33  ;;  %v4904_v50 = vsel %vm511_vm0, %v4840_v26, 0.0  ;;  %v4843_v12 = vmul.f32 %v9749_v41, %v9749_v41 }
 0xa6d   : > { %v4726_v56 = vpop.xlane.xlu0 %4725  ;;  %4905 = vadd.xlane.f32.xlu0 %v4904_v50  ;;  %4908 = vadd.xlane.f32.xlu1 %v4907_v39  ;;  %v5172_v39 = vld [vmem:[%s10470_s10] sm:$0xff] }
 0xa6e   : > { %v9761_v18 = vsub.f32 %v9578_v31, %v4781_v43  ;;  %v4780_v25 = vmul.f32 0.0625, %v4726_v56  ;;  %v4842_v42 = vmul.f32 %v9755_v45, %v9755_v45  ;;  %v4913_v6 = vsel %vm511_vm0, %v4843_v12, 0.0  ;;  %v5173_v43 = vld [vmem:[%s10470_s10 + $0x8] sm:$0xff] }
 0xa6f   : > { %v4735_v60 = vpop.xlane.xlu1 %4734  ;;  %v5174_v12 = vpack.c.bf16 %v5173_v43, %v5172_v39 }
 0xa70   : > { %v9767_v33 = vsub.f32 %v9575_v13, %v4780_v25  ;;  %v4783_v26 = vmul.f32 0.0625, %v4735_v60  ;;  %v4910_v8 = vsel %vm511_vm0, %v4842_v42, 0.0  ;;  %v4845_v50 = vmul.f32 %v9761_v18, %v9761_v18 }
 0xa71   : > { %v4732_v56 = vpop.xlane.xlu0 %4731  ;;  %4911 = vadd.xlane.f32.xlu0 %v4910_v8  ;;  %4914 = vadd.xlane.f32.xlu1 %v4913_v6 }
 0xa72   : > { %v9779_v25 = vsub.f32 %v9583_v51, %v4783_v26  ;;  %v4782_v60 = vmul.f32 0.0625, %v4732_v56  ;;  %v4844_v42 = vmul.f32 %v9767_v33, %v9767_v33  ;;  %v4919_v13 = vsel %vm511_vm0, %v4845_v50, 0.0  ;;  %6787 = vmatprep.subr.bf16.mxu0 %v5174_v12 }
 0xa73   : > { %v4741_v31 = vpop.xlane.xlu1 %4740  ;;  %6788 = vmatpush3.bf16.msra.mxu0 %v5174_v12 }
 0xa74   : > { %v9785_v30 = vsub.f32 %v9588_v36, %v4782_v60  ;;  %v4785_v46 = vmul.f32 0.0625, %v4741_v31  ;;  %v4916_v54 = vsel %vm511_vm0, %v4844_v42, 0.0  ;;  %v4847_v8 = vmul.f32 %v9779_v25, %v9779_v25 }
 0xa75   : > { %v4738_v6 = vpop.xlane.xlu0 %4737  ;;  %4917 = vadd.xlane.f32.xlu0 %v4916_v54  ;;  %4920 = vadd.xlane.f32.xlu1 %v4919_v13 }
 0xa76   : > { %v9791_v26 = vsub.f32 %v9602_v29, %v4785_v46  ;;  %v4784_v39 = vmul.f32 0.0625, %v4738_v6  ;;  %v4846_v50 = vmul.f32 %v9785_v30, %v9785_v30  ;;  %v4925_v56 = vsel %vm511_vm0, %v4847_v8, 0.0 }
 0xa77   : > { %v4747_v43 = vpop.xlane.xlu1 %4746 }
 0xa78   : > { %v9797_v31 = vsub.f32 %v9599_v10, %v4784_v39  ;;  %v4787_v60 = vmul.f32 0.0625, %v4747_v43  ;;  %v4922_v42 = vsel %vm511_vm0, %v4846_v50, 0.0  ;;  %v4849_v54 = vmul.f32 %v9791_v26, %v9791_v26 }
 0xa79   : > { %v4744_v13 = vpop.xlane.xlu0 %4743  ;;  %4923 = vadd.xlane.f32.xlu0 %v4922_v42  ;;  %4926 = vadd.xlane.f32.xlu1 %v4925_v56 }
 0xa7a   : > { %v9803_v46 = vsub.f32 %v9607_v38, %v4787_v60  ;;  %v4786_v12 = vmul.f32 0.0625, %v4744_v13  ;;  %v4848_v6 = vmul.f32 %v9797_v31, %v9797_v31  ;;  %v4931_v39 = vsel %vm511_vm0, %v4849_v54, 0.0 }
 0xa7b   : > { %v4753_v8 = vpop.xlane.xlu1 %4752 }
 0xa7c   : > { %v9809_v43 = vsub.f32 %v9613_v14, %v4786_v12  ;;  %v4789_v50 = vmul.f32 0.0625, %v4753_v8  ;;  %v4928_v29 = vsel %vm511_vm0, %v4848_v6, 0.0  ;;  %v4851_v42 = vmul.f32 %v9803_v46, %v9803_v46 }
 0xa7d   : > { %4929 = vadd.xlane.f32.xlu0 %v4928_v29  ;;  %v4750_v56 = vpop.xlane.xlu0 %4749  ;;  %4932 = vadd.xlane.f32.xlu1 %v4931_v39 }
 0xa7e   : > { %v9815_v60 = vsub.f32 %v9629_v11, %v4789_v50  ;;  %v4788_v13 = vmul.f32 0.0625, %v4750_v56  ;;  %v4850_v38 = vmul.f32 %v9809_v43, %v9809_v43  ;;  %v4937_v12 = vsel %vm511_vm0, %v4851_v42, 0.0 }
 0xa7f   : > { %v4759_v54 = vpop.xlane.xlu1 %4758 }
 0xa80   : > { %v9821_v8 = vsub.f32 %v9626_v52, %v4788_v13  ;;  %v4791_v6 = vmul.f32 0.0625, %v4759_v54  ;;  %v4934_v10 = vsel %vm511_vm0, %v4850_v38, 0.0  ;;  %v4853_v29 = vmul.f32 %v9815_v60, %v9815_v60 }
 0xa81   : > { %4935 = vadd.xlane.f32.xlu0 %v4934_v10  ;;  %v4756_v39 = vpop.xlane.xlu0 %4755  ;;  %4938 = vadd.xlane.f32.xlu1 %v4937_v12 }
 0xa82   : > { %v9827_v50 = vsub.f32 %v9634_v37, %v4791_v6  ;;  %v4790_v56 = vmul.f32 0.0625, %v4756_v39  ;;  %v4852_v11 = vmul.f32 %v9821_v8, %v9821_v8  ;;  %v4943_v38 = vsel %vm511_vm0, %v4853_v29, 0.0  ;;  %v5696_v29 = vld [vmem:[%s10472_s12 + $0x8] sm:$0xff] }
 0xa84   : > { %v9832_v42 = vsub.f32 %v9619_v34, %v4790_v56  ;;  %v4940_v13 = vsel %vm511_vm0, %v4852_v11, 0.0  ;;  %v4855_v54 = vmul.f32 %v9827_v50, %v9827_v50  ;;  %v5695_v11 = vld [vmem:[%s10472_s12] sm:$0xff] }
 0xa85   : > { %4941 = vadd.xlane.f32.xlu0 %v4940_v13  ;;  %4944 = vadd.xlane.f32.xlu1 %v4943_v38  ;;  %v9848_v39 = vpack.c.bf16 %v5696_v29, %v5695_v11 }
 0xa86   : > { %v4854_v10 = vmul.f32 %v9832_v42, %v9832_v42  ;;  %v4949_v6 = vsel %vm511_vm0, %v4855_v54, 0.0 }
 0xa87   : > { %6821 = vmatprep.subr.bf16.mxu0 %v9848_v39 }
 0xa88   : > { %v4946_v12 = vsel %vm511_vm0, %v4854_v10, 0.0 }
 0xa89   : > { %4947 = vadd.xlane.f32.xlu0 %v4946_v12  ;;  %4950 = vadd.xlane.f32.xlu1 %v4949_v6 }
 0xad6   : > { %v4858_v56 = vpop.xlane.xlu0 %4857 }
 0xad7   : > { %v4952_v13 = vmul.f32 0.0625, %v4858_v56  ;;  %v9854_v56 = vld [vmem:[%s10468_s8] ss:$0 sm:$0xff] }
 0xad8   : > { %v4861_v38 = vpop.xlane.xlu1 %4860 }
 0xad9   : > { %v4984_v10 = vadd.f32 1e-05, %v4952_v13  ;;  %v4953_v37 = vmul.f32 0.0625, %v4861_v38 }
 0xada   : > { %v4864_v54 = vpop.xlane.xlu0 %4863 }
 0xadb   : > { %7260 = vrsqrt.f32 %v4984_v10  ;;  %v4985_v12 = vadd.f32 1e-05, %v4953_v37  ;;  %v4954_v6 = vmul.f32 0.0625, %v4864_v54 }
 0xadd   : > { %7262 = vrsqrt.f32 %v4985_v12  ;;  %v4986_v52 = vadd.f32 1e-05, %v4954_v6 }
 0xade   : > { %v4867_v34 = vpop.xlane.xlu1 %4866 }
 0xadf   : > { %7264 = vrsqrt.f32 %v4986_v52  ;;  %v4955_v14 = vmul.f32 0.0625, %v4867_v34 }
 0xae1   : > { %v4987_v51 = vadd.f32 1e-05, %v4955_v14 }
 0xae2   : > { %v4870_v36 = vpop.xlane.xlu0 %4869  ;;  %v4873_v11 = vpop.xlane.xlu1 %4872 }
 0xae3   : > { %7266 = vrsqrt.f32 %v4987_v51  ;;  %v4956_v29 = vmul.f32 0.0625, %v4870_v36  ;;  %v4957_v53 = vmul.f32 0.0625, %v4873_v11 }
 0xae5   : > { %v7261_v44 = vpop.eup %7260  ;;  %v4988_v13 = vadd.f32 1e-05, %v4956_v29  ;;  %v4989_v37 = vadd.f32 1e-05, %v4957_v53  ;;  %v9862_v53 = vld [vmem:[%s10469_s9] ss:$0 sm:$0xff] }
 0xae6   : > { %v5048_v38 = vmul.f32 %v7261_v44, %v9645_v7  ;;  %v4876_v10 = vpop.xlane.xlu0 %4875  ;;  %v4879_v54 = vpop.xlane.xlu1 %4878 }
 0xae7   : > { %v7263_v52 = vpop.eup %7262  ;;  %7268 = vrsqrt.f32 %v4988_v13  ;;  %v4958_v14 = vmul.f32 0.0625, %v4876_v10  ;;  %v4959_v34 = vmul.f32 0.0625, %v4879_v54 }
 0xae8   : > { %v5049_v51 = vmul.f32 %v7263_v52, %v9648_v32  ;;  %7270 = vrsqrt.f32 %v4989_v37  ;;  %v5086_v36 = vmul.f32 %v9854_v56, %v5048_v38 }
 0xae9   : > { %v7265_v12 = vpop.eup %7264  ;;  %v4990_v6 = vadd.f32 1e-05, %v4958_v14  ;;  %v4991_v11 = vadd.f32 1e-05, %v4959_v34 }
 0xaea   : > { %v5050_v44 = vmul.f32 %v7265_v12, %v9653_v55  ;;  %v4882_v7 = vpop.xlane.xlu0 %4881  ;;  %v4885_v29 = vpop.xlane.xlu1 %4884  ;;  %v5087_v13 = vmul.f32 %v9854_v56, %v5049_v51  ;;  %v5124_v37 = vadd.f32 %v9862_v53, %v5086_v36 }
 0xaeb   : > { %7272 = vrsqrt.f32 %v4990_v6  ;;  %v4960_v10 = vmul.f32 0.0625, %v4882_v7  ;;  %v4961_v32 = vmul.f32 0.0625, %v4885_v29 }
 0xaec   : > { %7274 = vrsqrt.f32 %v4991_v11  ;;  %v5125_v38 = vadd.f32 %v9862_v53, %v5087_v13  ;;  %v5088_v34 = vmul.f32 %v9854_v56, %v5050_v44 }
 0xaed   : > { %v7267_v54 = vpop.eup %7266  ;;  %v4992_v52 = vadd.f32 1e-05, %v4960_v10  ;;  %v4993_v14 = vadd.f32 1e-05, %v4961_v32 }
 0xaee   : > { %v5051_v59 = vmul.f32 %v7267_v54, %v9662_v27  ;;  %v4888_v55 = vpop.xlane.xlu0 %4887  ;;  %v4891_v12 = vpop.xlane.xlu1 %4890  ;;  %v5156_v17 = vpack.c.bf16 %v5125_v38, %v5124_v37  ;;  %v5126_v27 = vadd.f32 %v9862_v53, %v5088_v34 }
 0xaef   : > { %7276 = vrsqrt.f32 %v4992_v52  ;;  %v4962_v51 = vmul.f32 0.0625, %v4888_v55  ;;  %v4963_v6 = vmul.f32 0.0625, %v4891_v12 }
 0xaf0   : > { %v5089_v7 = vmul.f32 %v9854_v56, %v5051_v59  ;;  %7278 = vrsqrt.f32 %v4993_v14  ;;  %6789 = vmatprep.mubr.msk.bf16.mxu0 %vm511_vm0, %v5156_v17 }
 0xaf1   : > { %v7269_v36 = vpop.eup %7268  ;;  %v4994_v11 = vadd.f32 1e-05, %v4962_v51  ;;  %v4995_v29 = vadd.f32 1e-05, %v4963_v6 }
 0xaf2   : > { %v7271_v13 = vpop.eup %7270  ;;  %v5052_v10 = vmul.f32 %v7269_v36, %v9671_v1  ;;  %v4894_v44 = vpop.xlane.xlu0 %4893  ;;  %v5127_v37 = vadd.f32 %v9862_v53, %v5089_v7 }
 0xaf3   : > { %v4897_v32 = vpop.xlane.xlu1 %4896  ;;  %v5053_v38 = vmul.f32 %v7271_v13, %v9666_v57  ;;  %7280 = vrsqrt.f32 %v4994_v11  ;;  %v4964_v54 = vmul.f32 0.0625, %v4894_v44 }
 0xaf4   : > { %v4965_v59 = vmul.f32 0.0625, %v4897_v32  ;;  %7282 = vrsqrt.f32 %v4995_v29  ;;  %v5157_v52 = vpack.c.bf16 %v5127_v37, %v5126_v27  ;;  %v5090_v17 = vmul.f32 %v9854_v56, %v5052_v10 }
 0xaf5   : > { %v7273_v14 = vpop.eup %7272  ;;  %v4996_v55 = vadd.f32 1e-05, %v4964_v54  ;;  %v5091_v1 = vmul.f32 %v9854_v56, %v5053_v38 }
 0xaf6   : > { %v4997_v12 = vadd.f32 1e-05, %v4965_v59  ;;  %v7275_v51 = vpop.eup %7274  ;;  %v5054_v6 = vmul.f32 %v7273_v14, %v9683_v0  ;;  %v4900_v34 = vpop.xlane.xlu0 %4899  ;;  %6790 = vmatmul.mubr.msk.bf16.vlgmr.msra.gmra.mrb[92].mxu0 %vm511_vm0, %v5157_v52  ;;  %v5128_v57 = vadd.f32 %v9862_v53, %v5090_v17 }
 0xaf7   : > { %v4903_v7 = vpop.xlane.xlu1 %4902  ;;  %v5055_v36 = vmul.f32 %v7275_v51, %v9677_v62  ;;  %7284 = vrsqrt.f32 %v4996_v55  ;;  %v4966_v11 = vmul.f32 0.0625, %v4900_v34  ;;  %6822 = vmatpush3.bf16.msra.mxu0 %v9848_v39  ;;  %v5129_v13 = vadd.f32 %v9862_v53, %v5091_v1 }
 0xaf8   : > { %v4967_v29 = vmul.f32 0.0625, %v4903_v7  ;;  %7286 = vrsqrt.f32 %v4997_v12  ;;  %v5092_v10 = vmul.f32 %v9854_v56, %v5054_v6 }
 0xaf9   : > { %v7277_v44 = vpop.eup %7276  ;;  %v4998_v0 = vadd.f32 1e-05, %v4966_v11  ;;  %v5093_v27 = vmul.f32 %v9854_v56, %v5055_v36  ;;  %v5158_v62 = vpack.c.bf16 %v5129_v13, %v5128_v57 }
 0xafa   : > { %v4999_v32 = vadd.f32 1e-05, %v4967_v29  ;;  %v7279_v37 = vpop.eup %7278  ;;  %v5056_v38 = vmul.f32 %v7277_v44, %v9695_v15  ;;  %v4906_v54 = vpop.xlane.xlu0 %4905  ;;  %v5130_v52 = vadd.f32 %v9862_v53, %v5092_v10 }
 0xafb   : > { %v4909_v59 = vpop.xlane.xlu1 %4908  ;;  %v5057_v39 = vmul.f32 %v7279_v37, %v9689_v20  ;;  %7288 = vrsqrt.f32 %v4998_v0  ;;  %v4968_v17 = vmul.f32 0.0625, %v4906_v54  ;;  %6793 = vmatprep.mubr.msk.bf16.mxu0 %vm511_vm0, %v5158_v62  ;;  %v5131_v55 = vadd.f32 %v9862_v53, %v5093_v27 }
 0xafc   : > { %v4969_v14 = vmul.f32 0.0625, %v4909_v59  ;;  %7290 = vrsqrt.f32 %v4999_v32  ;;  %v5094_v12 = vmul.f32 %v9854_v56, %v5056_v38 }
 0xafd   : > { %v7281_v1 = vpop.eup %7280  ;;  %v5000_v51 = vadd.f32 1e-05, %v4968_v17  ;;  %v5095_v6 = vmul.f32 %v9854_v56, %v5057_v39  ;;  %v5159_v20 = vpack.c.bf16 %v5131_v55, %v5130_v52 }
 0xafe   : > { %v5001_v15 = vadd.f32 1e-05, %v4969_v14  ;;  %v7283_v34 = vpop.eup %7282  ;;  %v5058_v7 = vmul.f32 %v7281_v1, %v9707_v16  ;;  %v4912_v57 = vpop.xlane.xlu0 %4911  ;;  %v5132_v11 = vadd.f32 %v9862_v53, %v5094_v12 }
 0xaff   : > { %v4915_v36 = vpop.xlane.xlu1 %4914  ;;  %v5059_v29 = vmul.f32 %v7283_v34, %v9701_v22  ;;  %7292 = vrsqrt.f32 %v5000_v51  ;;  %v4970_v13 = vmul.f32 0.0625, %v4912_v57  ;;  %6794 = vmatmul.mubr.msk.bf16.gmra.mrb[96].mxu0 %vm511_vm0, %v5159_v20  ;;  %v5133_v44 = vadd.f32 %v9862_v53, %v5095_v6 }
 0xb00   : > { %v4971_v10 = vmul.f32 0.0625, %v4915_v36  ;;  %7294 = vrsqrt.f32 %v5001_v15  ;;  %v5096_v0 = vmul.f32 %v9854_v56, %v5058_v7 }
 0xb01   : > { %v7285_v32 = vpop.eup %7284  ;;  %v5002_v27 = vadd.f32 1e-05, %v4970_v13  ;;  %v5097_v37 = vmul.f32 %v9854_v56, %v5059_v29  ;;  %v5160_v22 = vpack.c.bf16 %v5133_v44, %v5132_v11 }
 0xb02   : > { %v5003_v16 = vadd.f32 1e-05, %v4971_v10  ;;  %v7287_v38 = vpop.eup %7286  ;;  %v5060_v54 = vmul.f32 %v7285_v32, %v9719_v35  ;;  %v4918_v62 = vpop.xlane.xlu0 %4917  ;;  %v5134_v52 = vadd.f32 %v9862_v53, %v5096_v0 }
 0xb03   : > { %v4921_v59 = vpop.xlane.xlu1 %4920  ;;  %v5061_v39 = vmul.f32 %v7287_v38, %v9713_v47  ;;  %7296 = vrsqrt.f32 %v5002_v27  ;;  %v4972_v17 = vmul.f32 0.0625, %v4918_v62  ;;  %6797 = vmatprep.mubr.msk.bf16.mxu0 %vm511_vm0, %v5160_v22  ;;  %v5135_v55 = vadd.f32 %v9862_v53, %v5097_v37 }
 0xb04   : > { %v4973_v14 = vmul.f32 0.0625, %v4921_v59  ;;  %7298 = vrsqrt.f32 %v5003_v16  ;;  %v5098_v12 = vmul.f32 %v9854_v56, %v5060_v54 }
 0xb05   : > { %v7289_v1 = vpop.eup %7288  ;;  %v5004_v51 = vadd.f32 1e-05, %v4972_v17  ;;  %v5099_v15 = vmul.f32 %v9854_v56, %v5061_v39  ;;  %v5161_v47 = vpack.c.bf16 %v5135_v55, %v5134_v52 }
 0xb06   : > { %v5005_v35 = vadd.f32 1e-05, %v4973_v14  ;;  %v7291_v6 = vpop.eup %7290  ;;  %v5062_v34 = vmul.f32 %v7289_v1, %v9731_v9  ;;  %v4924_v7 = vpop.xlane.xlu0 %4923  ;;  %v5136_v20 = vadd.f32 %v9862_v53, %v5098_v12 }
 0xb07   : > { %v4927_v57 = vpop.xlane.xlu1 %4926  ;;  %v5063_v36 = vmul.f32 %v7291_v6, %v9725_v48  ;;  %7300 = vrsqrt.f32 %v5004_v51  ;;  %v4974_v11 = vmul.f32 0.0625, %v4924_v7  ;;  %6798 = vmatmul.mubr.msk.bf16.gmra.mrb[100].mxu0 %vm511_vm0, %v5161_v47  ;;  %v5137_v13 = vadd.f32 %v9862_v53, %v5099_v15 }
 0xb08   : > { %v4975_v29 = vmul.f32 0.0625, %v4927_v57  ;;  %7302 = vrsqrt.f32 %v5005_v35  ;;  %v5100_v10 = vmul.f32 %v9854_v56, %v5062_v34 }
 0xb09   : > { %v7293_v44 = vpop.eup %7292  ;;  %v5006_v0 = vadd.f32 1e-05, %v4974_v11  ;;  %v5101_v32 = vmul.f32 %v9854_v56, %v5063_v36  ;;  %v5162_v48 = vpack.c.bf16 %v5137_v13, %v5136_v20 }
 0xb0a   : > { %v5007_v9 = vadd.f32 1e-05, %v4975_v29  ;;  %v7295_v27 = vpop.eup %7294  ;;  %v5064_v16 = vmul.f32 %v7293_v44, %v9743_v40  ;;  %v4930_v37 = vpop.xlane.xlu0 %4929  ;;  %v5138_v54 = vadd.f32 %v9862_v53, %v5100_v10 }
 0xb0b   : > { %v4933_v38 = vpop.xlane.xlu1 %4932  ;;  %v5065_v62 = vmul.f32 %v7295_v27, %v9737_v2  ;;  %7304 = vrsqrt.f32 %v5006_v0  ;;  %v4976_v22 = vmul.f32 0.0625, %v4930_v37  ;;  %6801 = vmatprep.mubr.msk.bf16.mxu0 %vm511_vm0, %v5162_v48  ;;  %v5139_v52 = vadd.f32 %v9862_v53, %v5101_v32 }
 0xb0c   : > { %v4977_v59 = vmul.f32 0.0625, %v4933_v38  ;;  %7306 = vrsqrt.f32 %v5007_v9  ;;  %v5102_v39 = vmul.f32 %v9854_v56, %v5064_v16 }
 0xb0d   : > { %v7297_v17 = vpop.eup %7296  ;;  %v5008_v14 = vadd.f32 1e-05, %v4976_v22  ;;  %v5103_v55 = vmul.f32 %v9854_v56, %v5065_v62  ;;  %v5163_v2 = vpack.c.bf16 %v5139_v52, %v5138_v54 }
 0xb0e   : > { %v5009_v40 = vadd.f32 1e-05, %v4977_v59  ;;  %v7299_v12 = vpop.eup %7298  ;;  %v5066_v1 = vmul.f32 %v7297_v17, %v9755_v45  ;;  %v4936_v51 = vpop.xlane.xlu0 %4935  ;;  %v5140_v15 = vadd.f32 %v9862_v53, %v5102_v39 }
 0xb0f   : > { %v4939_v35 = vpop.xlane.xlu1 %4938  ;;  %v5067_v6 = vmul.f32 %v7299_v12, %v9749_v41  ;;  %7308 = vrsqrt.f32 %v5008_v14  ;;  %v4978_v34 = vmul.f32 0.0625, %v4936_v51  ;;  %6802 = vmatmul.mubr.msk.bf16.gmra.mrb[104].mxu0 %vm511_vm0, %v5163_v2  ;;  %v5141_v47 = vadd.f32 %v9862_v53, %v5103_v55 }
 0xb10   : > { %v4979_v7 = vmul.f32 0.0625, %v4939_v35  ;;  %7310 = vrsqrt.f32 %v5009_v40  ;;  %v5104_v57 = vmul.f32 %v9854_v56, %v5066_v1 }
 0xb11   : > { %v7301_v20 = vpop.eup %7300  ;;  %v5010_v36 = vadd.f32 1e-05, %v4978_v34  ;;  %v5105_v11 = vmul.f32 %v9854_v56, %v5067_v6  ;;  %v5164_v41 = vpack.c.bf16 %v5141_v47, %v5140_v15 }
 0xb12   : > { %v5011_v45 = vadd.f32 1e-05, %v4979_v7  ;;  %v7303_v29 = vpop.eup %7302  ;;  %v5068_v13 = vmul.f32 %v7301_v20, %v9767_v33  ;;  %v4942_v10 = vpop.xlane.xlu0 %4941  ;;  %v5142_v0 = vadd.f32 %v9862_v53, %v5104_v57 }
 0xb13   : > { %v4945_v44 = vpop.xlane.xlu1 %4944  ;;  %v5069_v9 = vmul.f32 %v7303_v29, %v9761_v18  ;;  %7312 = vrsqrt.f32 %v5010_v36  ;;  %v4980_v32 = vmul.f32 0.0625, %v4942_v10  ;;  %6805 = vmatprep.mubr.msk.bf16.mxu0 %vm511_vm0, %v5164_v41  ;;  %v5143_v16 = vadd.f32 %v9862_v53, %v5105_v11 }
 0xb14   : > { %v4981_v27 = vmul.f32 0.0625, %v4945_v44  ;;  %7314 = vrsqrt.f32 %v5011_v45  ;;  %v5106_v37 = vmul.f32 %v9854_v56, %v5068_v13 }
 0xb15   : > { %v7305_v48 = vpop.eup %7304  ;;  %v5012_v38 = vadd.f32 1e-05, %v4980_v32  ;;  %v5107_v54 = vmul.f32 %v9854_v56, %v5069_v9  ;;  %v5165_v18 = vpack.c.bf16 %v5143_v16, %v5142_v0 }
 0xb16   : > { %v5013_v33 = vadd.f32 1e-05, %v4981_v27  ;;  %v7307_v62 = vpop.eup %7306  ;;  %v5070_v22 = vmul.f32 %v7305_v48, %v9785_v30  ;;  %v4948_v59 = vpop.xlane.xlu0 %4947  ;;  %v5144_v39 = vadd.f32 %v9862_v53, %v5106_v37 }
 0xb17   : > { %v4951_v52 = vpop.xlane.xlu1 %4950  ;;  %v5071_v17 = vmul.f32 %v7307_v62, %v9779_v25  ;;  %7316 = vrsqrt.f32 %v5012_v38  ;;  %v4982_v14 = vmul.f32 0.0625, %v4948_v59  ;;  %6806 = vmatmul.mubr.msk.bf16.gmra.mrb[108].mxu0 %vm511_vm0, %v5165_v18  ;;  %v5145_v55 = vadd.f32 %v9862_v53, %v5107_v54 }
 0xb18   : > { %v4983_v40 = vmul.f32 0.0625, %v4951_v52  ;;  %7318 = vrsqrt.f32 %v5013_v33  ;;  %v5108_v12 = vmul.f32 %v9854_v56, %v5070_v22 }
 0xb19   : > { %v7309_v1 = vpop.eup %7308  ;;  %v5014_v51 = vadd.f32 1e-05, %v4982_v14  ;;  %v5109_v2 = vmul.f32 %v9854_v56, %v5071_v17  ;;  %v5166_v6 = vpack.c.bf16 %v5145_v55, %v5144_v39  ;;  %v5698_v39 = vld [vmem:[%s10472_s12 + $0x18] sm:$0xff] }
 0xb1a   : > { %v5015_v30 = vadd.f32 1e-05, %v4983_v40  ;;  %v7311_v35 = vpop.eup %7310  ;;  %v5072_v15 = vmul.f32 %v7309_v1, %v9797_v31  ;;  %v5146_v25 = vadd.f32 %v9862_v53, %v5108_v12  ;;  %v5701_v40 = vld [vmem:[%s10472_s12 + $0x30] sm:$0xff]  ;;  %v5702_v55 = vld [vmem:[%s10472_s12 + $0x38] sm:$0xff]  ;;  %v9995_v1 = vld [vmem:[%s10471_s11] ss:$0 sm:$0xff] }
 0xb1b   : > { %v5073_v34 = vmul.f32 %v7311_v35, %v9791_v26  ;;  %7320 = vrsqrt.f32 %v5014_v51  ;;  %v5147_v7 = vadd.f32 %v9862_v53, %v5109_v2  ;;  %6809 = vmatprep.mubr.msk.bf16.mxu0 %vm511_vm0, %v5166_v6  ;;  %v5706_v12 = vpack.c.bf16 %v5702_v55, %v5701_v40 }
 0xb1c   : > { %7322 = vrsqrt.f32 %v5015_v30  ;;  %v5110_v47 = vmul.f32 %v9854_v56, %v5072_v15 }
 0xb1d   : > { %v7313_v57 = vpop.eup %7312  ;;  %v5167_v20 = vpack.c.bf16 %v5147_v7, %v5146_v25  ;;  %v5111_v36 = vmul.f32 %v9854_v56, %v5073_v34 }
 0xb1e   : > { %v7315_v45 = vpop.eup %7314  ;;  %v5074_v31 = vmul.f32 %v7313_v57, %v9809_v43  ;;  %v5148_v11 = vadd.f32 %v9862_v53, %v5110_v47 }
 0xb1f   : > { %v5075_v29 = vmul.f32 %v7315_v45, %v9803_v46  ;;  %v5149_v26 = vadd.f32 %v9862_v53, %v5111_v36  ;;  %6810 = vmatmul.mubr.msk.bf16.gmra.mrb[112].mxu0 %vm511_vm0, %v5167_v20 }
 0xb20   : > { %v5112_v13 = vmul.f32 %v9854_v56, %v5074_v31 }
 0xb21   : > { %v7317_v10 = vpop.eup %7316  ;;  %v5168_v41 = vpack.c.bf16 %v5149_v26, %v5148_v11  ;;  %v5113_v44 = vmul.f32 %v9854_v56, %v5075_v29 }
 0xb22   : > { %v7319_v0 = vpop.eup %7318  ;;  %v5076_v9 = vmul.f32 %v7317_v10, %v9821_v8  ;;  %v5150_v32 = vadd.f32 %v9862_v53, %v5112_v13 }
 0xb23   : > { %v5077_v43 = vmul.f32 %v7319_v0, %v9815_v60  ;;  %6813 = vmatprep.mubr.msk.bf16.mxu0 %vm511_vm0, %v5168_v41  ;;  %v5151_v46 = vadd.f32 %v9862_v53, %v5113_v44 }
 0xb24   : > { %v5114_v27 = vmul.f32 %v9854_v56, %v5076_v9 }
 0xb25   : > { %v7321_v16 = vpop.eup %7320  ;;  %v5169_v37 = vpack.c.bf16 %v5151_v46, %v5150_v32  ;;  %v5115_v48 = vmul.f32 %v9854_v56, %v5077_v43 }
 0xb26   : > { %v7323_v38 = vpop.eup %7322  ;;  %v5078_v33 = vmul.f32 %v7321_v16, %v9832_v42  ;;  %v5152_v54 = vadd.f32 %v9862_v53, %v5114_v27 }
 0xb27   : > { %v5079_v8 = vmul.f32 %v7323_v38, %v9827_v50  ;;  %v5153_v62 = vadd.f32 %v9862_v53, %v5115_v48  ;;  %6814 = vmatmul.mubr.msk.bf16.gmra.mrb[116].mxu0 %vm511_vm0, %v5169_v37  ;;  %v5697_v50 = vld [vmem:[%s10472_s12 + $0x10] sm:$0xff] }
 0xb28   : > { %v5116_v60 = vmul.f32 %v9854_v56, %v5078_v33  ;;  %v5704_v17 = vpack.c.bf16 %v5698_v39, %v5697_v50 }
 0xb29   : > { %v5170_v22 = vpack.c.bf16 %v5153_v62, %v5152_v54  ;;  %v5117_v59 = vmul.f32 %v9854_v56, %v5079_v8  ;;  %v5699_v56 = vld [vmem:[%s10472_s12 + $0x20] sm:$0xff] }
 0xb2a   : > { %v5154_v18 = vadd.f32 %v9862_v53, %v5116_v60  ;;  %6823 = vmatprep.subr.bf16.mxu0 %v5704_v17 }
 0xb2b   : > { %6817 = vmatprep.mubr.msk.bf16.mxu0 %vm511_vm0, %v5170_v22  ;;  %v5155_v52 = vadd.f32 %v9862_v53, %v5117_v59  ;;  %6824 = vmatpush3.bf16.msra.mxu0 %v5704_v17  ;;  %v5700_v53 = vld [vmem:[%s10472_s12 + $0x28] sm:$0xff] }
 0xb2c   : > { %v5705_v14 = vpack.c.bf16 %v5700_v53, %v5699_v56 }
 0xb2d   : > { %v5171_v42 = vpack.c.bf16 %v5155_v52, %v5154_v18 }
 0xb2e   : > { %6825 = vmatprep.subr.bf16.mxu0 %v5705_v14 }
 0xb2f   : > { %6818 = vmatmul.mubr.msk.bf16.gmra.mrb[120].mxu0 %vm511_vm0, %v5171_v42 }
 0xb30   : > { %6826 = vmatpush3.bf16.msra.mxu0 %v5705_v14 }
 0xb31   : > { %6827 = vmatprep.subr.bf16.mxu0 %v5706_v12 }
 0xb34   : > { %6828 = vmatpush3.bf16.msra.mxu0 %v5706_v12 }
 0xbc9   : > { %v6791_v51 = vpop.f32.mrb[92].mxu0 }
 0xbca   : > { %v9998_v30 = vadd.f32 %v6791_v51, %v9995_v1  ;;  %v5264_v2 = vpop.f32.mrb[93].mxu0 }
 0xbcb   : > { %v10001_v35 = vadd.f32 %v9995_v1, %v5264_v2  ;;  %v6792_v15 = vpop.f32.mrb[94].mxu0 }
 0xbcc   : > { %v5393_v6 = vmul.f32 %v9998_v30, %v9998_v30  ;;  %v10006_v25 = vadd.f32 %v6792_v15, %v9995_v1  ;;  %v5267_v34 = vpop.f32.mrb[95].mxu0 }
 0xbcd   : > { %v5391_v7 = vmul.f32 %v10001_v35, %v10001_v35  ;;  %v10011_v47 = vadd.f32 %v9995_v1, %v5267_v34 }
 0xbce   : > { %v5425_v57 = vmul.f32 %v5393_v6, %v9998_v30  ;;  %v5394_v20 = vmul.f32 %v10006_v25, %v10006_v25 }
 0xbcf   : > { %v5423_v36 = vmul.f32 %v5391_v7, %v10001_v35  ;;  %v5392_v45 = vmul.f32 %v10011_v47, %v10011_v47 }
 0xbd0   : > { %v5457_v31 = vmul.f32 0.044715, %v5425_v57  ;;  %v5426_v11 = vmul.f32 %v5394_v20, %v10006_v25 }
 0xbd1   : > { %v5455_v29 = vmul.f32 0.044715, %v5423_v36  ;;  %v5424_v26 = vmul.f32 %v5392_v45, %v10011_v47 }
 0xbd2   : > { %v5489_v13 = vadd.f32 %v5457_v31, %v9998_v30  ;;  %v5458_v10 = vmul.f32 0.044715, %v5426_v11  ;;  %v6795_v0 = vpop.f32.mrb[96].mxu0 }
 0xbd3   : > { %v5487_v41 = vadd.f32 %v5455_v29, %v10001_v35  ;;  %v5456_v44 = vmul.f32 0.044715, %v5424_v26  ;;  %v10025_v43 = vadd.f32 %v6795_v0, %v9995_v1  ;;  %v5280_v46 = vpop.f32.mrb[97].mxu0 }
 0xbd4   : > { %v5521_v9 = vmul.f32 0.7978846, %v5489_v13  ;;  %v5490_v32 = vadd.f32 %v5458_v10, %v10006_v25  ;;  %v10029_v37 = vadd.f32 %v9995_v1, %v5280_v46  ;;  %v6796_v48 = vpop.f32.mrb[98].mxu0 }
 0xbd5   : > { %v5519_v27 = vmul.f32 0.7978846, %v5487_v41  ;;  %v5488_v16 = vadd.f32 %v5456_v44, %v10011_v47  ;;  %v5397_v33 = vmul.f32 %v10025_v43, %v10025_v43  ;;  %v10034_v54 = vadd.f32 %v6796_v48, %v9995_v1  ;;  %v5283_v8 = vpop.f32.mrb[99].mxu0 }
 0xbd6   : > { %7324 = vtanh.f32 %v5521_v9  ;;  %v5522_v38 = vmul.f32 0.7978846, %v5490_v32  ;;  %v5395_v60 = vmul.f32 %v10029_v37, %v10029_v37  ;;  %v10039_v22 = vadd.f32 %v9995_v1, %v5283_v8 }
 0xbd7   : > { %7326 = vtanh.f32 %v5519_v27  ;;  %v5520_v62 = vmul.f32 0.7978846, %v5488_v16  ;;  %v5429_v59 = vmul.f32 %v5397_v33, %v10025_v43  ;;  %v5398_v18 = vmul.f32 %v10034_v54, %v10034_v54 }
 0xbd8   : > { %7328 = vtanh.f32 %v5522_v38  ;;  %v5427_v52 = vmul.f32 %v5395_v60, %v10029_v37  ;;  %v5396_v42 = vmul.f32 %v10039_v22, %v10039_v22 }
 0xbd9   : > { %7330 = vtanh.f32 %v5520_v62  ;;  %v5461_v50 = vmul.f32 0.044715, %v5429_v59  ;;  %v5430_v39 = vmul.f32 %v5398_v18, %v10034_v54 }
 0xbda   : > { %v5459_v17 = vmul.f32 0.044715, %v5427_v52  ;;  %v5428_v56 = vmul.f32 %v5396_v42, %v10039_v22  ;;  %v6799_v53 = vpop.f32.mrb[100].mxu0 }
 0xbdb   : > { %v5493_v14 = vadd.f32 %v5461_v50, %v10025_v43  ;;  %v5462_v40 = vmul.f32 0.044715, %v5430_v39  ;;  %v10051_v55 = vadd.f32 %v6799_v53, %v9995_v1  ;;  %v5296_v12 = vpop.f32.mrb[101].mxu0 }
 0xbdc   : > { %v5491_v51 = vadd.f32 %v5459_v17, %v10029_v37  ;;  %v5460_v2 = vmul.f32 0.044715, %v5428_v56  ;;  %v10055_v15 = vadd.f32 %v9995_v1, %v5296_v12  ;;  %v6800_v6 = vpop.f32.mrb[102].mxu0 }
 0xbdd   : > { %v5525_v34 = vmul.f32 0.7978846, %v5493_v14  ;;  %v5494_v7 = vadd.f32 %v5462_v40, %v10034_v54  ;;  %v5401_v57 = vmul.f32 %v10051_v55, %v10051_v55  ;;  %v10061_v20 = vadd.f32 %v6800_v6, %v9995_v1  ;;  %v5299_v36 = vpop.f32.mrb[103].mxu0 }
 0xbde   : > { %v5523_v45 = vmul.f32 0.7978846, %v5491_v51  ;;  %v5492_v31 = vadd.f32 %v5460_v2, %v10039_v22  ;;  %v5399_v11 = vmul.f32 %v10055_v15, %v10055_v15  ;;  %v10067_v29 = vadd.f32 %v9995_v1, %v5299_v36 }
 0xbdf   : > { %7332 = vtanh.f32 %v5525_v34  ;;  %v5526_v13 = vmul.f32 0.7978846, %v5494_v7  ;;  %v5433_v10 = vmul.f32 %v5401_v57, %v10051_v55  ;;  %v5402_v41 = vmul.f32 %v10061_v20, %v10061_v20 }
 0xbe0   : > { %v7325_v26 = vpop.eup %7324  ;;  %7334 = vtanh.f32 %v5523_v45  ;;  %v5524_v9 = vmul.f32 0.7978846, %v5492_v31  ;;  %v5431_v32 = vmul.f32 %v5399_v11, %v10055_v15  ;;  %v5400_v53 = vmul.f32 %v10067_v29, %v10067_v29 }
 0xbe1   : > { %v7327_v44 = vpop.eup %7326  ;;  %v5585_v0 = vadd.f32 1.0, %v7325_v26  ;;  %7336 = vtanh.f32 %v5526_v13  ;;  %v5465_v16 = vmul.f32 0.044715, %v5433_v10  ;;  %v5434_v48 = vmul.f32 %v5402_v41, %v10061_v20 }
 0xbe2   : > { %v7329_v46 = vpop.eup %7328  ;;  %v5583_v27 = vadd.f32 1.0, %v7327_v44  ;;  %7338 = vtanh.f32 %v5524_v9  ;;  %v5463_v62 = vmul.f32 0.044715, %v5431_v32  ;;  %v6803_v60 = vpop.f32.mrb[104].mxu0  ;;  %v5432_v57 = vmul.f32 %v5400_v53, %v10067_v29 }
 0xbe3   : > { %v7331_v38 = vpop.eup %7330  ;;  %v5617_v33 = vmul.f32 0.5, %v5585_v0  ;;  %v5586_v8 = vadd.f32 1.0, %v7329_v46  ;;  %v5497_v52 = vadd.f32 %v5465_v16, %v10051_v55  ;;  %v5466_v42 = vmul.f32 0.044715, %v5434_v48  ;;  %v5312_v50 = vpop.f32.mrb[105].mxu0 }
 0xbe4   : > { %v5615_v59 = vmul.f32 0.5, %v5583_v27  ;;  %v5584_v18 = vadd.f32 1.0, %v7331_v38  ;;  %v5495_v56 = vadd.f32 %v5463_v62, %v10055_v15  ;;  %v6804_v14 = vpop.f32.mrb[106].mxu0  ;;  %v10088_v31 = vadd.f32 %v9995_v1, %v5312_v50 }
 0xbe5   : > { %v5649_v39 = vmul.f32 %v5617_v33, %v9998_v30  ;;  %v5618_v17 = vmul.f32 0.5, %v5586_v8  ;;  %v5529_v51 = vmul.f32 0.7978846, %v5497_v52  ;;  %v5498_v2 = vadd.f32 %v5466_v42, %v10061_v20  ;;  %v5315_v6 = vpop.f32.mrb[107].mxu0 }
 0xbe6   : > { %v5647_v40 = vmul.f32 %v5615_v59, %v10001_v35  ;;  %v5616_v12 = vmul.f32 0.5, %v5584_v18  ;;  %v5527_v7 = vmul.f32 0.7978846, %v5495_v56  ;;  %v10084_v30 = vadd.f32 %v6803_v60, %v9995_v1 }
 0xbe7   : > { %v5650_v34 = vmul.f32 %v5618_v17, %v10006_v25  ;;  %7340 = vtanh.f32 %v5529_v51  ;;  %v5530_v45 = vmul.f32 0.7978846, %v5498_v2  ;;  %v5464_v11 = vmul.f32 0.044715, %v5432_v57 }
 0xbe8   : > { %v5648_v36 = vmul.f32 %v5616_v12, %v10011_v47  ;;  %7342 = vtanh.f32 %v5527_v7  ;;  %v5405_v26 = vmul.f32 %v10084_v30, %v10084_v30  ;;  %v5403_v13 = vmul.f32 %v10088_v31, %v10088_v31 }
 0xbe9   : > { %v5680_v35 = vpack.c.bf16 %v5650_v34, %v5649_v39  ;;  %v7333_v25 = vpop.eup %7332  ;;  %7344 = vtanh.f32 %v5530_v45  ;;  %v10095_v10 = vadd.f32 %v6804_v14, %v9995_v1  ;;  %v10098_v47 = vadd.f32 %v9995_v1, %v5315_v6 }
 0xbea   : > { %v7335_v41 = vpop.eup %7334  ;;  %v5589_v44 = vadd.f32 1.0, %v7333_v25  ;;  %v5496_v0 = vadd.f32 %v5464_v11, %v10067_v29  ;;  %v5437_v9 = vmul.f32 %v5405_v26, %v10084_v30  ;;  %v6807_v32 = vpop.f32.mrb[108].mxu0  ;;  %v5679_v46 = vpack.c.bf16 %v5648_v36, %v5647_v40 }
 0xbeb   : > { %v7337_v27 = vpop.eup %7336  ;;  %v5587_v16 = vadd.f32 1.0, %v7335_v41  ;;  %v5435_v48 = vmul.f32 %v5403_v13, %v10088_v31  ;;  %v5406_v38 = vmul.f32 %v10095_v10, %v10095_v10  ;;  %v5404_v33 = vmul.f32 %v10098_v47, %v10098_v47  ;;  %v5328_v8 = vpop.f32.mrb[109].mxu0 }
 0xbec   : > { %v7339_v62 = vpop.eup %7338  ;;  %v5621_v60 = vmul.f32 0.5, %v5589_v44  ;;  %v5590_v59 = vadd.f32 1.0, %v7337_v27  ;;  %v5528_v18 = vmul.f32 0.7978846, %v5496_v0  ;;  %v5469_v52 = vmul.f32 0.044715, %v5437_v9  ;;  %6829 = vmatprep.mubr.msk.bf16.mxu0 %vm5714_vm4, %v5679_v46 }
 0xbed   : > { %v5619_v42 = vmul.f32 0.5, %v5587_v16  ;;  %v5588_v50 = vadd.f32 1.0, %v7339_v62  ;;  %v5467_v39 = vmul.f32 0.044715, %v5435_v48  ;;  %v5438_v17 = vmul.f32 %v5406_v38, %v10095_v10  ;;  %v6808_v56 = vpop.f32.mrb[110].mxu0  ;;  %6830 = vmatmul.mubr.msk.bf16.vlgmr.msra.gmra.mrb[124].mxu0 %vm5714_vm4, %v5680_v35 }
 0xbee   : > { %v5622_v53 = vmul.f32 0.5, %v5590_v59  ;;  %7346 = vtanh.f32 %v5528_v18  ;;  %v5501_v14 = vadd.f32 %v5469_v52, %v10084_v30  ;;  %v5331_v40 = vpop.f32.mrb[111].mxu0  ;;  %v10112_v12 = vmul.f32 %v5621_v60, %v10025_v43 }
 0xbef   : > { %v10115_v51 = vmul.f32 %v5619_v42, %v10029_v37  ;;  %v5499_v2 = vadd.f32 %v5467_v39, %v10088_v31  ;;  %v5470_v6 = vmul.f32 0.044715, %v5438_v17  ;;  %v5620_v34 = vmul.f32 0.5, %v5588_v50 }
 0xbf0   : > { %v5533_v7 = vmul.f32 0.7978846, %v5501_v14  ;;  %v5436_v57 = vmul.f32 %v5404_v33, %v10098_v47  ;;  %v10120_v36 = vadd.f32 %v6807_v32, %v9995_v1  ;;  %v10123_v35 = vmul.f32 %v5622_v53, %v10034_v54 }
 0xbf1   : > { %v7341_v45 = vpop.eup %7340  ;;  %v5531_v11 = vmul.f32 0.7978846, %v5499_v2  ;;  %v5502_v43 = vadd.f32 %v5470_v6, %v10095_v10  ;;  %v10127_v37 = vadd.f32 %v9995_v1, %v5328_v8  ;;  %v10137_v60 = vadd.f32 %v6808_v56, %v9995_v1 }
 0xbf2   : > { %v7343_v26 = vpop.eup %7342  ;;  %v5593_v25 = vadd.f32 1.0, %v7341_v45  ;;  %7348 = vtanh.f32 %v5533_v7  ;;  %v5468_v13 = vmul.f32 0.044715, %v5436_v57  ;;  %v5409_v41 = vmul.f32 %v10120_v36, %v10120_v36  ;;  %v6811_v44 = vpop.f32.mrb[112].mxu0 }
 0xbf3   : > { %v7345_v0 = vpop.eup %7344  ;;  %v5591_v9 = vadd.f32 1.0, %v7343_v26  ;;  %7350 = vtanh.f32 %v5531_v11  ;;  %v5534_v32 = vmul.f32 0.7978846, %v5502_v43  ;;  %v5407_v54 = vmul.f32 %v10127_v37, %v10127_v37  ;;  %v5344_v46 = vpop.f32.mrb[113].mxu0 }
 0xbf4   : > { %v5625_v27 = vmul.f32 0.5, %v5593_v25  ;;  %v5594_v16 = vadd.f32 1.0, %v7345_v0  ;;  %v5500_v48 = vadd.f32 %v5468_v13, %v10098_v47  ;;  %v5441_v38 = vmul.f32 %v5409_v41, %v10120_v36  ;;  %v6812_v33 = vpop.f32.mrb[114].mxu0 }
 0xbf5   : > { %v5623_v8 = vmul.f32 0.5, %v5591_v9  ;;  %7352 = vtanh.f32 %v5534_v32  ;;  %v5439_v62 = vmul.f32 %v5407_v54, %v10127_v37  ;;  %v5347_v59 = vpop.f32.mrb[115].mxu0  ;;  %v10140_v18 = vmul.f32 %v5620_v34, %v10039_v22 }
 0xbf6   : > { %v10143_v52 = vmul.f32 %v5625_v27, %v10051_v55  ;;  %v5532_v42 = vmul.f32 0.7978846, %v5500_v48  ;;  %v5473_v50 = vmul.f32 0.044715, %v5441_v38  ;;  %v5626_v39 = vmul.f32 0.5, %v5594_v16 }
 0xbf7   : > { %v5471_v17 = vmul.f32 0.044715, %v5439_v62  ;;  %v5410_v53 = vmul.f32 %v10137_v60, %v10137_v60  ;;  %v10148_v14 = vadd.f32 %v9995_v1, %v5331_v40  ;;  %v10151_v56 = vmul.f32 %v5623_v8, %v10055_v15 }
 0xbf8   : > { %v7347_v2 = vpop.eup %7346  ;;  %7354 = vtanh.f32 %v5532_v42  ;;  %v5505_v22 = vadd.f32 %v5473_v50, %v10120_v36  ;;  %v10155_v55 = vadd.f32 %v6811_v44, %v9995_v1  ;;  %v10164_v15 = vadd.f32 %v9995_v1, %v5344_v46 }
 0xbf9   : > { %v5592_v6 = vadd.f32 1.0, %v7347_v2  ;;  %v5503_v34 = vadd.f32 %v5471_v17, %v10127_v37  ;;  %v5442_v7 = vmul.f32 %v5410_v53, %v10137_v60  ;;  %v5408_v57 = vmul.f32 %v10148_v14, %v10148_v14 }
 0xbfa   : > { %v5537_v40 = vmul.f32 0.7978846, %v5505_v22  ;;  %v5413_v45 = vmul.f32 %v10155_v55, %v10155_v55  ;;  %v10167_v11 = vadd.f32 %v6812_v33, %v9995_v1  ;;  %v6815_v43 = vpop.f32.mrb[116].mxu0  ;;  %v10170_v26 = vmul.f32 %v5626_v39, %v10061_v20 }
 0xbfb   : > { %v5535_v25 = vmul.f32 0.7978846, %v5503_v34  ;;  %v5474_v13 = vmul.f32 0.044715, %v5442_v7  ;;  %v5440_v41 = vmul.f32 %v5408_v57, %v10148_v14  ;;  %v5360_v44 = vpop.f32.mrb[117].mxu0  ;;  %v5411_v32 = vmul.f32 %v10164_v15, %v10164_v15 }
 0xbfc   : > { %v7349_v0 = vpop.eup %7348  ;;  %7356 = vtanh.f32 %v5537_v40  ;;  %v5445_v9 = vmul.f32 %v5413_v45, %v10155_v55  ;;  %v5414_v54 = vmul.f32 %v10167_v11, %v10167_v11  ;;  %v6816_v46 = vpop.f32.mrb[118].mxu0  ;;  %v5624_v16 = vmul.f32 0.5, %v5592_v6 }
 0xbfd   : > { %v7351_v27 = vpop.eup %7350  ;;  %v5597_v20 = vadd.f32 1.0, %v7349_v0  ;;  %7358 = vtanh.f32 %v5535_v25  ;;  %v5506_v48 = vadd.f32 %v5474_v13, %v10137_v60  ;;  %v5363_v38 = vpop.f32.mrb[119].mxu0  ;;  %v5472_v8 = vmul.f32 0.044715, %v5440_v41 }
 0xbfe   : > { %v5595_v33 = vadd.f32 1.0, %v7351_v27  ;;  %v5477_v62 = vmul.f32 0.044715, %v5445_v9  ;;  %v5443_v42 = vmul.f32 %v5411_v32, %v10164_v15  ;;  %v5446_v53 = vmul.f32 %v5414_v54, %v10167_v11 }
 0xbff   : > { %v7353_v50 = vpop.eup %7352  ;;  %v5629_v39 = vmul.f32 0.5, %v5597_v20  ;;  %v5538_v17 = vmul.f32 0.7978846, %v5506_v48  ;;  %v10182_v2 = vadd.f32 %v9995_v1, %v5347_v59  ;;  %v5504_v34 = vadd.f32 %v5472_v8, %v10148_v14 }
 0xc00   : > { %v5627_v22 = vmul.f32 0.5, %v5595_v33  ;;  %v5598_v6 = vadd.f32 1.0, %v7353_v50  ;;  %v5509_v7 = vadd.f32 %v5477_v62, %v10155_v55  ;;  %v5656_v57 = vmul.f32 %v5624_v16, %v10067_v29 }
 0xc01   : > { %7360 = vtanh.f32 %v5538_v17  ;;  %v5475_v40 = vmul.f32 0.044715, %v5443_v42  ;;  %v5478_v45 = vmul.f32 0.044715, %v5446_v53  ;;  %v10188_v13 = vmul.f32 %v5629_v39, %v10084_v30 }
 0xc02   : > { %v7355_v25 = vpop.eup %7354  ;;  %v5630_v41 = vmul.f32 0.5, %v5598_v6  ;;  %v5536_v0 = vmul.f32 0.7978846, %v5504_v34  ;;  %v5541_v9 = vmul.f32 0.7978846, %v5509_v7  ;;  %v6819_v59 = vpop.f32.mrb[120].mxu0  ;;  %v5412_v20 = vmul.f32 %v10182_v2, %v10182_v2 }
 0xc03   : > { %v5596_v32 = vadd.f32 1.0, %v7355_v25  ;;  %v5507_v54 = vadd.f32 %v5475_v40, %v10164_v15  ;;  %v5510_v27 = vadd.f32 %v5478_v45, %v10167_v11  ;;  %v10194_v29 = vpop.f32.mrb[121].mxu0  ;;  %v10197_v16 = vmul.f32 %v5627_v22, %v10088_v31 }
 0xc04   : > { %7362 = vtanh.f32 %v5536_v0  ;;  %v5681_v30 = vpack.c.bf16 %v10140_v18, %v10115_v51  ;;  %v5682_v48 = vpack.c.bf16 %v10123_v35, %v10112_v12  ;;  %v10203_v33 = vpop.f32.mrb[122].mxu0  ;;  %v5444_v17 = vmul.f32 %v5412_v20, %v10182_v2 }
 0xc05   : > { %v5628_v8 = vmul.f32 0.5, %v5596_v32  ;;  %7364 = vtanh.f32 %v5541_v9  ;;  %v5539_v62 = vmul.f32 0.7978846, %v5507_v54  ;;  %v5542_v42 = vmul.f32 0.7978846, %v5510_v27  ;;  %v10205_v50 = vpop.f32.mrb[123].mxu0 }
 0xc06   : > { %v7357_v39 = vpop.eup %7356  ;;  %6833 = vmatprep.mubr.msk.bf16.mxu0 %vm5714_vm4, %v5681_v30  ;;  %v10210_v31 = vadd.f32 %v6815_v43, %v9995_v1  ;;  %v10213_v51 = vadd.f32 %v9995_v1, %v5360_v44  ;;  %v10216_v12 = vadd.f32 %v6816_v46, %v9995_v1  ;;  %v10219_v18 = vmul.f32 %v5630_v41, %v10095_v10 }
 0xc07   : > { %v7359_v35 = vpop.eup %7358  ;;  %v5601_v53 = vadd.f32 1.0, %v7357_v39  ;;  %7366 = vtanh.f32 %v5539_v62  ;;  %6834 = vmatmul.mubr.msk.bf16.gmra.mrb[128].mxu0 %vm5714_vm4, %v5682_v48  ;;  %v10223_v22 = vadd.f32 %v9995_v1, %v5363_v38  ;;  %v5476_v43 = vmul.f32 0.044715, %v5444_v17 }
 0xc08   : > { %v5599_v6 = vadd.f32 1.0, %v7359_v35  ;;  %7368 = vtanh.f32 %v5542_v42  ;;  %v5417_v44 = vmul.f32 %v10210_v31, %v10210_v31  ;;  %v5415_v46 = vmul.f32 %v10213_v51, %v10213_v51 }
 0xc09   : > { %v5633_v34 = vmul.f32 0.5, %v5601_v53  ;;  %v5418_v10 = vmul.f32 %v10216_v12, %v10216_v12  ;;  %v5416_v7 = vmul.f32 %v10223_v22, %v10223_v22  ;;  %v10234_v40 = vmul.f32 %v5628_v8, %v10098_v47 }
 0xc0a   : > { %v5508_v38 = vadd.f32 %v5476_v43, %v10182_v2  ;;  %v5449_v45 = vmul.f32 %v5417_v44, %v10210_v31  ;;  %v5683_v25 = vpack.c.bf16 %v5656_v57, %v10151_v56  ;;  %v5631_v0 = vmul.f32 0.5, %v5599_v6 }
 0xc0b   : > { %v7361_v41 = vpop.eup %7360  ;;  %v5447_v9 = vmul.f32 %v5415_v46, %v10213_v51  ;;  %v5450_v32 = vmul.f32 %v5418_v10, %v10216_v12  ;;  %v5448_v54 = vmul.f32 %v5416_v7, %v10223_v22  ;;  %v10243_v27 = vmul.f32 %v5633_v34, %v10120_v36 }
 0xc0c   : > { %v5602_v20 = vadd.f32 1.0, %v7361_v41  ;;  %v5540_v47 = vmul.f32 0.7978846, %v5508_v38  ;;  %v5481_v30 = vmul.f32 0.044715, %v5449_v45  ;;  %6837 = vmatprep.mubr.msk.bf16.mxu0 %vm5714_vm4, %v5683_v25  ;;  %v5684_v56 = vpack.c.bf16 %v10170_v26, %v10143_v52 }
 0xc0d   : > { %v5479_v48 = vmul.f32 0.044715, %v5447_v9  ;;  %v5482_v8 = vmul.f32 0.044715, %v5450_v32  ;;  %v5480_v62 = vmul.f32 0.044715, %v5448_v54  ;;  %v10250_v17 = vadd.f32 %v6819_v59, %v9995_v1 }
 0xc0e   : > { %v7363_v57 = vpop.eup %7362  ;;  %v5634_v42 = vmul.f32 0.5, %v5602_v20  ;;  %7370 = vtanh.f32 %v5540_v47  ;;  %v5513_v39 = vadd.f32 %v5481_v30, %v10210_v31  ;;  %v5663_v52 = vmul.f32 %v5631_v0, %v10127_v37 }
 0xc0f   : > { %v7365_v36 = vpop.eup %7364  ;;  %v5600_v35 = vadd.f32 1.0, %v7363_v57  ;;  %v5511_v53 = vadd.f32 %v5479_v48, %v10213_v51  ;;  %v5514_v6 = vadd.f32 %v5482_v8, %v10216_v12  ;;  %v5512_v43 = vadd.f32 %v5480_v62, %v10223_v22  ;;  %6838 = vmatmul.mubr.msk.bf16.gmra.mrb[132].mxu0 %vm5714_vm4, %v5684_v56 }
 0xc10   : > { %v5605_v26 = vadd.f32 1.0, %v7365_v36  ;;  %v5545_v44 = vmul.f32 0.7978846, %v5513_v39  ;;  %v5421_v34 = vmul.f32 %v10250_v17, %v10250_v17  ;;  %v10261_v38 = vadd.f32 %v9995_v1, %v10194_v29 }
 0xc11   : > { %v7367_v46 = vpop.eup %7366  ;;  %v5632_v59 = vmul.f32 0.5, %v5600_v35  ;;  %v5543_v10 = vmul.f32 0.7978846, %v5511_v53  ;;  %v5546_v7 = vmul.f32 0.7978846, %v5514_v6  ;;  %v5666_v37 = vmul.f32 %v5634_v42, %v10137_v60 }
 0xc12   : > { %v7369_v45 = vpop.eup %7368  ;;  %v5637_v25 = vmul.f32 0.5, %v5605_v26  ;;  %v5603_v41 = vadd.f32 1.0, %v7367_v46  ;;  %7372 = vtanh.f32 %v5545_v44  ;;  %v5544_v9 = vmul.f32 0.7978846, %v5512_v43 }
 0xc13   : > { %v5606_v0 = vadd.f32 1.0, %v7369_v45  ;;  %7374 = vtanh.f32 %v5543_v10  ;;  %v5453_v32 = vmul.f32 %v5421_v34, %v10250_v17  ;;  %v5664_v54 = vmul.f32 %v5632_v59, %v10148_v14 }
 0xc14   : > { %v10267_v20 = vmul.f32 %v5637_v25, %v10155_v55  ;;  %7376 = vtanh.f32 %v5546_v7  ;;  %v5419_v29 = vmul.f32 %v10261_v38, %v10261_v38  ;;  %v10273_v48 = vadd.f32 %v10203_v33, %v9995_v1 }
 0xc15   : > { %v5638_v47 = vmul.f32 0.5, %v5606_v0  ;;  %7378 = vtanh.f32 %v5544_v9  ;;  %v5485_v30 = vmul.f32 0.044715, %v5453_v32  ;;  %v5635_v60 = vmul.f32 0.5, %v5603_v41 }
 0xc16   : > { %v5451_v8 = vmul.f32 %v5419_v29, %v10261_v38  ;;  %v10278_v14 = vadd.f32 %v9995_v1, %v10205_v50  ;;  %v5685_v55 = vpack.c.bf16 %v10234_v40, %v10197_v16  ;;  %v5422_v57 = vmul.f32 %v10273_v48, %v10273_v48 }
 0xc17   : > { %v5670_v62 = vmul.f32 %v5638_v47, %v10167_v11  ;;  %v5517_v56 = vadd.f32 %v5485_v30, %v10250_v17  ;;  %v5686_v33 = vpack.c.bf16 %v10219_v18, %v10188_v13  ;;  %v5687_v1 = vpack.c.bf16 %v5664_v54, %v5663_v52 }
 0xc18   : > { %v7371_v42 = vpop.eup %7370  ;;  %v5483_v39 = vmul.f32 0.044715, %v5451_v8  ;;  %v5420_v36 = vmul.f32 %v10278_v14, %v10278_v14  ;;  %6841 = vmatprep.mubr.msk.bf16.mxu0 %vm5714_vm4, %v5685_v55  ;;  %v5688_v16 = vpack.c.bf16 %v5666_v37, %v10243_v27  ;;  %v5454_v40 = vmul.f32 %v5422_v57, %v10273_v48 }
 0xc19   : > { %v5604_v50 = vadd.f32 1.0, %v7371_v42  ;;  %v5549_v11 = vmul.f32 0.7978846, %v5517_v56  ;;  %6842 = vmatmul.mubr.msk.bf16.gmra.mrb[136].mxu0 %vm5714_vm4, %v5686_v33  ;;  %v5690_v35 = vpack.c.bf16 %v5670_v62, %v10267_v20  ;;  %v5667_v44 = vmul.f32 %v5635_v60, %v10164_v15 }
 0xc1a   : > { %v5515_v13 = vadd.f32 %v5483_v39, %v10261_v38  ;;  %v5452_v18 = vmul.f32 %v5420_v36, %v10278_v14  ;;  %6845 = vmatprep.mubr.msk.bf16.mxu0 %vm5714_vm4, %v5687_v1  ;;  %v5486_v6 = vmul.f32 0.044715, %v5454_v40 }
 0xc1b   : > { %v5636_v53 = vmul.f32 0.5, %v5604_v50  ;;  %7380 = vtanh.f32 %v5549_v11 }
 0xc1c   : > { %v7373_v43 = vpop.eup %7372  ;;  %v5547_v52 = vmul.f32 0.7978846, %v5515_v13  ;;  %v5484_v27 = vmul.f32 0.044715, %v5452_v18  ;;  %v5518_v59 = vadd.f32 %v5486_v6, %v10273_v48  ;;  %v10320_v18 = vld [vmem:[%s10473_s13] ss:$0 sm:$0xff] }
 0xc1d   : > { %v7375_v26 = vpop.eup %7374  ;;  %v5668_v34 = vmul.f32 %v5636_v53, %v10182_v2  ;;  %v5609_v46 = vadd.f32 1.0, %v7373_v43 }
 0xc1e   : > { %v7377_v10 = vpop.eup %7376  ;;  %v5607_v7 = vadd.f32 1.0, %v7375_v26  ;;  %7382 = vtanh.f32 %v5547_v52  ;;  %v5516_v45 = vadd.f32 %v5484_v27, %v10278_v14  ;;  %v5550_v37 = vmul.f32 0.7978846, %v5518_v59 }
 0xc1f   : > { %v7379_v25 = vpop.eup %7378  ;;  %v5641_v41 = vmul.f32 0.5, %v5609_v46  ;;  %v5610_v9 = vadd.f32 1.0, %v7377_v10  ;;  %v5689_v0 = vpack.c.bf16 %v5668_v34, %v5667_v44 }
 0xc20   : > { %v5639_v32 = vmul.f32 0.5, %v5607_v7  ;;  %v5608_v54 = vadd.f32 1.0, %v7379_v25  ;;  %v5548_v20 = vmul.f32 0.7978846, %v5516_v45  ;;  %7384 = vtanh.f32 %v5550_v37 }
 0xc21   : > { %v5642_v29 = vmul.f32 0.5, %v5610_v9  ;;  %6846 = vmatmul.mubr.msk.bf16.gmra.mrb[140].mxu0 %vm5714_vm4, %v5688_v16  ;;  %v5673_v2 = vmul.f32 %v5641_v41, %v10210_v31 }
 0xc22   : > { %v5640_v15 = vmul.f32 0.5, %v5608_v54  ;;  %7386 = vtanh.f32 %v5548_v20  ;;  %6849 = vmatprep.mubr.msk.bf16.mxu0 %vm5714_vm4, %v5689_v0  ;;  %v5671_v30 = vmul.f32 %v5639_v32, %v10213_v51 }
 0xc23   : > { %v5674_v47 = vmul.f32 %v5642_v29, %v10216_v12 }
 0xc24   : > { %v5672_v60 = vmul.f32 %v5640_v15, %v10223_v22 }
 0xc25   : > { %v7381_v8 = vpop.eup %7380  ;;  %v5692_v55 = vpack.c.bf16 %v5674_v47, %v5673_v2 }
 0xc26   : > { %v5691_v62 = vpack.c.bf16 %v5672_v60, %v5671_v30  ;;  %v5613_v57 = vadd.f32 1.0, %v7381_v8  ;;  %v10689_v8 = vld [vmem:[#allocation4_spill] sm:$0xff] }
 0xc28   : > { %v7383_v56 = vpop.eup %7382  ;;  %v5645_v36 = vmul.f32 0.5, %v5613_v57 }
 0xc29   : > { %v5611_v33 = vadd.f32 1.0, %v7383_v56  ;;  %6850 = vmatmul.mubr.msk.bf16.gmra.mrb[144].mxu0 %vm5714_vm4, %v5690_v35  ;;  %v10690_v56 = vld [vmem:[#allocation20_spill] sm:$0xff] }
 0xc2a   : > { %6853 = vmatprep.mubr.msk.bf16.mxu0 %vm5714_vm4, %v5691_v62  ;;  %v7385_v42 = vpop.eup %7384  ;;  %v5677_v22 = vmul.f32 %v5645_v36, %v10250_v17 }
 0xc2b   : > { %v5614_v31 = vadd.f32 1.0, %v7385_v42  ;;  %v5643_v1 = vmul.f32 0.5, %v5611_v33  ;;  %v10691_v33 = vld [vmem:[#allocation23_spill] sm:$0xff] }
 0xc2c   : > { %v7387_v39 = vpop.eup %7386 }
 0xc2d   : > { %v5612_v12 = vadd.f32 1.0, %v7387_v39  ;;  %v5646_v51 = vmul.f32 0.5, %v5614_v31  ;;  %v5675_v11 = vmul.f32 %v5643_v1, %v10261_v38  ;;  %v10692_v39 = vld [vmem:[#allocation27_spill] sm:$0xff] }
 0xc2f   : > { %v5644_v16 = vmul.f32 0.5, %v5612_v12  ;;  %v5678_v50 = vmul.f32 %v5646_v51, %v10273_v48 }
 0xc31   : > { %v5676_v40 = vmul.f32 %v5644_v16, %v10278_v14  ;;  %6854 = vmatmul.mubr.msk.bf16.gmra.mrb[148].mxu0 %vm5714_vm4, %v5692_v55  ;;  %v5694_v35 = vpack.c.bf16 %v5678_v50, %v5677_v22  ;;  %v10693_v22 = vld [vmem:[#allocation25_spill] sm:$0xff] }
 0xc33   : > { %v5693_v13 = vpack.c.bf16 %v5676_v40, %v5675_v11 }
 0xc35   : > { %6857 = vmatprep.mubr.msk.bf16.mxu0 %vm5714_vm4, %v5693_v13 }
 0xc39   : > { %6858 = vmatmul.mubr.msk.bf16.gmra.mrb[152].mxu0 %vm5714_vm4, %v5694_v35  ;;  %v10694_v35 = vld [vmem:[#allocation21_spill] sm:$0xff] }
 0xcc0   : > { %v6831_v17 = vpop.f32.mrb[124].mxu0 }
 0xcc1   : > { %v5806_v48 = vadd.f32 %v6831_v17, %v10320_v18  ;;  %v5797_v53 = vpop.f32.mrb[125].mxu0 }
 0xcc2   : > { %v5798_v38 = vadd.f32 %v10320_v18, %v5797_v53  ;;  %v6832_v14 = vpop.f32.mrb[126].mxu0 }
 0xcc3   : > { %v5926_v6 = vadd.f32 %v5806_v48, %v9459_v58  ;;  %v5809_v43 = vadd.f32 %v6832_v14, %v10320_v18  ;;  %v5800_v52 = vpop.f32.mrb[127].mxu0  ;;  %v10695_v48 = vld [vmem:[#allocation9_spill] sm:$0xff] }
 0xcc4   : > { %v5924_v27 = vadd.f32 %v5798_v38, %v9455_v24  ;;  %v5801_v26 = vadd.f32 %v10320_v18, %v5800_v52  ;;  %v10696_v38 = vld [vmem:[#allocation2_spill] sm:$0xff] }
 0xcc5   : > { %5958 = vst.msk [vmem:[%s10328_s24 + $0x10] sm:$0xff] %vm511_vm0, %v5926_v6  ;;  %v5927_v44 = vadd.f32 %v5809_v43, %v9470_v21 }
 0xcc6   : > { %5956 = vst.msk [vmem:[%s10328_s24] sm:$0xff] %vm511_vm0, %v5924_v27  ;;  %v5925_v34 = vadd.f32 %v5801_v26, %v9463_v4 }
 0xcc7   : > { %5959 = vst.msk [vmem:[%s10328_s24 + $0x18] sm:$0xff] %vm511_vm0, %v5927_v44  ;;  %v10697_v44 = vld [vmem:[#allocation5_spill] sm:$0xff] }
 0xcc8   : > { %5957 = vst.msk [vmem:[%s10328_s24 + $0x8] sm:$0xff] %vm511_vm0, %v5925_v34 }
 0xcda   : > { %v6835_v58 = vpop.f32.mrb[128].mxu0 }
 0xcdb   : > { %v5822_v24 = vadd.f32 %v6835_v58, %v10320_v18  ;;  %v5813_v46 = vpop.f32.mrb[129].mxu0 }
 0xcdc   : > { %v5814_v59 = vadd.f32 %v10320_v18, %v5813_v46  ;;  %v6836_v10 = vpop.f32.mrb[130].mxu0  ;;  %v10698_v46 = vld [vmem:[#allocation10_spill] sm:$0xff] }
 0xcdd   : > { %v5930_v21 = vadd.f32 %v5822_v24, %v9492_v61  ;;  %v5825_v7 = vadd.f32 %v6836_v10, %v10320_v18  ;;  %v5816_v45 = vpop.f32.mrb[131].mxu0 }
 0xcde   : > { %v5928_v4 = vadd.f32 %v5814_v59, %v9479_v19  ;;  %v5817_v25 = vadd.f32 %v10320_v18, %v5816_v45  ;;  %v10700_v45 = vld [vmem:[#allocation8_spill] sm:$0xff] }
 0xcdf   : > { %5962 = vst.msk [vmem:[%s10328_s24 + $0x30] sm:$0xff] %vm511_vm0, %v5930_v21  ;;  %v5931_v41 = vadd.f32 %v5825_v7, %v9487_v63  ;;  %v10699_v21 = vld [vmem:[#allocation3_spill] sm:$0xff] }
 0xce0   : > { %5960 = vst.msk [vmem:[%s10328_s24 + $0x20] sm:$0xff] %vm511_vm0, %v5928_v4  ;;  %v5929_v9 = vadd.f32 %v5817_v25, %v9482_v49 }
 0xce1   : > { %5963 = vst.msk [vmem:[%s10328_s24 + $0x38] sm:$0xff] %vm511_vm0, %v5931_v41 }
 0xce2   : > { %5961 = vst.msk [vmem:[%s10328_s24 + $0x28] sm:$0xff] %vm511_vm0, %v5929_v9  ;;  %v6839_v61 = vpop.f32.mrb[132].mxu0 }
 0xce3   : > { %v5838_v19 = vadd.f32 %v6839_v61, %v10320_v18  ;;  %v5829_v37 = vpop.f32.mrb[133].mxu0 }
 0xce4   : > { %v5830_v0 = vadd.f32 %v10320_v18, %v5829_v37  ;;  %v6840_v32 = vpop.f32.mrb[134].mxu0  ;;  %v10701_v37 = vld [vmem:[#allocation12_spill] sm:$0xff] }
 0xce5   : > { %v5934_v63 = vadd.f32 %v5838_v19, %v9516_v28  ;;  %v5841_v54 = vadd.f32 %v6840_v32, %v10320_v18  ;;  %v5832_v20 = vpop.f32.mrb[135].mxu0 }
 0xce6   : > { %v5932_v49 = vadd.f32 %v5830_v0, %v9503_v23  ;;  %v5833_v29 = vadd.f32 %v10320_v18, %v5832_v20 }
 0xce7   : > { %5966 = vst.msk [vmem:[%s10328_s24 + $0x50] sm:$0xff] %vm511_vm0, %v5934_v63  ;;  %v5935_v15 = vadd.f32 %v5841_v54, %v9511_v5  ;;  %v10702_v54 = vld [vmem:[#allocation22_spill] sm:$0xff] }
 0xce8   : > { %5964 = vst.msk [vmem:[%s10328_s24 + $0x40] sm:$0xff] %vm511_vm0, %v5932_v49  ;;  %v5933_v2 = vadd.f32 %v5833_v29, %v9506_v3  ;;  %v10703_v29 = vld [vmem:[#allocation14_spill] sm:$0xff] }
 0xce9   : > { %5967 = vst.msk [vmem:[%s10328_s24 + $0x58] sm:$0xff] %vm511_vm0, %v5935_v15 }
 0xcea   : > { %5965 = vst.msk [vmem:[%s10328_s24 + $0x48] sm:$0xff] %vm511_vm0, %v5933_v2  ;;  %v10704_v2 = vld [vmem:[#allocation6_spill] sm:$0xff] }
 0xcec   : > { %v6843_v28 = vpop.f32.mrb[136].mxu0 }
 0xced   : > { %v5854_v23 = vadd.f32 %v6843_v28, %v10320_v18  ;;  %v5845_v47 = vpop.f32.mrb[137].mxu0 }
 0xcee   : > { %v5846_v30 = vadd.f32 %v10320_v18, %v5845_v47  ;;  %v6844_v60 = vpop.f32.mrb[138].mxu0 }
 0xcef   : > { %v5938_v5 = vadd.f32 %v5854_v23, %v10689_v8  ;;  %v5857_v55 = vadd.f32 %v6844_v60, %v10320_v18  ;;  %v5848_v62 = vpop.f32.mrb[139].mxu0 }
 0xcf0   : > { %v5936_v3 = vadd.f32 %v5846_v30, %v10690_v56  ;;  %v5849_v57 = vadd.f32 %v10320_v18, %v5848_v62 }
 0xcf1   : > { %5970 = vst.msk [vmem:[%s10328_s24 + $0x70] sm:$0xff] %vm511_vm0, %v5938_v5  ;;  %v5939_v42 = vadd.f32 %v5857_v55, %v10691_v33  ;;  %v10705_v5 = vld [vmem:[#allocation24_spill] sm:$0xff] }
 0xcf2   : > { %5968 = vst.msk [vmem:[%s10328_s24 + $0x60] sm:$0xff] %vm511_vm0, %v5936_v3  ;;  %v5937_v36 = vadd.f32 %v5849_v57, %v10692_v39  ;;  %v10706_v3 = vld [vmem:[#allocation7_spill] sm:$0xff] }
 0xcf3   : > { %5971 = vst.msk [vmem:[%s10328_s24 + $0x78] sm:$0xff] %vm511_vm0, %v5939_v42  ;;  %v10707_v42 = vld [vmem:[#allocation26_spill] sm:$0xff] }
 0xcf4   : > { %5969 = vst.msk [vmem:[%s10328_s24 + $0x68] sm:$0xff] %vm511_vm0, %v5937_v36  ;;  %v6847_v31 = vpop.f32.mrb[140].mxu0  ;;  %v10708_v36 = vld [vmem:[#allocation16_spill] sm:$0xff] }
 0xcf5   : > { %v5870_v1 = vadd.f32 %v6847_v31, %v10320_v18  ;;  %v5861_v12 = vpop.f32.mrb[141].mxu0 }
 0xcf6   : > { %v5862_v51 = vadd.f32 %v10320_v18, %v5861_v12  ;;  %v6848_v16 = vpop.f32.mrb[142].mxu0 }
 0xcf7   : > { %v5942_v50 = vadd.f32 %v5870_v1, %v10693_v22  ;;  %v5873_v11 = vadd.f32 %v6848_v16, %v10320_v18  ;;  %v5864_v40 = vpop.f32.mrb[143].mxu0 }
 0xcf8   : > { %v5940_v13 = vadd.f32 %v5862_v51, %v10694_v35  ;;  %v5865_v17 = vadd.f32 %v10320_v18, %v5864_v40 }
 0xcf9   : > { %5974 = vst.msk [vmem:[%s10328_s24 + $0x90] sm:$0xff] %vm511_vm0, %v5942_v50  ;;  %v5943_v53 = vadd.f32 %v5873_v11, %v10695_v48 }
 0xcfa   : > { %5972 = vst.msk [vmem:[%s10328_s24 + $0x80] sm:$0xff] %vm511_vm0, %v5940_v13  ;;  %v5941_v14 = vadd.f32 %v5865_v17, %v10696_v38 }
 0xcfb   : > { %5975 = vst.msk [vmem:[%s10328_s24 + $0x98] sm:$0xff] %vm511_vm0, %v5943_v53 }
 0xcfc   : > { %5973 = vst.msk [vmem:[%s10328_s24 + $0x88] sm:$0xff] %vm511_vm0, %v5941_v14  ;;  %v6851_v6 = vpop.f32.mrb[144].mxu0 }
 0xcfd   : > { %v5886_v43 = vadd.f32 %v6851_v6, %v10320_v18  ;;  %v5877_v52 = vpop.f32.mrb[145].mxu0 }
 0xcfe   : > { %v5878_v27 = vadd.f32 %v10320_v18, %v5877_v52  ;;  %v6852_v26 = vpop.f32.mrb[146].mxu0 }
 0xcff   : > { %v5946_v34 = vadd.f32 %v5886_v43, %v10697_v44  ;;  %v5889_v58 = vadd.f32 %v6852_v26, %v10320_v18  ;;  %v5880_v24 = vpop.f32.mrb[147].mxu0 }
 0xd00   : > { %v5944_v59 = vadd.f32 %v5878_v27, %v10698_v46  ;;  %v5881_v10 = vadd.f32 %v10320_v18, %v5880_v24 }
 0xd01   : > { %5978 = vst.msk [vmem:[%s10328_s24 + $0xb0] sm:$0xff] %vm511_vm0, %v5946_v34  ;;  %v5947_v7 = vadd.f32 %v5889_v58, %v10699_v21 }
 0xd02   : > { %5976 = vst.msk [vmem:[%s10328_s24 + $0xa0] sm:$0xff] %vm511_vm0, %v5944_v59  ;;  %v5945_v4 = vadd.f32 %v5881_v10, %v10700_v45 }
 0xd03   : > { %5979 = vst.msk [vmem:[%s10328_s24 + $0xb8] sm:$0xff] %vm511_vm0, %v5947_v7 }
 0xd04   : > { %5977 = vst.msk [vmem:[%s10328_s24 + $0xa8] sm:$0xff] %vm511_vm0, %v5945_v4  ;;  %v6855_v25 = vpop.f32.mrb[148].mxu0 }
 0xd05   : > { %v5902_v41 = vadd.f32 %v6855_v25, %v10320_v18  ;;  %v5893_v9 = vpop.f32.mrb[149].mxu0 }
 0xd06   : > { %v5894_v61 = vadd.f32 %v10320_v18, %v5893_v9  ;;  %v6856_v19 = vpop.f32.mrb[150].mxu0 }
 0xd07   : > { %v5950_v0 = vadd.f32 %v5902_v41, %v10701_v37  ;;  %v5905_v32 = vadd.f32 %v6856_v19, %v10320_v18  ;;  %v5896_v63 = vpop.f32.mrb[151].mxu0 }
 0xd08   : > { %v5948_v20 = vadd.f32 %v5894_v61, %v10702_v54  ;;  %v5897_v49 = vadd.f32 %v10320_v18, %v5896_v63 }
 0xd09   : > { %5982 = vst.msk [vmem:[%s10328_s24 + $0xd0] sm:$0xff] %vm511_vm0, %v5950_v0  ;;  %v5951_v15 = vadd.f32 %v5905_v32, %v10703_v29 }
 0xd0a   : > { %5980 = vst.msk [vmem:[%s10328_s24 + $0xc0] sm:$0xff] %vm511_vm0, %v5948_v20  ;;  %v5949_v28 = vadd.f32 %v5897_v49, %v10704_v2 }
 0xd0b   : > { %5983 = vst.msk [vmem:[%s10328_s24 + $0xd8] sm:$0xff] %vm511_vm0, %v5951_v15 }
 0xd0c   : > { %5981 = vst.msk [vmem:[%s10328_s24 + $0xc8] sm:$0xff] %vm511_vm0, %v5949_v28  ;;  %v6859_v23 = vpop.f32.mrb[152].mxu0 }
 0xd0d   : > { %v5918_v47 = vadd.f32 %v6859_v23, %v10320_v18  ;;  %v5909_v30 = vpop.f32.mrb[153].mxu0 }
 0xd0e   : > { %v5910_v60 = vadd.f32 %v10320_v18, %v5909_v30  ;;  %v6860_v8 = vpop.f32.mrb[154].mxu0 }
 0xd0f   : > { %v5954_v55 = vadd.f32 %v5918_v47, %v10705_v5  ;;  %v5921_v62 = vadd.f32 %v6860_v8, %v10320_v18  ;;  %v5912_v56 = vpop.f32.mrb[155].mxu0 }
 0xd10   : > { %v5952_v57 = vadd.f32 %v5910_v60, %v10706_v3  ;;  %v5913_v33 = vadd.f32 %v10320_v18, %v5912_v56 }
 0xd11   : > { %5986 = vst.msk [vmem:[%s10328_s24 + $0xf0] sm:$0xff] %vm511_vm0, %v5954_v55  ;;  %v5955_v39 = vadd.f32 %v5921_v62, %v10707_v42 }
 0xd12   : > { %5984 = vst.msk [vmem:[%s10328_s24 + $0xe0] sm:$0xff] %vm511_vm0, %v5952_v57  ;;  %v5953_v31 = vadd.f32 %v5913_v33, %v10708_v36 }
 0xd13   : > { %5987 = vst.msk [vmem:[%s10328_s24 + $0xf8] sm:$0xff] %vm511_vm0, %v5955_v39 }
 0xd14   : > { %5985 = vst.msk [vmem:[%s10328_s24 + $0xe8] sm:$0xff] %vm511_vm0, %v5953_v31 }
 0xd15 PF: > { %s24_s29 = sadd.s32 1, %s7426_s29  }
 0xd16   : > { %p21_p4 = scmp.ge.s32.totalorder %s24_s29, 4  }
 0xd18   :  { %23 = sbr.rel (!%p21_p4) target bundleno = 1 (0x1), region = 106 }

</bundles_post_ra>
